<compile_context>
chip_gen: v5e
topology: v5e:2x2
jax: 0.10.0
libtpu: 0.0.40
codegen_flags: <defaults>
</compile_context>

<pallas_src>
import jax
import jax.numpy as jnp
from jax.experimental import pallas as pl
from jax.experimental.pallas import tpu as pltpu


# ----------------------------------------------------------------------------
# Host-side (wrapper) helpers — all operate on tiny boundary tensors / weights.
# ----------------------------------------------------------------------------
def _bilinear_matrix(out_size, in_size):
    """align_corners=False bilinear interpolation weights as a dense matrix."""
    scale = in_size / out_size
    i = jnp.arange(out_size, dtype=jnp.float32)
    src = jnp.clip((i + 0.5) * scale - 0.5, 0.0, in_size - 1.0)
    lo = jnp.floor(src).astype(jnp.int32)
    hi = jnp.minimum(lo + 1, in_size - 1)
    frac = src - lo.astype(jnp.float32)
    rows = jnp.arange(out_size)
    mat = jnp.zeros((out_size, in_size), jnp.float32)
    mat = mat.at[rows, lo].add(1.0 - frac)
    mat = mat.at[rows, hi].add(frac)
    return mat


def _band_weight(w, W, Cm):
    """(KD,KH,KW,Cin,Cout) -> (KD*KH, W*Cm, W*Cm) banded matrix.

    band[kd*KH+kh, win*Cm+cin, wout*Cm+cout] = w[kd, kh, win-wout+pw, cin, cout]
    for 0 <= win-wout+pw < KW, else 0.  Contracting an unpadded (T*H, W*Cm)
    row-slab with this matrix performs the kw and channel reductions at once
    AND implements the 'same' zero padding along W (no lane padding needed).
    Both channel axes are zero-padded to Cm.
    """
    KD, KH, KW, Cin, Cout = w.shape
    pw = KW // 2
    wp = jnp.zeros((KD, KH, KW, Cm, Cm), jnp.float32)
    wp = wp.at[:, :, :, :Cin, :Cout].set(w.astype(jnp.float32))
    win = jnp.arange(W)[:, None]
    wout = jnp.arange(W)[None, :]
    kw = win - wout + pw                                       # (W, W)
    mask = (kw >= 0) & (kw < KW)
    g = jnp.take(wp, jnp.clip(kw, 0, KW - 1).reshape(-1), axis=2)
    g = g.reshape(KD, KH, W, W, Cm, Cm)
    g = jnp.where(mask[None, None, :, :, None, None], g, 0.0)
    g = g.transpose(0, 1, 2, 4, 3, 5)                          # (KD,KH,Win,Cin,Wout,Cout)
    return g.reshape(KD * KH, W * Cm, W * Cm)


def _tile_bias(b, W, Cm):
    bp = jnp.zeros((Cm,), jnp.float32).at[: b.shape[0]].set(b.astype(jnp.float32))
    return jnp.tile(bp, W)                                     # (W*Cm,)


# ----------------------------------------------------------------------------
# Fused kernel: per grid step n, the whole (T,H,W,C) clip stays in VMEM.
# ----------------------------------------------------------------------------
def _make_fused_kernel(T, H, Ho, Kl, No, res_num):
    KH = 3

    def kernel(x_ref, band_ref, bias_ref, alpha_ref, ah_ref, awx_ref, o_ref,
               xbuf, ybuf):
        # Zero both padded buffers once; afterwards only interiors are written,
        # so the T/H borders provide the conv zero padding for every stage.
        xbuf[...] = jnp.zeros_like(xbuf)
        ybuf[...] = jnp.zeros_like(ybuf)
        xbuf[1:1 + T, 1:1 + H, :] = x_ref[0]

        def conv(src_ref, ci):
            # One MXU matmul per (kd, kh) tap, M = T*H rows; kw + channels are
            # folded into the banded weight (K = N = W*Cm).  bf16 x bf16 -> f32.
            acc = jnp.zeros((T * H, Kl), jnp.float32)
            for kd in range(3):
                for kh in range(KH):
                    lhs = src_ref[kd:kd + T, kh:kh + H, :].reshape(T * H, Kl)
                    acc = acc + jnp.dot(lhs, band_ref[ci, kd * KH + kh],
                                        preferred_element_type=jnp.float32)
            return acc + bias_ref[ci]                          # (1, Kl) broadcast

        # ---- first_block: Conv3d(3, mid, 3, pad=1) + PReLU -------------------
        a = conv(xbuf, 0)
        a = jnp.where(a >= 0.0, a, alpha_ref[0] * a)
        ybuf[1:1 + T, 1:1 + H, :] = a.reshape(T, H, Kl).astype(ybuf.dtype)

        # ---- feat_extractor: res_num x ResidualBlock3D_NoBN ------------------
        ci = 1
        for _ in range(res_num):
            h = jnp.maximum(conv(ybuf, ci), 0.0)
            xbuf[1:1 + T, 1:1 + H, :] = h.reshape(T, H, Kl).astype(xbuf.dtype)
            o = conv(xbuf, ci + 1)
            o = o + ybuf[1:1 + T, 1:1 + H, :].reshape(T * H, Kl).astype(jnp.float32)
            ybuf[1:1 + T, 1:1 + H, :] = o.reshape(T, H, Kl).astype(ybuf.dtype)
            ci += 2

        # ---- down_head: Conv3d + PReLU + separable bilinear resize -----------
        d = conv(ybuf, ci)
        d = jnp.where(d >= 0.0, d, alpha_ref[1] * d)
        d = d.reshape(T, H, Kl)
        ah = ah_ref[...]                                       # (Ho, H) bf16
        awx = awx_ref[...]                                     # (Kl, No) bf16
        for t in range(T):
            yt = jnp.dot(ah, d[t].astype(jnp.bfloat16),
                         preferred_element_type=jnp.float32)   # (Ho, Kl)
            ot = jnp.dot(yt.astype(jnp.bfloat16), awx,
                         preferred_element_type=jnp.float32)   # (Ho, No)
            o_ref[0, t] = ot.astype(o_ref.dtype)

    return kernel


# ----------------------------------------------------------------------------
# STREV_down forward
# ----------------------------------------------------------------------------
def strev_down_forward(params, imgs, target_size):
    """imgs: (N, 3, T, H, W) NCDHW float32; returns (N, mid, T, Ht, Wt)."""
    N, Cin, T, H, W = imgs.shape
    mid = params["first_w"].shape[-1]
    res_num = len(params["res"])
    Ho, Wo = target_size
    Cm = max(8, ((mid + 7) // 8) * 8)          # channel padding to a sublane multiple
    Kl = W * Cm                                 # lane width of every activation row
    No = Wo * Cm                                # lane width of the downsampled output
    Tp, Hp = T + 2, H + 2
    NC = 2 + 2 * res_num                        # total number of conv layers

    # Lane-dense channels-last bf16 input (boundary tensor only: 3 channels).
    x = jnp.transpose(imgs, (0, 2, 3, 4, 1))
    x = jnp.pad(x, ((0, 0),) * 4 + ((0, Cm - Cin), ))
    x = x.reshape(N, T, H, Kl).astype(jnp.bfloat16)

    # Banded weights (one (W*Cm, W*Cm) matrix per (kd,kh) tap), biases, alphas.
    # NOTE: the band inflates weight bytes by O(W); fine at these sizes, but at
    # production W / mid_channels tile its output axis (v7x has only 64 MiB VMEM).
    ws = [(params["first_w"], params["first_b"])]
    for (w1, b1, w2, b2) in params["res"]:
        ws += [(w1, b1), (w2, b2)]
    ws += [(params["down_w"], params["down_b"])]
    bands = jnp.stack([_band_weight(w, W, Cm) for (w, _) in ws]).astype(jnp.bfloat16)
    biases = jnp.stack([_tile_bias(b, W, Cm) for (_, b) in ws]).reshape(NC, 1, Kl)
    alphas = jnp.stack([jnp.asarray(params["first_alpha"], jnp.float32),
                        jnp.asarray(params["down_alpha"], jnp.float32)])

    # Separable bilinear (align_corners=False) resize matrices for down_head.
    ah = _bilinear_matrix(Ho, H).astype(jnp.bfloat16)          # (Ho, H)
    aw = _bilinear_matrix(Wo, W)                               # (Wo, W)
    eye = jnp.eye(Cm, dtype=jnp.float32)
    awx = (aw.T[:, None, :, None] * eye[None, :, None, :]).reshape(Kl, No)
    awx = awx.astype(jnp.bfloat16)

    blk_bytes = (T * H * Kl * 2 + NC * 9 * Kl * Kl * 2 + NC * Kl * 4
                 + Ho * H * 2 + Kl * No * 2 + T * Ho * No * 4)
    scratch_bytes = 2 * Tp * Hp * Kl * 2
    vmem_limit = int(min(48 * 1024 * 1024,
                         2 * blk_bytes + scratch_bytes + 16 * 1024 * 1024))

    out = pl.pallas_call(
        _make_fused_kernel(T, H, Ho, Kl, No, res_num),
        out_shape=jax.ShapeDtypeStruct((N, T, Ho, No), jnp.float32),
        grid=(N,),
        in_specs=[
            pl.BlockSpec((1, T, H, Kl), lambda n: (n, 0, 0, 0)),       # input clip
            pl.BlockSpec((NC, 9, Kl, Kl), lambda n: (0, 0, 0, 0)),     # banded weights
            pl.BlockSpec((NC, 1, Kl), lambda n: (0, 0, 0)),            # biases
            pl.BlockSpec(memory_space=pltpu.MemorySpace.SMEM),         # PReLU alphas
            pl.BlockSpec((Ho, H), lambda n: (0, 0)),                   # height resize
            pl.BlockSpec((Kl, No), lambda n: (0, 0)),                  # width resize
        ],
        out_specs=pl.BlockSpec((1, T, Ho, No), lambda n: (n, 0, 0, 0)),
        scratch_shapes=[pltpu.VMEM((Tp, Hp, Kl), jnp.bfloat16),
                        pltpu.VMEM((Tp, Hp, Kl), jnp.bfloat16)],
        compiler_params=pltpu.CompilerParams(
            dimension_semantics=("parallel",),
            vmem_limit_bytes=vmem_limit),
    )(x, bands, biases, alphas, ah, awx)

    out = out.reshape(N, T, Ho, Wo, Cm)[..., :mid]
    return jnp.transpose(out, (0, 4, 1, 2, 3))                 # back to NCDHW


# ----------------------------------------------------------------------------
# Parameters (deterministic) and pure-JAX f32 reference for validation.
# ----------------------------------------------------------------------------
def init_params(key, mid_channels, three_d_res_num, k=3):
    keys = iter(jax.random.split(key, 64))

    def conv_init(cin, cout):
        kw_ = next(keys)
        kb_ = next(keys)
        fan = k * k * k * cin
        w = jax.random.normal(kw_, (k, k, k, cin, cout), jnp.float32) * (fan ** -0.5)
        b = jax.random.normal(kb_, (cout,), jnp.float32) * 0.01
        return w, b

    p = {}
    p["first_w"], p["first_b"] = conv_init(3, mid_channels)
    p["first_alpha"] = jnp.float32(0.25)          # nn.PReLU() default (scalar alpha)
    p["res"] = []
    for _ in range(three_d_res_num):
        w1, b1 = conv_init(mid_channels, mid_channels)
        w2, b2 = conv_init(mid_channels, mid_channels)
        p["res"].append((w1, b1, w2, b2))
    p["down_w"], p["down_b"] = conv_init(mid_channels, mid_channels)
    p["down_alpha"] = jnp.float32(0.25)
    return p


def _conv3d_ref(x, w, b):
    dn = jax.lax.conv_dimension_numbers(x.shape, w.shape, ("NDHWC", "DHWIO", "NDHWC"))
    return jax.lax.conv_general_dilated(x, w, (1, 1, 1), "SAME",
                                        dimension_numbers=dn) + b


def strev_down_reference(params, imgs, target_size):
    """Pure-JAX f32 reference with the same down_head approximation."""
    x = jnp.transpose(imgs, (0, 2, 3, 4, 1)).astype(jnp.float32)
    x = _conv3d_ref(x, params["first_w"], params["first_b"])
    x = jnp.where(x >= 0, x, params["first_alpha"] * x)
    for (w1, b1, w2, b2) in params["res"]:
        h = jnp.maximum(_conv3d_ref(x, w1, b1), 0.0)
        x = x + _conv3d_ref(h, w2, b2)
    x = _conv3d_ref(x, params["down_w"], params["down_b"])
    x = jnp.where(x >= 0, x, params["down_alpha"] * x)
    Ho, Wo = target_size
    _, _, H, W, _ = x.shape
    ah = _bilinear_matrix(Ho, H)
    aw = _bilinear_matrix(Wo, W)
    x = jnp.einsum("oh,nthwc->ntowc", ah, x)
    x = jnp.einsum("pw,ntowc->ntopc", aw, x)
    return jnp.transpose(x, (0, 4, 1, 2, 3))


# TODO(synk): exact ModuleNet3D (down_head) source is not provided; it is
# approximated as Conv3d(mid, mid, 3, pad=1) + PReLU + separable bilinear
# spatial resampling (align_corners=False), fused into the same kernel.

if __name__ == "__main__":
    key = jax.random.PRNGKey(0)
    N, T, H, W = 2, 4, 16, 16
    mid_channels, three_d_res_num = 8, 2
    target_size = (8, 8)

    pkey, dkey = jax.random.split(key)
    params = init_params(pkey, mid_channels, three_d_res_num)
    imgs = jax.random.normal(dkey, (N, 3, T, H, W), jnp.float32)

    fwd = jax.jit(lambda p, im: strev_down_forward(p, im, target_size))
    out = jax.block_until_ready(fwd(params, imgs))
    assert out.shape == (N, mid_channels, T, target_size[0], target_size[1])
    assert bool(jnp.all(jnp.isfinite(out)))

    # Sanity-check the fused bf16 kernel against the f32 reference.
    ref = jax.block_until_ready(strev_down_reference(params, imgs, target_size))
    err = float(jnp.max(jnp.abs(out - ref)))
    scale = float(jnp.max(jnp.abs(ref))) + 1e-6
    assert err <= 0.1 * scale + 1e-2, f"mismatch: max|err|={err}, max|ref|={scale}"

    print("KERNEL_OK")
</pallas_src>

<mosaic_0001>
module attributes {stable_mosaic.version = 11 : i64} {
  func.func @kernel(%arg0: i32, %arg1: memref<1x4x16x128xbf16, #tpu.memory_space<vmem>>, %arg2: memref<6x9x128x128xbf16, #tpu.memory_space<vmem>>, %arg3: memref<6x1x128xf32, #tpu.memory_space<vmem>>, %arg4: memref<2xf32, #tpu.memory_space<smem>>, %arg5: memref<8x16xbf16, #tpu.memory_space<vmem>>, %arg6: memref<128x64xbf16, #tpu.memory_space<vmem>>, %arg7: memref<1x4x8x64xf32, #tpu.memory_space<vmem>>, %arg8: memref<6x18x128xbf16, #tpu.memory_space<vmem>>, %arg9: memref<6x18x128xbf16, #tpu.memory_space<vmem>>) attributes {dimension_semantics = [#tpu.dimension_semantics<parallel>], iteration_bounds = array<i64: 2>, scalar_prefetch = 0 : i64, scratch_operands = 2 : i64, tpu.core_type = #tpu.core_type<tc>, window_params = [{transform_indices = @transform_0, window_bounds = array<i64: 1, 4, 16, 128>}, {pipeline_mode = #tpu.pipeline_mode<synchronous>, transform_indices = @transform_1, window_bounds = array<i64: 6, 9, 128, 128>}, {pipeline_mode = #tpu.pipeline_mode<synchronous>, transform_indices = @transform_2, window_bounds = array<i64: 6, 1, 128>}, {transform_indices = @transform_3, window_bounds = array<i64: 2>}, {pipeline_mode = #tpu.pipeline_mode<synchronous>, transform_indices = @transform_4, window_bounds = array<i64: 8, 16>}, {pipeline_mode = #tpu.pipeline_mode<synchronous>, transform_indices = @transform_5, window_bounds = array<i64: 128, 64>}, {transform_indices = @transform_6, window_bounds = array<i64: 1, 4, 8, 64>}]} {
    %cst = arith.constant 0.000000e+00 : bf16
    %0 = vector.broadcast %cst : bf16 to vector<6x18x128xbf16>
    %c0 = arith.constant 0 : index
    %c0_0 = arith.constant 0 : index
    %c0_1 = arith.constant 0 : index
    %1 = vector.load %arg8[%c0, %c0_0, %c0_1] : memref<6x18x128xbf16, #tpu.memory_space<vmem>>, vector<6x18x128xbf16>
    tpu.vector_store %arg8[%c0, %c0_0, %c0_1], %0 {strides = array<i32>} : memref<6x18x128xbf16, #tpu.memory_space<vmem>>, vector<6x18x128xbf16>,
    %cst_2 = arith.constant 0.000000e+00 : bf16
    %2 = vector.broadcast %cst_2 : bf16 to vector<6x18x128xbf16>
    %c0_3 = arith.constant 0 : index
    %c0_4 = arith.constant 0 : index
    %c0_5 = arith.constant 0 : index
    %3 = vector.load %arg9[%c0_3, %c0_4, %c0_5] : memref<6x18x128xbf16, #tpu.memory_space<vmem>>, vector<6x18x128xbf16>
    tpu.vector_store %arg9[%c0_3, %c0_4, %c0_5], %2 {strides = array<i32>} : memref<6x18x128xbf16, #tpu.memory_space<vmem>>, vector<6x18x128xbf16>,
    %c0_6 = arith.constant 0 : index
    %c0_7 = arith.constant 0 : index
    %c0_8 = arith.constant 0 : index
    %c0_9 = arith.constant 0 : index
    %4 = vector.load %arg1[%c0_6, %c0_7, %c0_8, %c0_9] : memref<1x4x16x128xbf16, #tpu.memory_space<vmem>>, vector<1x4x16x128xbf16>
    %5 = vector.shape_cast %4 : vector<1x4x16x128xbf16> to vector<4x16x128xbf16>
    %c1 = arith.constant 1 : index
    %c1_10 = arith.constant 1 : index
    %c0_11 = arith.constant 0 : index
    %6 = vector.load %arg8[%c1, %c1_10, %c0_11] : memref<6x18x128xbf16, #tpu.memory_space<vmem>>, vector<4x16x128xbf16>
    tpu.vector_store %arg8[%c1, %c1_10, %c0_11], %5 {strides = array<i32>} : memref<6x18x128xbf16, #tpu.memory_space<vmem>>, vector<4x16x128xbf16>,
    %cst_12 = arith.constant 0.000000e+00 : f32
    %7 = vector.broadcast %cst_12 : f32 to vector<64x128xf32>
    %c0_13 = arith.constant 0 : index
    %c0_14 = arith.constant 0 : index
    %c0_15 = arith.constant 0 : index
    %8 = vector.load %arg8[%c0_13, %c0_14, %c0_15] : memref<6x18x128xbf16, #tpu.memory_space<vmem>>, vector<4x16x128xbf16>
    %9 = vector.shape_cast %8 : vector<4x16x128xbf16> to vector<64x128xbf16>
    %c0_16 = arith.constant 0 : index
    %c0_17 = arith.constant 0 : index
    %c0_18 = arith.constant 0 : index
    %c0_19 = arith.constant 0 : index
    %10 = vector.load %arg2[%c0_16, %c0_17, %c0_18, %c0_19] : memref<6x9x128x128xbf16, #tpu.memory_space<vmem>>, vector<1x1x128x128xbf16>
    %11 = vector.shape_cast %10 : vector<1x1x128x128xbf16> to vector<128x128xbf16>
    %cst_20 = arith.constant dense<0.000000e+00> : vector<64x128xf32>
    %12 = tpu.matmul %9, %11, %cst_20 {dimension_numbers = #tpu.dot_dimension_numbers<[1], [0], [0], [1], [0, 0, 1, 1], [], []>} : vector<64x128xbf16>, vector<128x128xbf16>, vector<64x128xf32> -> vector<64x128xf32>
    %13 = arith.addf %7, %12 : vector<64x128xf32>
    %c0_21 = arith.constant 0 : index
    %c1_22 = arith.constant 1 : index
    %c0_23 = arith.constant 0 : index
    %14 = vector.load %arg8[%c0_21, %c1_22, %c0_23] : memref<6x18x128xbf16, #tpu.memory_space<vmem>>, vector<4x16x128xbf16>
    %15 = vector.shape_cast %14 : vector<4x16x128xbf16> to vector<64x128xbf16>
    %c0_24 = arith.constant 0 : index
    %c1_25 = arith.constant 1 : index
    %c0_26 = arith.constant 0 : index
    %c0_27 = arith.constant 0 : index
    %16 = vector.load %arg2[%c0_24, %c1_25, %c0_26, %c0_27] : memref<6x9x128x128xbf16, #tpu.memory_space<vmem>>, vector<1x1x128x128xbf16>
    %17 = vector.shape_cast %16 : vector<1x1x128x128xbf16> to vector<128x128xbf16>
    %cst_28 = arith.constant dense<0.000000e+00> : vector<64x128xf32>
    %18 = tpu.matmul %15, %17, %cst_28 {dimension_numbers = #tpu.dot_dimension_numbers<[1], [0], [0], [1], [0, 0, 1, 1], [], []>} : vector<64x128xbf16>, vector<128x128xbf16>, vector<64x128xf32> -> vector<64x128xf32>
    %19 = arith.addf %13, %18 : vector<64x128xf32>
    %c0_29 = arith.constant 0 : index
    %c2 = arith.constant 2 : index
    %c0_30 = arith.constant 0 : index
    %20 = vector.load %arg8[%c0_29, %c2, %c0_30] : memref<6x18x128xbf16, #tpu.memory_space<vmem>>, vector<4x16x128xbf16>
    %21 = vector.shape_cast %20 : vector<4x16x128xbf16> to vector<64x128xbf16>
    %c0_31 = arith.constant 0 : index
    %c2_32 = arith.constant 2 : index
    %c0_33 = arith.constant 0 : index
    %c0_34 = arith.constant 0 : index
    %22 = vector.load %arg2[%c0_31, %c2_32, %c0_33, %c0_34] : memref<6x9x128x128xbf16, #tpu.memory_space<vmem>>, vector<1x1x128x128xbf16>
    %23 = vector.shape_cast %22 : vector<1x1x128x128xbf16> to vector<128x128xbf16>
    %cst_35 = arith.constant dense<0.000000e+00> : vector<64x128xf32>
    %24 = tpu.matmul %21, %23, %cst_35 {dimension_numbers = #tpu.dot_dimension_numbers<[1], [0], [0], [1], [0, 0, 1, 1], [], []>} : vector<64x128xbf16>, vector<128x128xbf16>, vector<64x128xf32> -> vector<64x128xf32>
    %25 = arith.addf %19, %24 : vector<64x128xf32>
    %c1_36 = arith.constant 1 : index
    %c0_37 = arith.constant 0 : index
    %c0_38 = arith.constant 0 : index
    %26 = vector.load %arg8[%c1_36, %c0_37, %c0_38] : memref<6x18x128xbf16, #tpu.memory_space<vmem>>, vector<4x16x128xbf16>
    %27 = vector.shape_cast %26 : vector<4x16x128xbf16> to vector<64x128xbf16>
    %c0_39 = arith.constant 0 : index
    %c3 = arith.constant 3 : index
    %c0_40 = arith.constant 0 : index
    %c0_41 = arith.constant 0 : index
    %28 = vector.load %arg2[%c0_39, %c3, %c0_40, %c0_41] : memref<6x9x128x128xbf16, #tpu.memory_space<vmem>>, vector<1x1x128x128xbf16>
    %29 = vector.shape_cast %28 : vector<1x1x128x128xbf16> to vector<128x128xbf16>
    %cst_42 = arith.constant dense<0.000000e+00> : vector<64x128xf32>
    %30 = tpu.matmul %27, %29, %cst_42 {dimension_numbers = #tpu.dot_dimension_numbers<[1], [0], [0], [1], [0, 0, 1, 1], [], []>} : vector<64x128xbf16>, vector<128x128xbf16>, vector<64x128xf32> -> vector<64x128xf32>
    %31 = arith.addf %25, %30 : vector<64x128xf32>
    %c1_43 = arith.constant 1 : index
    %c1_44 = arith.constant 1 : index
    %c0_45 = arith.constant 0 : index
    %32 = vector.load %arg8[%c1_43, %c1_44, %c0_45] : memref<6x18x128xbf16, #tpu.memory_space<vmem>>, vector<4x16x128xbf16>
    %33 = vector.shape_cast %32 : vector<4x16x128xbf16> to vector<64x128xbf16>
    %c0_46 = arith.constant 0 : index
    %c4 = arith.constant 4 : index
    %c0_47 = arith.constant 0 : index
    %c0_48 = arith.constant 0 : index
    %34 = vector.load %arg2[%c0_46, %c4, %c0_47, %c0_48] : memref<6x9x128x128xbf16, #tpu.memory_space<vmem>>, vector<1x1x128x128xbf16>
    %35 = vector.shape_cast %34 : vector<1x1x128x128xbf16> to vector<128x128xbf16>
    %cst_49 = arith.constant dense<0.000000e+00> : vector<64x128xf32>
    %36 = tpu.matmul %33, %35, %cst_49 {dimension_numbers = #tpu.dot_dimension_numbers<[1], [0], [0], [1], [0, 0, 1, 1], [], []>} : vector<64x128xbf16>, vector<128x128xbf16>, vector<64x128xf32> -> vector<64x128xf32>
    %37 = arith.addf %31, %36 : vector<64x128xf32>
    %c1_50 = arith.constant 1 : index
    %c2_51 = arith.constant 2 : index
    %c0_52 = arith.constant 0 : index
    %38 = vector.load %arg8[%c1_50, %c2_51, %c0_52] : memref<6x18x128xbf16, #tpu.memory_space<vmem>>, vector<4x16x128xbf16>
    %39 = vector.shape_cast %38 : vector<4x16x128xbf16> to vector<64x128xbf16>
    %c0_53 = arith.constant 0 : index
    %c5 = arith.constant 5 : index
    %c0_54 = arith.constant 0 : index
    %c0_55 = arith.constant 0 : index
    %40 = vector.load %arg2[%c0_53, %c5, %c0_54, %c0_55] : memref<6x9x128x128xbf16, #tpu.memory_space<vmem>>, vector<1x1x128x128xbf16>
    %41 = vector.shape_cast %40 : vector<1x1x128x128xbf16> to vector<128x128xbf16>
    %cst_56 = arith.constant dense<0.000000e+00> : vector<64x128xf32>
    %42 = tpu.matmul %39, %41, %cst_56 {dimension_numbers = #tpu.dot_dimension_numbers<[1], [0], [0], [1], [0, 0, 1, 1], [], []>} : vector<64x128xbf16>, vector<128x128xbf16>, vector<64x128xf32> -> vector<64x128xf32>
    %43 = arith.addf %37, %42 : vector<64x128xf32>
    %c2_57 = arith.constant 2 : index
    %c0_58 = arith.constant 0 : index
    %c0_59 = arith.constant 0 : index
    %44 = vector.load %arg8[%c2_57, %c0_58, %c0_59] : memref<6x18x128xbf16, #tpu.memory_space<vmem>>, vector<4x16x128xbf16>
    %45 = vector.shape_cast %44 : vector<4x16x128xbf16> to vector<64x128xbf16>
    %c0_60 = arith.constant 0 : index
    %c6 = arith.constant 6 : index
    %c0_61 = arith.constant 0 : index
    %c0_62 = arith.constant 0 : index
    %46 = vector.load %arg2[%c0_60, %c6, %c0_61, %c0_62] : memref<6x9x128x128xbf16, #tpu.memory_space<vmem>>, vector<1x1x128x128xbf16>
    %47 = vector.shape_cast %46 : vector<1x1x128x128xbf16> to vector<128x128xbf16>
    %cst_63 = arith.constant dense<0.000000e+00> : vector<64x128xf32>
    %48 = tpu.matmul %45, %47, %cst_63 {dimension_numbers = #tpu.dot_dimension_numbers<[1], [0], [0], [1], [0, 0, 1, 1], [], []>} : vector<64x128xbf16>, vector<128x128xbf16>, vector<64x128xf32> -> vector<64x128xf32>
    %49 = arith.addf %43, %48 : vector<64x128xf32>
    %c2_64 = arith.constant 2 : index
    %c1_65 = arith.constant 1 : index
    %c0_66 = arith.constant 0 : index
    %50 = vector.load %arg8[%c2_64, %c1_65, %c0_66] : memref<6x18x128xbf16, #tpu.memory_space<vmem>>, vector<4x16x128xbf16>
    %51 = vector.shape_cast %50 : vector<4x16x128xbf16> to vector<64x128xbf16>
    %c0_67 = arith.constant 0 : index
    %c7 = arith.constant 7 : index
    %c0_68 = arith.constant 0 : index
    %c0_69 = arith.constant 0 : index
    %52 = vector.load %arg2[%c0_67, %c7, %c0_68, %c0_69] : memref<6x9x128x128xbf16, #tpu.memory_space<vmem>>, vector<1x1x128x128xbf16>
    %53 = vector.shape_cast %52 : vector<1x1x128x128xbf16> to vector<128x128xbf16>
    %cst_70 = arith.constant dense<0.000000e+00> : vector<64x128xf32>
    %54 = tpu.matmul %51, %53, %cst_70 {dimension_numbers = #tpu.dot_dimension_numbers<[1], [0], [0], [1], [0, 0, 1, 1], [], []>} : vector<64x128xbf16>, vector<128x128xbf16>, vector<64x128xf32> -> vector<64x128xf32>
    %55 = arith.addf %49, %54 : vector<64x128xf32>
    %c2_71 = arith.constant 2 : index
    %c2_72 = arith.constant 2 : index
    %c0_73 = arith.constant 0 : index
    %56 = vector.load %arg8[%c2_71, %c2_72, %c0_73] : memref<6x18x128xbf16, #tpu.memory_space<vmem>>, vector<4x16x128xbf16>
    %57 = vector.shape_cast %56 : vector<4x16x128xbf16> to vector<64x128xbf16>
    %c0_74 = arith.constant 0 : index
    %c8 = arith.constant 8 : index
    %c0_75 = arith.constant 0 : index
    %c0_76 = arith.constant 0 : index
    %58 = vector.load %arg2[%c0_74, %c8, %c0_75, %c0_76] : memref<6x9x128x128xbf16, #tpu.memory_space<vmem>>, vector<1x1x128x128xbf16>
    %59 = vector.shape_cast %58 : vector<1x1x128x128xbf16> to vector<128x128xbf16>
    %cst_77 = arith.constant dense<0.000000e+00> : vector<64x128xf32>
    %60 = tpu.matmul %57, %59, %cst_77 {dimension_numbers = #tpu.dot_dimension_numbers<[1], [0], [0], [1], [0, 0, 1, 1], [], []>} : vector<64x128xbf16>, vector<128x128xbf16>, vector<64x128xf32> -> vector<64x128xf32>
    %61 = arith.addf %55, %60 : vector<64x128xf32>
    %c0_78 = arith.constant 0 : index
    %c0_79 = arith.constant 0 : index
    %c0_80 = arith.constant 0 : index
    %62 = vector.load %arg3[%c0_78, %c0_79, %c0_80] : memref<6x1x128xf32, #tpu.memory_space<vmem>>, vector<1x1x128xf32>
    %63 = vector.shape_cast %62 : vector<1x1x128xf32> to vector<1x128xf32>
    %64 = vector.broadcast %63 : vector<1x128xf32> to vector<64x128xf32>
    %65 = arith.addf %61, %64 : vector<64x128xf32>
    %cst_81 = arith.constant 0.000000e+00 : f32
    %66 = vector.broadcast %cst_81 : f32 to vector<64x128xf32>
    %67 = arith.cmpf oge, %65, %66 : vector<64x128xf32>
    %c0_82 = arith.constant 0 : index
    %68 = memref.load %arg4[%c0_82] : memref<2xf32, #tpu.memory_space<smem>>
    %69 = vector.broadcast %68 : f32 to vector<64x128xf32>
    %70 = arith.mulf %69, %65 : vector<64x128xf32>
    %71 = arith.select %67, %65, %70 : vector<64x128xi1>, vector<64x128xf32>
    %72 = vector.shape_cast %71 : vector<64x128xf32> to vector<4x16x128xf32>
    %73 = arith.truncf %72 : vector<4x16x128xf32> to vector<4x16x128xbf16>
    %c1_83 = arith.constant 1 : index
    %c1_84 = arith.constant 1 : index
    %c0_85 = arith.constant 0 : index
    %74 = vector.load %arg9[%c1_83, %c1_84, %c0_85] : memref<6x18x128xbf16, #tpu.memory_space<vmem>>, vector<4x16x128xbf16>
    tpu.vector_store %arg9[%c1_83, %c1_84, %c0_85], %73 {strides = array<i32>} : memref<6x18x128xbf16, #tpu.memory_space<vmem>>, vector<4x16x128xbf16>,
    %cst_86 = arith.constant 0.000000e+00 : f32
    %75 = vector.broadcast %cst_86 : f32 to vector<64x128xf32>
    %c0_87 = arith.constant 0 : index
    %c0_88 = arith.constant 0 : index
    %c0_89 = arith.constant 0 : index
    %76 = vector.load %arg9[%c0_87, %c0_88, %c0_89] : memref<6x18x128xbf16, #tpu.memory_space<vmem>>, vector<4x16x128xbf16>
    %77 = vector.shape_cast %76 : vector<4x16x128xbf16> to vector<64x128xbf16>
    %c1_90 = arith.constant 1 : index
    %c0_91 = arith.constant 0 : index
    %c0_92 = arith.constant 0 : index
    %c0_93 = arith.constant 0 : index
    %78 = vector.load %arg2[%c1_90, %c0_91, %c0_92, %c0_93] : memref<6x9x128x128xbf16, #tpu.memory_space<vmem>>, vector<1x1x128x128xbf16>
    %79 = vector.shape_cast %78 : vector<1x1x128x128xbf16> to vector<128x128xbf16>
    %cst_94 = arith.constant dense<0.000000e+00> : vector<64x128xf32>
    %80 = tpu.matmul %77, %79, %cst_94 {dimension_numbers = #tpu.dot_dimension_numbers<[1], [0], [0], [1], [0, 0, 1, 1], [], []>} : vector<64x128xbf16>, vector<128x128xbf16>, vector<64x128xf32> -> vector<64x128xf32>
    %81 = arith.addf %75, %80 : vector<64x128xf32>
    %c0_95 = arith.constant 0 : index
    %c1_96 = arith.constant 1 : index
    %c0_97 = arith.constant 0 : index
    %82 = vector.load %arg9[%c0_95, %c1_96, %c0_97] : memref<6x18x128xbf16, #tpu.memory_space<vmem>>, vector<4x16x128xbf16>
    %83 = vector.shape_cast %82 : vector<4x16x128xbf16> to vector<64x128xbf16>
    %c1_98 = arith.constant 1 : index
    %c1_99 = arith.constant 1 : index
    %c0_100 = arith.constant 0 : index
    %c0_101 = arith.constant 0 : index
    %84 = vector.load %arg2[%c1_98, %c1_99, %c0_100, %c0_101] : memref<6x9x128x128xbf16, #tpu.memory_space<vmem>>, vector<1x1x128x128xbf16>
    %85 = vector.shape_cast %84 : vector<1x1x128x128xbf16> to vector<128x128xbf16>
    %cst_102 = arith.constant dense<0.000000e+00> : vector<64x128xf32>
    %86 = tpu.matmul %83, %85, %cst_102 {dimension_numbers = #tpu.dot_dimension_numbers<[1], [0], [0], [1], [0, 0, 1, 1], [], []>} : vector<64x128xbf16>, vector<128x128xbf16>, vector<64x128xf32> -> vector<64x128xf32>
    %87 = arith.addf %81, %86 : vector<64x128xf32>
    %c0_103 = arith.constant 0 : index
    %c2_104 = arith.constant 2 : index
    %c0_105 = arith.constant 0 : index
    %88 = vector.load %arg9[%c0_103, %c2_104, %c0_105] : memref<6x18x128xbf16, #tpu.memory_space<vmem>>, vector<4x16x128xbf16>
    %89 = vector.shape_cast %88 : vector<4x16x128xbf16> to vector<64x128xbf16>
    %c1_106 = arith.constant 1 : index
    %c2_107 = arith.constant 2 : index
    %c0_108 = arith.constant 0 : index
    %c0_109 = arith.constant 0 : index
    %90 = vector.load %arg2[%c1_106, %c2_107, %c0_108, %c0_109] : memref<6x9x128x128xbf16, #tpu.memory_space<vmem>>, vector<1x1x128x128xbf16>
    %91 = vector.shape_cast %90 : vector<1x1x128x128xbf16> to vector<128x128xbf16>
    %cst_110 = arith.constant dense<0.000000e+00> : vector<64x128xf32>
    %92 = tpu.matmul %89, %91, %cst_110 {dimension_numbers = #tpu.dot_dimension_numbers<[1], [0], [0], [1], [0, 0, 1, 1], [], []>} : vector<64x128xbf16>, vector<128x128xbf16>, vector<64x128xf32> -> vector<64x128xf32>
    %93 = arith.addf %87, %92 : vector<64x128xf32>
    %c1_111 = arith.constant 1 : index
    %c0_112 = arith.constant 0 : index
    %c0_113 = arith.constant 0 : index
    %94 = vector.load %arg9[%c1_111, %c0_112, %c0_113] : memref<6x18x128xbf16, #tpu.memory_space<vmem>>, vector<4x16x128xbf16>
    %95 = vector.shape_cast %94 : vector<4x16x128xbf16> to vector<64x128xbf16>
    %c1_114 = arith.constant 1 : index
    %c3_115 = arith.constant 3 : index
    %c0_116 = arith.constant 0 : index
    %c0_117 = arith.constant 0 : index
    %96 = vector.load %arg2[%c1_114, %c3_115, %c0_116, %c0_117] : memref<6x9x128x128xbf16, #tpu.memory_space<vmem>>, vector<1x1x128x128xbf16>
    %97 = vector.shape_cast %96 : vector<1x1x128x128xbf16> to vector<128x128xbf16>
    %cst_118 = arith.constant dense<0.000000e+00> : vector<64x128xf32>
    %98 = tpu.matmul %95, %97, %cst_118 {dimension_numbers = #tpu.dot_dimension_numbers<[1], [0], [0], [1], [0, 0, 1, 1], [], []>} : vector<64x128xbf16>, vector<128x128xbf16>, vector<64x128xf32> -> vector<64x128xf32>
    %99 = arith.addf %93, %98 : vector<64x128xf32>
    %c1_119 = arith.constant 1 : index
    %c1_120 = arith.constant 1 : index
    %c0_121 = arith.constant 0 : index
    %100 = vector.load %arg9[%c1_119, %c1_120, %c0_121] : memref<6x18x128xbf16, #tpu.memory_space<vmem>>, vector<4x16x128xbf16>
    %101 = vector.shape_cast %100 : vector<4x16x128xbf16> to vector<64x128xbf16>
    %c1_122 = arith.constant 1 : index
    %c4_123 = arith.constant 4 : index
    %c0_124 = arith.constant 0 : index
    %c0_125 = arith.constant 0 : index
    %102 = vector.load %arg2[%c1_122, %c4_123, %c0_124, %c0_125] : memref<6x9x128x128xbf16, #tpu.memory_space<vmem>>, vector<1x1x128x128xbf16>
    %103 = vector.shape_cast %102 : vector<1x1x128x128xbf16> to vector<128x128xbf16>
    %cst_126 = arith.constant dense<0.000000e+00> : vector<64x128xf32>
    %104 = tpu.matmul %101, %103, %cst_126 {dimension_numbers = #tpu.dot_dimension_numbers<[1], [0], [0], [1], [0, 0, 1, 1], [], []>} : vector<64x128xbf16>, vector<128x128xbf16>, vector<64x128xf32> -> vector<64x128xf32>
    %105 = arith.addf %99, %104 : vector<64x128xf32>
    %c1_127 = arith.constant 1 : index
    %c2_128 = arith.constant 2 : index
    %c0_129 = arith.constant 0 : index
    %106 = vector.load %arg9[%c1_127, %c2_128, %c0_129] : memref<6x18x128xbf16, #tpu.memory_space<vmem>>, vector<4x16x128xbf16>
    %107 = vector.shape_cast %106 : vector<4x16x128xbf16> to vector<64x128xbf16>
    %c1_130 = arith.constant 1 : index
    %c5_131 = arith.constant 5 : index
    %c0_132 = arith.constant 0 : index
    %c0_133 = arith.constant 0 : index
    %108 = vector.load %arg2[%c1_130, %c5_131, %c0_132, %c0_133] : memref<6x9x128x128xbf16, #tpu.memory_space<vmem>>, vector<1x1x128x128xbf16>
    %109 = vector.shape_cast %108 : vector<1x1x128x128xbf16> to vector<128x128xbf16>
    %cst_134 = arith.constant dense<0.000000e+00> : vector<64x128xf32>
    %110 = tpu.matmul %107, %109, %cst_134 {dimension_numbers = #tpu.dot_dimension_numbers<[1], [0], [0], [1], [0, 0, 1, 1], [], []>} : vector<64x128xbf16>, vector<128x128xbf16>, vector<64x128xf32> -> vector<64x128xf32>
    %111 = arith.addf %105, %110 : vector<64x128xf32>
    %c2_135 = arith.constant 2 : index
    %c0_136 = arith.constant 0 : index
    %c0_137 = arith.constant 0 : index
    %112 = vector.load %arg9[%c2_135, %c0_136, %c0_137] : memref<6x18x128xbf16, #tpu.memory_space<vmem>>, vector<4x16x128xbf16>
    %113 = vector.shape_cast %112 : vector<4x16x128xbf16> to vector<64x128xbf16>
    %c1_138 = arith.constant 1 : index
    %c6_139 = arith.constant 6 : index
    %c0_140 = arith.constant 0 : index
    %c0_141 = arith.constant 0 : index
    %114 = vector.load %arg2[%c1_138, %c6_139, %c0_140, %c0_141] : memref<6x9x128x128xbf16, #tpu.memory_space<vmem>>, vector<1x1x128x128xbf16>
    %115 = vector.shape_cast %114 : vector<1x1x128x128xbf16> to vector<128x128xbf16>
    %cst_142 = arith.constant dense<0.000000e+00> : vector<64x128xf32>
    %116 = tpu.matmul %113, %115, %cst_142 {dimension_numbers = #tpu.dot_dimension_numbers<[1], [0], [0], [1], [0, 0, 1, 1], [], []>} : vector<64x128xbf16>, vector<128x128xbf16>, vector<64x128xf32> -> vector<64x128xf32>
    %117 = arith.addf %111, %116 : vector<64x128xf32>
    %c2_143 = arith.constant 2 : index
    %c1_144 = arith.constant 1 : index
    %c0_145 = arith.constant 0 : index
    %118 = vector.load %arg9[%c2_143, %c1_144, %c0_145] : memref<6x18x128xbf16, #tpu.memory_space<vmem>>, vector<4x16x128xbf16>
    %119 = vector.shape_cast %118 : vector<4x16x128xbf16> to vector<64x128xbf16>
    %c1_146 = arith.constant 1 : index
    %c7_147 = arith.constant 7 : index
    %c0_148 = arith.constant 0 : index
    %c0_149 = arith.constant 0 : index
    %120 = vector.load %arg2[%c1_146, %c7_147, %c0_148, %c0_149] : memref<6x9x128x128xbf16, #tpu.memory_space<vmem>>, vector<1x1x128x128xbf16>
    %121 = vector.shape_cast %120 : vector<1x1x128x128xbf16> to vector<128x128xbf16>
    %cst_150 = arith.constant dense<0.000000e+00> : vector<64x128xf32>
    %122 = tpu.matmul %119, %121, %cst_150 {dimension_numbers = #tpu.dot_dimension_numbers<[1], [0], [0], [1], [0, 0, 1, 1], [], []>} : vector<64x128xbf16>, vector<128x128xbf16>, vector<64x128xf32> -> vector<64x128xf32>
    %123 = arith.addf %117, %122 : vector<64x128xf32>
    %c2_151 = arith.constant 2 : index
    %c2_152 = arith.constant 2 : index
    %c0_153 = arith.constant 0 : index
    %124 = vector.load %arg9[%c2_151, %c2_152, %c0_153] : memref<6x18x128xbf16, #tpu.memory_space<vmem>>, vector<4x16x128xbf16>
    %125 = vector.shape_cast %124 : vector<4x16x128xbf16> to vector<64x128xbf16>
    %c1_154 = arith.constant 1 : index
    %c8_155 = arith.constant 8 : index
    %c0_156 = arith.constant 0 : index
    %c0_157 = arith.constant 0 : index
    %126 = vector.load %arg2[%c1_154, %c8_155, %c0_156, %c0_157] : memref<6x9x128x128xbf16, #tpu.memory_space<vmem>>, vector<1x1x128x128xbf16>
    %127 = vector.shape_cast %126 : vector<1x1x128x128xbf16> to vector<128x128xbf16>
    %cst_158 = arith.constant dense<0.000000e+00> : vector<64x128xf32>
    %128 = tpu.matmul %125, %127, %cst_158 {dimension_numbers = #tpu.dot_dimension_numbers<[1], [0], [0], [1], [0, 0, 1, 1], [], []>} : vector<64x128xbf16>, vector<128x128xbf16>, vector<64x128xf32> -> vector<64x128xf32>
    %129 = arith.addf %123, %128 : vector<64x128xf32>
    %c1_159 = arith.constant 1 : index
    %c0_160 = arith.constant 0 : index
    %c0_161 = arith.constant 0 : index
    %130 = vector.load %arg3[%c1_159, %c0_160, %c0_161] : memref<6x1x128xf32, #tpu.memory_space<vmem>>, vector<1x1x128xf32>
    %131 = vector.shape_cast %130 : vector<1x1x128xf32> to vector<1x128xf32>
    %132 = vector.broadcast %131 : vector<1x128xf32> to vector<64x128xf32>
    %133 = arith.addf %129, %132 : vector<64x128xf32>
    %cst_162 = arith.constant 0.000000e+00 : f32
    %134 = vector.broadcast %cst_162 : f32 to vector<64x128xf32>
    %135 = arith.maximumf %133, %134 : vector<64x128xf32>
    %136 = vector.shape_cast %135 : vector<64x128xf32> to vector<4x16x128xf32>
    %137 = arith.truncf %136 : vector<4x16x128xf32> to vector<4x16x128xbf16>
    %c1_163 = arith.constant 1 : index
    %c1_164 = arith.constant 1 : index
    %c0_165 = arith.constant 0 : index
    %138 = vector.load %arg8[%c1_163, %c1_164, %c0_165] : memref<6x18x128xbf16, #tpu.memory_space<vmem>>, vector<4x16x128xbf16>
    tpu.vector_store %arg8[%c1_163, %c1_164, %c0_165], %137 {strides = array<i32>} : memref<6x18x128xbf16, #tpu.memory_space<vmem>>, vector<4x16x128xbf16>,
    %cst_166 = arith.constant 0.000000e+00 : f32
    %139 = vector.broadcast %cst_166 : f32 to vector<64x128xf32>
    %c0_167 = arith.constant 0 : index
    %c0_168 = arith.constant 0 : index
    %c0_169 = arith.constant 0 : index
    %140 = vector.load %arg8[%c0_167, %c0_168, %c0_169] : memref<6x18x128xbf16, #tpu.memory_space<vmem>>, vector<4x16x128xbf16>
    %141 = vector.shape_cast %140 : vector<4x16x128xbf16> to vector<64x128xbf16>
    %c2_170 = arith.constant 2 : index
    %c0_171 = arith.constant 0 : index
    %c0_172 = arith.constant 0 : index
    %c0_173 = arith.constant 0 : index
    %142 = vector.load %arg2[%c2_170, %c0_171, %c0_172, %c0_173] : memref<6x9x128x128xbf16, #tpu.memory_space<vmem>>, vector<1x1x128x128xbf16>
    %143 = vector.shape_cast %142 : vector<1x1x128x128xbf16> to vector<128x128xbf16>
    %cst_174 = arith.constant dense<0.000000e+00> : vector<64x128xf32>
    %144 = tpu.matmul %141, %143, %cst_174 {dimension_numbers = #tpu.dot_dimension_numbers<[1], [0], [0], [1], [0, 0, 1, 1], [], []>} : vector<64x128xbf16>, vector<128x128xbf16>, vector<64x128xf32> -> vector<64x128xf32>
    %145 = arith.addf %139, %144 : vector<64x128xf32>
    %c0_175 = arith.constant 0 : index
    %c1_176 = arith.constant 1 : index
    %c0_177 = arith.constant 0 : index
    %146 = vector.load %arg8[%c0_175, %c1_176, %c0_177] : memref<6x18x128xbf16, #tpu.memory_space<vmem>>, vector<4x16x128xbf16>
    %147 = vector.shape_cast %146 : vector<4x16x128xbf16> to vector<64x128xbf16>
    %c2_178 = arith.constant 2 : index
    %c1_179 = arith.constant 1 : index
    %c0_180 = arith.constant 0 : index
    %c0_181 = arith.constant 0 : index
    %148 = vector.load %arg2[%c2_178, %c1_179, %c0_180, %c0_181] : memref<6x9x128x128xbf16, #tpu.memory_space<vmem>>, vector<1x1x128x128xbf16>
    %149 = vector.shape_cast %148 : vector<1x1x128x128xbf16> to vector<128x128xbf16>
    %cst_182 = arith.constant dense<0.000000e+00> : vector<64x128xf32>
    %150 = tpu.matmul %147, %149, %cst_182 {dimension_numbers = #tpu.dot_dimension_numbers<[1], [0], [0], [1], [0, 0, 1, 1], [], []>} : vector<64x128xbf16>, vector<128x128xbf16>, vector<64x128xf32> -> vector<64x128xf32>
    %151 = arith.addf %145, %150 : vector<64x128xf32>
    %c0_183 = arith.constant 0 : index
    %c2_184 = arith.constant 2 : index
    %c0_185 = arith.constant 0 : index
    %152 = vector.load %arg8[%c0_183, %c2_184, %c0_185] : memref<6x18x128xbf16, #tpu.memory_space<vmem>>, vector<4x16x128xbf16>
    %153 = vector.shape_cast %152 : vector<4x16x128xbf16> to vector<64x128xbf16>
    %c2_186 = arith.constant 2 : index
    %c2_187 = arith.constant 2 : index
    %c0_188 = arith.constant 0 : index
    %c0_189 = arith.constant 0 : index
    %154 = vector.load %arg2[%c2_186, %c2_187, %c0_188, %c0_189] : memref<6x9x128x128xbf16, #tpu.memory_space<vmem>>, vector<1x1x128x128xbf16>
    %155 = vector.shape_cast %154 : vector<1x1x128x128xbf16> to vector<128x128xbf16>
    %cst_190 = arith.constant dense<0.000000e+00> : vector<64x128xf32>
    %156 = tpu.matmul %153, %155, %cst_190 {dimension_numbers = #tpu.dot_dimension_numbers<[1], [0], [0], [1], [0, 0, 1, 1], [], []>} : vector<64x128xbf16>, vector<128x128xbf16>, vector<64x128xf32> -> vector<64x128xf32>
    %157 = arith.addf %151, %156 : vector<64x128xf32>
    %c1_191 = arith.constant 1 : index
    %c0_192 = arith.constant 0 : index
    %c0_193 = arith.constant 0 : index
    %158 = vector.load %arg8[%c1_191, %c0_192, %c0_193] : memref<6x18x128xbf16, #tpu.memory_space<vmem>>, vector<4x16x128xbf16>
    %159 = vector.shape_cast %158 : vector<4x16x128xbf16> to vector<64x128xbf16>
    %c2_194 = arith.constant 2 : index
    %c3_195 = arith.constant 3 : index
    %c0_196 = arith.constant 0 : index
    %c0_197 = arith.constant 0 : index
    %160 = vector.load %arg2[%c2_194, %c3_195, %c0_196, %c0_197] : memref<6x9x128x128xbf16, #tpu.memory_space<vmem>>, vector<1x1x128x128xbf16>
    %161 = vector.shape_cast %160 : vector<1x1x128x128xbf16> to vector<128x128xbf16>
    %cst_198 = arith.constant dense<0.000000e+00> : vector<64x128xf32>
    %162 = tpu.matmul %159, %161, %cst_198 {dimension_numbers = #tpu.dot_dimension_numbers<[1], [0], [0], [1], [0, 0, 1, 1], [], []>} : vector<64x128xbf16>, vector<128x128xbf16>, vector<64x128xf32> -> vector<64x128xf32>
    %163 = arith.addf %157, %162 : vector<64x128xf32>
    %c1_199 = arith.constant 1 : index
    %c1_200 = arith.constant 1 : index
    %c0_201 = arith.constant 0 : index
    %164 = vector.load %arg8[%c1_199, %c1_200, %c0_201] : memref<6x18x128xbf16, #tpu.memory_space<vmem>>, vector<4x16x128xbf16>
    %165 = vector.shape_cast %164 : vector<4x16x128xbf16> to vector<64x128xbf16>
    %c2_202 = arith.constant 2 : index
    %c4_203 = arith.constant 4 : index
    %c0_204 = arith.constant 0 : index
    %c0_205 = arith.constant 0 : index
    %166 = vector.load %arg2[%c2_202, %c4_203, %c0_204, %c0_205] : memref<6x9x128x128xbf16, #tpu.memory_space<vmem>>, vector<1x1x128x128xbf16>
    %167 = vector.shape_cast %166 : vector<1x1x128x128xbf16> to vector<128x128xbf16>
    %cst_206 = arith.constant dense<0.000000e+00> : vector<64x128xf32>
    %168 = tpu.matmul %165, %167, %cst_206 {dimension_numbers = #tpu.dot_dimension_numbers<[1], [0], [0], [1], [0, 0, 1, 1], [], []>} : vector<64x128xbf16>, vector<128x128xbf16>, vector<64x128xf32> -> vector<64x128xf32>
    %169 = arith.addf %163, %168 : vector<64x128xf32>
    %c1_207 = arith.constant 1 : index
    %c2_208 = arith.constant 2 : index
    %c0_209 = arith.constant 0 : index
    %170 = vector.load %arg8[%c1_207, %c2_208, %c0_209] : memref<6x18x128xbf16, #tpu.memory_space<vmem>>, vector<4x16x128xbf16>
    %171 = vector.shape_cast %170 : vector<4x16x128xbf16> to vector<64x128xbf16>
    %c2_210 = arith.constant 2 : index
    %c5_211 = arith.constant 5 : index
    %c0_212 = arith.constant 0 : index
    %c0_213 = arith.constant 0 : index
    %172 = vector.load %arg2[%c2_210, %c5_211, %c0_212, %c0_213] : memref<6x9x128x128xbf16, #tpu.memory_space<vmem>>, vector<1x1x128x128xbf16>
    %173 = vector.shape_cast %172 : vector<1x1x128x128xbf16> to vector<128x128xbf16>
    %cst_214 = arith.constant dense<0.000000e+00> : vector<64x128xf32>
    %174 = tpu.matmul %171, %173, %cst_214 {dimension_numbers = #tpu.dot_dimension_numbers<[1], [0], [0], [1], [0, 0, 1, 1], [], []>} : vector<64x128xbf16>, vector<128x128xbf16>, vector<64x128xf32> -> vector<64x128xf32>
    %175 = arith.addf %169, %174 : vector<64x128xf32>
    %c2_215 = arith.constant 2 : index
    %c0_216 = arith.constant 0 : index
    %c0_217 = arith.constant 0 : index
    %176 = vector.load %arg8[%c2_215, %c0_216, %c0_217] : memref<6x18x128xbf16, #tpu.memory_space<vmem>>, vector<4x16x128xbf16>
    %177 = vector.shape_cast %176 : vector<4x16x128xbf16> to vector<64x128xbf16>
    %c2_218 = arith.constant 2 : index
    %c6_219 = arith.constant 6 : index
    %c0_220 = arith.constant 0 : index
    %c0_221 = arith.constant 0 : index
    %178 = vector.load %arg2[%c2_218, %c6_219, %c0_220, %c0_221] : memref<6x9x128x128xbf16, #tpu.memory_space<vmem>>, vector<1x1x128x128xbf16>
    %179 = vector.shape_cast %178 : vector<1x1x128x128xbf16> to vector<128x128xbf16>
    %cst_222 = arith.constant dense<0.000000e+00> : vector<64x128xf32>
    %180 = tpu.matmul %177, %179, %cst_222 {dimension_numbers = #tpu.dot_dimension_numbers<[1], [0], [0], [1], [0, 0, 1, 1], [], []>} : vector<64x128xbf16>, vector<128x128xbf16>, vector<64x128xf32> -> vector<64x128xf32>
    %181 = arith.addf %175, %180 : vector<64x128xf32>
    %c2_223 = arith.constant 2 : index
    %c1_224 = arith.constant 1 : index
    %c0_225 = arith.constant 0 : index
    %182 = vector.load %arg8[%c2_223, %c1_224, %c0_225] : memref<6x18x128xbf16, #tpu.memory_space<vmem>>, vector<4x16x128xbf16>
    %183 = vector.shape_cast %182 : vector<4x16x128xbf16> to vector<64x128xbf16>
    %c2_226 = arith.constant 2 : index
    %c7_227 = arith.constant 7 : index
    %c0_228 = arith.constant 0 : index
    %c0_229 = arith.constant 0 : index
    %184 = vector.load %arg2[%c2_226, %c7_227, %c0_228, %c0_229] : memref<6x9x128x128xbf16, #tpu.memory_space<vmem>>, vector<1x1x128x128xbf16>
    %185 = vector.shape_cast %184 : vector<1x1x128x128xbf16> to vector<128x128xbf16>
    %cst_230 = arith.constant dense<0.000000e+00> : vector<64x128xf32>
    %186 = tpu.matmul %183, %185, %cst_230 {dimension_numbers = #tpu.dot_dimension_numbers<[1], [0], [0], [1], [0, 0, 1, 1], [], []>} : vector<64x128xbf16>, vector<128x128xbf16>, vector<64x128xf32> -> vector<64x128xf32>
    %187 = arith.addf %181, %186 : vector<64x128xf32>
    %c2_231 = arith.constant 2 : index
    %c2_232 = arith.constant 2 : index
    %c0_233 = arith.constant 0 : index
    %188 = vector.load %arg8[%c2_231, %c2_232, %c0_233] : memref<6x18x128xbf16, #tpu.memory_space<vmem>>, vector<4x16x128xbf16>
    %189 = vector.shape_cast %188 : vector<4x16x128xbf16> to vector<64x128xbf16>
    %c2_234 = arith.constant 2 : index
    %c8_235 = arith.constant 8 : index
    %c0_236 = arith.constant 0 : index
    %c0_237 = arith.constant 0 : index
    %190 = vector.load %arg2[%c2_234, %c8_235, %c0_236, %c0_237] : memref<6x9x128x128xbf16, #tpu.memory_space<vmem>>, vector<1x1x128x128xbf16>
    %191 = vector.shape_cast %190 : vector<1x1x128x128xbf16> to vector<128x128xbf16>
    %cst_238 = arith.constant dense<0.000000e+00> : vector<64x128xf32>
    %192 = tpu.matmul %189, %191, %cst_238 {dimension_numbers = #tpu.dot_dimension_numbers<[1], [0], [0], [1], [0, 0, 1, 1], [], []>} : vector<64x128xbf16>, vector<128x128xbf16>, vector<64x128xf32> -> vector<64x128xf32>
    %193 = arith.addf %187, %192 : vector<64x128xf32>
    %c2_239 = arith.constant 2 : index
    %c0_240 = arith.constant 0 : index
    %c0_241 = arith.constant 0 : index
    %194 = vector.load %arg3[%c2_239, %c0_240, %c0_241] : memref<6x1x128xf32, #tpu.memory_space<vmem>>, vector<1x1x128xf32>
    %195 = vector.shape_cast %194 : vector<1x1x128xf32> to vector<1x128xf32>
    %196 = vector.broadcast %195 : vector<1x128xf32> to vector<64x128xf32>
    %197 = arith.addf %193, %196 : vector<64x128xf32>
    %c1_242 = arith.constant 1 : index
    %c1_243 = arith.constant 1 : index
    %c0_244 = arith.constant 0 : index
    %198 = vector.load %arg9[%c1_242, %c1_243, %c0_244] : memref<6x18x128xbf16, #tpu.memory_space<vmem>>, vector<4x16x128xbf16>
    %199 = vector.shape_cast %198 : vector<4x16x128xbf16> to vector<64x128xbf16>
    %200 = arith.extf %199 : vector<64x128xbf16> to vector<64x128xf32>
    %201 = arith.addf %197, %200 : vector<64x128xf32>
    %202 = vector.shape_cast %201 : vector<64x128xf32> to vector<4x16x128xf32>
    %203 = arith.truncf %202 : vector<4x16x128xf32> to vector<4x16x128xbf16>
    %c1_245 = arith.constant 1 : index
    %c1_246 = arith.constant 1 : index
    %c0_247 = arith.constant 0 : index
    %204 = vector.load %arg9[%c1_245, %c1_246, %c0_247] : memref<6x18x128xbf16, #tpu.memory_space<vmem>>, vector<4x16x128xbf16>
    tpu.vector_store %arg9[%c1_245, %c1_246, %c0_247], %203 {strides = array<i32>} : memref<6x18x128xbf16, #tpu.memory_space<vmem>>, vector<4x16x128xbf16>,
    %cst_248 = arith.constant 0.000000e+00 : f32
    %205 = vector.broadcast %cst_248 : f32 to vector<64x128xf32>
    %c0_249 = arith.constant 0 : index
    %c0_250 = arith.constant 0 : index
    %c0_251 = arith.constant 0 : index
    %206 = vector.load %arg9[%c0_249, %c0_250, %c0_251] : memref<6x18x128xbf16, #tpu.memory_space<vmem>>, vector<4x16x128xbf16>
    %207 = vector.shape_cast %206 : vector<4x16x128xbf16> to vector<64x128xbf16>
    %c3_252 = arith.constant 3 : index
    %c0_253 = arith.constant 0 : index
    %c0_254 = arith.constant 0 : index
    %c0_255 = arith.constant 0 : index
    %208 = vector.load %arg2[%c3_252, %c0_253, %c0_254, %c0_255] : memref<6x9x128x128xbf16, #tpu.memory_space<vmem>>, vector<1x1x128x128xbf16>
    %209 = vector.shape_cast %208 : vector<1x1x128x128xbf16> to vector<128x128xbf16>
    %cst_256 = arith.constant dense<0.000000e+00> : vector<64x128xf32>
    %210 = tpu.matmul %207, %209, %cst_256 {dimension_numbers = #tpu.dot_dimension_numbers<[1], [0], [0], [1], [0, 0, 1, 1], [], []>} : vector<64x128xbf16>, vector<128x128xbf16>, vector<64x128xf32> -> vector<64x128xf32>
    %211 = arith.addf %205, %210 : vector<64x128xf32>
    %c0_257 = arith.constant 0 : index
    %c1_258 = arith.constant 1 : index
    %c0_259 = arith.constant 0 : index
    %212 = vector.load %arg9[%c0_257, %c1_258, %c0_259] : memref<6x18x128xbf16, #tpu.memory_space<vmem>>, vector<4x16x128xbf16>
    %213 = vector.shape_cast %212 : vector<4x16x128xbf16> to vector<64x128xbf16>
    %c3_260 = arith.constant 3 : index
    %c1_261 = arith.constant 1 : index
    %c0_262 = arith.constant 0 : index
    %c0_263 = arith.constant 0 : index
    %214 = vector.load %arg2[%c3_260, %c1_261, %c0_262, %c0_263] : memref<6x9x128x128xbf16, #tpu.memory_space<vmem>>, vector<1x1x128x128xbf16>
    %215 = vector.shape_cast %214 : vector<1x1x128x128xbf16> to vector<128x128xbf16>
    %cst_264 = arith.constant dense<0.000000e+00> : vector<64x128xf32>
    %216 = tpu.matmul %213, %215, %cst_264 {dimension_numbers = #tpu.dot_dimension_numbers<[1], [0], [0], [1], [0, 0, 1, 1], [], []>} : vector<64x128xbf16>, vector<128x128xbf16>, vector<64x128xf32> -> vector<64x128xf32>
    %217 = arith.addf %211, %216 : vector<64x128xf32>
    %c0_265 = arith.constant 0 : index
    %c2_266 = arith.constant 2 : index
    %c0_267 = arith.constant 0 : index
    %218 = vector.load %arg9[%c0_265, %c2_266, %c0_267] : memref<6x18x128xbf16, #tpu.memory_space<vmem>>, vector<4x16x128xbf16>
    %219 = vector.shape_cast %218 : vector<4x16x128xbf16> to vector<64x128xbf16>
    %c3_268 = arith.constant 3 : index
    %c2_269 = arith.constant 2 : index
    %c0_270 = arith.constant 0 : index
    %c0_271 = arith.constant 0 : index
    %220 = vector.load %arg2[%c3_268, %c2_269, %c0_270, %c0_271] : memref<6x9x128x128xbf16, #tpu.memory_space<vmem>>, vector<1x1x128x128xbf16>
    %221 = vector.shape_cast %220 : vector<1x1x128x128xbf16> to vector<128x128xbf16>
    %cst_272 = arith.constant dense<0.000000e+00> : vector<64x128xf32>
    %222 = tpu.matmul %219, %221, %cst_272 {dimension_numbers = #tpu.dot_dimension_numbers<[1], [0], [0], [1], [0, 0, 1, 1], [], []>} : vector<64x128xbf16>, vector<128x128xbf16>, vector<64x128xf32> -> vector<64x128xf32>
    %223 = arith.addf %217, %222 : vector<64x128xf32>
    %c1_273 = arith.constant 1 : index
    %c0_274 = arith.constant 0 : index
    %c0_275 = arith.constant 0 : index
    %224 = vector.load %arg9[%c1_273, %c0_274, %c0_275] : memref<6x18x128xbf16, #tpu.memory_space<vmem>>, vector<4x16x128xbf16>
    %225 = vector.shape_cast %224 : vector<4x16x128xbf16> to vector<64x128xbf16>
    %c3_276 = arith.constant 3 : index
    %c3_277 = arith.constant 3 : index
    %c0_278 = arith.constant 0 : index
    %c0_279 = arith.constant 0 : index
    %226 = vector.load %arg2[%c3_276, %c3_277, %c0_278, %c0_279] : memref<6x9x128x128xbf16, #tpu.memory_space<vmem>>, vector<1x1x128x128xbf16>
    %227 = vector.shape_cast %226 : vector<1x1x128x128xbf16> to vector<128x128xbf16>
    %cst_280 = arith.constant dense<0.000000e+00> : vector<64x128xf32>
    %228 = tpu.matmul %225, %227, %cst_280 {dimension_numbers = #tpu.dot_dimension_numbers<[1], [0], [0], [1], [0, 0, 1, 1], [], []>} : vector<64x128xbf16>, vector<128x128xbf16>, vector<64x128xf32> -> vector<64x128xf32>
    %229 = arith.addf %223, %228 : vector<64x128xf32>
    %c1_281 = arith.constant 1 : index
    %c1_282 = arith.constant 1 : index
    %c0_283 = arith.constant 0 : index
    %230 = vector.load %arg9[%c1_281, %c1_282, %c0_283] : memref<6x18x128xbf16, #tpu.memory_space<vmem>>, vector<4x16x128xbf16>
    %231 = vector.shape_cast %230 : vector<4x16x128xbf16> to vector<64x128xbf16>
    %c3_284 = arith.constant 3 : index
    %c4_285 = arith.constant 4 : index
    %c0_286 = arith.constant 0 : index
    %c0_287 = arith.constant 0 : index
    %232 = vector.load %arg2[%c3_284, %c4_285, %c0_286, %c0_287] : memref<6x9x128x128xbf16, #tpu.memory_space<vmem>>, vector<1x1x128x128xbf16>
    %233 = vector.shape_cast %232 : vector<1x1x128x128xbf16> to vector<128x128xbf16>
    %cst_288 = arith.constant dense<0.000000e+00> : vector<64x128xf32>
    %234 = tpu.matmul %231, %233, %cst_288 {dimension_numbers = #tpu.dot_dimension_numbers<[1], [0], [0], [1], [0, 0, 1, 1], [], []>} : vector<64x128xbf16>, vector<128x128xbf16>, vector<64x128xf32> -> vector<64x128xf32>
    %235 = arith.addf %229, %234 : vector<64x128xf32>
    %c1_289 = arith.constant 1 : index
    %c2_290 = arith.constant 2 : index
    %c0_291 = arith.constant 0 : index
    %236 = vector.load %arg9[%c1_289, %c2_290, %c0_291] : memref<6x18x128xbf16, #tpu.memory_space<vmem>>, vector<4x16x128xbf16>
    %237 = vector.shape_cast %236 : vector<4x16x128xbf16> to vector<64x128xbf16>
    %c3_292 = arith.constant 3 : index
    %c5_293 = arith.constant 5 : index
    %c0_294 = arith.constant 0 : index
    %c0_295 = arith.constant 0 : index
    %238 = vector.load %arg2[%c3_292, %c5_293, %c0_294, %c0_295] : memref<6x9x128x128xbf16, #tpu.memory_space<vmem>>, vector<1x1x128x128xbf16>
    %239 = vector.shape_cast %238 : vector<1x1x128x128xbf16> to vector<128x128xbf16>
    %cst_296 = arith.constant dense<0.000000e+00> : vector<64x128xf32>
    %240 = tpu.matmul %237, %239, %cst_296 {dimension_numbers = #tpu.dot_dimension_numbers<[1], [0], [0], [1], [0, 0, 1, 1], [], []>} : vector<64x128xbf16>, vector<128x128xbf16>, vector<64x128xf32> -> vector<64x128xf32>
    %241 = arith.addf %235, %240 : vector<64x128xf32>
    %c2_297 = arith.constant 2 : index
    %c0_298 = arith.constant 0 : index
    %c0_299 = arith.constant 0 : index
    %242 = vector.load %arg9[%c2_297, %c0_298, %c0_299] : memref<6x18x128xbf16, #tpu.memory_space<vmem>>, vector<4x16x128xbf16>
    %243 = vector.shape_cast %242 : vector<4x16x128xbf16> to vector<64x128xbf16>
    %c3_300 = arith.constant 3 : index
    %c6_301 = arith.constant 6 : index
    %c0_302 = arith.constant 0 : index
    %c0_303 = arith.constant 0 : index
    %244 = vector.load %arg2[%c3_300, %c6_301, %c0_302, %c0_303] : memref<6x9x128x128xbf16, #tpu.memory_space<vmem>>, vector<1x1x128x128xbf16>
    %245 = vector.shape_cast %244 : vector<1x1x128x128xbf16> to vector<128x128xbf16>
    %cst_304 = arith.constant dense<0.000000e+00> : vector<64x128xf32>
    %246 = tpu.matmul %243, %245, %cst_304 {dimension_numbers = #tpu.dot_dimension_numbers<[1], [0], [0], [1], [0, 0, 1, 1], [], []>} : vector<64x128xbf16>, vector<128x128xbf16>, vector<64x128xf32> -> vector<64x128xf32>
    %247 = arith.addf %241, %246 : vector<64x128xf32>
    %c2_305 = arith.constant 2 : index
    %c1_306 = arith.constant 1 : index
    %c0_307 = arith.constant 0 : index
    %248 = vector.load %arg9[%c2_305, %c1_306, %c0_307] : memref<6x18x128xbf16, #tpu.memory_space<vmem>>, vector<4x16x128xbf16>
    %249 = vector.shape_cast %248 : vector<4x16x128xbf16> to vector<64x128xbf16>
    %c3_308 = arith.constant 3 : index
    %c7_309 = arith.constant 7 : index
    %c0_310 = arith.constant 0 : index
    %c0_311 = arith.constant 0 : index
    %250 = vector.load %arg2[%c3_308, %c7_309, %c0_310, %c0_311] : memref<6x9x128x128xbf16, #tpu.memory_space<vmem>>, vector<1x1x128x128xbf16>
    %251 = vector.shape_cast %250 : vector<1x1x128x128xbf16> to vector<128x128xbf16>
    %cst_312 = arith.constant dense<0.000000e+00> : vector<64x128xf32>
    %252 = tpu.matmul %249, %251, %cst_312 {dimension_numbers = #tpu.dot_dimension_numbers<[1], [0], [0], [1], [0, 0, 1, 1], [], []>} : vector<64x128xbf16>, vector<128x128xbf16>, vector<64x128xf32> -> vector<64x128xf32>
    %253 = arith.addf %247, %252 : vector<64x128xf32>
    %c2_313 = arith.constant 2 : index
    %c2_314 = arith.constant 2 : index
    %c0_315 = arith.constant 0 : index
    %254 = vector.load %arg9[%c2_313, %c2_314, %c0_315] : memref<6x18x128xbf16, #tpu.memory_space<vmem>>, vector<4x16x128xbf16>
    %255 = vector.shape_cast %254 : vector<4x16x128xbf16> to vector<64x128xbf16>
    %c3_316 = arith.constant 3 : index
    %c8_317 = arith.constant 8 : index
    %c0_318 = arith.constant 0 : index
    %c0_319 = arith.constant 0 : index
    %256 = vector.load %arg2[%c3_316, %c8_317, %c0_318, %c0_319] : memref<6x9x128x128xbf16, #tpu.memory_space<vmem>>, vector<1x1x128x128xbf16>
    %257 = vector.shape_cast %256 : vector<1x1x128x128xbf16> to vector<128x128xbf16>
    %cst_320 = arith.constant dense<0.000000e+00> : vector<64x128xf32>
    %258 = tpu.matmul %255, %257, %cst_320 {dimension_numbers = #tpu.dot_dimension_numbers<[1], [0], [0], [1], [0, 0, 1, 1], [], []>} : vector<64x128xbf16>, vector<128x128xbf16>, vector<64x128xf32> -> vector<64x128xf32>
    %259 = arith.addf %253, %258 : vector<64x128xf32>
    %c3_321 = arith.constant 3 : index
    %c0_322 = arith.constant 0 : index
    %c0_323 = arith.constant 0 : index
    %260 = vector.load %arg3[%c3_321, %c0_322, %c0_323] : memref<6x1x128xf32, #tpu.memory_space<vmem>>, vector<1x1x128xf32>
    %261 = vector.shape_cast %260 : vector<1x1x128xf32> to vector<1x128xf32>
    %262 = vector.broadcast %261 : vector<1x128xf32> to vector<64x128xf32>
    %263 = arith.addf %259, %262 : vector<64x128xf32>
    %cst_324 = arith.constant 0.000000e+00 : f32
    %264 = vector.broadcast %cst_324 : f32 to vector<64x128xf32>
    %265 = arith.maximumf %263, %264 : vector<64x128xf32>
    %266 = vector.shape_cast %265 : vector<64x128xf32> to vector<4x16x128xf32>
    %267 = arith.truncf %266 : vector<4x16x128xf32> to vector<4x16x128xbf16>
    %c1_325 = arith.constant 1 : index
    %c1_326 = arith.constant 1 : index
    %c0_327 = arith.constant 0 : index
    %268 = vector.load %arg8[%c1_325, %c1_326, %c0_327] : memref<6x18x128xbf16, #tpu.memory_space<vmem>>, vector<4x16x128xbf16>
    tpu.vector_store %arg8[%c1_325, %c1_326, %c0_327], %267 {strides = array<i32>} : memref<6x18x128xbf16, #tpu.memory_space<vmem>>, vector<4x16x128xbf16>,
    %cst_328 = arith.constant 0.000000e+00 : f32
    %269 = vector.broadcast %cst_328 : f32 to vector<64x128xf32>
    %c0_329 = arith.constant 0 : index
    %c0_330 = arith.constant 0 : index
    %c0_331 = arith.constant 0 : index
    %270 = vector.load %arg8[%c0_329, %c0_330, %c0_331] : memref<6x18x128xbf16, #tpu.memory_space<vmem>>, vector<4x16x128xbf16>
    %271 = vector.shape_cast %270 : vector<4x16x128xbf16> to vector<64x128xbf16>
    %c4_332 = arith.constant 4 : index
    %c0_333 = arith.constant 0 : index
    %c0_334 = arith.constant 0 : index
    %c0_335 = arith.constant 0 : index
    %272 = vector.load %arg2[%c4_332, %c0_333, %c0_334, %c0_335] : memref<6x9x128x128xbf16, #tpu.memory_space<vmem>>, vector<1x1x128x128xbf16>
    %273 = vector.shape_cast %272 : vector<1x1x128x128xbf16> to vector<128x128xbf16>
    %cst_336 = arith.constant dense<0.000000e+00> : vector<64x128xf32>
    %274 = tpu.matmul %271, %273, %cst_336 {dimension_numbers = #tpu.dot_dimension_numbers<[1], [0], [0], [1], [0, 0, 1, 1], [], []>} : vector<64x128xbf16>, vector<128x128xbf16>, vector<64x128xf32> -> vector<64x128xf32>
    %275 = arith.addf %269, %274 : vector<64x128xf32>
    %c0_337 = arith.constant 0 : index
    %c1_338 = arith.constant 1 : index
    %c0_339 = arith.constant 0 : index
    %276 = vector.load %arg8[%c0_337, %c1_338, %c0_339] : memref<6x18x128xbf16, #tpu.memory_space<vmem>>, vector<4x16x128xbf16>
    %277 = vector.shape_cast %276 : vector<4x16x128xbf16> to vector<64x128xbf16>
    %c4_340 = arith.constant 4 : index
    %c1_341 = arith.constant 1 : index
    %c0_342 = arith.constant 0 : index
    %c0_343 = arith.constant 0 : index
    %278 = vector.load %arg2[%c4_340, %c1_341, %c0_342, %c0_343] : memref<6x9x128x128xbf16, #tpu.memory_space<vmem>>, vector<1x1x128x128xbf16>
    %279 = vector.shape_cast %278 : vector<1x1x128x128xbf16> to vector<128x128xbf16>
    %cst_344 = arith.constant dense<0.000000e+00> : vector<64x128xf32>
    %280 = tpu.matmul %277, %279, %cst_344 {dimension_numbers = #tpu.dot_dimension_numbers<[1], [0], [0], [1], [0, 0, 1, 1], [], []>} : vector<64x128xbf16>, vector<128x128xbf16>, vector<64x128xf32> -> vector<64x128xf32>
    %281 = arith.addf %275, %280 : vector<64x128xf32>
    %c0_345 = arith.constant 0 : index
    %c2_346 = arith.constant 2 : index
    %c0_347 = arith.constant 0 : index
    %282 = vector.load %arg8[%c0_345, %c2_346, %c0_347] : memref<6x18x128xbf16, #tpu.memory_space<vmem>>, vector<4x16x128xbf16>
    %283 = vector.shape_cast %282 : vector<4x16x128xbf16> to vector<64x128xbf16>
    %c4_348 = arith.constant 4 : index
    %c2_349 = arith.constant 2 : index
    %c0_350 = arith.constant 0 : index
    %c0_351 = arith.constant 0 : index
    %284 = vector.load %arg2[%c4_348, %c2_349, %c0_350, %c0_351] : memref<6x9x128x128xbf16, #tpu.memory_space<vmem>>, vector<1x1x128x128xbf16>
    %285 = vector.shape_cast %284 : vector<1x1x128x128xbf16> to vector<128x128xbf16>
    %cst_352 = arith.constant dense<0.000000e+00> : vector<64x128xf32>
    %286 = tpu.matmul %283, %285, %cst_352 {dimension_numbers = #tpu.dot_dimension_numbers<[1], [0], [0], [1], [0, 0, 1, 1], [], []>} : vector<64x128xbf16>, vector<128x128xbf16>, vector<64x128xf32> -> vector<64x128xf32>
    %287 = arith.addf %281, %286 : vector<64x128xf32>
    %c1_353 = arith.constant 1 : index
    %c0_354 = arith.constant 0 : index
    %c0_355 = arith.constant 0 : index
    %288 = vector.load %arg8[%c1_353, %c0_354, %c0_355] : memref<6x18x128xbf16, #tpu.memory_space<vmem>>, vector<4x16x128xbf16>
    %289 = vector.shape_cast %288 : vector<4x16x128xbf16> to vector<64x128xbf16>
    %c4_356 = arith.constant 4 : index
    %c3_357 = arith.constant 3 : index
    %c0_358 = arith.constant 0 : index
    %c0_359 = arith.constant 0 : index
    %290 = vector.load %arg2[%c4_356, %c3_357, %c0_358, %c0_359] : memref<6x9x128x128xbf16, #tpu.memory_space<vmem>>, vector<1x1x128x128xbf16>
    %291 = vector.shape_cast %290 : vector<1x1x128x128xbf16> to vector<128x128xbf16>
    %cst_360 = arith.constant dense<0.000000e+00> : vector<64x128xf32>
    %292 = tpu.matmul %289, %291, %cst_360 {dimension_numbers = #tpu.dot_dimension_numbers<[1], [0], [0], [1], [0, 0, 1, 1], [], []>} : vector<64x128xbf16>, vector<128x128xbf16>, vector<64x128xf32> -> vector<64x128xf32>
    %293 = arith.addf %287, %292 : vector<64x128xf32>
    %c1_361 = arith.constant 1 : index
    %c1_362 = arith.constant 1 : index
    %c0_363 = arith.constant 0 : index
    %294 = vector.load %arg8[%c1_361, %c1_362, %c0_363] : memref<6x18x128xbf16, #tpu.memory_space<vmem>>, vector<4x16x128xbf16>
    %295 = vector.shape_cast %294 : vector<4x16x128xbf16> to vector<64x128xbf16>
    %c4_364 = arith.constant 4 : index
    %c4_365 = arith.constant 4 : index
    %c0_366 = arith.constant 0 : index
    %c0_367 = arith.constant 0 : index
    %296 = vector.load %arg2[%c4_364, %c4_365, %c0_366, %c0_367] : memref<6x9x128x128xbf16, #tpu.memory_space<vmem>>, vector<1x1x128x128xbf16>
    %297 = vector.shape_cast %296 : vector<1x1x128x128xbf16> to vector<128x128xbf16>
    %cst_368 = arith.constant dense<0.000000e+00> : vector<64x128xf32>
    %298 = tpu.matmul %295, %297, %cst_368 {dimension_numbers = #tpu.dot_dimension_numbers<[1], [0], [0], [1], [0, 0, 1, 1], [], []>} : vector<64x128xbf16>, vector<128x128xbf16>, vector<64x128xf32> -> vector<64x128xf32>
    %299 = arith.addf %293, %298 : vector<64x128xf32>
    %c1_369 = arith.constant 1 : index
    %c2_370 = arith.constant 2 : index
    %c0_371 = arith.constant 0 : index
    %300 = vector.load %arg8[%c1_369, %c2_370, %c0_371] : memref<6x18x128xbf16, #tpu.memory_space<vmem>>, vector<4x16x128xbf16>
    %301 = vector.shape_cast %300 : vector<4x16x128xbf16> to vector<64x128xbf16>
    %c4_372 = arith.constant 4 : index
    %c5_373 = arith.constant 5 : index
    %c0_374 = arith.constant 0 : index
    %c0_375 = arith.constant 0 : index
    %302 = vector.load %arg2[%c4_372, %c5_373, %c0_374, %c0_375] : memref<6x9x128x128xbf16, #tpu.memory_space<vmem>>, vector<1x1x128x128xbf16>
    %303 = vector.shape_cast %302 : vector<1x1x128x128xbf16> to vector<128x128xbf16>
    %cst_376 = arith.constant dense<0.000000e+00> : vector<64x128xf32>
    %304 = tpu.matmul %301, %303, %cst_376 {dimension_numbers = #tpu.dot_dimension_numbers<[1], [0], [0], [1], [0, 0, 1, 1], [], []>} : vector<64x128xbf16>, vector<128x128xbf16>, vector<64x128xf32> -> vector<64x128xf32>
    %305 = arith.addf %299, %304 : vector<64x128xf32>
    %c2_377 = arith.constant 2 : index
    %c0_378 = arith.constant 0 : index
    %c0_379 = arith.constant 0 : index
    %306 = vector.load %arg8[%c2_377, %c0_378, %c0_379] : memref<6x18x128xbf16, #tpu.memory_space<vmem>>, vector<4x16x128xbf16>
    %307 = vector.shape_cast %306 : vector<4x16x128xbf16> to vector<64x128xbf16>
    %c4_380 = arith.constant 4 : index
    %c6_381 = arith.constant 6 : index
    %c0_382 = arith.constant 0 : index
    %c0_383 = arith.constant 0 : index
    %308 = vector.load %arg2[%c4_380, %c6_381, %c0_382, %c0_383] : memref<6x9x128x128xbf16, #tpu.memory_space<vmem>>, vector<1x1x128x128xbf16>
    %309 = vector.shape_cast %308 : vector<1x1x128x128xbf16> to vector<128x128xbf16>
    %cst_384 = arith.constant dense<0.000000e+00> : vector<64x128xf32>
    %310 = tpu.matmul %307, %309, %cst_384 {dimension_numbers = #tpu.dot_dimension_numbers<[1], [0], [0], [1], [0, 0, 1, 1], [], []>} : vector<64x128xbf16>, vector<128x128xbf16>, vector<64x128xf32> -> vector<64x128xf32>
    %311 = arith.addf %305, %310 : vector<64x128xf32>
    %c2_385 = arith.constant 2 : index
    %c1_386 = arith.constant 1 : index
    %c0_387 = arith.constant 0 : index
    %312 = vector.load %arg8[%c2_385, %c1_386, %c0_387] : memref<6x18x128xbf16, #tpu.memory_space<vmem>>, vector<4x16x128xbf16>
    %313 = vector.shape_cast %312 : vector<4x16x128xbf16> to vector<64x128xbf16>
    %c4_388 = arith.constant 4 : index
    %c7_389 = arith.constant 7 : index
    %c0_390 = arith.constant 0 : index
    %c0_391 = arith.constant 0 : index
    %314 = vector.load %arg2[%c4_388, %c7_389, %c0_390, %c0_391] : memref<6x9x128x128xbf16, #tpu.memory_space<vmem>>, vector<1x1x128x128xbf16>
    %315 = vector.shape_cast %314 : vector<1x1x128x128xbf16> to vector<128x128xbf16>
    %cst_392 = arith.constant dense<0.000000e+00> : vector<64x128xf32>
    %316 = tpu.matmul %313, %315, %cst_392 {dimension_numbers = #tpu.dot_dimension_numbers<[1], [0], [0], [1], [0, 0, 1, 1], [], []>} : vector<64x128xbf16>, vector<128x128xbf16>, vector<64x128xf32> -> vector<64x128xf32>
    %317 = arith.addf %311, %316 : vector<64x128xf32>
    %c2_393 = arith.constant 2 : index
    %c2_394 = arith.constant 2 : index
    %c0_395 = arith.constant 0 : index
    %318 = vector.load %arg8[%c2_393, %c2_394, %c0_395] : memref<6x18x128xbf16, #tpu.memory_space<vmem>>, vector<4x16x128xbf16>
    %319 = vector.shape_cast %318 : vector<4x16x128xbf16> to vector<64x128xbf16>
    %c4_396 = arith.constant 4 : index
    %c8_397 = arith.constant 8 : index
    %c0_398 = arith.constant 0 : index
    %c0_399 = arith.constant 0 : index
    %320 = vector.load %arg2[%c4_396, %c8_397, %c0_398, %c0_399] : memref<6x9x128x128xbf16, #tpu.memory_space<vmem>>, vector<1x1x128x128xbf16>
    %321 = vector.shape_cast %320 : vector<1x1x128x128xbf16> to vector<128x128xbf16>
    %cst_400 = arith.constant dense<0.000000e+00> : vector<64x128xf32>
    %322 = tpu.matmul %319, %321, %cst_400 {dimension_numbers = #tpu.dot_dimension_numbers<[1], [0], [0], [1], [0, 0, 1, 1], [], []>} : vector<64x128xbf16>, vector<128x128xbf16>, vector<64x128xf32> -> vector<64x128xf32>
    %323 = arith.addf %317, %322 : vector<64x128xf32>
    %c4_401 = arith.constant 4 : index
    %c0_402 = arith.constant 0 : index
    %c0_403 = arith.constant 0 : index
    %324 = vector.load %arg3[%c4_401, %c0_402, %c0_403] : memref<6x1x128xf32, #tpu.memory_space<vmem>>, vector<1x1x128xf32>
    %325 = vector.shape_cast %324 : vector<1x1x128xf32> to vector<1x128xf32>
    %326 = vector.broadcast %325 : vector<1x128xf32> to vector<64x128xf32>
    %327 = arith.addf %323, %326 : vector<64x128xf32>
    %c1_404 = arith.constant 1 : index
    %c1_405 = arith.constant 1 : index
    %c0_406 = arith.constant 0 : index
    %328 = vector.load %arg9[%c1_404, %c1_405, %c0_406] : memref<6x18x128xbf16, #tpu.memory_space<vmem>>, vector<4x16x128xbf16>
    %329 = vector.shape_cast %328 : vector<4x16x128xbf16> to vector<64x128xbf16>
    %330 = arith.extf %329 : vector<64x128xbf16> to vector<64x128xf32>
    %331 = arith.addf %327, %330 : vector<64x128xf32>
    %332 = vector.shape_cast %331 : vector<64x128xf32> to vector<4x16x128xf32>
    %333 = arith.truncf %332 : vector<4x16x128xf32> to vector<4x16x128xbf16>
    %c1_407 = arith.constant 1 : index
    %c1_408 = arith.constant 1 : index
    %c0_409 = arith.constant 0 : index
    %334 = vector.load %arg9[%c1_407, %c1_408, %c0_409] : memref<6x18x128xbf16, #tpu.memory_space<vmem>>, vector<4x16x128xbf16>
    tpu.vector_store %arg9[%c1_407, %c1_408, %c0_409], %333 {strides = array<i32>} : memref<6x18x128xbf16, #tpu.memory_space<vmem>>, vector<4x16x128xbf16>,
    %cst_410 = arith.constant 0.000000e+00 : f32
    %335 = vector.broadcast %cst_410 : f32 to vector<64x128xf32>
    %c0_411 = arith.constant 0 : index
    %c0_412 = arith.constant 0 : index
    %c0_413 = arith.constant 0 : index
    %336 = vector.load %arg9[%c0_411, %c0_412, %c0_413] : memref<6x18x128xbf16, #tpu.memory_space<vmem>>, vector<4x16x128xbf16>
    %337 = vector.shape_cast %336 : vector<4x16x128xbf16> to vector<64x128xbf16>
    %c5_414 = arith.constant 5 : index
    %c0_415 = arith.constant 0 : index
    %c0_416 = arith.constant 0 : index
    %c0_417 = arith.constant 0 : index
    %338 = vector.load %arg2[%c5_414, %c0_415, %c0_416, %c0_417] : memref<6x9x128x128xbf16, #tpu.memory_space<vmem>>, vector<1x1x128x128xbf16>
    %339 = vector.shape_cast %338 : vector<1x1x128x128xbf16> to vector<128x128xbf16>
    %cst_418 = arith.constant dense<0.000000e+00> : vector<64x128xf32>
    %340 = tpu.matmul %337, %339, %cst_418 {dimension_numbers = #tpu.dot_dimension_numbers<[1], [0], [0], [1], [0, 0, 1, 1], [], []>} : vector<64x128xbf16>, vector<128x128xbf16>, vector<64x128xf32> -> vector<64x128xf32>
    %341 = arith.addf %335, %340 : vector<64x128xf32>
    %c0_419 = arith.constant 0 : index
    %c1_420 = arith.constant 1 : index
    %c0_421 = arith.constant 0 : index
    %342 = vector.load %arg9[%c0_419, %c1_420, %c0_421] : memref<6x18x128xbf16, #tpu.memory_space<vmem>>, vector<4x16x128xbf16>
    %343 = vector.shape_cast %342 : vector<4x16x128xbf16> to vector<64x128xbf16>
    %c5_422 = arith.constant 5 : index
    %c1_423 = arith.constant 1 : index
    %c0_424 = arith.constant 0 : index
    %c0_425 = arith.constant 0 : index
    %344 = vector.load %arg2[%c5_422, %c1_423, %c0_424, %c0_425] : memref<6x9x128x128xbf16, #tpu.memory_space<vmem>>, vector<1x1x128x128xbf16>
    %345 = vector.shape_cast %344 : vector<1x1x128x128xbf16> to vector<128x128xbf16>
    %cst_426 = arith.constant dense<0.000000e+00> : vector<64x128xf32>
    %346 = tpu.matmul %343, %345, %cst_426 {dimension_numbers = #tpu.dot_dimension_numbers<[1], [0], [0], [1], [0, 0, 1, 1], [], []>} : vector<64x128xbf16>, vector<128x128xbf16>, vector<64x128xf32> -> vector<64x128xf32>
    %347 = arith.addf %341, %346 : vector<64x128xf32>
    %c0_427 = arith.constant 0 : index
    %c2_428 = arith.constant 2 : index
    %c0_429 = arith.constant 0 : index
    %348 = vector.load %arg9[%c0_427, %c2_428, %c0_429] : memref<6x18x128xbf16, #tpu.memory_space<vmem>>, vector<4x16x128xbf16>
    %349 = vector.shape_cast %348 : vector<4x16x128xbf16> to vector<64x128xbf16>
    %c5_430 = arith.constant 5 : index
    %c2_431 = arith.constant 2 : index
    %c0_432 = arith.constant 0 : index
    %c0_433 = arith.constant 0 : index
    %350 = vector.load %arg2[%c5_430, %c2_431, %c0_432, %c0_433] : memref<6x9x128x128xbf16, #tpu.memory_space<vmem>>, vector<1x1x128x128xbf16>
    %351 = vector.shape_cast %350 : vector<1x1x128x128xbf16> to vector<128x128xbf16>
    %cst_434 = arith.constant dense<0.000000e+00> : vector<64x128xf32>
    %352 = tpu.matmul %349, %351, %cst_434 {dimension_numbers = #tpu.dot_dimension_numbers<[1], [0], [0], [1], [0, 0, 1, 1], [], []>} : vector<64x128xbf16>, vector<128x128xbf16>, vector<64x128xf32> -> vector<64x128xf32>
    %353 = arith.addf %347, %352 : vector<64x128xf32>
    %c1_435 = arith.constant 1 : index
    %c0_436 = arith.constant 0 : index
    %c0_437 = arith.constant 0 : index
    %354 = vector.load %arg9[%c1_435, %c0_436, %c0_437] : memref<6x18x128xbf16, #tpu.memory_space<vmem>>, vector<4x16x128xbf16>
    %355 = vector.shape_cast %354 : vector<4x16x128xbf16> to vector<64x128xbf16>
    %c5_438 = arith.constant 5 : index
    %c3_439 = arith.constant 3 : index
    %c0_440 = arith.constant 0 : index
    %c0_441 = arith.constant 0 : index
    %356 = vector.load %arg2[%c5_438, %c3_439, %c0_440, %c0_441] : memref<6x9x128x128xbf16, #tpu.memory_space<vmem>>, vector<1x1x128x128xbf16>
    %357 = vector.shape_cast %356 : vector<1x1x128x128xbf16> to vector<128x128xbf16>
    %cst_442 = arith.constant dense<0.000000e+00> : vector<64x128xf32>
    %358 = tpu.matmul %355, %357, %cst_442 {dimension_numbers = #tpu.dot_dimension_numbers<[1], [0], [0], [1], [0, 0, 1, 1], [], []>} : vector<64x128xbf16>, vector<128x128xbf16>, vector<64x128xf32> -> vector<64x128xf32>
    %359 = arith.addf %353, %358 : vector<64x128xf32>
    %c1_443 = arith.constant 1 : index
    %c1_444 = arith.constant 1 : index
    %c0_445 = arith.constant 0 : index
    %360 = vector.load %arg9[%c1_443, %c1_444, %c0_445] : memref<6x18x128xbf16, #tpu.memory_space<vmem>>, vector<4x16x128xbf16>
    %361 = vector.shape_cast %360 : vector<4x16x128xbf16> to vector<64x128xbf16>
    %c5_446 = arith.constant 5 : index
    %c4_447 = arith.constant 4 : index
    %c0_448 = arith.constant 0 : index
    %c0_449 = arith.constant 0 : index
    %362 = vector.load %arg2[%c5_446, %c4_447, %c0_448, %c0_449] : memref<6x9x128x128xbf16, #tpu.memory_space<vmem>>, vector<1x1x128x128xbf16>
    %363 = vector.shape_cast %362 : vector<1x1x128x128xbf16> to vector<128x128xbf16>
    %cst_450 = arith.constant dense<0.000000e+00> : vector<64x128xf32>
    %364 = tpu.matmul %361, %363, %cst_450 {dimension_numbers = #tpu.dot_dimension_numbers<[1], [0], [0], [1], [0, 0, 1, 1], [], []>} : vector<64x128xbf16>, vector<128x128xbf16>, vector<64x128xf32> -> vector<64x128xf32>
    %365 = arith.addf %359, %364 : vector<64x128xf32>
    %c1_451 = arith.constant 1 : index
    %c2_452 = arith.constant 2 : index
    %c0_453 = arith.constant 0 : index
    %366 = vector.load %arg9[%c1_451, %c2_452, %c0_453] : memref<6x18x128xbf16, #tpu.memory_space<vmem>>, vector<4x16x128xbf16>
    %367 = vector.shape_cast %366 : vector<4x16x128xbf16> to vector<64x128xbf16>
    %c5_454 = arith.constant 5 : index
    %c5_455 = arith.constant 5 : index
    %c0_456 = arith.constant 0 : index
    %c0_457 = arith.constant 0 : index
    %368 = vector.load %arg2[%c5_454, %c5_455, %c0_456, %c0_457] : memref<6x9x128x128xbf16, #tpu.memory_space<vmem>>, vector<1x1x128x128xbf16>
    %369 = vector.shape_cast %368 : vector<1x1x128x128xbf16> to vector<128x128xbf16>
    %cst_458 = arith.constant dense<0.000000e+00> : vector<64x128xf32>
    %370 = tpu.matmul %367, %369, %cst_458 {dimension_numbers = #tpu.dot_dimension_numbers<[1], [0], [0], [1], [0, 0, 1, 1], [], []>} : vector<64x128xbf16>, vector<128x128xbf16>, vector<64x128xf32> -> vector<64x128xf32>
    %371 = arith.addf %365, %370 : vector<64x128xf32>
    %c2_459 = arith.constant 2 : index
    %c0_460 = arith.constant 0 : index
    %c0_461 = arith.constant 0 : index
    %372 = vector.load %arg9[%c2_459, %c0_460, %c0_461] : memref<6x18x128xbf16, #tpu.memory_space<vmem>>, vector<4x16x128xbf16>
    %373 = vector.shape_cast %372 : vector<4x16x128xbf16> to vector<64x128xbf16>
    %c5_462 = arith.constant 5 : index
    %c6_463 = arith.constant 6 : index
    %c0_464 = arith.constant 0 : index
    %c0_465 = arith.constant 0 : index
    %374 = vector.load %arg2[%c5_462, %c6_463, %c0_464, %c0_465] : memref<6x9x128x128xbf16, #tpu.memory_space<vmem>>, vector<1x1x128x128xbf16>
    %375 = vector.shape_cast %374 : vector<1x1x128x128xbf16> to vector<128x128xbf16>
    %cst_466 = arith.constant dense<0.000000e+00> : vector<64x128xf32>
    %376 = tpu.matmul %373, %375, %cst_466 {dimension_numbers = #tpu.dot_dimension_numbers<[1], [0], [0], [1], [0, 0, 1, 1], [], []>} : vector<64x128xbf16>, vector<128x128xbf16>, vector<64x128xf32> -> vector<64x128xf32>
    %377 = arith.addf %371, %376 : vector<64x128xf32>
    %c2_467 = arith.constant 2 : index
    %c1_468 = arith.constant 1 : index
    %c0_469 = arith.constant 0 : index
    %378 = vector.load %arg9[%c2_467, %c1_468, %c0_469] : memref<6x18x128xbf16, #tpu.memory_space<vmem>>, vector<4x16x128xbf16>
    %379 = vector.shape_cast %378 : vector<4x16x128xbf16> to vector<64x128xbf16>
    %c5_470 = arith.constant 5 : index
    %c7_471 = arith.constant 7 : index
    %c0_472 = arith.constant 0 : index
    %c0_473 = arith.constant 0 : index
    %380 = vector.load %arg2[%c5_470, %c7_471, %c0_472, %c0_473] : memref<6x9x128x128xbf16, #tpu.memory_space<vmem>>, vector<1x1x128x128xbf16>
    %381 = vector.shape_cast %380 : vector<1x1x128x128xbf16> to vector<128x128xbf16>
    %cst_474 = arith.constant dense<0.000000e+00> : vector<64x128xf32>
    %382 = tpu.matmul %379, %381, %cst_474 {dimension_numbers = #tpu.dot_dimension_numbers<[1], [0], [0], [1], [0, 0, 1, 1], [], []>} : vector<64x128xbf16>, vector<128x128xbf16>, vector<64x128xf32> -> vector<64x128xf32>
    %383 = arith.addf %377, %382 : vector<64x128xf32>
    %c2_475 = arith.constant 2 : index
    %c2_476 = arith.constant 2 : index
    %c0_477 = arith.constant 0 : index
    %384 = vector.load %arg9[%c2_475, %c2_476, %c0_477] : memref<6x18x128xbf16, #tpu.memory_space<vmem>>, vector<4x16x128xbf16>
    %385 = vector.shape_cast %384 : vector<4x16x128xbf16> to vector<64x128xbf16>
    %c5_478 = arith.constant 5 : index
    %c8_479 = arith.constant 8 : index
    %c0_480 = arith.constant 0 : index
    %c0_481 = arith.constant 0 : index
    %386 = vector.load %arg2[%c5_478, %c8_479, %c0_480, %c0_481] : memref<6x9x128x128xbf16, #tpu.memory_space<vmem>>, vector<1x1x128x128xbf16>
    %387 = vector.shape_cast %386 : vector<1x1x128x128xbf16> to vector<128x128xbf16>
    %cst_482 = arith.constant dense<0.000000e+00> : vector<64x128xf32>
    %388 = tpu.matmul %385, %387, %cst_482 {dimension_numbers = #tpu.dot_dimension_numbers<[1], [0], [0], [1], [0, 0, 1, 1], [], []>} : vector<64x128xbf16>, vector<128x128xbf16>, vector<64x128xf32> -> vector<64x128xf32>
    %389 = arith.addf %383, %388 : vector<64x128xf32>
    %c5_483 = arith.constant 5 : index
    %c0_484 = arith.constant 0 : index
    %c0_485 = arith.constant 0 : index
    %390 = vector.load %arg3[%c5_483, %c0_484, %c0_485] : memref<6x1x128xf32, #tpu.memory_space<vmem>>, vector<1x1x128xf32>
    %391 = vector.shape_cast %390 : vector<1x1x128xf32> to vector<1x128xf32>
    %392 = vector.broadcast %391 : vector<1x128xf32> to vector<64x128xf32>
    %393 = arith.addf %389, %392 : vector<64x128xf32>
    %cst_486 = arith.constant 0.000000e+00 : f32
    %394 = vector.broadcast %cst_486 : f32 to vector<64x128xf32>
    %395 = arith.cmpf oge, %393, %394 : vector<64x128xf32>
    %c1_487 = arith.constant 1 : index
    %396 = memref.load %arg4[%c1_487] : memref<2xf32, #tpu.memory_space<smem>>
    %397 = vector.broadcast %396 : f32 to vector<64x128xf32>
    %398 = arith.mulf %397, %393 : vector<64x128xf32>
    %399 = arith.select %395, %393, %398 : vector<64x128xi1>, vector<64x128xf32>
    %400 = vector.shape_cast %399 : vector<64x128xf32> to vector<4x16x128xf32>
    %c0_488 = arith.constant 0 : index
    %c0_489 = arith.constant 0 : index
    %401 = vector.load %arg5[%c0_488, %c0_489] : memref<8x16xbf16, #tpu.memory_space<vmem>>, vector<8x16xbf16>
    %c0_490 = arith.constant 0 : index
    %c0_491 = arith.constant 0 : index
    %402 = vector.load %arg6[%c0_490, %c0_491] : memref<128x64xbf16, #tpu.memory_space<vmem>>, vector<128x64xbf16>
    %403 = vector.extract_strided_slice %400 {offsets = [0, 0, 0], sizes = [1, 16, 128], strides = [1, 1, 1]} : vector<4x16x128xf32> to vector<1x16x128xf32>
    %404 = vector.shape_cast %403 : vector<1x16x128xf32> to vector<16x128xf32>
    %405 = arith.truncf %404 : vector<16x128xf32> to vector<16x128xbf16>
    %cst_492 = arith.constant dense<0.000000e+00> : vector<8x128xf32>
    %406 = tpu.matmul %401, %405, %cst_492 {dimension_numbers = #tpu.dot_dimension_numbers<[1], [0], [0], [1], [0, 0, 1, 1], [], []>} : vector<8x16xbf16>, vector<16x128xbf16>, vector<8x128xf32> -> vector<8x128xf32>
    %407 = arith.truncf %406 : vector<8x128xf32> to vector<8x128xbf16>
    %cst_493 = arith.constant dense<0.000000e+00> : vector<8x64xf32>
    %408 = tpu.matmul %407, %402, %cst_493 {dimension_numbers = #tpu.dot_dimension_numbers<[1], [0], [0], [1], [0, 0, 1, 1], [], []>} : vector<8x128xbf16>, vector<128x64xbf16>, vector<8x64xf32> -> vector<8x64xf32>
    %c0_494 = arith.constant 0 : index
    %c0_495 = arith.constant 0 : index
    %c0_496 = arith.constant 0 : index
    %c0_497 = arith.constant 0 : index
    %409 = vector.load %arg7[%c0_494, %c0_495, %c0_496, %c0_497] : memref<1x4x8x64xf32, #tpu.memory_space<vmem>>, vector<1x1x8x64xf32>
    %410 = vector.shape_cast %409 : vector<1x1x8x64xf32> to vector<8x64xf32>
    %411 = vector.shape_cast %408 : vector<8x64xf32> to vector<1x1x8x64xf32>
    tpu.vector_store %arg7[%c0_494, %c0_495, %c0_496, %c0_497], %411 {strides = array<i32>} : memref<1x4x8x64xf32, #tpu.memory_space<vmem>>, vector<1x1x8x64xf32>,
    %412 = vector.extract_strided_slice %400 {offsets = [1, 0, 0], sizes = [1, 16, 128], strides = [1, 1, 1]} : vector<4x16x128xf32> to vector<1x16x128xf32>
    %413 = vector.shape_cast %412 : vector<1x16x128xf32> to vector<16x128xf32>
    %414 = arith.truncf %413 : vector<16x128xf32> to vector<16x128xbf16>
    %cst_498 = arith.constant dense<0.000000e+00> : vector<8x128xf32>
    %415 = tpu.matmul %401, %414, %cst_498 {dimension_numbers = #tpu.dot_dimension_numbers<[1], [0], [0], [1], [0, 0, 1, 1], [], []>} : vector<8x16xbf16>, vector<16x128xbf16>, vector<8x128xf32> -> vector<8x128xf32>
    %416 = arith.truncf %415 : vector<8x128xf32> to vector<8x128xbf16>
    %cst_499 = arith.constant dense<0.000000e+00> : vector<8x64xf32>
    %417 = tpu.matmul %416, %402, %cst_499 {dimension_numbers = #tpu.dot_dimension_numbers<[1], [0], [0], [1], [0, 0, 1, 1], [], []>} : vector<8x128xbf16>, vector<128x64xbf16>, vector<8x64xf32> -> vector<8x64xf32>
    %c0_500 = arith.constant 0 : index
    %c1_501 = arith.constant 1 : index
    %c0_502 = arith.constant 0 : index
    %c0_503 = arith.constant 0 : index
    %418 = vector.load %arg7[%c0_500, %c1_501, %c0_502, %c0_503] : memref<1x4x8x64xf32, #tpu.memory_space<vmem>>, vector<1x1x8x64xf32>
    %419 = vector.shape_cast %418 : vector<1x1x8x64xf32> to vector<8x64xf32>
    %420 = vector.shape_cast %417 : vector<8x64xf32> to vector<1x1x8x64xf32>
    tpu.vector_store %arg7[%c0_500, %c1_501, %c0_502, %c0_503], %420 {strides = array<i32>} : memref<1x4x8x64xf32, #tpu.memory_space<vmem>>, vector<1x1x8x64xf32>,
    %421 = vector.extract_strided_slice %400 {offsets = [2, 0, 0], sizes = [1, 16, 128], strides = [1, 1, 1]} : vector<4x16x128xf32> to vector<1x16x128xf32>
    %422 = vector.shape_cast %421 : vector<1x16x128xf32> to vector<16x128xf32>
    %423 = arith.truncf %422 : vector<16x128xf32> to vector<16x128xbf16>
    %cst_504 = arith.constant dense<0.000000e+00> : vector<8x128xf32>
    %424 = tpu.matmul %401, %423, %cst_504 {dimension_numbers = #tpu.dot_dimension_numbers<[1], [0], [0], [1], [0, 0, 1, 1], [], []>} : vector<8x16xbf16>, vector<16x128xbf16>, vector<8x128xf32> -> vector<8x128xf32>
    %425 = arith.truncf %424 : vector<8x128xf32> to vector<8x128xbf16>
    %cst_505 = arith.constant dense<0.000000e+00> : vector<8x64xf32>
    %426 = tpu.matmul %425, %402, %cst_505 {dimension_numbers = #tpu.dot_dimension_numbers<[1], [0], [0], [1], [0, 0, 1, 1], [], []>} : vector<8x128xbf16>, vector<128x64xbf16>, vector<8x64xf32> -> vector<8x64xf32>
    %c0_506 = arith.constant 0 : index
    %c2_507 = arith.constant 2 : index
    %c0_508 = arith.constant 0 : index
    %c0_509 = arith.constant 0 : index
    %427 = vector.load %arg7[%c0_506, %c2_507, %c0_508, %c0_509] : memref<1x4x8x64xf32, #tpu.memory_space<vmem>>, vector<1x1x8x64xf32>
    %428 = vector.shape_cast %427 : vector<1x1x8x64xf32> to vector<8x64xf32>
    %429 = vector.shape_cast %426 : vector<8x64xf32> to vector<1x1x8x64xf32>
    tpu.vector_store %arg7[%c0_506, %c2_507, %c0_508, %c0_509], %429 {strides = array<i32>} : memref<1x4x8x64xf32, #tpu.memory_space<vmem>>, vector<1x1x8x64xf32>,
    %430 = vector.extract_strided_slice %400 {offsets = [3, 0, 0], sizes = [1, 16, 128], strides = [1, 1, 1]} : vector<4x16x128xf32> to vector<1x16x128xf32>
    %431 = vector.shape_cast %430 : vector<1x16x128xf32> to vector<16x128xf32>
    %432 = arith.truncf %431 : vector<16x128xf32> to vector<16x128xbf16>
    %cst_510 = arith.constant dense<0.000000e+00> : vector<8x128xf32>
    %433 = tpu.matmul %401, %432, %cst_510 {dimension_numbers = #tpu.dot_dimension_numbers<[1], [0], [0], [1], [0, 0, 1, 1], [], []>} : vector<8x16xbf16>, vector<16x128xbf16>, vector<8x128xf32> -> vector<8x128xf32>
    %434 = arith.truncf %433 : vector<8x128xf32> to vector<8x128xbf16>
    %cst_511 = arith.constant dense<0.000000e+00> : vector<8x64xf32>
    %435 = tpu.matmul %434, %402, %cst_511 {dimension_numbers = #tpu.dot_dimension_numbers<[1], [0], [0], [1], [0, 0, 1, 1], [], []>} : vector<8x128xbf16>, vector<128x64xbf16>, vector<8x64xf32> -> vector<8x64xf32>
    %c0_512 = arith.constant 0 : index
    %c3_513 = arith.constant 3 : index
    %c0_514 = arith.constant 0 : index
    %c0_515 = arith.constant 0 : index
    %436 = vector.load %arg7[%c0_512, %c3_513, %c0_514, %c0_515] : memref<1x4x8x64xf32, #tpu.memory_space<vmem>>, vector<1x1x8x64xf32>
    %437 = vector.shape_cast %436 : vector<1x1x8x64xf32> to vector<8x64xf32>
    %438 = vector.shape_cast %435 : vector<8x64xf32> to vector<1x1x8x64xf32>
    tpu.vector_store %arg7[%c0_512, %c3_513, %c0_514, %c0_515], %438 {strides = array<i32>} : memref<1x4x8x64xf32, #tpu.memory_space<vmem>>, vector<1x1x8x64xf32>,
    return
  }
  func.func @transform_0(%arg0: i32) -> (i32, i32, i32, i32) {
    %c0_i32 = arith.constant 0 : i32
    %c0_i32_0 = arith.constant 0 : i32
    %c0_i32_1 = arith.constant 0 : i32
    %c0_i32_2 = arith.constant 0 : i32
    return %arg0, %c0_i32, %c0_i32_0, %c0_i32_1 : i32, i32, i32, i32
  }
  func.func @transform_1(%arg0: i32) -> (i32, i32, i32, i32) {
    %c0_i32 = arith.constant 0 : i32
    %c0_i32_0 = arith.constant 0 : i32
    %c0_i32_1 = arith.constant 0 : i32
    %c0_i32_2 = arith.constant 0 : i32
    %c0_i32_3 = arith.constant 0 : i32
    return %c0_i32, %c0_i32_0, %c0_i32_1, %c0_i32_2 : i32, i32, i32, i32
  }
  func.func @transform_2(%arg0: i32) -> (i32, i32, i32) {
    %c0_i32 = arith.constant 0 : i32
    %c0_i32_0 = arith.constant 0 : i32
    %c0_i32_1 = arith.constant 0 : i32
    %c0_i32_2 = arith.constant 0 : i32
    return %c0_i32, %c0_i32_0, %c0_i32_1 : i32, i32, i32
  }
  func.func @transform_3(%arg0: i32) -> i32 {
    %c0_i32 = arith.constant 0 : i32
    %c0_i32_0 = arith.constant 0 : i32
    return %c0_i32 : i32
  }
  func.func @transform_4(%arg0: i32) -> (i32, i32) {
    %c0_i32 = arith.constant 0 : i32
    %c0_i32_0 = arith.constant 0 : i32
    %c0_i32_1 = arith.constant 0 : i32
    return %c0_i32, %c0_i32_0 : i32, i32
  }
  func.func @transform_5(%arg0: i32) -> (i32, i32) {
    %c0_i32 = arith.constant 0 : i32
    %c0_i32_0 = arith.constant 0 : i32
    %c0_i32_1 = arith.constant 0 : i32
    return %c0_i32, %c0_i32_0 : i32, i32
  }
  func.func @transform_6(%arg0: i32) -> (i32, i32, i32, i32) {
    %c0_i32 = arith.constant 0 : i32
    %c0_i32_0 = arith.constant 0 : i32
    %c0_i32_1 = arith.constant 0 : i32
    %c0_i32_2 = arith.constant 0 : i32
    return %arg0, %c0_i32, %c0_i32_0, %c0_i32_1 : i32, i32, i32, i32
  }
}

</mosaic_0001>

<bundles_post_ra>
// kernel: tile.33
= control target key start
LH: loop header
LB: loop body
LE: loop exit
PB: predicated region body
PF: predicated region fallthrough
CT: control target
= control target key end

     0   :  { %s28_s0 = inlined_call_operand.vmem [shape: f32[8], index: 0, kind: input, shape index: {}]   ;;  %s29_s1 = inlined_call_operand.vmem [shape: f32[16,8], index: 1, kind: output, shape index: {}]  }
   0x1   :  { %v4_v0 = vld [vmem:[%s28_s0] ss:$0 sm:$0xff] }
   0x2   :  { %5 = vst [vmem:[%s29_s1] sm:$0xff] %v4_v0 }
   0x3   :  { %8 = vst [vmem:[%s29_s1 + $0x8] sm:$0xff] %v4_v0 }

// kernel: tile.54
= control target key start
LH: loop header
LB: loop body
LE: loop exit
PB: predicated region body
PF: predicated region fallthrough
CT: control target
= control target key end

     0   :  { %s131_s10 = smov 120   ;;  %s132_s11 = smov 104   ;;  %vm3_vm0 = vcmask 64512   ;;  %vm9_vm1 = vcmask 1048512   ;;  %vm15_vm2 = vcmask 982912   ;;  %vm21_vm3 = vcmask 917312   ;;  %s207_s0 = inlined_call_operand.vmem [shape: f32[16,8], index: 0, kind: input, shape index: {}]   ;;  %s208_s1 = inlined_call_operand.vmem [shape: f32[1,128], index: 1, kind: output, shape index: {}]  }
   0x1   :  { %v101_v0 = vld [vmem:[%s207_s0 + $0xf] sm:$0x1]   ;;  %v103_v1 = vld [vmem:[%s207_s0 + $0xd] sm:$0x1]   ;;  %v105_v2 = vld [vmem:[%s207_s0 + $0xb] sm:$0x1]  }
   0x2   :  { %7 = vrot.lane.b32.xlu0 %v101_v0, %s131_s10  ;;  %19 = vrot.lane.b32.xlu1 %v103_v1, %s132_s11  ;;  %s133_s14 = smov 88   ;;  %v102_v3 = vld [vmem:[%s207_s0 + $0xe] sm:$0x1]   ;;  %v104_v4 = vld [vmem:[%s207_s0 + $0xc] sm:$0x1]   ;;  %s134_s19 = smov 112  }
   0x3   :  { %31 = vrot.lane.b32.xlu2 %v105_v2, %s133_s14  ;;  %s135_s20 = smov 96   ;;  %v106_v5 = vld [vmem:[%s207_s0 + $0xa] sm:$0x1]   ;;  %s136_s23 = smov 80   ;;  %v107_v6 = vld [vmem:[%s207_s0 + $0x9] sm:$0x1]  }
   0x4   :  { %v108_v7 = vld [vmem:[%s207_s0 + $0x8] sm:$0x1]   ;;  %s137_s28 = smov 72   ;;  %s138_s29 = smov 64   ;;  %v109_v8 = vld [vmem:[%s207_s0 + $0x7] sm:$0x1]  }
   0x5   :  { %s139_s3 = smov 56   ;;  %v110_v9 = vld [vmem:[%s207_s0 + $0x6] sm:$0x1]   ;;  %v111_v10 = vld [vmem:[%s207_s0 + $0x5] sm:$0x1]   ;;  %s140_s8 = smov 48  }
   0x6   :  { %s141_s9 = smov 40   ;;  %v112_v11 = vld [vmem:[%s207_s0 + $0x4] sm:$0x1]   ;;  %s142_s12 = smov 32   ;;  %v113_v12 = vld [vmem:[%s207_s0 + $0x3] sm:$0x1]  }
   0x7   :  { %v114_v13 = vld [vmem:[%s207_s0 + $0x2] sm:$0x1]   ;;  %s143_s17 = smov 24   ;;  %s144_s18 = smov 16   ;;  %v115_v14 = vld [vmem:[%s207_s0 + $0x1] sm:$0x1]  }
   0x8   :  { %s145_s21 = smov 8   ;;  %v2_v15 = vld [vmem:[%s207_s0] sm:$0x1]   ;;  %vm27_vm4 = vcmask 851712   ;;  %vm33_vm5 = vcmask 786112   ;;  %vm39_vm6 = vcmask 720512  }
   0x9   :  { %4 = vst.msk [vmem:[#allocation0] sm:$0x1] %vm3_vm0, %v2_v15   ;;  %vm45_vm7 = vcmask 654912   ;;  %vm51_vm8 = vcmask 589312   ;;  %vm57_vm9 = vcmask 523712   ;;  %vm63_vm10 = vcmask 458112  }
   0xa   :  { %13 = vrot.lane.b32.xlu0 %v102_v3, %s134_s19  ;;  %25 = vrot.lane.b32.xlu1 %v104_v4, %s135_s20  ;;  %vm69_vm11 = vcmask 392512   ;;  %vm75_vm12 = vcmask 326912   ;;  %vm81_vm13 = vcmask 261312   ;;  %vm87_vm14 = vcmask 195712  }
   0xb   :  { %37 = vrot.lane.b32.xlu2 %v106_v5, %s136_s23  ;;  %vm93_vm15 = vcmask 130112  }
  0x12   :  { %43 = vrot.lane.b32.xlu0 %v107_v6, %s137_s28  ;;  %49 = vrot.lane.b32.xlu1 %v108_v7, %s138_s29 }
  0x13   :  { %55 = vrot.lane.b32.xlu2 %v109_v8, %s139_s3 }
  0x1a   :  { %61 = vrot.lane.b32.xlu0 %v110_v9, %s140_s8  ;;  %67 = vrot.lane.b32.xlu1 %v111_v10, %s141_s9 }
  0x1b   :  { %73 = vrot.lane.b32.xlu2 %v112_v11, %s142_s12 }
  0x22   :  { %79 = vrot.lane.b32.xlu0 %v113_v12, %s143_s17  ;;  %85 = vrot.lane.b32.xlu1 %v114_v13, %s144_s18 }
  0x23   :  { %91 = vrot.lane.b32.xlu2 %v115_v14, %s145_s21 }
  0x5d   :  { %v32_v16 = vpop.permute.xlu2 %31  }
  0x65   :  { %v38_v17 = vpop.permute.xlu2 %37  }
  0x6d   :  { %v56_v18 = vpop.permute.xlu2 %55  }
  0x74   :  { %v8_v19 = vpop.permute.xlu0 %7   ;;  %v20_v20 = vpop.permute.xlu1 %19  }
  0x75   :  { %10 = vst.msk [vmem:[#allocation0] sm:$0x1] %vm9_vm1, %v8_v19   ;;  %v74_v21 = vpop.permute.xlu2 %73  }
  0x7c   :  { %v14_v22 = vpop.permute.xlu0 %13   ;;  %v26_v23 = vpop.permute.xlu1 %25  }
  0x7d   :  { %16 = vst.msk [vmem:[#allocation0] sm:$0x1] %vm15_vm2, %v14_v22   ;;  %v92_v24 = vpop.permute.xlu2 %91  }
  0x7e   :  { %22 = vst.msk [vmem:[#allocation0] sm:$0x1] %vm21_vm3, %v20_v20  }
  0x7f   :  { %28 = vst.msk [vmem:[#allocation0] sm:$0x1] %vm27_vm4, %v26_v23  }
  0x80   :  { %34 = vst.msk [vmem:[#allocation0] sm:$0x1] %vm33_vm5, %v32_v16  }
  0x81   :  { %40 = vst.msk [vmem:[#allocation0] sm:$0x1] %vm39_vm6, %v38_v17  }
  0x84   :  { %v44_v25 = vpop.permute.xlu0 %43   ;;  %v50_v26 = vpop.permute.xlu1 %49  }
  0x85   :  { %46 = vst.msk [vmem:[#allocation0] sm:$0x1] %vm45_vm7, %v44_v25  }
  0x86   :  { %52 = vst.msk [vmem:[#allocation0] sm:$0x1] %vm51_vm8, %v50_v26  }
  0x87   :  { %58 = vst.msk [vmem:[#allocation0] sm:$0x1] %vm57_vm9, %v56_v18  }
  0x8c   :  { %v62_v27 = vpop.permute.xlu0 %61   ;;  %v68_v28 = vpop.permute.xlu1 %67  }
  0x8d   :  { %64 = vst.msk [vmem:[#allocation0] sm:$0x1] %vm63_vm10, %v62_v27  }
  0x8e   :  { %70 = vst.msk [vmem:[#allocation0] sm:$0x1] %vm69_vm11, %v68_v28  }
  0x8f   :  { %76 = vst.msk [vmem:[#allocation0] sm:$0x1] %vm75_vm12, %v74_v21  }
  0x94   :  { %v80_v29 = vpop.permute.xlu0 %79   ;;  %v86_v30 = vpop.permute.xlu1 %85  }
  0x95   :  { %82 = vst.msk [vmem:[#allocation0] sm:$0x1] %vm81_vm13, %v80_v29  }
  0x96   :  { %88 = vst.msk [vmem:[#allocation0] sm:$0x1] %vm87_vm14, %v86_v30  }
  0x97   :  { %94 = vst.msk [vmem:[#allocation0] sm:$0x1] %vm93_vm15, %v92_v24  }
  0x9e   :  { %v97_v31 = vld [vmem:[#allocation0] sm:$0x1] }
  0x9f   :  { %100 = vst [vmem:[%s208_s1] sm:$0x1] %v97_v31 }

// kernel: _lambda_.1
= control target key start
LH: loop header
LB: loop body
LE: loop exit
PB: predicated region body
PF: predicated region fallthrough
CT: control target
= control target key end

     0   :  { %11 = vsyncpa [#allocation5], 0  ;;  %s14505_s21 = smov 0   ;;  %s18291_s0 = inlined_call_operand.vmem [shape: bf16[2,4,16,128], index: 0, kind: input, shape index: {}]   ;;  %s18292_s1 = inlined_call_operand.vmem [shape: bf16[6,9,128,128], index: 1, kind: input, shape index: {}]   ;;  %s18293_s2 = inlined_call_operand.vmem [shape: f32[6,1,128], index: 2, kind: input, shape index: {}]   ;;  %s18294_s3 = inlined_call_operand.vmem [shape: f32[2], index: 3, kind: input, shape index: {}]   ;;  %s18295_s4 = inlined_call_operand.vmem [shape: bf16[8,16], index: 4, kind: input, shape index: {}]   ;;  %s18296_s5 = inlined_call_operand.vmem [shape: bf16[128,64], index: 5, kind: input, shape index: {}]   ;;  %s18297_s6 = inlined_call_operand.vmem [shape: f32[2,4,8,64], index: 6, kind: output, shape index: {}]  }
   0x1 LB: > { %s14511_s22 = sadd.s32 4294967295, %s14466_s21   ;;  %p10909_p0 = scmp.ge.s32.totalorder %s14466_s21, 1  ;;  %s14466_s21 = sphi %s14505_s21, %s17_s21  }
   0x2   : > { %p179_p1 = scmp.lt.s32.totalorder %s14466_s21, 3  ;;  %s197_s25 = sshll.u32 %s18294_s3, 4  ;;  %s198_s25 = int_to_ptr.vmem [resolvable:$true] %s197_s25 }
   0x3   : > { %p14423_p3 = scmp.eq.s32.totalorder %s14511_s22, 0  ;;  %s14468_s26 = smov [#allocation4]  }
   0x4   : > { %p180_p2 = pnand %p10909_p0, %p179_p1 }
   0x6   : > { %p14419_p4 = pneg %p180_p2  ;;  %224 = sbr.rel (%p180_p2) target bundleno = 2082 (0x822), region = 44 }
   0x8   : > { %p14420_p5 = pnand %p14423_p3, %p14419_p4 }
   0xa   : > { %14422 = dma.vmem_to_smem (!%p14420_p5), %s198_s25, 16, %s14468_s26, [#allocation5]  }
   0xb   : > { %14461 = dma.done.wait (%p14423_p3), [#allocation5], 16  }
   0xc   : > { %14463 = vsyncadd (%p14423_p3), [#allocation5], 4294967280 }
   0xd   : > { %231 = sfence }
   0xe   : > { %v13922_v0 = vld [vmem:[%s18292_s1 + $0x78] sm:$0xff]  ;;  %v14469_v4 = vmov 0   ;;  %v13921_v5 = vld [vmem:[%s18292_s1 + $0x70] sm:$0xff]  ;;  %p256_p6 = scmp.lt.s32.totalorder %s14511_s22, 1  ;;  %v13920_v9 = vld [vmem:[%s18292_s1 + $0x68] sm:$0xff]  ;;  %vm778_vm2 = vcmask 1042432  }
   0xf   : > { %v13914_v1 = vld [vmem:[%s18292_s1 + $0x38] sm:$0xff]  ;;  %267 = vst [vmem:[#allocation2] sm:$0xf] %v14469_v4  ;;  %636 = vmatpush.bf16.msra.mxu0 %v13922_v0  ;;  %v13913_v6 = vld [vmem:[%s18292_s1 + $0x30] sm:$0xff]  ;;  %v13912_v10 = vld [vmem:[%s18292_s1 + $0x28] sm:$0xff]  ;;  %vm779_vm3 = vcmask 1046532  }
  0x10   : > { %v13930_v2 = vld [vmem:[%s18292_s1 + $0xb8] sm:$0xff]  ;;  %737 = vmatpush.bf16.msra.mxu1 %v13914_v1  ;;  %268 = vst [vmem:[#allocation2 + $0x4] sm:$0xf] %v14469_v4  ;;  %v13929_v7 = vld [vmem:[%s18292_s1 + $0xb0] sm:$0xff]  ;;  %v13928_v11 = vld [vmem:[%s18292_s1 + $0xa8] sm:$0xff]  ;;  %s18350_s22 = smov (!%p256_p6, %s14511_s22), 1 }
  0x11   : > { %v13942_v3 = vld [vmem:[%s18292_s1 + $0xf8] sm:$0xff]  ;;  %890 = vmatpush.bf16.msra.mxu2 %v13930_v2  ;;  %v13941_v8 = vld [vmem:[%s18292_s1 + $0xf0] sm:$0xff]  ;;  %269 = vst [vmem:[#allocation2 + $0x8] sm:$0x1] %v14469_v4  ;;  %v13940_v12 = vld [vmem:[%s18292_s1 + $0xe8] sm:$0xff]  ;;  %s13901_s17 = sshll.u32 %s18350_s22, 5 }
  0x12   : > { %1024 = vmatpush.bf16.msra.mxu3 %v13942_v3  ;;  %270 = vst [vmem:[#allocation2 + $0xc] sm:$0xf] %v14469_v4  ;;  %vm456_vm0 = vsmask.f32 3328  ;;  %v13919_v13 = vld [vmem:[%s18292_s1 + $0x60] sm:$0xff]  ;;  %v13918_v22 = vld [vmem:[%s18292_s1 + $0x58] sm:$0xff]  ;;  %s14619_s28 = scalar_lea.vmem %s18291_s0, %s13901_s17  ;;  %vm14646_vm5 = vmor %vm778_vm2, %vm779_vm3  ;;  %s265_s26 = scalar_lea.vmem %s18297_s6, %s13901_s17 }
  0x13   : > { %637 = vmatpush.bf16.msra.mxu0 %v13921_v5  ;;  %271 = vst [vmem:[#allocation2 + $0x10] sm:$0xf] %v14469_v4  ;;  %v13911_v14 = vld [vmem:[%s18292_s1 + $0x20] sm:$0xff]  ;;  %v13910_v25 = vld [vmem:[%s18292_s1 + $0x18] sm:$0xff]  ;;  %v13917_v36 = vld [vmem:[%s18292_s1 + $0x50] sm:$0xff]  ;;  %vm395_vm6 = vcmask 1043456  }
  0x14   : > { %738 = vmatpush.bf16.msra.mxu1 %v13913_v6  ;;  %272 = vst [vmem:[#allocation2 + $0x14] sm:$0x1] %v14469_v4  ;;  %v13927_v15 = vld [vmem:[%s18292_s1 + $0xa0] sm:$0xff]  ;;  %v13926_v28 = vld [vmem:[%s18292_s1 + $0x98] sm:$0xff]  ;;  %vm457_vm1 = vsmask.f32 7440 }
  0x15   : > { %891 = vmatpush.bf16.msra.mxu2 %v13929_v7  ;;  %273 = vst [vmem:[#allocation2 + $0x18] sm:$0xf] %v14469_v4  ;;  %v13939_v16 = vld [vmem:[%s18292_s1 + $0xe0] sm:$0xff]  ;;  %v13938_v32 = vld [vmem:[%s18292_s1 + $0xd8] sm:$0xff]  ;;  %v13909_v38 = vld [vmem:[%s18292_s1 + $0x10] sm:$0xff]  ;;  %vm402_vm8 = vcmask 1040384  }
  0x16   : > { %1025 = vmatpush.bf16.msra.mxu3 %v13941_v8  ;;  %274 = vst [vmem:[#allocation2 + $0x1c] sm:$0xf] %v14469_v4  ;;  %v428_v17 = vld [vmem:[#allocation2] sm:$0xf]  ;;  %v13925_v39 = vld [vmem:[%s18292_s1 + $0x90] sm:$0xff]  ;;  %vm14634_vm4 = vmor %vm456_vm0, %vm457_vm1  ;;  %s1992_s25 = sld [smem:[#allocation4]] }
  0x17   : > { %638 = vmatpush.bf16.msra.mxu0 %v13920_v9  ;;  %275 = vst [vmem:[#allocation2 + $0x20] sm:$0x1] %v14469_v4  ;;  %v14582_v18 = vld [vmem:[#allocation2 + $0x4] sm:$0xf]  ;;  %v460_v20 = vshrl.u32 %v428_v17, 16  ;;  %v463_v21 = vshll.u32 %v428_v17, 16 }
  0x18   : > { %739 = vmatpush.bf16.msra.mxu1 %v13912_v10  ;;  %v14584_v19 = vld [vmem:[#allocation2 + $0x8] sm:$0x1]  ;;  %v469_v23 = vshll.u32 %v14582_v18, 16  ;;  %v473_v24 = vshrl.u32 %v14582_v18, 16  ;;  %276 = vst [vmem:[#allocation2 + $0x24] sm:$0xf] %v14469_v4 }
  0x19   : > { %892 = vmatpush.bf16.msra.mxu2 %v13928_v11  ;;  %v462_v26 = vrot.slane %v460_v20, 4  ;;  %v465_v27 = vrot.slane %v463_v21, 5  ;;  %277 = vst [vmem:[#allocation2 + $0x28] sm:$0xf] %v14469_v4  ;;  %v479_v31 = vshll.u32 %v14584_v19, 16  ;;  %v783_v35 = vrot.slane %v14582_v18, 5 }
  0x1a   : > { %1026 = vmatpush.bf16.msra.mxu3 %v13940_v12  ;;  %v14600_v29 = vrot.slane %v469_v23, 5  ;;  %v475_v30 = vrot.slane %v473_v24, 4  ;;  %278 = vst [vmem:[#allocation2 + $0x2c] sm:$0x1] %v14469_v4  ;;  %v766_v34 = vld [vmem:[#allocation2] sm:$0xe] }
  0x1b   : > { %639 = vmatpush.bf16.msra.mxu0 %v13919_v13  ;;  %v466_v33 = vor.u32 %v465_v27, %v462_v26  ;;  %279 = vst [vmem:[#allocation2 + $0x30] sm:$0xf] %v14469_v4  ;;  %v13937_v40 = vld [vmem:[%s18292_s1 + $0xd0] sm:$0xff]  ;;  %v481_v43 = vrot.slane %v479_v31, 5  ;;  %v11014_v44 = vrot.slane %v766_v34, 9  ;;  %v785_v46 = vrot.slane %v783_v35, 4 }
  0x1c   : > { %740 = vmatpush.bf16.msra.mxu1 %v13911_v14  ;;  %v476_v37 = vor.u32 %v475_v30, %v14600_v29  ;;  %280 = vst [vmem:[#allocation2 + $0x34] sm:$0xf] %v14469_v4  ;;  %v786_v47 = vrot.slane %v14584_v19, 5  ;;  %v14641_v48 = vld [vmem:[%s14619_s28] sm:$0xf]  ;;  %v13916_v51 = vld [vmem:[%s18292_s1 + $0x48] sm:$0xff] }
  0x1d   : > { %893 = vmatpush.bf16.msra.mxu2 %v13927_v15  ;;  %281 = vst [vmem:[#allocation2 + $0x38] sm:$0x1] %v14469_v4  ;;  %v467_v41 = vrot.slane %v466_v33, 4  ;;  %v14651_v50 = vld [vmem:[%s14619_s28 + $0x4] sm:$0xf]  ;;  %v13908_v52 = vld [vmem:[%s18292_s1 + $0x8] sm:$0xff]  ;;  %v784_v59 = vsel %vm14646_vm5, %v11014_v44, %v783_v35 }
  0x1e   : > { %1027 = vmatpush.bf16.msra.mxu3 %v13939_v16  ;;  %v477_v42 = vrot.slane %v476_v37, 4  ;;  %282 = vst [vmem:[#allocation2 + $0x3c] sm:$0xf] %v14469_v4  ;;  %v13924_v53 = vld [vmem:[%s18292_s1 + $0x88] sm:$0xff]  ;;  %v315_v56 = vshrl.u32 %v14641_v48, 16  ;;  %v787_v60 = vsel %vm14646_vm5, %v785_v46, %v786_v47  ;;  %v323_v61 = vshrl.u32 %v14651_v50, 16 }
  0x1f   : > { %640 = vmatpush.bf16.msra.mxu0 %v13918_v22  ;;  %283 = vst [vmem:[#allocation2 + $0x40] sm:$0xf] %v14469_v4  ;;  %v472_v54 = vsel %vm14634_vm4, %v467_v41, %v14600_v29  ;;  %v14671_v57 = vld [vmem:[%s14619_s28 + $0x8] sm:$0xf]  ;;  %vm311_vm7 = vsmask.f32 256  ;;  %v826_v8 = vunpack.c.l.b16 %v784_v59  ;;  %v827_v9 = vunpack.c.l.b16 %v787_v60 }
  0x20   : > { %741 = vmatpush.bf16.msra.mxu1 %v13910_v25  ;;  %284 = vst [vmem:[#allocation2 + $0x44] sm:$0x1] %v14469_v4  ;;  %v482_v55 = vsel %vm14634_vm4, %v477_v42, %v481_v43  ;;  %v13936_v58 = vld [vmem:[%s18292_s1 + $0xc8] sm:$0xff]  ;;  %v13915_v62 = vld [vmem:[%s18292_s1 + $0x40] sm:$0xff]  ;;  %v332_v1 = vshrl.u32 %v14671_v57, 16  ;;  %v572_v5 = vunpack.c.l.b16 %v472_v54  ;;  %v318_v7 = vshll.u32 %v14641_v48, 16  ;;  %vm14731_vm13 = vmand %vm402_vm8, %vm311_vm7 }
  0x21   : > { %894 = vmatpush.bf16.msra.mxu2 %v13926_v28  ;;  %285 = vst [vmem:[#allocation3] sm:$0xf] %v14469_v4  ;;  %v13907_v63 = vld [vmem:[%s18292_s1] sm:$0xff]  ;;  %v14690_v0 = vld [vmem:[%s14619_s28 + $0xc] sm:$0xf]  ;;  %v573_v6 = vunpack.c.l.b16 %v482_v55  ;;  %v317_v10 = vrot.slane %v315_v56, 7  ;;  %v834_v18 = vpack.c.b16 %v827_v9, %v826_v8 }
  0x22   : > { %1028 = vmatpush.bf16.msra.mxu3 %v13938_v32  ;;  %286 = vst [vmem:[#allocation3 + $0x4] sm:$0xf] %v14469_v4  ;;  %v13923_v2 = vld [vmem:[%s18292_s1 + $0x80] sm:$0xff]  ;;  %vm312_vm9 = vsmask.f32 4368  ;;  %v326_v11 = vshll.u32 %v14651_v50, 16 }
  0x23   : > { %641 = vmatpush.bf16.msra.mxu0 %v13917_v36  ;;  %287 = vst [vmem:[#allocation3 + $0x8] sm:$0x1] %v14469_v4  ;;  %v13935_v3 = vld [vmem:[%s18292_s1 + $0xc0] sm:$0xff]  ;;  %v325_v13 = vrot.slane %v323_v61, 7  ;;  %v340_v14 = vshrl.u32 %v14690_v0, 16  ;;  %v334_v15 = vrot.slane %v332_v1, 7  ;;  %v580_v17 = vpack.c.b16 %v573_v6, %v572_v5  ;;  %vm14724_vm12 = vmor %vm311_vm7, %vm312_vm9 }
  0x24   : > { %742 = vmatpush.bf16.msra.mxu1 %v13909_v38  ;;  %288 = vst [vmem:[#allocation3 + $0xc] sm:$0xf] %v14469_v4  ;;  %v13903_v12 = vld [vmem:[#allocation2] sm:$0xff]  ;;  %vm396_vm10 = vsmask.f32 7938  ;;  %v335_v16 = vshll.u32 %v14671_v57, 16  ;;  %v320_v22 = vor.u32 %v318_v7, %v317_v10 }
  0x25   : > { %895 = vmatpush.bf16.msra.mxu2 %v13925_v39  ;;  %289 = vst [vmem:[#allocation3 + $0x10] sm:$0xf] %v14469_v4  ;;  %v398_v19 = vld [vmem:[#allocation2 + $0xc] sm:$0xf]  ;;  %v342_v20 = vrot.slane %v340_v14, 7  ;;  %v343_v21 = vshll.u32 %v14690_v0, 16  ;;  %v328_v26 = vor.u32 %v326_v11, %v325_v13  ;;  %vm14717_vm11 = vmand %vm395_vm6, %vm396_vm10 }
  0x26   : > { %1029 = vmatpush.bf16.msra.mxu3 %v13937_v40  ;;  %290 = vst [vmem:[#allocation3 + $0x14] sm:$0x1] %v14469_v4  ;;  %v307_v23 = vld [vmem:[%s14619_s28 + $0x10] sm:$0xf]  ;;  %v308_v24 = vld [vmem:[%s14619_s28 + $0x14] sm:$0xf]  ;;  %v337_v33 = vor.u32 %v335_v16, %v334_v15  ;;  %v399_v39 = vsel %vm14717_vm11, %v320_v22, %v398_v19 }
  0x27   : > { %642 = vmatpush.bf16.msra.mxu0 %v13916_v51  ;;  %291 = vst [vmem:[#allocation3 + $0x18] sm:$0xf] %v14469_v4  ;;  %v321_v25 = vrot.slane %v317_v10, 4  ;;  %v349_v28 = vshrl.u32 %v307_v23, 16  ;;  %v357_v29 = vshrl.u32 %v308_v24, 16  ;;  %v330_v31 = vrot.slane %v325_v13, 4 }
  0x28   : > { %743 = vmatpush.bf16.msra.mxu1 %v13908_v52  ;;  %292 = vst [vmem:[#allocation3 + $0x1c] sm:$0xf] %v14469_v4  ;;  %v404_v32 = vld [vmem:[#allocation2 + $0x14] sm:$0x1]  ;;  %v352_v36 = vshll.u32 %v307_v23, 16  ;;  %v360_v38 = vshll.u32 %v308_v24, 16  ;;  %v345_v41 = vor.u32 %v343_v21, %v342_v20 }
  0x29   : > { %896 = vmatpush.bf16.msra.mxu2 %v13924_v53  ;;  %293 = vst [vmem:[#allocation3 + $0x20] sm:$0x1] %v14469_v4  ;;  %v351_v35 = vrot.slane %v349_v28, 7  ;;  %v359_v37 = vrot.slane %v357_v29, 7  ;;  %v338_v40 = vrot.slane %v334_v15, 4  ;;  %v329_v43 = vsel %vm14724_vm12, %v321_v25, %v328_v26  ;;  %v13950_v59 = vld [vmem:[%s18292_s1 + $0x138] sm:$0xff] }
  0x2a   : > { %1030 = vmatpush.bf16.msra.mxu3 %v13936_v58  ;;  %294 = vst [vmem:[#allocation3 + $0x24] sm:$0xf] %v14469_v4  ;;  %v407_v42 = vld [vmem:[#allocation2 + $0x18] sm:$0xf]  ;;  %v347_v44 = vrot.slane %v342_v20, 4  ;;  %v405_v46 = vsel %vm14731_vm13, %v330_v31, %v404_v32  ;;  %s13859_s24 = sld [smem:[#allocation4 + $0x1]] }
  0x2b   : > { %643 = vmatpush.bf16.msra.mxu0 %v13915_v62  ;;  %295 = vst [vmem:[#allocation3 + $0x28] sm:$0xf] %v14469_v4  ;;  %v411_v47 = vld [vmem:[#allocation2 + $0x20] sm:$0x1]  ;;  %v354_v48 = vor.u32 %v352_v36, %v351_v35  ;;  %v408_v50 = vsel %vm14717_vm11, %v337_v33, %v407_v42  ;;  %v355_v51 = vrot.slane %v351_v35, 4  ;;  %v362_v52 = vor.u32 %v360_v38, %v359_v37  ;;  %v13970_v60 = vld [vmem:[%s18292_s1 + $0x1b8] sm:$0xff] }
  0x2c   : > { %744 = vmatpush.bf16.msra.mxu1 %v13907_v63  ;;  %296 = vst [vmem:[#allocation3 + $0x2c] sm:$0x1] %v14469_v4  ;;  %v414_v53 = vld [vmem:[#allocation2 + $0x24] sm:$0xf]  ;;  %v346_v54 = vsel %vm14724_vm12, %v338_v40, %v345_v41  ;;  %v364_v57 = vrot.slane %v359_v37, 4  ;;  %v13958_v25 = vld [vmem:[%s18292_s1 + $0x178] sm:$0xff] }
  0x2d   : > { %897 = vmatpush.bf16.msra.mxu2 %v13923_v2  ;;  %297 = vst [vmem:[#allocation3 + $0x30] sm:$0xf] %v14469_v4  ;;  %v415_v55 = vsel %vm14717_vm11, %v354_v48, %v414_v53  ;;  %v363_v56 = vsel %vm14724_vm12, %v355_v51, %v362_v52  ;;  %v418_v58 = vld [vmem:[#allocation2 + $0x2c] sm:$0x1]  ;;  %v13978_v33 = vld [vmem:[%s18292_s1 + $0x1f8] sm:$0xff]  ;;  %v13949_v35 = vld [vmem:[%s18292_s1 + $0x130] sm:$0xff] }
  0x2e   : > { %1031 = vmatpush.bf16.msra.mxu3 %v13935_v3  ;;  %644 = vmatmul.bf16.vlgmr.msra.gmra.mxu0 %v580_v17  ;;  %298 = vst [vmem:[#allocation3 + $0x34] sm:$0xf] %v14469_v4  ;;  %v419_v5 = vsel %vm14731_vm13, %v364_v57, %v418_v58  ;;  %v13969_v40 = vld [vmem:[%s18292_s1 + $0x1b0] sm:$0xff]  ;;  %v13968_v53 = vld [vmem:[%s18292_s1 + $0x1a8] sm:$0xff]  ;;  %vm10669_vm8 = vcmask 130048  }
  0x2f   : > { %745 = vmatmul.bf16.vlgmr.msra.gmra.mxu1 %v13903_v12  ;;  %299 = vst [vmem:[#allocation3 + $0x38] sm:$0x1] %v14469_v4  ;;  %1250 = vmatpush.bf16.msrb.mxu0 %v13950_v59  ;;  %v13957_v41 = vld [vmem:[%s18292_s1 + $0x170] sm:$0xff] }
  0x30   : > { %898 = vmatmul.bf16.vlgmr.msra.gmra.mxu2 %v834_v18  ;;  %300 = vst [vmem:[#allocation3 + $0x3c] sm:$0xf] %v14469_v4  ;;  %1412 = vmatpush.bf16.msrb.mxu1 %v13958_v25 }
  0x31   : > { %301 = vst [vmem:[#allocation3 + $0x40] sm:$0xf] %v14469_v4  ;;  %1547 = vmatpush.bf16.msrb.mxu2 %v13970_v60  ;;  %v13956_v60 = vld [vmem:[%s18292_s1 + $0x168] sm:$0xff] }
  0x32   : > { %302 = vst [vmem:[#allocation3 + $0x44] sm:$0x1] %v14469_v4  ;;  %v412_v4 = vsel %vm14731_vm13, %v347_v44, %v411_v47  ;;  %1773 = vmatpush.bf16.msrb.mxu3 %v13978_v33  ;;  %v13948_v47 = vld [vmem:[%s18292_s1 + $0x128] sm:$0xff] }
  0x33   : > { %400 = vst [vmem:[#allocation2 + $0xc] sm:$0xf] %v399_v39  ;;  %1251 = vmatpush.bf16.msrb.mxu0 %v13949_v35  ;;  %v13954_v35 = vld [vmem:[%s18292_s1 + $0x158] sm:$0xff] }
  0x34   : > { %401 = vst [vmem:[#allocation2 + $0x10] sm:$0xf] %v329_v43  ;;  %1413 = vmatpush.bf16.msrb.mxu1 %v13957_v41 }
  0x35   : > { %406 = vst [vmem:[#allocation2 + $0x14] sm:$0x1] %v405_v46  ;;  %v13977_v46 = vld [vmem:[%s18292_s1 + $0x1f0] sm:$0xff]  ;;  %1548 = vmatpush.bf16.msrb.mxu2 %v13969_v40 }
  0x36   : > { %409 = vst [vmem:[#allocation2 + $0x18] sm:$0xf] %v408_v50  ;;  %1774 = vmatpush.bf16.msrb.mxu3 %v13977_v46  ;;  %v13965_v40 = vld [vmem:[%s18292_s1 + $0x190] sm:$0xff] }
  0x37   : > { %410 = vst [vmem:[#allocation2 + $0x1c] sm:$0xf] %v346_v54  ;;  %1252 = vmatpush.bf16.msrb.mxu0 %v13948_v47  ;;  %v421_v46 = vld [vmem:[#allocation2 + $0x30] sm:$0xf] }
  0x38   : > { %413 = vst [vmem:[#allocation2 + $0x20] sm:$0x1] %v412_v4  ;;  %1414 = vmatpush.bf16.msrb.mxu1 %v13956_v60  ;;  %v13964_v60 = vld [vmem:[%s18292_s1 + $0x188] sm:$0xff] }
  0x39   : > { %416 = vst [vmem:[#allocation2 + $0x24] sm:$0xf] %v415_v55  ;;  %1549 = vmatpush.bf16.msrb.mxu2 %v13968_v53 }
  0x3a   : > { %v430_v61 = vld [vmem:[#allocation2 + $0xc] sm:$0xf]  ;;  %417 = vst [vmem:[#allocation2 + $0x28] sm:$0xf] %v363_v56 }
  0x3b   : > { %v767_v62 = vld [vmem:[#allocation2 + $0xc] sm:$0xe]  ;;  %v431_v0 = vld [vmem:[#allocation2 + $0x10] sm:$0xf]  ;;  %v484_v1 = vshrl.u32 %v430_v61, 16  ;;  %v487_v2 = vshll.u32 %v430_v61, 16 }
  0x3c   : > { %v13931_v63 = vld [vmem:[#allocation2 + $0xc] sm:$0xff]  ;;  %v453_v6 = vld [vmem:[#allocation2 + $0x14] sm:$0x1]  ;;  %v493_v7 = vshll.u32 %v431_v0, 16  ;;  %v497_v8 = vshrl.u32 %v431_v0, 16  ;;  %v11015_v9 = vrot.slane %v767_v62, 9 }
  0x3d   : > { %v13904_v3 = vld [vmem:[#allocation2 + $0xc] sm:$0xff]  ;;  %v790_v10 = vrot.slane %v431_v0, 5  ;;  %1032 = vmatmul.bf16.vlgmr.msra.gmra.mxu3 %v13931_v63  ;;  %v486_v11 = vrot.slane %v484_v1, 4  ;;  %v489_v12 = vrot.slane %v487_v2, 5  ;;  %v503_v13 = vshll.u32 %v453_v6, 16  ;;  %v13947_v0 = vld [vmem:[%s18292_s1 + $0x120] sm:$0xff] }
  0x3e   : > { %v793_v14 = vrot.slane %v453_v6, 5  ;;  %v432_v15 = vld [vmem:[#allocation2 + $0x18] sm:$0xf]  ;;  %v495_v16 = vrot.slane %v493_v7, 5  ;;  %v499_v17 = vrot.slane %v497_v8, 4  ;;  %v13976_v63 = vld [vmem:[%s18292_s1 + $0x1e8] sm:$0xff]  ;;  %1253 = vmatpush.bf16.msrb.mxu0 %v13947_v0 }
  0x3f   : > { %750 = vmatmul.bf16.gmra.mxu1 %v13904_v3  ;;  %v791_v18 = vsel %vm14646_vm5, %v11015_v9, %v790_v10  ;;  %v792_v19 = vrot.slane %v790_v10, 4  ;;  %v14764_v20 = vld [vmem:[#allocation2 + $0x1c] sm:$0xf]  ;;  %v490_v21 = vor.u32 %v489_v12, %v486_v11  ;;  %v505_v22 = vrot.slane %v503_v13, 5  ;;  %v454_v29 = vld [vmem:[#allocation2 + $0x20] sm:$0x1]  ;;  %1775 = vmatpush.bf16.msrb.mxu3 %v13976_v63 }
  0x40   : > { %v828_v23 = vunpack.c.l.b16 %v791_v18  ;;  %v508_v24 = vshrl.u32 %v432_v15, 16  ;;  %v500_v26 = vor.u32 %v499_v17, %v495_v16  ;;  %v511_v31 = vshll.u32 %v432_v15, 16  ;;  %v768_v52 = vld [vmem:[#allocation2 + $0x18] sm:$0xe]  ;;  %420 = vst [vmem:[#allocation2 + $0x2c] sm:$0x1] %v419_v5 }
  0x41   : > { %v794_v28 = vsel %vm14646_vm5, %v792_v19, %v793_v14  ;;  %v517_v32 = vshll.u32 %v14764_v20, 16  ;;  %v491_v36 = vrot.slane %v490_v21, 4  ;;  %v521_v39 = vshrl.u32 %v14764_v20, 16  ;;  %v13967_v3 = vld [vmem:[%s18292_s1 + $0x1a0] sm:$0xff]  ;;  %v309_v7 = vld [vmem:[%s14619_s28 + $0x18] sm:$0xf] }
  0x42   : > { %v829_v37 = vunpack.c.l.b16 %v794_v28  ;;  %v510_v38 = vrot.slane %v508_v24, 4  ;;  %v501_v42 = vrot.slane %v500_v26, 4  ;;  %v513_v43 = vrot.slane %v511_v31, 5  ;;  %v434_v5 = vld [vmem:[#allocation2 + $0x24] sm:$0xf]  ;;  %v13932_v8 = vld [vmem:[#allocation2 + $0x18] sm:$0xff]  ;;  %1550 = vmatpush.bf16.msrb.mxu2 %v13967_v3 }
  0x43   : > { %v14785_v44 = vrot.slane %v517_v32, 5  ;;  %v496_v48 = vsel %vm14634_vm4, %v491_v36, %v495_v16  ;;  %v523_v51 = vrot.slane %v521_v39, 4  ;;  %v527_v58 = vshll.u32 %v454_v29, 16  ;;  %v13905_v11 = vld [vmem:[#allocation2 + $0x18] sm:$0xff]  ;;  %v14815_v12 = vld [vmem:[#allocation2 + $0x28] sm:$0xf] }
  0x44   : > { %v835_v50 = vpack.c.b16 %v829_v37, %v828_v23  ;;  %v506_v54 = vsel %vm14634_vm4, %v501_v42, %v505_v22  ;;  %v574_v4 = vunpack.c.l.b16 %v496_v48  ;;  %v514_v55 = vor.u32 %v513_v43, %v510_v38  ;;  %v13955_v15 = vld [vmem:[%s18292_s1 + $0x160] sm:$0xff]  ;;  %v13946_v19 = vld [vmem:[%s18292_s1 + $0x118] sm:$0xff]  ;;  %v13945_v39 = vld [vmem:[%s18292_s1 + $0x110] sm:$0xff] }
  0x45   : > { %v575_v56 = vunpack.c.l.b16 %v506_v54  ;;  %v524_v57 = vor.u32 %v523_v51, %v14785_v44  ;;  %v797_v59 = vrot.slane %v14764_v20, 5  ;;  %v11016_v61 = vrot.slane %v768_v52, 9  ;;  %v13975_v16 = vld [vmem:[%s18292_s1 + $0x1e0] sm:$0xff]  ;;  %v13966_v20 = vld [vmem:[%s18292_s1 + $0x198] sm:$0xff]  ;;  %1415 = vmatpush.bf16.msrb.mxu1 %v13955_v15  ;;  %1254 = vmatpush.bf16.msrb.mxu0 %v13946_v19 }
  0x46   : > { %903 = vmatmul.bf16.gmra.mxu2 %v835_v50  ;;  %v800_v62 = vrot.slane %v454_v29, 5  ;;  %v515_v6 = vrot.slane %v514_v55, 4  ;;  %v529_v10 = vrot.slane %v527_v58, 5  ;;  %v532_v17 = vshrl.u32 %v434_v5, 16  ;;  %v310_v29 = vld [vmem:[%s14619_s28 + $0x1c] sm:$0xf]  ;;  %1776 = vmatpush.bf16.msrb.mxu3 %v13975_v16 }
  0x47   : > { %v581_v1 = vpack.c.b16 %v575_v56, %v574_v4  ;;  %v799_v2 = vrot.slane %v797_v59, 4  ;;  %v525_v9 = vrot.slane %v524_v57, 4  ;;  %v798_v13 = vsel %vm14646_vm5, %v11016_v61, %v797_v59  ;;  %v13974_v36 = vld [vmem:[%s18292_s1 + $0x1d8] sm:$0xff]  ;;  %1551 = vmatpush.bf16.msrb.mxu2 %v13966_v20  ;;  %v769_v50 = vld [vmem:[#allocation2 + $0x24] sm:$0xe]  ;;  %v13953_v56 = vld [vmem:[%s18292_s1 + $0x150] sm:$0xff] }
  0x48   : > { %v535_v18 = vshll.u32 %v434_v5, 16  ;;  %v366_v21 = vshrl.u32 %v309_v7, 16  ;;  %v520_v22 = vsel %vm14634_vm4, %v515_v6, %v14785_v44  ;;  %v541_v23 = vshll.u32 %v14815_v12, 16  ;;  %v455_v53 = vld [vmem:[#allocation2 + $0x2c] sm:$0x1]  ;;  %v13973_v57 = vld [vmem:[%s18292_s1 + $0x1d0] sm:$0xff] }
  0x49   : > { %649 = vmatmul.bf16.gmra.mxu0 %v581_v1  ;;  %v801_v14 = vsel %vm14646_vm5, %v799_v2, %v800_v62  ;;  %v530_v24 = vsel %vm14634_vm4, %v525_v9, %v529_v10  ;;  %v830_v25 = vunpack.c.l.b16 %v798_v13  ;;  %v545_v28 = vshrl.u32 %v14815_v12, 16  ;;  %1416 = vmatpush.bf16.msrb.mxu1 %v13954_v35  ;;  %v13944_v59 = vld [vmem:[%s18292_s1 + $0x108] sm:$0xff]  ;;  %v13943_v9 = vld [vmem:[%s18292_s1 + $0x100] sm:$0xff]  ;;  %v1062_v13 = vld [vmem:[#allocation2 + $0x10] sm:$0xf] }
  0x4a   : > { %v831_v26 = vunpack.c.l.b16 %v801_v14  ;;  %v534_v31 = vrot.slane %v532_v17, 4  ;;  %v537_v32 = vrot.slane %v535_v18, 5  ;;  %v368_v33 = vrot.slane %v366_v21, 7  ;;  %1777 = vmatpush.bf16.msrb.mxu3 %v13974_v36  ;;  %1255 = vmatpush.bf16.msrb.mxu0 %v13945_v39  ;;  %v13963_v10 = vld [vmem:[%s18292_s1 + $0x180] sm:$0xff] }
  0x4b   : > { %v576_v37 = vunpack.c.l.b16 %v520_v22  ;;  %v369_v38 = vshll.u32 %v309_v7, 16  ;;  %v577_v41 = vunpack.c.l.b16 %v530_v24  ;;  %v14853_v42 = vrot.slane %v541_v23, 5  ;;  %1552 = vmatpush.bf16.msrb.mxu2 %v13965_v40  ;;  %v13952_v7 = vld [vmem:[%s18292_s1 + $0x148] sm:$0xff]  ;;  %v13951_v21 = vld [vmem:[%s18292_s1 + $0x140] sm:$0xff]  ;;  %v14903_v40 = vld [vmem:[#allocation2 + $0x1c] sm:$0xf] }
  0x4c   : > { %v804_v43 = vrot.slane %v14815_v12, 5  ;;  %v374_v44 = vshrl.u32 %v310_v29, 16  ;;  %v836_v47 = vpack.c.b16 %v831_v26, %v830_v25  ;;  %v547_v48 = vrot.slane %v545_v28, 4  ;;  %v1061_v12 = vld [vmem:[#allocation2 + $0xc] sm:$0xf]  ;;  %v13933_v14 = vld [vmem:[#allocation2 + $0x24] sm:$0xff] }
  0x4d   : > { %1037 = vmatmul.bf16.gmra.mxu3 %v13932_v8  ;;  %v371_v51 = vor.u32 %v369_v38, %v368_v33  ;;  %v377_v52 = vshll.u32 %v310_v29, 16  ;;  %v538_v54 = vor.u32 %v537_v32, %v534_v31  ;;  %v372_v4 = vrot.slane %v368_v33, 4  ;;  %1417 = vmatpush.bf16.msrb.mxu1 %v13953_v56  ;;  %v13972_v8 = vld [vmem:[%s18292_s1 + $0x1c8] sm:$0xff]  ;;  %v13971_v22 = vld [vmem:[%s18292_s1 + $0x1c0] sm:$0xff]  ;;  %v1063_v32 = vld [vmem:[#allocation2 + $0x14] sm:$0x1] }
  0x4e   : > { %v14856_v55 = vrot.slane %v374_v44, 7  ;;  %v582_v61 = vpack.c.b16 %v577_v41, %v576_v37  ;;  %v11017_v62 = vrot.slane %v769_v50, 9  ;;  %v548_v0 = vor.u32 %v547_v48, %v14853_v42  ;;  %1778 = vmatpush.bf16.msrb.mxu3 %v13973_v57  ;;  %1256 = vmatpush.bf16.msrb.mxu0 %v13944_v59  ;;  %v13906_v17 = vld [vmem:[#allocation2 + $0x24] sm:$0xff]  ;;  %v1287_v23 = vld [vmem:[#allocation2 + $0xc] sm:$0xe] }
  0x4f   : > { %755 = vmatmul.bf16.gmra.mxu1 %v13905_v11  ;;  %v422_v58 = vsel %vm14717_vm11, %v371_v51, %v421_v46  ;;  %v551_v1 = vshll.u32 %v455_v53, 16  ;;  %v806_v2 = vrot.slane %v804_v43, 4  ;;  %v807_v3 = vrot.slane %v455_v53, 5  ;;  %1553 = vmatpush.bf16.msrb.mxu2 %v13964_v60  ;;  %v1584_v38 = vld [vmem:[#allocation2 + $0x18] sm:$0xf] }
  0x50   : > { %v379_v63 = vor.u32 %v377_v52, %v14856_v55  ;;  %423 = vst [vmem:[#allocation2 + $0x30] sm:$0xf] %v422_v58  ;;  %v539_v5 = vrot.slane %v538_v54, 4  ;;  %v805_v11 = vsel %vm14646_vm5, %v11017_v62, %v804_v43  ;;  %v549_v15 = vrot.slane %v548_v0, 4 }
  0x51   : > { %v553_v16 = vrot.slane %v551_v1, 5  ;;  %v808_v18 = vsel %vm14646_vm5, %v806_v2, %v807_v3  ;;  %v1305_v19 = vrot.slane %v1062_v13, 5  ;;  %1418 = vmatpush.bf16.msrb.mxu1 %v13952_v7  ;;  %v1074_v24 = vshrl.u32 %v1061_v12, 16  ;;  %v1064_v2 = vld [vmem:[#allocation2 + $0x18] sm:$0xf] }
  0x52   : > { %v380_v6 = vsel %vm14724_vm12, %v372_v4, %v379_v63  ;;  %v544_v20 = vsel %vm14634_vm4, %v539_v5, %v14853_v42  ;;  %1779 = vmatpush.bf16.msrb.mxu3 %v13972_v8  ;;  %1257 = vmatpush.bf16.msrb.mxu0 %v13943_v9  ;;  %v1077_v25 = vshll.u32 %v1061_v12, 16  ;;  %v1083_v26 = vshll.u32 %v1062_v13, 16  ;;  %v14911_v63 = vld [vmem:[#allocation2 + $0x20] sm:$0x1]  ;;  %v1065_v3 = vld [vmem:[#allocation2 + $0x1c] sm:$0xf] }
  0x53   : > { %424 = vst [vmem:[#allocation2 + $0x34] sm:$0xf] %v380_v6  ;;  %1554 = vmatpush.bf16.msrb.mxu2 %v13963_v10  ;;  %v1087_v28 = vshrl.u32 %v1062_v13, 16  ;;  %v832_v29 = vunpack.c.l.b16 %v805_v11  ;;  %v833_v31 = vunpack.c.l.b16 %v808_v18  ;;  %v554_v33 = vsel %vm14634_vm4, %v549_v15, %v553_v16 }
  0x54   : > { %v11178_v35 = vrot.slane %v1287_v23, 9  ;;  %v1307_v36 = vrot.slane %v1305_v19, 4  ;;  %v1308_v37 = vrot.slane %v1063_v32, 5  ;;  %v578_v39 = vunpack.c.l.b16 %v544_v20  ;;  %v1288_v20 = vld [vmem:[#allocation2 + $0x18] sm:$0xe] }
  0x55   : > { %1419 = vmatpush.bf16.msrb.mxu1 %v13951_v21  ;;  %v1076_v41 = vrot.slane %v1074_v24, 4  ;;  %v1079_v42 = vrot.slane %v1077_v25, 5  ;;  %v1085_v43 = vrot.slane %v1083_v26, 5  ;;  %v1089_v44 = vrot.slane %v1087_v28, 4  ;;  %v1066_v25 = vld [vmem:[#allocation2 + $0x20] sm:$0x1] }
  0x56   : > { %908 = vmatmul.bf16.gmra.mxu2 %v836_v47  ;;  %1780 = vmatpush.bf16.msrb.mxu3 %v13971_v22  ;;  %v579_v46 = vunpack.c.l.b16 %v554_v33  ;;  %v837_v47 = vpack.c.b16 %v833_v31, %v832_v29  ;;  %v1597_v48 = vshrl.u32 %v1584_v38, 16  ;;  %v1600_v50 = vshll.u32 %v1584_v38, 16  ;;  %v14921_v38 = vld [vmem:[#allocation2 + $0x28] sm:$0xf] }
  0x57   : > { %v1306_v51 = vsel %vm14646_vm5, %v11178_v35, %v1305_v19  ;;  %v1309_v52 = vsel %vm14646_vm5, %v1307_v36, %v1308_v37  ;;  %v1606_v53 = vshll.u32 %v14903_v40, 16  ;;  %v1610_v54 = vshrl.u32 %v14903_v40, 16  ;;  %v425_v19 = vld [vmem:[#allocation2 + $0x38] sm:$0x1] }
  0x58   : > { %v1080_v4 = vor.u32 %v1079_v42, %v1076_v41  ;;  %v1090_v56 = vor.u32 %v1089_v44, %v1085_v43  ;;  %v1093_v57 = vshll.u32 %v1063_v32, 16  ;;  %v1348_v58 = vunpack.c.l.b16 %v1306_v51  ;;  %v1587_v32 = vld [vmem:[#allocation2 + $0x24] sm:$0xf] }
  0x59   : > { %654 = vmatmul.bf16.gmra.mxu0 %v582_v61  ;;  %v1349_v59 = vunpack.c.l.b16 %v1309_v52  ;;  %v1599_v60 = vrot.slane %v1597_v48, 4  ;;  %v1602_v61 = vrot.slane %v1600_v50, 5  ;;  %v583_v62 = vpack.c.b16 %v579_v46, %v578_v39  ;;  %v13959_v46 = vld [vmem:[#allocation2 + $0x18] sm:$0xff] }
  0x5a   : > { %v1608_v0 = vrot.slane %v1606_v53, 5  ;;  %v1612_v1 = vrot.slane %v1610_v54, 4  ;;  %v381_v5 = vrot.slane %v14856_v55, 4  ;;  %v1081_v6 = vrot.slane %v1080_v4, 4  ;;  %v13934_v12 = vld [vmem:[#allocation2 + $0x30] sm:$0xff] }
  0x5b   : > { %v1095_v7 = vrot.slane %v1093_v57, 5  ;;  %v1091_v8 = vrot.slane %v1090_v56, 4  ;;  %v1356_v9 = vpack.c.b16 %v1349_v59, %v1348_v58  ;;  %v1603_v10 = vor.u32 %v1602_v61, %v1599_v60 }
  0x5c   : > { %v1616_v11 = vshll.u32 %v14911_v63, 16  ;;  %v1613_v13 = vor.u32 %v1612_v1, %v1608_v0  ;;  %v1101_v15 = vshll.u32 %v1064_v2, 16  ;;  %v1107_v16 = vshll.u32 %v1065_v3, 16 }
  0x5d   : > { %1042 = vmatmul.bf16.gmra.mxu3 %v13933_v14  ;;  %v1098_v14 = vshrl.u32 %v1064_v2, 16  ;;  %v1312_v18 = vrot.slane %v1065_v3, 5  ;;  %v426_v55 = vsel %vm14731_vm13, %v381_v5, %v425_v19  ;;  %v1086_v21 = vsel %vm14634_vm4, %v1081_v6, %v1085_v43  ;;  %v14935_v6 = vld [vmem:[#allocation2 + $0x2c] sm:$0x1] }
  0x5e   : > { %v1096_v22 = vsel %vm14634_vm4, %v1091_v8, %v1095_v7  ;;  %v1604_v23 = vrot.slane %v1603_v10, 4  ;;  %v1618_v24 = vrot.slane %v1616_v11, 5  ;;  %427 = vst [vmem:[#allocation2 + $0x38] sm:$0x1] %v426_v55  ;;  %v1614_v26 = vrot.slane %v1613_v13, 4  ;;  %v13986_v13 = vld [vmem:[%s18292_s1 + $0x238] sm:$0xff] }
  0x5f   : > { %760 = vmatmul.bf16.gmra.mxu1 %v13906_v17  ;;  %v1111_v17 = vshrl.u32 %v1065_v3, 16  ;;  %v1100_v28 = vrot.slane %v1098_v14, 4  ;;  %v1103_v29 = vrot.slane %v1101_v15, 5  ;;  %v1109_v31 = vrot.slane %v1107_v16, 5  ;;  %v1067_v8 = vld [vmem:[#allocation2 + $0x24] sm:$0xf]  ;;  %1935 = vmatpush.bf16.msra.mxu0 %v13986_v13 }
  0x60   : > { %v11179_v35 = vrot.slane %v1288_v20, 9  ;;  %v1314_v36 = vrot.slane %v1312_v18, 4  ;;  %v1315_v37 = vrot.slane %v1066_v25, 5  ;;  %v1186_v39 = vunpack.c.l.b16 %v1086_v21  ;;  %v1289_v21 = vld [vmem:[#allocation2 + $0x24] sm:$0xe] }
  0x61   : > { %v1113_v33 = vrot.slane %v1111_v17, 4  ;;  %v1187_v41 = vunpack.c.l.b16 %v1096_v22  ;;  %v1117_v42 = vshll.u32 %v1066_v25, 16  ;;  %v1621_v43 = vshrl.u32 %v1587_v32, 16 }
  0x62   : > { %v1624_v44 = vshll.u32 %v1587_v32, 16  ;;  %v1619_v48 = vsel %vm14634_vm4, %v1614_v26, %v1618_v24  ;;  %v1630_v50 = vshll.u32 %v14921_v38, 16  ;;  %v1634_v51 = vshrl.u32 %v14921_v38, 16 }
  0x63   : > { %v1104_v52 = vor.u32 %v1103_v29, %v1100_v28  ;;  %v1114_v53 = vor.u32 %v1113_v33, %v1109_v31  ;;  %v1313_v54 = vsel %vm14646_vm5, %v11179_v35, %v1312_v18  ;;  %v1316_v4 = vsel %vm14646_vm5, %v1314_v36, %v1315_v37  ;;  %v1590_v28 = vld [vmem:[#allocation2 + $0x30] sm:$0xf]  ;;  %v14946_v29 = vld [vmem:[#allocation2 + $0x34] sm:$0xf] }
  0x64   : > { %v1194_v56 = vpack.c.b16 %v1187_v41, %v1186_v39  ;;  %v1710_v58 = vunpack.c.l.b16 %v1619_v48  ;;  %v1623_v59 = vrot.slane %v1621_v43, 4  ;;  %v1626_v60 = vrot.slane %v1624_v44, 5  ;;  %v13984_v43 = vld [vmem:[%s18292_s1 + $0x228] sm:$0xff] }
  0x65   : > { %v1350_v61 = vunpack.c.l.b16 %v1313_v54  ;;  %v1636_v1 = vrot.slane %v1634_v51, 4  ;;  %v1105_v2 = vrot.slane %v1104_v52, 4  ;;  %v1115_v3 = vrot.slane %v1114_v53, 4 }
  0x66   : > { %913 = vmatmul.bf16.gmra.mxu2 %v837_v47  ;;  %v1609_v47 = vsel %vm14634_vm4, %v1604_v23, %v1608_v0  ;;  %v14933_v0 = vrot.slane %v1630_v50, 5  ;;  %v1119_v5 = vrot.slane %v1117_v42, 5  ;;  %v1627_v7 = vor.u32 %v1626_v60, %v1623_v59  ;;  %v1069_v23 = vld [vmem:[#allocation2 + $0x2c] sm:$0x1]  ;;  %v13960_v50 = vld [vmem:[#allocation2 + $0x24] sm:$0xff] }
  0x67   : > { %v1709_v57 = vunpack.c.l.b16 %v1609_v47  ;;  %v1110_v14 = vsel %vm14634_vm4, %v1105_v2, %v1109_v31  ;;  %v1640_v16 = vshll.u32 %v14935_v6, 16  ;;  %v1122_v18 = vshrl.u32 %v1067_v8, 16  ;;  %v13985_v31 = vld [vmem:[%s18292_s1 + $0x230] sm:$0xff]  ;;  %v13983_v59 = vld [vmem:[%s18292_s1 + $0x220] sm:$0xff] }
  0x68   : > { %v1120_v15 = vsel %vm14634_vm4, %v1115_v3, %v1119_v5  ;;  %v1125_v19 = vshll.u32 %v1067_v8, 16  ;;  %v1628_v22 = vrot.slane %v1627_v7, 4  ;;  %v1188_v24 = vunpack.c.l.b16 %v1110_v14  ;;  %1936 = vmatpush.bf16.msra.mxu0 %v13985_v31  ;;  %v14971_v7 = vld [vmem:[#allocation2 + $0x38] sm:$0x1] }
  0x69   : > { %659 = vmatmul.bf16.gmra.mxu0 %v583_v62  ;;  %v1351_v62 = vunpack.c.l.b16 %v1316_v4  ;;  %v1717_v10 = vpack.c.b16 %v1710_v58, %v1709_v57  ;;  %v1189_v25 = vunpack.c.l.b16 %v1120_v15  ;;  %v1642_v32 = vrot.slane %v1640_v16, 5  ;;  %v1071_v16 = vld [vmem:[#allocation2 + $0x34] sm:$0xf] }
  0x6a   : > { %v11180_v33 = vrot.slane %v1289_v21, 9  ;;  %v1322_v36 = vrot.slane %v1069_v23, 5  ;;  %v1124_v37 = vrot.slane %v1122_v18, 4  ;;  %v1127_v39 = vrot.slane %v1125_v19, 5  ;;  %v1070_v18 = vld [vmem:[#allocation2 + $0x30] sm:$0xf] }
  0x6b   : > { %v1357_v11 = vpack.c.b16 %v1351_v62, %v1350_v61  ;;  %v1645_v44 = vshrl.u32 %v1590_v28, 16  ;;  %v1654_v47 = vshll.u32 %v14946_v29, 16  ;;  %v1658_v48 = vshrl.u32 %v14946_v29, 16 }
  0x6c   : > { %v1633_v51 = vsel %vm14634_vm4, %v1628_v22, %v14933_v0  ;;  %v1195_v4 = vpack.c.b16 %v1189_v25, %v1188_v24  ;;  %v1141_v58 = vshll.u32 %v1069_v23, 16  ;;  %1937 = vmatpush.bf16.msra.mxu0 %v13984_v43  ;;  %v1664_v13 = vshll.u32 %v14971_v7, 16  ;;  %v1072_v25 = vld [vmem:[#allocation2 + $0x38] sm:$0x1] }
  0x6d   : > { %1047 = vmatmul.bf16.gmra.mxu3 %v13934_v12  ;;  %v1637_v12 = vor.u32 %v1636_v1, %v14933_v0  ;;  %v1647_v60 = vrot.slane %v1645_v44, 4  ;;  %v1656_v62 = vrot.slane %v1654_v47, 5  ;;  %v1660_v0 = vrot.slane %v1658_v48, 4  ;;  %v13980_v44 = vld [vmem:[%s18292_s1 + $0x208] sm:$0xff] }
  0x6e   : > { %v1711_v1 = vunpack.c.l.b16 %v1633_v51  ;;  %v1326_v19 = vrot.slane %v1071_v16, 5  ;;  %v1666_v24 = vrot.slane %v1664_v13, 5  ;;  %v1155_v31 = vshll.u32 %v1071_v16, 16  ;;  %v13961_v51 = vld [vmem:[#allocation2 + $0x30] sm:$0xff]  ;;  %v15003_v13 = vld [vmem:[#allocation2 + $0x44] sm:$0x1] }
  0x6f   : > { %1420 = vmatmul.bf16.vlgmr.msrb.gmra.mxu1 %v1356_v9  ;;  %v1068_v9 = vld [vmem:[#allocation2 + $0x28] sm:$0xf]  ;;  %v1638_v26 = vrot.slane %v1637_v12, 4  ;;  %v1661_v12 = vor.u32 %v1660_v0, %v1656_v62 }
  0x70   : > { %v1319_v17 = vrot.slane %v1068_v9, 5  ;;  %v1131_v20 = vshll.u32 %v1068_v9, 16  ;;  %v1135_v55 = vshrl.u32 %v1068_v9, 16  ;;  %v1143_v9 = vrot.slane %v1141_v58, 5  ;;  %1938 = vmatpush.bf16.msra.mxu0 %v13983_v59 }
  0x71   : > { %v1643_v52 = vsel %vm14634_vm4, %v1638_v26, %v1642_v32  ;;  %v1662_v23 = vrot.slane %v1661_v12, 4  ;;  %v1146_v26 = vshrl.u32 %v1070_v18, 16  ;;  %v1593_v32 = vld [vmem:[#allocation2 + $0x3c] sm:$0xf] }
  0x72   : > { %v1321_v35 = vrot.slane %v1319_v17, 4  ;;  %v14951_v41 = vrot.slane %v1131_v20, 5  ;;  %v1137_v42 = vrot.slane %v1135_v55, 4  ;;  %v1320_v53 = vsel %vm14646_vm5, %v11180_v33, %v1319_v17  ;;  %v13982_v17 = vld [vmem:[%s18292_s1 + $0x218] sm:$0xff]  ;;  %v1290_v55 = vld [vmem:[#allocation2 + $0x30] sm:$0xe] }
  0x73   : > { %v1712_v2 = vunpack.c.l.b16 %v1643_v52  ;;  %v1352_v3 = vunpack.c.l.b16 %v1320_v53  ;;  %v13981_v33 = vld [vmem:[%s18292_s1 + $0x210] sm:$0xff]  ;;  %v1667_v47 = vsel %vm14634_vm4, %v1662_v23, %v1666_v24  ;;  %v1669_v48 = vshrl.u32 %v1593_v32, 16 }
  0x74   : > { %v1323_v54 = vsel %vm14646_vm5, %v1321_v35, %v1322_v36  ;;  %v1138_v57 = vor.u32 %v1137_v42, %v14951_v41  ;;  %1939 = vmatpush.bf16.msra.mxu0 %v13982_v17  ;;  %v1159_v35 = vshrl.u32 %v1071_v16, 16  ;;  %v11181_v36 = vrot.slane %v1290_v55, 9 }
  0x75   : > { %v1353_v5 = vunpack.c.l.b16 %v1323_v54  ;;  %v1718_v14 = vpack.c.b16 %v1712_v2, %v1711_v1  ;;  %v1148_v52 = vrot.slane %v1146_v26, 4  ;;  %v1157_v54 = vrot.slane %v1155_v31, 5  ;;  %v13962_v31 = vld [vmem:[#allocation2 + $0x3c] sm:$0xff] }
  0x76   : > { %1555 = vmatmul.bf16.vlgmr.msrb.gmra.mxu2 %v13959_v46  ;;  %v1648_v46 = vshll.u32 %v1590_v28, 16  ;;  %v1149_v28 = vshll.u32 %v1070_v18, 16  ;;  %v1714_v0 = vunpack.c.l.b16 %v1667_v47  ;;  %v1165_v1 = vshll.u32 %v1072_v25, 16 }
  0x77   : > { %v1358_v15 = vpack.c.b16 %v1353_v5, %v1352_v3  ;;  %v1688_v55 = vshll.u32 %v15003_v13, 16  ;;  %v1831_v47 = vrot.slane %v14911_v63, 5  ;;  %v1838_v63 = vrot.slane %v14935_v6, 5 }
  0x78   : > { %v1650_v61 = vrot.slane %v1648_v46, 5  ;;  %1940 = vmatpush.bf16.msra.mxu0 %v13981_v33  ;;  %v1151_v53 = vrot.slane %v1149_v28, 5  ;;  %v1167_v16 = vrot.slane %v1165_v1, 5  ;;  %v1845_v6 = vrot.slane %v14971_v7, 5 }
  0x79   : > { %1258 = vmatmul.bf16.vlgmr.msrb.gmra.mxu0 %v1194_v56  ;;  %v1128_v56 = vor.u32 %v1127_v39, %v1124_v37  ;;  %v1328_v37 = vrot.slane %v1326_v19, 4  ;;  %v1329_v39 = vrot.slane %v1072_v25, 5  ;;  %v1690_v25 = vrot.slane %v1688_v55, 5 }
  0x7a   : > { %v1152_v2 = vor.u32 %v1151_v53, %v1148_v52 }
  0x7b   : > { %v1129_v8 = vrot.slane %v1128_v56, 4  ;;  %v1161_v56 = vrot.slane %v1159_v35, 4  ;;  %v1330_v58 = vsel %vm14646_vm5, %v1328_v37, %v1329_v39  ;;  %v1828_v39 = vrot.slane %v14903_v40, 5 }
  0x7c   : > { %1941 = vmatpush.bf16.msra.mxu0 %v13980_v44  ;;  %v1355_v5 = vunpack.c.l.b16 %v1330_v58  ;;  %v1835_v40 = vrot.slane %v14921_v38, 5  ;;  %v1842_v38 = vrot.slane %v14946_v29, 5 }
  0x7d   : > { %1781 = vmatmul.bf16.vlgmr.msrb.gmra.mxu3 %v1717_v10  ;;  %v1139_v10 = vrot.slane %v1138_v57, 4  ;;  %v1134_v20 = vsel %vm14634_vm4, %v1129_v8, %v14951_v41  ;;  %v14985_v41 = vld [vmem:[#allocation2 + $0x40] sm:$0xf]  ;;  %v1327_v57 = vsel %vm14646_vm5, %v11181_v36, %v1326_v19  ;;  %v1671_v8 = vrot.slane %v1669_v48, 4 }
  0x7e   : > { %v1190_v42 = vunpack.c.l.b16 %v1134_v20  ;;  %v1682_v59 = vshrl.u32 %v14985_v41, 16  ;;  %v1354_v3 = vunpack.c.l.b16 %v1327_v57  ;;  %v1837_v57 = vrot.slane %v1835_v40, 4 }
  0x7f   : > { %1425 = vmatmul.bf16.gmra.mxu1 %v1357_v11  ;;  %v1651_v11 = vor.u32 %v1650_v61, %v1647_v60  ;;  %v1144_v21 = vsel %vm14634_vm4, %v1139_v10, %v1143_v9  ;;  %v13979_v60 = vld [vmem:[%s18292_s1 + $0x200] sm:$0xff]  ;;  %v1162_v9 = vor.u32 %v1161_v56, %v1157_v54  ;;  %v1849_v7 = vrot.slane %v14985_v41, 5 }
  0x80   : > { %v1191_v43 = vunpack.c.l.b16 %v1144_v21  ;;  %v1684_v12 = vrot.slane %v1682_v59, 4  ;;  %1942 = vmatpush.bf16.msra.mxu0 %v13979_v60  ;;  %v1359_v17 = vpack.c.b16 %v1355_v5, %v1354_v3  ;;  %v1839_v60 = vsel %vm14646_vm5, %v1837_v57, %v1838_v63 }
  0x81   : > { %v1652_v22 = vrot.slane %v1651_v11, 4  ;;  %v1163_v18 = vrot.slane %v1162_v9, 4  ;;  %v1844_v5 = vrot.slane %v1842_v38, 4 }
  0x82   : > { %v1196_v61 = vpack.c.b16 %v1191_v43, %v1190_v42  ;;  %v1810_v42 = vld [vmem:[#allocation2 + $0x18] sm:$0xe] }
  0x83   : > { %v1657_v46 = vsel %vm14634_vm4, %v1652_v22, %v1656_v62  ;;  %v1168_v22 = vsel %vm14634_vm4, %v1163_v18, %v1167_v16  ;;  %v11342_v44 = vrot.slane %v1810_v42, 9 }
  0x84   : > { %v1713_v62 = vunpack.c.l.b16 %v1657_v46  ;;  %v1193_v28 = vunpack.c.l.b16 %v1168_v22  ;;  %v1830_v46 = vrot.slane %v1828_v39, 4  ;;  %v1852_v22 = vrot.slane %v15003_v13, 5 }
  0x85   : > { %v1829_v48 = vsel %vm14646_vm5, %v11342_v44, %v1828_v39 }
  0x86   : > { %1560 = vmatmul.bf16.gmra.mxu2 %v13960_v50  ;;  %v1672_v50 = vshll.u32 %v1593_v32, 16 }
  0x88   : > { %v1674_v10 = vrot.slane %v1672_v50, 5  ;;  %v1832_v50 = vsel %vm14646_vm5, %v1830_v46, %v1831_v47 }
  0x89   : > { %1263 = vmatmul.bf16.gmra.mxu0 %v1195_v4  ;;  %v1678_v4 = vshll.u32 %v14985_v41, 16  ;;  %v1872_v52 = vunpack.c.l.b16 %v1832_v50 }
  0x8a   : > { %v1675_v19 = vor.u32 %v1674_v10, %v1671_v8 }
  0x8b   : > { %v1680_v11 = vrot.slane %v1678_v4, 5  ;;  %v1811_v4 = vld [vmem:[#allocation2 + $0x24] sm:$0xe] }
  0x8c   : > { %v1676_v23 = vrot.slane %v1675_v19, 4  ;;  %v11343_v56 = vrot.slane %v1811_v4, 9  ;;  %v1813_v19 = vld [vmem:[#allocation2 + $0x3c] sm:$0xe] }
  0x8d   : > { %1786 = vmatmul.bf16.gmra.mxu3 %v1718_v14  ;;  %v1719_v14 = vpack.c.b16 %v1714_v0, %v1713_v62  ;;  %v1685_v20 = vor.u32 %v1684_v12, %v1680_v11  ;;  %v1874_v62 = vunpack.c.l.b16 %v1839_v60  ;;  %v1846_v12 = vsel %vm14646_vm5, %v1844_v5, %v1845_v6  ;;  %v14014_v4 = vld [vmem:[%s18292_s1 + $0x2f8] sm:$0xff]  ;;  %v14013_v60 = vld [vmem:[%s18292_s1 + $0x2f0] sm:$0xff]  ;;  %v14004_v5 = vld [vmem:[%s18292_s1 + $0x2a8] sm:$0xff] }
  0x8e   : > { %v1681_v32 = vsel %vm14634_vm4, %v1676_v23, %v1680_v11  ;;  %v1836_v59 = vsel %vm14646_vm5, %v11343_v56, %v1835_v40  ;;  %v1876_v29 = vunpack.c.l.b16 %v1846_v12  ;;  %v11345_v55 = vrot.slane %v1813_v19, 9  ;;  %v13998_v40 = vld [vmem:[%s18292_s1 + $0x278] sm:$0xff]  ;;  %v13997_v56 = vld [vmem:[%s18292_s1 + $0x270] sm:$0xff]  ;;  %2584 = vmatpush.bf16.msra.mxu3 %v14014_v4  ;;  %v14011_v6 = vld [vmem:[%s18292_s1 + $0x2e0] sm:$0xff] }
  0x8f   : > { %1430 = vmatmul.bf16.gmra.mxu1 %v1358_v15  ;;  %v1153_v15 = vrot.slane %v1152_v2, 4  ;;  %v1686_v24 = vrot.slane %v1685_v20, 4  ;;  %v1715_v36 = vunpack.c.l.b16 %v1681_v32  ;;  %v1812_v2 = vld [vmem:[#allocation2 + $0x30] sm:$0xe]  ;;  %2434 = vmatpush.bf16.msra.mxu2 %v13998_v40  ;;  %v13992_v40 = vld [vmem:[%s18292_s1 + $0x248] sm:$0xff] }
  0x90   : > { %v11344_v3 = vrot.slane %v1812_v2, 9  ;;  %v14012_v2 = vld [vmem:[%s18292_s1 + $0x2e8] sm:$0xff] }
  0x91   : > { %v1158_v21 = vsel %vm14634_vm4, %v1153_v15, %v1157_v54  ;;  %v1691_v33 = vsel %vm14634_vm4, %v1686_v24, %v1690_v25  ;;  %v1850_v25 = vsel %vm14646_vm5, %v11345_v55, %v1849_v7  ;;  %v14026_v55 = vld [vmem:[%s18292_s1 + $0x338] sm:$0xff]  ;;  %v2128_v4 = vld [vmem:[#allocation3 + $0x4] sm:$0xf] }
  0x92   : > { %v1192_v26 = vunpack.c.l.b16 %v1158_v21  ;;  %v1716_v37 = vunpack.c.l.b16 %v1691_v33  ;;  %v1843_v11 = vsel %vm14646_vm5, %v11344_v3, %v1842_v38  ;;  %v1851_v21 = vrot.slane %v1849_v7, 4  ;;  %2585 = vmatpush.bf16.msra.mxu3 %v14013_v60  ;;  %v14005_v38 = vld [vmem:[%s18292_s1 + $0x2b0] sm:$0xff]  ;;  %v13995_v3 = vld [vmem:[%s18292_s1 + $0x260] sm:$0xff]  ;;  %v14010_v7 = vld [vmem:[%s18292_s1 + $0x2d8] sm:$0xff]  ;;  %2718 = vmatpush.bf16.msrb.mxu0 %v14026_v55 }
  0x93   : > { %2435 = vmatpush.bf16.msra.mxu2 %v13997_v56  ;;  %v2127_v56 = vld [vmem:[#allocation3] sm:$0xf] }
  0x94   : > { %v1197_v35 = vpack.c.b16 %v1193_v28, %v1192_v26  ;;  %v1720_v43 = vpack.c.b16 %v1716_v37, %v1715_v36  ;;  %v1853_v41 = vsel %vm14646_vm5, %v1851_v21, %v1852_v22  ;;  %v1877_v28 = vunpack.c.l.b16 %v1850_v25  ;;  %v13993_v21 = vld [vmem:[%s18292_s1 + $0x250] sm:$0xff]  ;;  %v14002_v25 = vld [vmem:[%s18292_s1 + $0x298] sm:$0xff]  ;;  %v14008_v60 = vld [vmem:[%s18292_s1 + $0x2c8] sm:$0xff] }
  0x96   : > { %1565 = vmatmul.bf16.gmra.mxu2 %v13961_v51  ;;  %v1871_v51 = vunpack.c.l.b16 %v1829_v48  ;;  %2586 = vmatpush.bf16.msra.mxu3 %v14012_v2  ;;  %v2157_v2 = vshrl.u32 %v2127_v56, 16 }
  0x98   : > { %v1879_v54 = vpack.c.b16 %v1872_v52, %v1871_v51 }
  0x99   : > { %1268 = vmatmul.bf16.gmra.mxu0 %v1196_v61  ;;  %v1873_v61 = vunpack.c.l.b16 %v1836_v59  ;;  %v14006_v59 = vld [vmem:[%s18292_s1 + $0x2b8] sm:$0xff] }
  0x9a   : > { %2333 = vmatpush.bf16.msra.mxu1 %v14006_v59  ;;  %2587 = vmatpush.bf16.msra.mxu3 %v14011_v6  ;;  %v14001_v59 = vld [vmem:[%s18292_s1 + $0x290] sm:$0xff]  ;;  %v2160_v6 = vshll.u32 %v2127_v56, 16 }
  0x9b   : > { %v1880_v0 = vpack.c.b16 %v1874_v62, %v1873_v61  ;;  %v13996_v62 = vld [vmem:[%s18292_s1 + $0x268] sm:$0xff] }
  0x9c   : > { %2436 = vmatpush.bf16.msra.mxu2 %v13996_v62  ;;  %v14024_v62 = vld [vmem:[%s18292_s1 + $0x328] sm:$0xff] }
  0x9d   : > { %1791 = vmatmul.bf16.gmra.mxu3 %v1719_v14  ;;  %v1875_v14 = vunpack.c.l.b16 %v1843_v11 }
  0x9e   : > { %2334 = vmatpush.bf16.msra.mxu1 %v14005_v38  ;;  %2588 = vmatpush.bf16.msra.mxu3 %v14010_v7  ;;  %v2477_v38 = vrot.slane %v2128_v4, 5  ;;  %v13991_v7 = vld [vmem:[%s18292_s1 + $0x240] sm:$0xff] }
  0x9f   : > { %1435 = vmatmul.bf16.gmra.mxu1 %v1359_v17  ;;  %v1881_v16 = vpack.c.b16 %v1876_v29, %v1875_v14  ;;  %v13994_v29 = vld [vmem:[%s18292_s1 + $0x258] sm:$0xff] }
  0xa0   : > { %2437 = vmatpush.bf16.msra.mxu2 %v13995_v3  ;;  %v2152_v3 = vld [vmem:[#allocation3 + $0x8] sm:$0x1] }
  0xa2   : > { %2335 = vmatpush.bf16.msra.mxu1 %v14004_v5  ;;  %v2463_v5 = vld [vmem:[#allocation3] sm:$0xe] }
  0xa3   : > { %v11506_v55 = vrot.slane %v2463_v5, 9  ;;  %v13987_v5 = vld [vmem:[#allocation3] sm:$0xff] }
  0xa4   : > { %2438 = vmatpush.bf16.msra.mxu2 %v13994_v29  ;;  %v2166_v29 = vshll.u32 %v2128_v4, 16 }
  0xa6   : > { %1570 = vmatmul.bf16.gmra.mxu2 %v13962_v31  ;;  %v1878_v31 = vunpack.c.l.b16 %v1853_v41  ;;  %v14009_v41 = vld [vmem:[%s18292_s1 + $0x2d0] sm:$0xff] }
  0xa7   : > { %2589 = vmatpush.bf16.msra.mxu3 %v14009_v41 }
  0xa8   : > { %v1882_v33 = vpack.c.b16 %v1878_v31, %v1877_v28  ;;  %2439 = vmatpush.bf16.msra.mxu2 %v13993_v21  ;;  %v14025_v28 = vld [vmem:[%s18292_s1 + $0x330] sm:$0xff]  ;;  %v2479_v21 = vrot.slane %v2477_v38, 4 }
  0xa9   : > { %1273 = vmatmul.bf16.gmra.mxu0 %v1197_v35 }
  0xaa   : > { %2719 = vmatpush.bf16.msrb.mxu0 %v14025_v28  ;;  %v2159_v28 = vrot.slane %v2157_v2, 4 }
  0xab   : > { %v15020_v53 = vpop.f32.mrf.mxu0  ;;  %2590 = vmatpush.bf16.msra.mxu3 %v14008_v60  ;;  %v2478_v60 = vsel %vm14646_vm5, %v11506_v55, %v2477_v38 }
  0xac   : > { %v15034_v8 = vpop.f32.mrf.mxu1  ;;  %2440 = vmatpush.bf16.msra.mxu2 %v13992_v40  ;;  %v2162_v40 = vrot.slane %v2160_v6, 5  ;;  %v2520_v6 = vunpack.c.l.b16 %v2478_v60 }
  0xad   : > { %1796 = vmatmul.bf16.gmra.mxu3 %v1720_v43 }
  0xae   : > { %2720 = vmatpush.bf16.msrb.mxu0 %v14024_v62 }
  0xb0   : > { %2441 = vmatpush.bf16.msra.mxu2 %v13991_v7 }
  0xb3   : > { %v15024_v58 = vpop.f32.mrf.mxu0  ;;  %v15036_v9 = vpop.f32.mrf.mxu2 }
  0xb4   : > { %v15049_v18 = vpop.f32.mrf.mxu1 }
  0xb6   : > { %2442 = vmatmul.bf16.vlgmr.msra.gmra.mxu2 %v13987_v5 }
  0xb9   : > { %1943 = vmatmul.bf16.vlgmr.msra.gmra.mxu0 %v1879_v54 }
  0xbb   : > { %v15051_v20 = vpop.f32.mrf.mxu2 }
  0xbc   : > { %v15062_v26 = vpop.f32.mrf.mxu1 }
  0xc0   : > { %v15044_v15 = vpop.f32.mrf.mxu3 }
  0xc4   : > { %v15070_v36 = vpop.f32.mrf.mxu1 }
  0xc6   : > { %v15030_v1 = vpop.f32.mrf.mxu0 }
  0xc7   : > { %v752_v5 = vadd.f32 %v15062_v26, %v15030_v1  ;;  %v15246_v1 = vstv %s1992_s25 }
  0xc8   : > { %v15054_v23 = vpop.f32.mrf.mxu3 }
  0xc9   : > { %1948 = vmatmul.bf16.gmra.mxu0 %v1880_v0  ;;  %v15064_v32 = vpop.f32.mrf.mxu2 }
  0xcc   : > { %v15078_v43 = vpop.f32.mrf.mxu1 }
  0xce   : > { %v15038_v10 = vpop.f32.mrf.mxu0 }
  0xd0   : > { %v15068_v13 = vpop.f32.mrf.mxu3 }
  0xd1   : > { %v15072_v37 = vpop.f32.mrf.mxu2 }
  0xd4   : > { %v15088_v50 = vpop.f32.mrf.mxu1 }
  0xd6   : > { %v15046_v17 = vpop.f32.mrf.mxu0 }
  0xd8   : > { %v15076_v42 = vpop.f32.mrf.mxu3 }
  0xd9   : > { %1953 = vmatmul.bf16.gmra.mxu0 %v1881_v16  ;;  %v15080_v44 = vpop.f32.mrf.mxu2  ;;  %v14003_v16 = vld [vmem:[%s18292_s1 + $0x2a0] sm:$0xff] }
  0xda   : > { %2336 = vmatpush.bf16.msra.mxu1 %v14003_v16  ;;  %v747_v16 = vadd.f32 %v15034_v8, %v15020_v53  ;;  %v14000_v53 = vld [vmem:[%s18292_s1 + $0x288] sm:$0xff]  ;;  %v14007_v8 = vld [vmem:[%s18292_s1 + $0x2c0] sm:$0xff] }
  0xdb   : > { %2591 = vmatpush.bf16.msra.mxu3 %v14007_v8 }
  0xdc   : > { %v15105_v57 = vpop.f32.mrf.mxu1  ;;  %v919_v56 = vadd.f32 %v15036_v9, %v747_v16  ;;  %v2176_v9 = vshll.u32 %v2152_v3, 16  ;;  %v2163_v16 = vor.u32 %v2162_v40, %v2159_v28  ;;  %v749_v40 = vadd.f32 %v15049_v18, %v15024_v58 }
  0xde   : > { %v15056_v24 = vpop.f32.mrf.mxu0  ;;  %2337 = vmatpush.bf16.msra.mxu1 %v14002_v25  ;;  %v2480_v25 = vrot.slane %v2152_v3, 5  ;;  %v2178_v55 = vrot.slane %v2176_v9, 5  ;;  %v13999_v3 = vld [vmem:[%s18292_s1 + $0x280] sm:$0xff]  ;;  %v920_v8 = vadd.f32 %v15051_v20, %v749_v40  ;;  %v14020_v20 = vld [vmem:[%s18292_s1 + $0x308] sm:$0xff] }
  0xe0   : > { %v15084_v47 = vpop.f32.mrf.mxu3  ;;  %v1054_v60 = vadd.f32 %v15054_v23, %v920_v8  ;;  %v15241_v23 = vld [vmem:[%s18293_s2] ss:$0 sm:$0xff] }
  0xe1   : > { %v15090_v51 = vpop.f32.mrf.mxu2 }
  0xe2   : > { %2338 = vmatpush.bf16.msra.mxu1 %v14001_v59  ;;  %v14023_v59 = vld [vmem:[%s18292_s1 + $0x320] sm:$0xff] }
  0xe3   : > { %2721 = vmatpush.bf16.msrb.mxu0 %v14023_v59 }
  0xe4   : > { %v15137_v11 = vpop.f32.mrf.mxu1 }
  0xe6   : > { %v15066_v35 = vpop.f32.mrf.mxu0  ;;  %2339 = vmatpush.bf16.msra.mxu1 %v14000_v53 }
  0xe8   : > { %v15092_v52 = vpop.f32.mrf.mxu3 }
  0xe9   : > { %1958 = vmatmul.bf16.gmra.mxu0 %v1882_v33  ;;  %v15107_v63 = vpop.f32.mrf.mxu2 }
  0xea   : > { %18308 = vst [vmem:[#allocation7_spill] sm:$0xff] %v15107_v63  ;;  %2340 = vmatpush.bf16.msra.mxu1 %v13999_v3 }
  0xec   : > { %v15160_v22 = vpop.f32.mrf.mxu1 }
  0xee   : > { %v15074_v39 = vpop.f32.mrf.mxu0 }
  0xf0   : > { %v15120_v0 = vpop.f32.mrf.mxu3 }
  0xf1   : > { %18309 = vst [vmem:[#allocation8_spill] sm:$0xff] %v15120_v0  ;;  %v15139_v12 = vpop.f32.mrf.mxu2  ;;  %v2170_v0 = vshrl.u32 %v2128_v4, 16  ;;  %v2481_v4 = vsel %vm14646_vm5, %v2479_v21, %v2480_v25  ;;  %v1053_v21 = vadd.f32 %v15044_v15, %v919_v56  ;;  %v14022_v25 = vld [vmem:[%s18292_s1 + $0x318] sm:$0xff] }
  0xf2   : > { %18310 = vst [vmem:[#allocation9_spill] sm:$0xff] %v15139_v12  ;;  %2722 = vmatpush.bf16.msrb.mxu0 %v14022_v25 }
  0xf3   : > { %v2172_v7 = vrot.slane %v2170_v0, 4 }
  0xf4   : > { %v1423_v62 = vpop.f32.mrf.mxu1 }
  0xf6   : > { %v15082_v46 = vpop.f32.mrf.mxu0 }
  0xf7   : > { %v1279_v53 = vadd.f32 %v15082_v46, %v1053_v21  ;;  %v754_v21 = vadd.f32 %v15070_v36, %v15038_v10 }
  0xf8   : > { %v15152_v19 = vpop.f32.mrf.mxu3 }
  0xf9   : > { %18311 = vst [vmem:[#allocation10_spill] sm:$0xff] %v15152_v19  ;;  %v15171_v31 = vpop.f32.mrf.mxu2  ;;  %v2168_v19 = vrot.slane %v2166_v29, 5  ;;  %v2521_v29 = vunpack.c.l.b16 %v2481_v4  ;;  %v1441_v58 = vadd.f32 %v15160_v22, %v1279_v53  ;;  %v921_v22 = vadd.f32 %v15064_v32, %v752_v5 }
  0xfb   : > { %v2528_v63 = vpack.c.b16 %v2521_v29, %v2520_v6  ;;  %v2173_v38 = vor.u32 %v2172_v7, %v2168_v19  ;;  %v1576_v4 = vadd.f32 %v15171_v31, %v1441_v58  ;;  %v14019_v31 = vld [vmem:[%s18292_s1 + $0x300] sm:$0xff]  ;;  %v1055_v26 = vadd.f32 %v15068_v13, %v921_v22 }
  0xfc   : > { %v1426_v46 = vpop.f32.mrf.mxu1  ;;  %v757_v58 = vadd.f32 %v15078_v43, %v15046_v17  ;;  %v759_v17 = vadd.f32 %v15088_v50, %v15056_v24  ;;  %v14042_v24 = vld [vmem:[%s18292_s1 + $0x3b8] sm:$0xff] }
  0xfd   : > { %2592 = vmatmul.bf16.vlgmr.msra.gmra.mxu3 %v2528_v63  ;;  %v2174_v28 = vrot.slane %v2173_v38, 4  ;;  %v14021_v63 = vld [vmem:[%s18292_s1 + $0x310] sm:$0xff]  ;;  %3106 = vmatpush.bf16.msrb.mxu2 %v14042_v24 }
  0xfe   : > { %v15086_v48 = vpop.f32.mrf.mxu0  ;;  %2723 = vmatpush.bf16.msrb.mxu0 %v14021_v63 }
  0xff   : > { %v2179_v56 = vsel %vm14634_vm4, %v2174_v28, %v2178_v55  ;;  %v1280_v6 = vadd.f32 %v15086_v48, %v1054_v60 }
 0x100   : > { %v1782_v41 = vpop.f32.mrf.mxu3  ;;  %v2270_v59 = vunpack.c.l.b16 %v2179_v56 }
 0x101   : > { %v1558_v12 = vpop.f32.mrf.mxu2  ;;  %v1802_v29 = vadd.f32 %v1782_v41, %v1576_v4  ;;  %v1442_v7 = vadd.f32 %v1423_v62, %v1280_v6  ;;  %v923_v4 = vadd.f32 %v15080_v44, %v757_v58 }
 0x102   : > { %2724 = vmatpush.bf16.msrb.mxu0 %v14020_v20 }
 0x103   : > { %v1577_v32 = vadd.f32 %v1558_v12, %v1442_v7 }
 0x104   : > { %v1428_v41 = vpop.f32.mrf.mxu1 }
 0x106   : > { %v15094_v54 = vpop.f32.mrf.mxu0  ;;  %2725 = vmatpush.bf16.msrb.mxu0 %v14019_v31  ;;  %v1057_v31 = vadd.f32 %v15084_v47, %v923_v4 }
 0x107   : > { %v1281_v3 = vadd.f32 %v15094_v54, %v1055_v26 }
 0x109   : > { %v1561_v9 = vpop.f32.mrf.mxu2  ;;  %v1443_v13 = vadd.f32 %v1426_v46, %v1281_v3 }
 0x10c   : > { %v1431_v46 = vpop.f32.mrf.mxu1 }
 0x10e   : > { %v15115_v61 = vpop.f32.mrf.mxu0 }
 0x111   : > { %v1563_v62 = vpop.f32.mrf.mxu2 }
 0x116   : > { %v15141_v14 = vpop.f32.mrf.mxu0 }
 0x117   : > { %v1283_v26 = vadd.f32 %v15141_v14, %v1057_v31  ;;  %v764_v14 = vadd.f32 %v15137_v11, %v15074_v39 }
 0x11e   : > { %v15173_v33 = vpop.f32.mrf.mxu0 }
 0x11f   : > { %18312 = vst [vmem:[#allocation11_spill] sm:$0xff] %v15173_v33  ;;  %v2164_v33 = vrot.slane %v2163_v16, 4 }
 0x121   : > { %v2169_v0 = vsel %vm14634_vm4, %v2164_v33, %v2168_v19  ;;  %v1784_v19 = vpop.f32.mrf.mxu3 }
 0x122   : > { %v2269_v15 = vunpack.c.l.b16 %v2169_v0  ;;  %v922_v0 = vadd.f32 %v15072_v37, %v754_v21  ;;  %v1803_v28 = vadd.f32 %v1784_v19, %v1577_v32  ;;  %v2099_v19 = vld [vmem:[#allocation3 + $0xc] sm:$0xf]  ;;  %v2103_v32 = vld [vmem:[#allocation3 + $0x14] sm:$0x1] }
 0x124   : > { %v2277_v18 = vpack.c.b16 %v2270_v59, %v2269_v15  ;;  %v1056_v8 = vadd.f32 %v15076_v42, %v922_v0  ;;  %v1578_v59 = vadd.f32 %v1561_v9, %v1443_v13  ;;  %v1566_v9 = vpop.f32.mrf.mxu2  ;;  %v1433_v0 = vpop.f32.mrf.mxu1 }
 0x126   : > { %v15206_v2 = vpop.f32.mrf.mxu0  ;;  %2341 = vmatmul.bf16.vlgmr.msra.gmra.mxu1 %v2277_v18  ;;  %v1282_v37 = vadd.f32 %v15115_v61, %v1056_v8  ;;  %v18314_v8 = vld [vmem:[#allocation7_spill] sm:$0xff] }
 0x128   : > { %v1444_v43 = vadd.f32 %v1428_v41, %v1282_v37 }
 0x129   : > { %v1787_v55 = vpop.f32.mrf.mxu3 }
 0x12a   : > { %v1804_v42 = vadd.f32 %v1787_v55, %v1578_v59  ;;  %v1579_v44 = vadd.f32 %v1563_v62, %v1444_v43 }
 0x12e   : > { %v15226_v33 = vpop.f32.mrf.mxu0 }
 0x131   : > { %v1789_v36 = vpop.f32.mrf.mxu3 }
 0x136   : > { %v1944_v16 = vpop.f32.mrf.mxu0 }
 0x137   : > { %v1964_v38 = vadd.f32 %v1944_v16, %v1802_v29  ;;  %v924_v16 = vadd.f32 %v15090_v51, %v759_v17  ;;  %v762_v51 = vadd.f32 %v15105_v57, %v15066_v35  ;;  %v18313_v35 = vld [vmem:[#allocation11_spill] sm:$0xff] }
 0x139   : > { %v1976_v48 = vadd.f32 %v15241_v23, %v1964_v38  ;;  %v1792_v50 = vpop.f32.mrf.mxu3  ;;  %v1058_v3 = vadd.f32 %v15092_v52, %v924_v16  ;;  %v925_v59 = vadd.f32 %v18314_v8, %v762_v51 }
 0x13b   : > { %vm1984_vm14 = vcmp.ge.f32.partialorder %v1976_v48, 0.0  ;;  %v1994_v25 = vmul.f32 %v15246_v1, %v1976_v48  ;;  %v1284_v57 = vadd.f32 %v18313_v35, %v1058_v3 }
 0x13d   : > { %v2002_v40 = vsel %vm1984_vm14, %v1976_v48, %v1994_v25  ;;  %v1805_v25 = vadd.f32 %v1789_v36, %v1579_v44  ;;  %v14041_v36 = vld [vmem:[%s18292_s1 + $0x3b0] sm:$0xff] }
 0x13e   : > { %v2010_v53 = vpack.c.bf16 %v2002_v40, %v2002_v40  ;;  %v1946_v15 = vpop.f32.mrf.mxu0  ;;  %3107 = vmatpush.bf16.msrb.mxu2 %v14041_v36 }
 0x13f   : > { %v1965_v12 = vadd.f32 %v1946_v15, %v1803_v28 }
 0x140   : > { %v2019_v56 = vshrl.u32 %v2010_v53, 16  ;;  %v2022_v63 = vshll.u32 %v2010_v53, 16 }
 0x141   : > { %v1977_v10 = vadd.f32 %v15241_v23, %v1965_v12  ;;  %v1445_v12 = vadd.f32 %v1431_v46, %v1283_v26 }
 0x142   : > { %v2021_v54 = vrot.slane %v2019_v56, 7 }
 0x143   : > { %vm1985_vm15 = vcmp.ge.f32.partialorder %v1977_v10, 0.0  ;;  %v1995_v18 = vmul.f32 %v15246_v1, %v1977_v10  ;;  %v1580_v58 = vadd.f32 %v1566_v9, %v1445_v12  ;;  %v14040_v9 = vld [vmem:[%s18292_s1 + $0x3a8] sm:$0xff] }
 0x144   : > { %v2024_v60 = vor.u32 %v2022_v63, %v2021_v54  ;;  %v2025_v41 = vrot.slane %v2021_v54, 4  ;;  %v18315_v54 = vld [vmem:[#allocation9_spill] sm:$0xff]  ;;  %3108 = vmatpush.bf16.msrb.mxu2 %v14040_v9 }
 0x145   : > { %v2003_v20 = vsel %vm1985_vm15, %v1977_v10, %v1995_v18  ;;  %v1568_v10 = vpop.f32.mrf.mxu2  ;;  %v926_v63 = vadd.f32 %v18315_v54, %v764_v14  ;;  %v1806_v16 = vadd.f32 %v1792_v50, %v1580_v58  ;;  %v1436_v14 = vpop.f32.mrf.mxu1  ;;  %v14033_v58 = vld [vmem:[%s18292_s1 + $0x370] sm:$0xff]  ;;  %vm10748_vm15 = vcmask 523264  }
 0x146   : > { %v2100_v5 = vsel %vm14717_vm11, %v2024_v60, %v2099_v19  ;;  %v2011_v6 = vpack.c.bf16 %v2003_v20, %v2003_v20  ;;  %v1949_v22 = vpop.f32.mrf.mxu0  ;;  %v2106_v60 = vld [vmem:[#allocation3 + $0x18] sm:$0xf] }
 0x147   : > { %2101 = vst [vmem:[#allocation3 + $0xc] sm:$0xf] %v2100_v5  ;;  %v1966_v61 = vadd.f32 %v1949_v22, %v1804_v42  ;;  %v1446_v42 = vadd.f32 %v1433_v0, %v1284_v57  ;;  %v18316_v22 = vld [vmem:[#allocation8_spill] sm:$0xff] }
 0x148   : > { %v2027_v29 = vshrl.u32 %v2011_v6, 16  ;;  %v2030_v55 = vshll.u32 %v2011_v6, 16  ;;  %v14054_v6 = vld [vmem:[%s18292_s1 + $0x3f8] sm:$0xff]  ;;  %v1059_v17 = vadd.f32 %v18316_v22, %v925_v59 }
 0x149   : > { %v1978_v7 = vadd.f32 %v15241_v23, %v1966_v61  ;;  %v1581_v44 = vadd.f32 %v1568_v10, %v1446_v42  ;;  %3241 = vmatpush.bf16.msrb.mxu3 %v14054_v6  ;;  %v2110_v10 = vld [vmem:[#allocation3 + $0x20] sm:$0x1]  ;;  %v14062_v42 = vld [vmem:[%s18292_s1 + $0x438] sm:$0xff] }
 0x14a   : > { %v2029_v38 = vrot.slane %v2027_v29, 7  ;;  %v18317_v29 = vld [vmem:[#allocation10_spill] sm:$0xff]  ;;  %v1285_v51 = vadd.f32 %v15206_v2, %v1059_v17  ;;  %v14053_v2 = vld [vmem:[%s18292_s1 + $0x3f0] sm:$0xff]  ;;  %3467 = vmatpush.bf16.msra.mxu0 %v14062_v42 }
 0x14b   : > { %vm1986_vm0 = vcmp.ge.f32.partialorder %v1978_v7, 0.0  ;;  %v1996_v48 = vmul.f32 %v15246_v1, %v1978_v7  ;;  %v15302_v31 = vadd.f32 %v18317_v29, %v926_v63 }
 0x14c   : > { %v2032_v47 = vor.u32 %v2030_v55, %v2029_v38  ;;  %v2034_v21 = vrot.slane %v2029_v38, 4  ;;  %v1794_v38 = vpop.f32.mrf.mxu3 }
 0x14d   : > { %v2004_v62 = vsel %vm1986_vm0, %v1978_v7, %v1996_v48  ;;  %3242 = vmatpush.bf16.msrb.mxu3 %v14053_v2 }
 0x14e   : > { %v2033_v28 = vsel %vm14724_vm12, %v2025_v41, %v2032_v47  ;;  %v2104_v40 = vsel %vm14731_vm13, %v2034_v21, %v2103_v32  ;;  %v2012_v53 = vpack.c.bf16 %v2004_v62, %v2004_v62  ;;  %v1951_v15 = vpop.f32.mrf.mxu0  ;;  %v2129_v13 = vld [vmem:[#allocation3 + $0xc] sm:$0xf] }
 0x14f   : > { %2102 = vst [vmem:[#allocation3 + $0x10] sm:$0xf] %v2033_v28  ;;  %v1967_v52 = vadd.f32 %v1951_v15, %v1805_v25  ;;  %v2181_v56 = vshrl.u32 %v2129_v13, 16  ;;  %v2184_v11 = vshll.u32 %v2129_v13, 16  ;;  %v2464_v5 = vld [vmem:[#allocation3 + $0xc] sm:$0xe] }
 0x150   : > { %2105 = vst [vmem:[#allocation3 + $0x14] sm:$0x1] %v2104_v40  ;;  %v2036_v39 = vshrl.u32 %v2012_v53, 16  ;;  %v2039_v46 = vshll.u32 %v2012_v53, 16  ;;  %v11507_v21 = vrot.slane %v2464_v5, 9  ;;  %v14034_v15 = vld [vmem:[%s18292_s1 + $0x378] sm:$0xff]  ;;  %v1447_v5 = vadd.f32 %v1436_v14, %v1285_v51 }
 0x151   : > { %v1979_v37 = vadd.f32 %v15241_v23, %v1967_v52  ;;  %v2183_v19 = vrot.slane %v2181_v56, 4  ;;  %v2186_v4 = vrot.slane %v2184_v11, 5  ;;  %v14039_v52 = vld [vmem:[%s18292_s1 + $0x3a0] sm:$0xff]  ;;  %v1571_v56 = vpop.f32.mrf.mxu2  ;;  %2944 = vmatpush.bf16.msrb.mxu1 %v14034_v15  ;;  %v2113_v14 = vld [vmem:[#allocation3 + $0x24] sm:$0xf] }
 0x152   : > { %v15290_v18 = vrot.slane %v2036_v39, 7  ;;  %3109 = vmatpush.bf16.msrb.mxu2 %v14039_v52 }
 0x153   : > { %vm1987_vm1 = vcmp.ge.f32.partialorder %v1979_v37, 0.0  ;;  %v1997_v20 = vmul.f32 %v15246_v1, %v1979_v37  ;;  %v2187_v61 = vor.u32 %v2186_v4, %v2183_v19  ;;  %v14038_v19 = vld [vmem:[%s18292_s1 + $0x398] sm:$0xff] }
 0x154   : > { %v2041_v43 = vor.u32 %v2039_v46, %v15290_v18  ;;  %v2042_v55 = vrot.slane %v15290_v18, 4 }
 0x155   : > { %v2005_v7 = vsel %vm1987_vm1, %v1979_v37, %v1997_v20  ;;  %v2188_v40 = vrot.slane %v2187_v61, 4  ;;  %v14052_v37 = vld [vmem:[%s18292_s1 + $0x3e8] sm:$0xff]  ;;  %v1807_v20 = vadd.f32 %v1794_v38, %v1581_v44  ;;  %2945 = vmatpush.bf16.msrb.mxu1 %v14033_v58 }
 0x156   : > { %v2107_v26 = vsel %vm14717_vm11, %v2041_v43, %v2106_v60  ;;  %v2013_v32 = vpack.c.bf16 %v2005_v7, %v2005_v7  ;;  %v1954_v48 = vpop.f32.mrf.mxu0  ;;  %v13988_v24 = vld [vmem:[#allocation3 + $0xc] sm:$0xff]  ;;  %v1582_v7 = vadd.f32 %v1571_v56, %v1447_v5  ;;  %3243 = vmatpush.bf16.msrb.mxu3 %v14052_v37  ;;  %3110 = vmatpush.bf16.msrb.mxu2 %v14038_v19 }
 0x157   : > { %v14015_v41 = vld [vmem:[#allocation3 + $0xc] sm:$0xff]  ;;  %2108 = vst [vmem:[#allocation3 + $0x18] sm:$0xf] %v2107_v26  ;;  %v1968_v50 = vadd.f32 %v1954_v48, %v1806_v16  ;;  %v2153_v3 = vld [vmem:[#allocation3 + $0x14] sm:$0x1]  ;;  %2447 = vmatmul.bf16.gmra.mxu2 %v13988_v24  ;;  %v1797_v48 = vpop.f32.mrf.mxu3 }
 0x158   : > { %v2130_v47 = vld [vmem:[#allocation3 + $0x10] sm:$0xf]  ;;  %v2044_v0 = vshrl.u32 %v2013_v32, 16  ;;  %2726 = vmatmul.bf16.vlgmr.msrb.gmra.mxu0 %v14015_v41  ;;  %v2487_v28 = vrot.slane %v2153_v3, 5  ;;  %v2047_v59 = vshll.u32 %v2013_v32, 16  ;;  %v2200_v63 = vshll.u32 %v2153_v3, 16 }
 0x159   : > { %v2484_v25 = vrot.slane %v2130_v47, 5  ;;  %v2190_v62 = vshll.u32 %v2130_v47, 16  ;;  %v2194_v53 = vshrl.u32 %v2130_v47, 16  ;;  %v1980_v13 = vadd.f32 %v15241_v23, %v1968_v50  ;;  %v14032_v3 = vld [vmem:[%s18292_s1 + $0x368] sm:$0xff] }
 0x15a   : > { %v2046_v8 = vrot.slane %v2044_v0, 7  ;;  %v2202_v38 = vrot.slane %v2200_v63, 5  ;;  %v1286_v32 = vadd.f32 %v15226_v33, %v15302_v31  ;;  %v14051_v33 = vld [vmem:[%s18292_s1 + $0x3e0] sm:$0xff]  ;;  %v14037_v31 = vld [vmem:[%s18292_s1 + $0x390] sm:$0xff]  ;;  %2946 = vmatpush.bf16.msrb.mxu1 %v14032_v3 }
 0x15b   : > { %v2485_v12 = vsel %vm14646_vm5, %v11507_v21, %v2484_v25  ;;  %v2486_v35 = vrot.slane %v2484_v25, 4  ;;  %v2192_v57 = vrot.slane %v2190_v62, 5  ;;  %v2196_v11 = vrot.slane %v2194_v53, 4  ;;  %v1438_v25 = vpop.f32.mrf.mxu1  ;;  %v14061_v53 = vld [vmem:[%s18292_s1 + $0x430] sm:$0xff]  ;;  %3244 = vmatpush.bf16.msrb.mxu3 %v14051_v33  ;;  %3111 = vmatpush.bf16.msrb.mxu2 %v14037_v31  ;;  %v14048_v33 = vld [vmem:[%s18292_s1 + $0x3c8] sm:$0xff] }
 0x15c   : > { %v2522_v39 = vunpack.c.l.b16 %v2485_v12  ;;  %vm1988_vm2 = vcmp.ge.f32.partialorder %v1980_v13, 0.0  ;;  %v1998_v36 = vmul.f32 %v15246_v1, %v1980_v13  ;;  %v2049_v18 = vor.u32 %v2047_v59, %v2046_v8  ;;  %v14050_v12 = vld [vmem:[%s18292_s1 + $0x3d8] sm:$0xff]  ;;  %3468 = vmatpush.bf16.msra.mxu0 %v14061_v53  ;;  %v14029_v3 = vld [vmem:[%s18292_s1 + $0x350] sm:$0xff] }
 0x15d   : > { %v2488_v54 = vsel %vm14646_vm5, %v2486_v35, %v2487_v28  ;;  %v2051_v46 = vrot.slane %v2046_v8, 4  ;;  %v2197_v4 = vor.u32 %v2196_v11, %v2192_v57  ;;  %v2193_v9 = vsel %vm14634_vm4, %v2188_v40, %v2192_v57  ;;  %v1573_v35 = vpop.f32.mrf.mxu2  ;;  %v14060_v11 = vld [vmem:[%s18292_s1 + $0x428] sm:$0xff]  ;;  %v14058_v53 = vld [vmem:[%s18292_s1 + $0x418] sm:$0xff] }
 0x15e   : > { %v2523_v60 = vunpack.c.l.b16 %v2488_v54  ;;  %v2006_v6 = vsel %vm1988_vm2, %v1980_v13, %v1998_v36  ;;  %v2050_v22 = vsel %vm14724_vm12, %v2042_v55, %v2049_v18  ;;  %v1956_v61 = vpop.f32.mrf.mxu0  ;;  %v2131_v16 = vld [vmem:[#allocation3 + $0x18] sm:$0xf]  ;;  %v2271_v50 = vunpack.c.l.b16 %v2193_v9 }
 0x15f   : > { %v2111_v17 = vsel %vm14731_vm13, %v2051_v46, %v2110_v10  ;;  %v2014_v43 = vpack.c.bf16 %v2006_v6, %v2006_v6  ;;  %2109 = vst [vmem:[#allocation3 + $0x1c] sm:$0xf] %v2050_v22  ;;  %v1969_v26 = vadd.f32 %v1956_v61, %v1807_v20  ;;  %v2198_v44 = vrot.slane %v2197_v4, 4  ;;  %v2465_v2 = vld [vmem:[#allocation3 + $0x18] sm:$0xe]  ;;  %3245 = vmatpush.bf16.msrb.mxu3 %v14050_v12  ;;  %v14049_v61 = vld [vmem:[%s18292_s1 + $0x3d0] sm:$0xff] }
 0x160   : > { %v2529_v29 = vpack.c.b16 %v2523_v60, %v2522_v39  ;;  %2112 = vst [vmem:[#allocation3 + $0x20] sm:$0x1] %v2111_v17  ;;  %v2205_v24 = vshrl.u32 %v2131_v16, 16  ;;  %v2208_v41 = vshll.u32 %v2131_v16, 16  ;;  %v14031_v13 = vld [vmem:[%s18292_s1 + $0x360] sm:$0xff]  ;;  %v1808_v8 = vadd.f32 %v1797_v48, %v1582_v7  ;;  %v14036_v39 = vld [vmem:[%s18292_s1 + $0x388] sm:$0xff]  ;;  %3469 = vmatpush.bf16.msra.mxu0 %v14060_v11 }
 0x161   : > { %v2053_v55 = vshrl.u32 %v2014_v43, 16  ;;  %v2056_v47 = vshll.u32 %v2014_v43, 16  ;;  %v1981_v21 = vadd.f32 %v15241_v23, %v1969_v26  ;;  %v2203_v51 = vsel %vm14634_vm4, %v2198_v44, %v2202_v38  ;;  %2947 = vmatpush.bf16.msrb.mxu1 %v14031_v13  ;;  %v14030_v43 = vld [vmem:[%s18292_s1 + $0x358] sm:$0xff]  ;;  %3112 = vmatpush.bf16.msrb.mxu2 %v14036_v39  ;;  %v14035_v44 = vld [vmem:[%s18292_s1 + $0x380] sm:$0xff] }
 0x162   : > { %2597 = vmatmul.bf16.gmra.mxu3 %v2529_v29  ;;  %v2272_v0 = vunpack.c.l.b16 %v2203_v51  ;;  %v2207_v28 = vrot.slane %v2205_v24, 4  ;;  %v2210_v40 = vrot.slane %v2208_v41, 5  ;;  %v1448_v59 = vadd.f32 %v1438_v25, %v1286_v32  ;;  %v14059_v38 = vld [vmem:[%s18292_s1 + $0x420] sm:$0xff]  ;;  %v1799_v32 = vpop.f32.mrf.mxu3 }
 0x163   : > { %v15355_v62 = vrot.slane %v2053_v55, 7  ;;  %vm1989_vm3 = vcmp.ge.f32.partialorder %v1981_v21, 0.0  ;;  %v1999_v15 = vmul.f32 %v15246_v1, %v1981_v21  ;;  %v11508_v46 = vrot.slane %v2465_v2, 9  ;;  %3246 = vmatpush.bf16.msrb.mxu3 %v14049_v61  ;;  %v14047_v11 = vld [vmem:[%s18292_s1 + $0x3c0] sm:$0xff] }
 0x164   : > { %v2278_v52 = vpack.c.b16 %v2272_v0, %v2271_v50  ;;  %v2211_v56 = vor.u32 %v2210_v40, %v2207_v28  ;;  %v1583_v60 = vadd.f32 %v1573_v35, %v1448_v59  ;;  %3470 = vmatpush.bf16.msra.mxu0 %v14059_v38 }
 0x165   : > { %v2058_v57 = vor.u32 %v2056_v47, %v15355_v62  ;;  %v2007_v10 = vsel %vm1989_vm3, %v1981_v21, %v1999_v15  ;;  %v2059_v36 = vrot.slane %v15355_v62, 4  ;;  %v2117_v47 = vld [vmem:[#allocation3 + $0x2c] sm:$0x1]  ;;  %2948 = vmatpush.bf16.msrb.mxu1 %v14030_v43  ;;  %3113 = vmatpush.bf16.msrb.mxu2 %v14035_v44 }
 0x166   : > { %v2015_v63 = vpack.c.bf16 %v2007_v10, %v2007_v10  ;;  %2346 = vmatmul.bf16.gmra.mxu1 %v2278_v52  ;;  %v1959_v58 = vpop.f32.mrf.mxu0  ;;  %v13989_v37 = vld [vmem:[#allocation3 + $0x18] sm:$0xff]  ;;  %v15377_v22 = vrot.slane %v2211_v56, 4  ;;  %v1809_v0 = vadd.f32 %v1799_v32, %v1583_v60  ;;  %v15413_v52 = vld [vmem:[#allocation3 + $0x10] sm:$0xf]  ;;  %v14028_v56 = vld [vmem:[%s18292_s1 + $0x348] sm:$0xff] }
 0x167   : > { %v2114_v54 = vsel %vm14717_vm11, %v2058_v57, %v2113_v14  ;;  %v14016_v19 = vld [vmem:[#allocation3 + $0x18] sm:$0xff]  ;;  %v1970_v4 = vadd.f32 %v1959_v58, %v1808_v8  ;;  %v2154_v42 = vld [vmem:[#allocation3 + $0x20] sm:$0x1]  ;;  %2452 = vmatmul.bf16.gmra.mxu2 %v13989_v37  ;;  %3247 = vmatpush.bf16.msrb.mxu3 %v14048_v33  ;;  %v2999_v37 = vrot.slane %v15413_v52, 5  ;;  %v2120_v60 = vld [vmem:[#allocation3 + $0x30] sm:$0xf] }
 0x168   : > { %v2132_v18 = vld [vmem:[#allocation3 + $0x1c] sm:$0xf]  ;;  %2115 = vst [vmem:[#allocation3 + $0x24] sm:$0xf] %v2114_v54  ;;  %v2061_v6 = vshrl.u32 %v2015_v63, 16  ;;  %2731 = vmatmul.bf16.gmra.mxu0 %v14016_v19  ;;  %v2494_v9 = vrot.slane %v2154_v42, 5 }
 0x169   : > { %v2491_v20 = vrot.slane %v2132_v18, 5  ;;  %v2214_v5 = vshll.u32 %v2132_v18, 16  ;;  %v2218_v17 = vshrl.u32 %v2132_v18, 16  ;;  %v1982_v29 = vadd.f32 %v15241_v23, %v1970_v4  ;;  %2949 = vmatpush.bf16.msrb.mxu1 %v14029_v3  ;;  %3471 = vmatpush.bf16.msra.mxu0 %v14058_v53  ;;  %v14057_v19 = vld [vmem:[%s18292_s1 + $0x410] sm:$0xff] }
 0x16a   : > { %v2063_v48 = vrot.slane %v2061_v6, 7  ;;  %v2064_v55 = vshll.u32 %v2015_v63, 16  ;;  %v2224_v50 = vshll.u32 %v2154_v42, 16 }
 0x16b   : > { %v2492_v16 = vsel %vm14646_vm5, %v11508_v46, %v2491_v20  ;;  %v2493_v7 = vrot.slane %v2491_v20, 4  ;;  %v2216_v26 = vrot.slane %v2214_v5, 5  ;;  %v2220_v41 = vrot.slane %v2218_v17, 4  ;;  %v15430_v20 = vld [vmem:[#allocation3 + $0xc] sm:$0xf]  ;;  %3248 = vmatpush.bf16.msrb.mxu3 %v14047_v11 }
 0x16c   : > { %v2524_v24 = vunpack.c.l.b16 %v2492_v16  ;;  %vm1990_vm6 = vcmp.ge.f32.partialorder %v1982_v29, 0.0  ;;  %v2000_v21 = vmul.f32 %v15246_v1, %v1982_v29  ;;  %v2066_v31 = vor.u32 %v2064_v55, %v2063_v48 }
 0x16d   : > { %v2495_v51 = vsel %vm14646_vm5, %v2493_v7, %v2494_v9  ;;  %v2068_v25 = vrot.slane %v2063_v48, 4  ;;  %v2221_v14 = vor.u32 %v2220_v41, %v2216_v26  ;;  %v2217_v40 = vsel %vm14634_vm4, %v15377_v22, %v2216_v26  ;;  %2950 = vmatpush.bf16.msrb.mxu1 %v14028_v56  ;;  %v14027_v22 = vld [vmem:[%s18292_s1 + $0x340] sm:$0xff]  ;;  %3472 = vmatpush.bf16.msra.mxu0 %v14057_v19 }
 0x16e   : > { %v2525_v62 = vunpack.c.l.b16 %v2495_v51  ;;  %v2008_v28 = vsel %vm1990_vm6, %v1982_v29, %v2000_v21  ;;  %v2067_v15 = vsel %vm14724_vm12, %v2059_v36, %v2066_v31  ;;  %v1961_v12 = vpop.f32.mrf.mxu0  ;;  %v2226_v10 = vrot.slane %v2224_v50, 5  ;;  %v15437_v29 = vld [vmem:[#allocation3 + $0x14] sm:$0x1] }
 0x16f   : > { %v2118_v2 = vsel %vm14731_vm13, %v2068_v25, %v2117_v47  ;;  %v2016_v13 = vpack.c.bf16 %v2008_v28, %v2008_v28  ;;  %v2133_v57 = vld [vmem:[#allocation3 + $0x24] sm:$0xf]  ;;  %2116 = vst [vmem:[#allocation3 + $0x28] sm:$0xf] %v2067_v15  ;;  %v1971_v8 = vadd.f32 %v1961_v12, %v1809_v0  ;;  %v2222_v59 = vrot.slane %v2221_v14, 4 }
 0x170   : > { %v2530_v35 = vpack.c.b16 %v2525_v62, %v2524_v24  ;;  %v2229_v39 = vshrl.u32 %v2133_v57, 16  ;;  %2119 = vst [vmem:[#allocation3 + $0x2c] sm:$0x1] %v2118_v2  ;;  %v2232_v54 = vshll.u32 %v2133_v57, 16  ;;  %v2273_v4 = vunpack.c.l.b16 %v2217_v40  ;;  %v2466_v5 = vld [vmem:[#allocation3 + $0x24] sm:$0xe] }
 0x171   : > { %v2070_v36 = vshrl.u32 %v2016_v13, 16  ;;  %v1983_v63 = vadd.f32 %v15241_v23, %v1971_v8  ;;  %v2227_v58 = vsel %vm14634_vm4, %v2222_v59, %v2226_v10  ;;  %v2073_v46 = vshll.u32 %v2016_v13, 16  ;;  %2951 = vmatpush.bf16.msrb.mxu1 %v14027_v22  ;;  %v14055_v40 = vld [vmem:[%s18292_s1 + $0x400] sm:$0xff] }
 0x172   : > { %2602 = vmatmul.bf16.gmra.mxu3 %v2530_v35  ;;  %v2274_v42 = vunpack.c.l.b16 %v2227_v58  ;;  %v2231_v6 = vrot.slane %v2229_v39, 4  ;;  %v2234_v9 = vrot.slane %v2232_v54, 5  ;;  %v3001_v16 = vrot.slane %v2999_v37, 4  ;;  %v2124_v35 = vld [vmem:[#allocation3 + $0x38] sm:$0x1] }
 0x173   : > { %v15428_v18 = vrot.slane %v2070_v36, 7  ;;  %vm1991_vm7 = vcmp.ge.f32.partialorder %v1983_v63, 0.0  ;;  %v2001_v23 = vmul.f32 %v15246_v1, %v1983_v63  ;;  %v14056_v1 = vld [vmem:[%s18292_s1 + $0x408] sm:$0xff]  ;;  %v2768_v7 = vshrl.u32 %v15430_v20, 16  ;;  %v2981_v36 = vld [vmem:[#allocation3 + $0xc] sm:$0xe] }
 0x174   : > { %v2279_v43 = vpack.c.b16 %v2274_v42, %v2273_v4  ;;  %v2771_v26 = vshll.u32 %v15430_v20, 16  ;;  %v11509_v24 = vrot.slane %v2466_v5, 9  ;;  %v2777_v41 = vshll.u32 %v15413_v52, 16  ;;  %3473 = vmatpush.bf16.msra.mxu0 %v14056_v1 }
 0x175   : > { %v2075_v17 = vor.u32 %v2073_v46, %v15428_v18  ;;  %v2009_v61 = vsel %vm1991_vm7, %v1983_v63, %v2001_v23  ;;  %v2235_v51 = vor.u32 %v2234_v9, %v2231_v6  ;;  %v2781_v25 = vshrl.u32 %v15413_v52, 16  ;;  %v3278_v6 = vld [vmem:[#allocation3 + $0x18] sm:$0xf] }
 0x176   : > { %v2017_v38 = vpack.c.bf16 %v2009_v61, %v2009_v61  ;;  %2351 = vmatmul.bf16.gmra.mxu1 %v2279_v43  ;;  %v13990_v32 = vld [vmem:[#allocation3 + $0x24] sm:$0xff]  ;;  %v3002_v13 = vrot.slane %v15437_v29, 5  ;;  %v2076_v12 = vrot.slane %v15428_v18, 4  ;;  %v15461_v58 = vrot.slane %v2777_v41, 5  ;;  %v15463_v18 = vld [vmem:[#allocation3 + $0x1c] sm:$0xf] }
 0x177   : > { %v2121_v44 = vsel %vm14717_vm11, %v2075_v17, %v2120_v60  ;;  %v14017_v48 = vld [vmem:[#allocation3 + $0x24] sm:$0xff]  ;;  %v2155_v47 = vld [vmem:[#allocation3 + $0x2c] sm:$0x1]  ;;  %2457 = vmatmul.bf16.gmra.mxu2 %v13990_v32  ;;  %v2236_v8 = vrot.slane %v2235_v51, 4  ;;  %v2783_v19 = vrot.slane %v2781_v25, 4  ;;  %v11670_v23 = vrot.slane %v2981_v36, 9 }
 0x178   : > { %v2134_v55 = vld [vmem:[#allocation3 + $0x28] sm:$0xf]  ;;  %2122 = vst [vmem:[#allocation3 + $0x30] sm:$0xf] %v2121_v44  ;;  %v2078_v3 = vshrl.u32 %v2017_v38, 16  ;;  %2736 = vmatmul.bf16.gmra.mxu0 %v14017_v48  ;;  %v2501_v33 = vrot.slane %v2155_v47, 5  ;;  %v3003_v5 = vsel %vm14646_vm5, %v3001_v16, %v3002_v13 }
 0x179   : > { %v2498_v21 = vrot.slane %v2134_v55, 5  ;;  %v2238_v50 = vshll.u32 %v2134_v55, 16  ;;  %v2242_v31 = vshrl.u32 %v2134_v55, 16  ;;  %v2248_v28 = vshll.u32 %v2155_v47, 16  ;;  %3474 = vmatpush.bf16.msra.mxu0 %v14055_v40 }
 0x17a   : > { %v2080_v53 = vrot.slane %v2078_v3, 7  ;;  %v2081_v15 = vshll.u32 %v2017_v38, 16  ;;  %v3300_v22 = vshll.u32 %v15463_v18, 16  ;;  %v3304_v17 = vshrl.u32 %v15463_v18, 16 }
 0x17b   : > { %v2499_v62 = vsel %vm14646_vm5, %v11509_v24, %v2498_v21  ;;  %v2500_v14 = vrot.slane %v2498_v21, 4  ;;  %v2240_v0 = vrot.slane %v2238_v50, 5  ;;  %v2244_v2 = vrot.slane %v2242_v31, 4  ;;  %v2759_v24 = vld [vmem:[#allocation3 + $0x1c] sm:$0xf] }
 0x17c   : > { %v2526_v56 = vunpack.c.l.b16 %v2499_v62  ;;  %v2083_v59 = vor.u32 %v2081_v15, %v2080_v53  ;;  %v2085_v10 = vrot.slane %v2080_v53, 4  ;;  %v2250_v63 = vrot.slane %v2248_v28, 5  ;;  %v2982_v53 = vld [vmem:[#allocation3 + $0x18] sm:$0xe] }
 0x17d   : > { %v2502_v57 = vsel %vm14646_vm5, %v2500_v14, %v2501_v33  ;;  %v2245_v11 = vor.u32 %v2244_v2, %v2240_v0  ;;  %v2241_v54 = vsel %vm14634_vm4, %v2236_v8, %v2240_v0  ;;  %v3000_v1 = vsel %vm14646_vm5, %v11670_v23, %v2999_v37  ;;  %v15485_v33 = vld [vmem:[#allocation3 + $0x20] sm:$0x1] }
 0x17e   : > { %v2527_v39 = vunpack.c.l.b16 %v2502_v57  ;;  %v2084_v46 = vsel %vm14724_vm12, %v2076_v12, %v2083_v59  ;;  %v2125_v60 = vsel %vm14731_vm13, %v2085_v10, %v2124_v35  ;;  %v2275_v43 = vunpack.c.l.b16 %v2241_v54  ;;  %v15487_v14 = vld [vmem:[#allocation3 + $0x20] sm:$0x1]  ;;  %v15493_v12 = vld [vmem:[#allocation3 + $0x28] sm:$0xf]  ;;  %v14043_v10 = vld [vmem:[#allocation3 + $0x18] sm:$0xff] }
 0x17f   : > { %v2246_v42 = vrot.slane %v2245_v11, 4  ;;  %2123 = vst [vmem:[#allocation3 + $0x34] sm:$0xf] %v2084_v46  ;;  %v2770_v16 = vrot.slane %v2768_v7, 4  ;;  %v3043_v44 = vunpack.c.l.b16 %v3003_v5  ;;  %v2773_v38 = vrot.slane %v2771_v26, 5 }
 0x180   : > { %v2531_v4 = vpack.c.b16 %v2527_v39, %v2526_v56  ;;  %2126 = vst [vmem:[#allocation3 + $0x38] sm:$0x1] %v2125_v60  ;;  %v2784_v32 = vor.u32 %v2783_v19, %v15461_v58  ;;  %v3291_v48 = vshrl.u32 %v3278_v6, 16  ;;  %v3294_v41 = vshll.u32 %v3278_v6, 16  ;;  %v2758_v56 = vld [vmem:[#allocation3 + $0x18] sm:$0xf] }
 0x181   : > { %v2251_v9 = vsel %vm14634_vm4, %v2246_v42, %v2250_v63  ;;  %v3302_v47 = vrot.slane %v3300_v22, 5  ;;  %v3306_v21 = vrot.slane %v3304_v17, 4  ;;  %v3042_v51 = vunpack.c.l.b16 %v3000_v1  ;;  %v3281_v42 = vld [vmem:[#allocation3 + $0x24] sm:$0xf] }
 0x182   : > { %2607 = vmatmul.bf16.gmra.mxu3 %v2531_v4  ;;  %v2276_v61 = vunpack.c.l.b16 %v2251_v9  ;;  %v2787_v52 = vshll.u32 %v15437_v29, 16  ;;  %v2774_v3 = vor.u32 %v2773_v38, %v2770_v16  ;;  %v3006_v7 = vrot.slane %v2759_v24, 5 }
 0x183   : > { %v3050_v50 = vpack.c.b16 %v3043_v44, %v3042_v51  ;;  %v2785_v20 = vrot.slane %v2784_v32, 4  ;;  %v3293_v26 = vrot.slane %v3291_v48, 4  ;;  %v3296_v31 = vrot.slane %v3294_v41, 5 }
 0x184   : > { %v2280_v55 = vpack.c.b16 %v2276_v61, %v2275_v43  ;;  %v3307_v25 = vor.u32 %v3306_v21, %v3302_v47  ;;  %v2789_v62 = vrot.slane %v2787_v52, 5  ;;  %v3310_v0 = vshll.u32 %v15485_v33, 16  ;;  %v2762_v61 = vld [vmem:[#allocation3 + $0x28] sm:$0xf]  ;;  %v15513_v52 = vld [vmem:[#allocation3 + $0x2c] sm:$0x1] }
 0x185   : > { %v3008_v28 = vrot.slane %v3006_v7, 4  ;;  %v2775_v29 = vrot.slane %v2774_v3, 4  ;;  %v3297_v15 = vor.u32 %v3296_v31, %v3293_v26  ;;  %v3009_v13 = vrot.slane %v15487_v14, 5  ;;  %v2983_v31 = vld [vmem:[#allocation3 + $0x24] sm:$0xe] }
 0x186   : > { %2356 = vmatmul.bf16.gmra.mxu1 %v2280_v55  ;;  %v14018_v37 = vld [vmem:[#allocation3 + $0x30] sm:$0xff]  ;;  %v2790_v40 = vsel %vm14634_vm4, %v2785_v20, %v2789_v62  ;;  %v3308_v2 = vrot.slane %v3307_v25, 4  ;;  %v3312_v57 = vrot.slane %v3310_v0, 5  ;;  %v2801_v8 = vshll.u32 %v2759_v24, 16  ;;  %v15520_v62 = vld [vmem:[#allocation3 + $0x2c] sm:$0x1] }
 0x187   : > { %3114 = vmatmul.bf16.vlgmr.msrb.gmra.mxu2 %v3050_v50  ;;  %v2780_v35 = vsel %vm14634_vm4, %v2775_v29, %v15461_v58  ;;  %v2805_v59 = vshrl.u32 %v2759_v24, 16  ;;  %v2881_v39 = vunpack.c.l.b16 %v2790_v40  ;;  %v11671_v11 = vrot.slane %v2982_v53, 9 }
 0x188   : > { %2741 = vmatmul.bf16.gmra.mxu0 %v14018_v37  ;;  %v3010_v36 = vsel %vm14646_vm5, %v3008_v28, %v3009_v13  ;;  %v3298_v54 = vrot.slane %v3297_v15, 4  ;;  %v3313_v63 = vsel %vm14634_vm4, %v3308_v2, %v3312_v57  ;;  %v3324_v19 = vshll.u32 %v15493_v12, 16  ;;  %v14070_v37 = vld [vmem:[%s18292_s1 + $0x478] sm:$0xff]  ;;  %v14069_v28 = vld [vmem:[%s18292_s1 + $0x470] sm:$0xff]  ;;  %v2761_v2 = vld [vmem:[#allocation3 + $0x24] sm:$0xf] }
 0x189   : > { %v3328_v46 = vshrl.u32 %v15493_v12, 16  ;;  %v2880_v58 = vunpack.c.l.b16 %v2780_v35  ;;  %v2792_v60 = vshrl.u32 %v2758_v56, 16  ;;  %v2795_v4 = vshll.u32 %v2758_v56, 16  ;;  %3629 = vmatpush.bf16.msra.mxu1 %v14070_v37  ;;  %v2765_v37 = vld [vmem:[#allocation3 + $0x34] sm:$0xf] }
 0x18a   : > { %v3007_v23 = vsel %vm14646_vm5, %v11671_v11, %v3006_v7  ;;  %v3303_v5 = vsel %vm14634_vm4, %v3298_v54, %v3302_v47  ;;  %v15508_v6 = vrot.slane %v2801_v8, 5  ;;  %v2807_v9 = vrot.slane %v2805_v59, 4  ;;  %v15527_v8 = vld [vmem:[#allocation3 + $0x34] sm:$0xf]  ;;  %v14068_v11 = vld [vmem:[%s18292_s1 + $0x468] sm:$0xff] }
 0x18b   : > { %v2888_v22 = vpack.c.b16 %v2881_v39, %v2880_v58  ;;  %v3045_v17 = vunpack.c.l.b16 %v3010_v36  ;;  %v3404_v43 = vunpack.c.l.b16 %v3313_v63  ;;  %v3315_v1 = vshrl.u32 %v3281_v42, 16  ;;  %v14044_v36 = vld [vmem:[#allocation3 + $0x24] sm:$0xff] }
 0x18c   : > { %v3318_v16 = vshll.u32 %v3281_v42, 16  ;;  %v15510_v44 = vrot.slane %v3324_v19, 5  ;;  %v3330_v38 = vrot.slane %v3328_v46, 4  ;;  %v3044_v32 = vunpack.c.l.b16 %v3007_v23 }
 0x18d   : > { %v3403_v48 = vunpack.c.l.b16 %v3303_v5  ;;  %v2794_v55 = vrot.slane %v2792_v60, 4  ;;  %v2797_v24 = vrot.slane %v2795_v4, 5  ;;  %v2808_v41 = vor.u32 %v2807_v9, %v15508_v6  ;;  %3630 = vmatpush.bf16.msra.mxu1 %v14069_v28  ;;  %v3284_v4 = vld [vmem:[#allocation3 + $0x30] sm:$0xf] }
 0x18e   : > { %v3051_v47 = vpack.c.b16 %v3045_v17, %v3044_v32  ;;  %v3013_v51 = vrot.slane %v2762_v61, 5  ;;  %v2811_v50 = vshll.u32 %v15487_v14, 16  ;;  %v3317_v3 = vrot.slane %v3315_v1, 4 }
 0x18f   : > { %v3411_v21 = vpack.c.b16 %v3404_v43, %v3403_v48  ;;  %v3320_v7 = vrot.slane %v3318_v16, 5  ;;  %v3331_v20 = vor.u32 %v3330_v38, %v15510_v44  ;;  %v2798_v26 = vor.u32 %v2797_v24, %v2794_v55 }
 0x190   : > { %v2809_v25 = vrot.slane %v2808_v41, 4  ;;  %v3334_v0 = vshll.u32 %v15513_v52, 16  ;;  %v3015_v29 = vrot.slane %v3013_v51, 4  ;;  %v2813_v14 = vrot.slane %v2811_v50, 5  ;;  %v15556_v50 = vld [vmem:[#allocation3 + $0x38] sm:$0x1] }
 0x191   : > { %v11672_v40 = vrot.slane %v2983_v31, 9  ;;  %v3321_v53 = vor.u32 %v3320_v7, %v3317_v3  ;;  %v3332_v15 = vrot.slane %v3331_v20, 4  ;;  %v2799_v13 = vrot.slane %v2798_v26, 4  ;;  %3631 = vmatpush.bf16.msra.mxu1 %v14068_v11  ;;  %v14066_v31 = vld [vmem:[%s18292_s1 + $0x458] sm:$0xff] }
 0x192   : > { %3249 = vmatmul.bf16.vlgmr.msrb.gmra.mxu3 %v14043_v10  ;;  %v3016_v35 = vrot.slane %v15520_v62, 5  ;;  %v2825_v57 = vshll.u32 %v2762_v61, 16  ;;  %v2829_v56 = vshrl.u32 %v2762_v61, 16  ;;  %v2814_v59 = vsel %vm14634_vm4, %v2809_v25, %v2813_v14  ;;  %v14067_v61 = vld [vmem:[%s18292_s1 + $0x460] sm:$0xff] }
 0x193   : > { %v3014_v10 = vsel %vm14646_vm5, %v11672_v40, %v3013_v51  ;;  %v3336_v39 = vrot.slane %v3334_v0, 5  ;;  %v2804_v54 = vsel %vm14634_vm4, %v2799_v13, %v15508_v6  ;;  %v2816_v19 = vshrl.u32 %v2761_v2, 16  ;;  %v2984_v0 = vld [vmem:[#allocation3 + $0x30] sm:$0xe]  ;;  %v15563_v40 = vld [vmem:[#allocation3 + $0x38] sm:$0x1] }
 0x194   : > { %v3017_v63 = vsel %vm14646_vm5, %v3015_v29, %v3016_v35  ;;  %v2819_v46 = vshll.u32 %v2761_v2, 16  ;;  %v3322_v58 = vrot.slane %v3321_v53, 4  ;;  %v3348_v42 = vshll.u32 %v15527_v8, 16  ;;  %v3287_v35 = vld [vmem:[#allocation3 + $0x3c] sm:$0xf] }
 0x195   : > { %v3337_v60 = vsel %vm14634_vm4, %v3332_v15, %v3336_v39  ;;  %v3352_v23 = vshrl.u32 %v15527_v8, 16  ;;  %v2883_v5 = vunpack.c.l.b16 %v2814_v59  ;;  %v15545_v9 = vrot.slane %v2825_v57, 5  ;;  %3632 = vmatpush.bf16.msra.mxu1 %v14067_v61  ;;  %v15569_v57 = vld [vmem:[#allocation3 + $0x40] sm:$0xf] }
 0x196   : > { %2952 = vmatmul.bf16.vlgmr.msrb.gmra.mxu1 %v2888_v22  ;;  %v2831_v22 = vrot.slane %v2829_v56, 4  ;;  %v3046_v6 = vunpack.c.l.b16 %v3014_v10  ;;  %v3047_v17 = vunpack.c.l.b16 %v3017_v63  ;;  %v3327_v43 = vsel %vm14634_vm4, %v3322_v58, %v15510_v44 }
 0x197   : > { %3119 = vmatmul.bf16.gmra.mxu2 %v3051_v47  ;;  %v2882_v1 = vunpack.c.l.b16 %v2804_v54  ;;  %v3406_v16 = vunpack.c.l.b16 %v3337_v60  ;;  %v3339_v38 = vshrl.u32 %v3284_v4, 16  ;;  %v3342_v32 = vshll.u32 %v3284_v4, 16  ;;  %v2764_v54 = vld [vmem:[#allocation3 + $0x30] sm:$0xf] }
 0x198   : > { %3475 = vmatmul.bf16.vlgmr.msra.gmra.mxu0 %v3411_v21  ;;  %v2818_v48 = vrot.slane %v2816_v19, 4  ;;  %v2821_v55 = vrot.slane %v2819_v46, 5  ;;  %v15553_v24 = vrot.slane %v3348_v42, 5  ;;  %v3354_v41 = vrot.slane %v3352_v23, 4  ;;  %v14064_v42 = vld [vmem:[%s18292_s1 + $0x448] sm:$0xff]  ;;  %v14045_v23 = vld [vmem:[#allocation3 + $0x30] sm:$0xff] }
 0x199   : > { %v2889_v47 = vpack.c.b16 %v2883_v5, %v2882_v1  ;;  %v3405_v21 = vunpack.c.l.b16 %v3327_v43  ;;  %v2832_v51 = vor.u32 %v2831_v22, %v15545_v9  ;;  %v3052_v44 = vpack.c.b16 %v3047_v17, %v3046_v6  ;;  %3633 = vmatpush.bf16.msra.mxu1 %v14066_v31 }
 0x19a   : > { %v2835_v7 = vshll.u32 %v15520_v62, 16  ;;  %v3341_v20 = vrot.slane %v3339_v38, 4  ;;  %v3344_v26 = vrot.slane %v3342_v32, 5  ;;  %v2822_v25 = vor.u32 %v2821_v55, %v2818_v48  ;;  %v14065_v62 = vld [vmem:[%s18292_s1 + $0x450] sm:$0xff] }
 0x19b   : > { %v3412_v3 = vpack.c.b16 %v3406_v16, %v3405_v21  ;;  %v3020_v28 = vrot.slane %v2765_v37, 5  ;;  %v3355_v29 = vor.u32 %v3354_v41, %v15553_v24  ;;  %v2833_v14 = vrot.slane %v2832_v51, 4  ;;  %v14063_v21 = vld [vmem:[%s18292_s1 + $0x440] sm:$0xff] }
 0x19c   : > { %v3358_v53 = vshll.u32 %v15556_v50, 16  ;;  %v2837_v15 = vrot.slane %v2835_v7, 5  ;;  %v11673_v2 = vrot.slane %v2984_v0, 9  ;;  %v3345_v13 = vor.u32 %v3344_v26, %v3341_v20 }
 0x19d   : > { %v2823_v56 = vrot.slane %v2822_v25, 4  ;;  %v3022_v59 = vrot.slane %v3020_v28, 4  ;;  %v3023_v10 = vrot.slane %v15563_v40, 5  ;;  %v3356_v39 = vrot.slane %v3355_v29, 4  ;;  %3634 = vmatpush.bf16.msra.mxu1 %v14065_v62 }
 0x19e   : > { %v2838_v11 = vsel %vm14634_vm4, %v2833_v14, %v2837_v15  ;;  %v2849_v63 = vshll.u32 %v2765_v37, 16  ;;  %v2853_v19 = vshrl.u32 %v2765_v37, 16  ;;  %v3363_v46 = vshrl.u32 %v3287_v35, 16 }
 0x19f   : > { %v3366_v58 = vshll.u32 %v3287_v35, 16  ;;  %v3372_v60 = vshll.u32 %v15569_v57, 16  ;;  %v3376_v4 = vshrl.u32 %v15569_v57, 16  ;;  %v2828_v5 = vsel %vm14634_vm4, %v2823_v56, %v15545_v9 }
 0x1a0   : > { %v3021_v22 = vsel %vm14646_vm5, %v11673_v2, %v3020_v28  ;;  %v3346_v6 = vrot.slane %v3345_v13, 4  ;;  %v2885_v17 = vunpack.c.l.b16 %v2838_v11  ;;  %v3024_v43 = vsel %vm14646_vm5, %v3022_v59, %v3023_v10  ;;  %v14046_v10 = vld [vmem:[#allocation3 + $0x3c] sm:$0xff] }
 0x1a1   : > { %v2840_v1 = vshrl.u32 %v2764_v54, 16  ;;  %v2843_v38 = vshll.u32 %v2764_v54, 16  ;;  %v2851_v32 = vrot.slane %v2849_v63, 5  ;;  %v2855_v9 = vrot.slane %v2853_v19, 4  ;;  %3635 = vmatpush.bf16.msra.mxu1 %v14064_v42 }
 0x1a2   : > { %3254 = vmatmul.bf16.gmra.mxu3 %v14044_v36  ;;  %v3360_v36 = vrot.slane %v3358_v53, 5  ;;  %v3351_v16 = vsel %vm14634_vm4, %v3346_v6, %v15553_v24  ;;  %v3365_v48 = vrot.slane %v3363_v46, 4  ;;  %v3368_v55 = vrot.slane %v3366_v58, 5 }
 0x1a3   : > { %v3374_v41 = vrot.slane %v3372_v60, 5  ;;  %v2884_v51 = vunpack.c.l.b16 %v2828_v5  ;;  %v3049_v37 = vunpack.c.l.b16 %v3024_v43  ;;  %v3048_v7 = vunpack.c.l.b16 %v3021_v22  ;;  %v3504_v5 = vld [vmem:[#allocation3 + $0x18] sm:$0xe] }
 0x1a4   : > { %v3361_v61 = vsel %vm14634_vm4, %v3356_v39, %v3360_v36  ;;  %v3407_v24 = vunpack.c.l.b16 %v3351_v16  ;;  %v2842_v26 = vrot.slane %v2840_v1, 4  ;;  %v2845_v31 = vrot.slane %v2843_v38, 5  ;;  %v15612_v1 = vpop.f32.mrf.mxu1 }
 0x1a5   : > { %v2890_v20 = vpack.c.b16 %v2885_v17, %v2884_v51  ;;  %v2856_v25 = vor.u32 %v2855_v9, %v2851_v32  ;;  %v3369_v0 = vor.u32 %v3368_v55, %v3365_v48  ;;  %3636 = vmatpush.bf16.msra.mxu1 %v14063_v21  ;;  %v3053_v14 = vpack.c.b16 %v3049_v37, %v3048_v7  ;;  %v3505_v9 = vld [vmem:[#allocation3 + $0x24] sm:$0xe]  ;;  %v3507_v7 = vld [vmem:[#allocation3 + $0x3c] sm:$0xe] }
 0x1a6   : > { %2957 = vmatmul.bf16.gmra.mxu1 %v2889_v47  ;;  %v3378_v47 = vrot.slane %v3376_v4, 4  ;;  %v2859_v62 = vshll.u32 %v15563_v40, 16  ;;  %v2846_v15 = vor.u32 %v2845_v31, %v2842_v26  ;;  %v3522_v42 = vrot.slane %v15463_v18, 5 }
 0x1a7   : > { %3124 = vmatmul.bf16.gmra.mxu2 %v3052_v44  ;;  %v3408_v44 = vunpack.c.l.b16 %v3361_v61  ;;  %v2857_v2 = vrot.slane %v2856_v25, 4  ;;  %v3370_v13 = vrot.slane %v3369_v0, 4  ;;  %v3525_v22 = vrot.slane %v15485_v33, 5  ;;  %v15629_v0 = vpop.f32.mrf.mxu2 }
 0x1a8   : > { %3480 = vmatmul.bf16.gmra.mxu0 %v3412_v3  ;;  %v15594_v3 = vld [vmem:[#allocation3 + $0x44] sm:$0x1]  ;;  %v3379_v28 = vor.u32 %v3378_v47, %v3374_v41  ;;  %v2861_v59 = vrot.slane %v2859_v62, 5  ;;  %v2847_v39 = vrot.slane %v2846_v15, 4  ;;  %v11834_v6 = vrot.slane %v3504_v5, 9 }
 0x1a9   : > { %v3382_v29 = vshll.u32 %v15594_v3, 16  ;;  %v3413_v53 = vpack.c.b16 %v3408_v44, %v3407_v24  ;;  %v3375_v36 = vsel %vm14634_vm4, %v3370_v13, %v3374_v41  ;;  %v3529_v18 = vrot.slane %v15493_v12, 5 }
 0x1aa   : > { %v3380_v35 = vrot.slane %v3379_v28, 4  ;;  %v2862_v11 = vsel %vm14634_vm4, %v2857_v2, %v2861_v59  ;;  %v2852_v40 = vsel %vm14634_vm4, %v2847_v39, %v2851_v32  ;;  %v3409_v19 = vunpack.c.l.b16 %v3375_v36  ;;  %v3506_v28 = vld [vmem:[#allocation3 + $0x30] sm:$0xe]  ;;  %v2593_v2 = vpop.f32.mrf.mxu3 }
 0x1ab   : > { %v3384_v56 = vrot.slane %v3382_v29, 5  ;;  %v2887_v63 = vunpack.c.l.b16 %v2862_v11  ;;  %v2886_v58 = vunpack.c.l.b16 %v2852_v40  ;;  %v3523_v43 = vsel %vm14646_vm5, %v11834_v6, %v3522_v42 }
 0x1ac   : > { %v3565_v16 = vunpack.c.l.b16 %v3523_v43  ;;  %v3531_v32 = vrot.slane %v3529_v18, 4  ;;  %v15615_v48 = vpop.f32.mrf.mxu1  ;;  %v3532_v33 = vrot.slane %v15513_v52, 5  ;;  %v11835_v55 = vrot.slane %v3505_v9, 9 }
 0x1ad   : > { %v3385_v54 = vsel %vm14634_vm4, %v3380_v35, %v3384_v56  ;;  %v2891_v60 = vpack.c.b16 %v2887_v63, %v2886_v58  ;;  %v3536_v12 = vrot.slane %v15527_v8, 5  ;;  %v3546_v52 = vrot.slane %v15594_v3, 5 }
 0x1ae   : > { %v3410_v46 = vunpack.c.l.b16 %v3385_v54  ;;  %v3533_v41 = vsel %vm14646_vm5, %v3531_v32, %v3532_v33  ;;  %v3530_v47 = vsel %vm14646_vm5, %v11835_v55, %v3529_v18  ;;  %v11837_v24 = vrot.slane %v3507_v7, 9  ;;  %v14082_v32 = vld [vmem:[%s18292_s1 + $0x4b8] sm:$0xff]  ;;  %v14081_v55 = vld [vmem:[%s18292_s1 + $0x4b0] sm:$0xff]  ;;  %v14088_v7 = vld [vmem:[%s18292_s1 + $0x4e8] sm:$0xff] }
 0x1af   : > { %v3568_v21 = vunpack.c.l.b16 %v3533_v41  ;;  %v3567_v51 = vunpack.c.l.b16 %v3530_v47  ;;  %v3538_v31 = vrot.slane %v3536_v12, 4  ;;  %v11836_v62 = vrot.slane %v3506_v28, 9  ;;  %v15644_v39 = vpop.f32.mrf.mxu2  ;;  %4110 = vmatpush.bf16.msra.mxu3 %v14082_v32  ;;  %v14090_v33 = vld [vmem:[%s18292_s1 + $0x4f8] sm:$0xff]  ;;  %v14089_v47 = vld [vmem:[%s18292_s1 + $0x4f0] sm:$0xff] }
 0x1b0   : > { %v3414_v4 = vpack.c.b16 %v3410_v46, %v3409_v19  ;;  %4009 = vmatpush.bf16.msra.mxu2 %v14090_v33  ;;  %v14109_v33 = vld [vmem:[%s18292_s1 + $0x570] sm:$0xff] }
 0x1b1   : > { %v3574_v44 = vpack.c.b16 %v3568_v21, %v3567_v51  ;;  %v3537_v13 = vsel %vm14646_vm5, %v11836_v62, %v3536_v12  ;;  %v14098_v21 = vld [vmem:[%s18292_s1 + $0x538] sm:$0xff]  ;;  %v14080_v51 = vld [vmem:[%s18292_s1 + $0x4a8] sm:$0xff] }
 0x1b2   : > { %3259 = vmatmul.bf16.gmra.mxu3 %v14045_v23  ;;  %v3524_v23 = vrot.slane %v3522_v42, 4  ;;  %v3569_v59 = vunpack.c.l.b16 %v3537_v13  ;;  %4260 = vmatpush.bf16.msrb.mxu0 %v14098_v21  ;;  %v14096_v13 = vld [vmem:[%s18292_s1 + $0x528] sm:$0xff] }
 0x1b3   : > { %4111 = vmatpush.bf16.msra.mxu3 %v14081_v55 }
 0x1b4   : > { %v3526_v17 = vsel %vm14646_vm5, %v3524_v23, %v3525_v22  ;;  %4010 = vmatpush.bf16.msra.mxu2 %v14089_v47 }
 0x1b5   : > { %v3566_v61 = vunpack.c.l.b16 %v3526_v17 }
 0x1b6   : > { %2962 = vmatmul.bf16.gmra.mxu1 %v2890_v20  ;;  %v3543_v20 = vrot.slane %v15569_v57, 5 }
 0x1b7   : > { %3129 = vmatmul.bf16.gmra.mxu2 %v3053_v14  ;;  %v3573_v38 = vpack.c.b16 %v3566_v61, %v3565_v16  ;;  %4112 = vmatpush.bf16.msra.mxu3 %v14080_v51 }
 0x1b8   : > { %3485 = vmatmul.bf16.gmra.mxu0 %v3413_v53  ;;  %v3545_v26 = vrot.slane %v3543_v20, 4  ;;  %v3544_v25 = vsel %vm14646_vm5, %v11837_v24, %v3543_v20  ;;  %v3539_v53 = vrot.slane %v15556_v50, 5  ;;  %v15646_v50 = vpop.f32.mrf.mxu3  ;;  %v14097_v20 = vld [vmem:[%s18292_s1 + $0x530] sm:$0xff]  ;;  %4011 = vmatpush.bf16.msra.mxu2 %v14088_v7 }
 0x1b9   : > { %v3571_v14 = vunpack.c.l.b16 %v3544_v25  ;;  %4261 = vmatpush.bf16.msrb.mxu0 %v14097_v20 }
 0x1ba   : > { %v3547_v29 = vsel %vm14646_vm5, %v3545_v26, %v3546_v52  ;;  %v3540_v3 = vsel %vm14646_vm5, %v3538_v31, %v3539_v53  ;;  %v14079_v52 = vld [vmem:[%s18292_s1 + $0x4a0] sm:$0xff] }
 0x1bb   : > { %v3572_v57 = vunpack.c.l.b16 %v3547_v29  ;;  %v3570_v35 = vunpack.c.l.b16 %v3540_v3  ;;  %4113 = vmatpush.bf16.msra.mxu3 %v14079_v52  ;;  %v2444_v29 = vadd.f32 %v15629_v0, %v15612_v1  ;;  %v14110_v0 = vld [vmem:[%s18292_s1 + $0x578] sm:$0xff]  ;;  %v14085_v52 = vld [vmem:[%s18292_s1 + $0x4d0] sm:$0xff] }
 0x1bc   : > { %4394 = vmatpush.bf16.msrb.mxu1 %v14110_v0 }
 0x1bd   : > { %v3576_v15 = vpack.c.b16 %v3572_v57, %v3571_v14  ;;  %v3575_v11 = vpack.c.b16 %v3570_v35, %v3569_v59  ;;  %v2613_v53 = vadd.f32 %v2593_v2, %v2444_v29  ;;  %v14078_v35 = vld [vmem:[%s18292_s1 + $0x498] sm:$0xff]  ;;  %4262 = vmatpush.bf16.msrb.mxu0 %v14096_v13  ;;  %v14095_v59 = vld [vmem:[%s18292_s1 + $0x520] sm:$0xff]  ;;  %v14093_v29 = vld [vmem:[%s18292_s1 + $0x510] sm:$0xff] }
 0x1be   : > { %v14086_v2 = vld [vmem:[%s18292_s1 + $0x4d8] sm:$0xff] }
 0x1bf   : > { %4114 = vmatpush.bf16.msra.mxu3 %v14078_v35 }
 0x1c0   : > { %4395 = vmatpush.bf16.msrb.mxu1 %v14109_v33 }
 0x1c1   : > { %4263 = vmatpush.bf16.msrb.mxu0 %v14095_v59 }
 0x1c2   : > { %3264 = vmatmul.bf16.gmra.mxu3 %v14046_v10 }
 0x1c6   : > { %2967 = vmatmul.bf16.gmra.mxu1 %v2891_v60 }
 0x1c8   : > { %3490 = vmatmul.bf16.gmra.mxu0 %v3414_v4 }
 0x1d5   : > { %v15640_v56 = vpop.f32.mrf.mxu0 }
 0x1d6   : > { %3637 = vmatmul.bf16.vlgmr.msra.gmra.mxu1 %v3573_v38  ;;  %v2747_v1 = vadd.f32 %v15640_v56, %v2613_v53  ;;  %v14077_v56 = vld [vmem:[%s18292_s1 + $0x490] sm:$0xff]  ;;  %v14075_v53 = vld [vmem:[%s18292_s1 + $0x480] sm:$0xff] }
 0x1d7   : > { %4115 = vmatpush.bf16.msra.mxu3 %v14077_v56  ;;  %v15811_v56 = vld [vmem:[#allocation2 + $0x8] sm:$0x1] }
 0x1da   : > { %v15650_v54 = vpop.f32.mrf.mxu2 }
 0x1dd   : > { %v15652_v40 = vpop.f32.mrf.mxu0 }
 0x1e2   : > { %v15658_v46 = vpop.f32.mrf.mxu2 }
 0x1e3   : > { %v15622_v37 = vpop.f32.mrf.mxu1 }
 0x1e4   : > { %v2449_v47 = vadd.f32 %v15650_v54, %v15622_v37  ;;  %v14094_v37 = vld [vmem:[%s18292_s1 + $0x518] sm:$0xff]  ;;  %v14108_v54 = vld [vmem:[%s18292_s1 + $0x568] sm:$0xff] }
 0x1e5   : > { %v15654_v63 = vpop.f32.mrf.mxu3  ;;  %v15660_v58 = vpop.f32.mrf.mxu0  ;;  %4264 = vmatpush.bf16.msrb.mxu0 %v14094_v37  ;;  %4396 = vmatpush.bf16.msrb.mxu1 %v14108_v54 }
 0x1e6   : > { %3642 = vmatmul.bf16.gmra.mxu1 %v3574_v44  ;;  %v2615_v51 = vadd.f32 %v15654_v63, %v2449_v47 }
 0x1e9   : > { %4265 = vmatpush.bf16.msrb.mxu0 %v14093_v29  ;;  %v14091_v29 = vld [vmem:[%s18292_s1 + $0x500] sm:$0xff] }
 0x1ea   : > { %v15666_v42 = vpop.f32.mrf.mxu2 }
 0x1eb   : > { %v15633_v8 = vpop.f32.mrf.mxu1 }
 0x1ed   : > { %v15662_v60 = vpop.f32.mrf.mxu3  ;;  %v15668_v23 = vpop.f32.mrf.mxu0 }
 0x1f2   : > { %v15672_v6 = vpop.f32.mrf.mxu2 }
 0x1f3   : > { %v15642_v10 = vpop.f32.mrf.mxu1 }
 0x1f5   : > { %v15670_v22 = vpop.f32.mrf.mxu3  ;;  %v15674_v17 = vpop.f32.mrf.mxu0 }
 0x1f6   : > { %3647 = vmatmul.bf16.gmra.mxu1 %v3575_v11  ;;  %v2446_v11 = vadd.f32 %v15644_v39, %v15615_v48 }
 0x1f8   : > { %v2614_v21 = vadd.f32 %v15646_v50, %v2446_v11  ;;  %v14076_v50 = vld [vmem:[%s18292_s1 + $0x488] sm:$0xff]  ;;  %v3803_v11 = vld [vmem:[#allocation2] sm:$0xf] }
 0x1f9   : > { %4116 = vmatpush.bf16.msra.mxu3 %v14076_v50  ;;  %v3833_v33 = vshrl.u32 %v3803_v11, 16  ;;  %v3836_v47 = vshll.u32 %v3803_v11, 16 }
 0x1fa   : > { %v15682_v38 = vpop.f32.mrf.mxu2 }
 0x1fb   : > { %v15648_v36 = vpop.f32.mrf.mxu1  ;;  %v3835_v54 = vrot.slane %v3833_v33, 4 }
 0x1fd   : > { %v15678_v61 = vpop.f32.mrf.mxu3  ;;  %v15684_v18 = vpop.f32.mrf.mxu0  ;;  %4117 = vmatpush.bf16.msra.mxu3 %v14075_v53 }
 0x202   : > { %v15708_v44 = vpop.f32.mrf.mxu2 }
 0x203   : > { %v15656_v19 = vpop.f32.mrf.mxu1 }
 0x205   : > { %v15689_v9 = vpop.f32.mrf.mxu3  ;;  %v15710_v12 = vpop.f32.mrf.mxu0 }
 0x206   : > { %3652 = vmatmul.bf16.gmra.mxu1 %v3576_v15  ;;  %v14087_v15 = vld [vmem:[%s18292_s1 + $0x4e0] sm:$0xff] }
 0x207   : > { %4012 = vmatpush.bf16.msra.mxu2 %v14087_v15  ;;  %v2451_v15 = vadd.f32 %v15658_v46, %v15633_v8  ;;  %v14071_v8 = vld [vmem:[#allocation2] sm:$0xff]  ;;  %v14092_v46 = vld [vmem:[%s18292_s1 + $0x508] sm:$0xff] }
 0x208   : > { %4118 = vmatmul.bf16.vlgmr.msra.gmra.mxu3 %v14071_v8  ;;  %4266 = vmatpush.bf16.msrb.mxu0 %v14092_v46 }
 0x20a   : > { %v3115_v31 = vpop.f32.mrf.mxu2 }
 0x20b   : > { %v15664_v4 = vpop.f32.mrf.mxu1  ;;  %4013 = vmatpush.bf16.msra.mxu2 %v14086_v2  ;;  %v15799_v2 = vld [vmem:[%s18293_s2 + $0x1] ss:$0 sm:$0xff] }
 0x20c   : > { %4267 = vmatpush.bf16.msrb.mxu0 %v14091_v29 }
 0x20d   : > { %v15721_v24 = vpop.f32.mrf.mxu3  ;;  %v15725_v25 = vpop.f32.mrf.mxu0 }
 0x20f   : > { %4014 = vmatpush.bf16.msra.mxu2 %v14085_v52 }
 0x212   : > { %v3117_v57 = vpop.f32.mrf.mxu2 }
 0x213   : > { %v2953_v5 = vpop.f32.mrf.mxu1 }
 0x214   : > { %v2973_v32 = vadd.f32 %v2953_v5, %v2747_v1  ;;  %v2748_v5 = vadd.f32 %v15652_v40, %v2614_v21 }
 0x215   : > { %v3250_v14 = vpop.f32.mrf.mxu3  ;;  %v3476_v62 = vpop.f32.mrf.mxu0 }
 0x216   : > { %v3135_v48 = vadd.f32 %v3115_v31, %v2973_v32  ;;  %v14084_v31 = vld [vmem:[%s18292_s1 + $0x4c8] sm:$0xff]  ;;  %v3804_v32 = vld [vmem:[#allocation2 + $0x4] sm:$0xf] }
 0x217   : > { %4015 = vmatpush.bf16.msra.mxu2 %v14084_v31  ;;  %v3842_v21 = vshll.u32 %v3804_v32, 16 }
 0x218   : > { %v3270_v40 = vadd.f32 %v3250_v14, %v3135_v48  ;;  %v2749_v14 = vadd.f32 %v15660_v58, %v2615_v51  ;;  %v14083_v58 = vld [vmem:[%s18292_s1 + $0x4c0] sm:$0xff]  ;;  %v3846_v48 = vshrl.u32 %v3804_v32, 16 }
 0x21a   : > { %v3120_v7 = vpop.f32.mrf.mxu2  ;;  %v3496_v35 = vadd.f32 %v3476_v62, %v3270_v40  ;;  %v14106_v62 = vld [vmem:[%s18292_s1 + $0x558] sm:$0xff]  ;;  %v3838_v40 = vrot.slane %v3836_v47, 5  ;;  %v3848_v31 = vrot.slane %v3846_v48, 4  ;;  %v4153_v47 = vrot.slane %v3804_v32, 5 }
 0x21b   : > { %v15676_v43 = vpop.f32.mrf.mxu1  ;;  %4016 = vmatpush.bf16.msra.mxu2 %v14083_v58 }
 0x21c   : > { %v2974_v63 = vadd.f32 %v15676_v43, %v2748_v5  ;;  %v14107_v43 = vld [vmem:[%s18292_s1 + $0x560] sm:$0xff] }
 0x21d   : > { %v3252_v55 = vpop.f32.mrf.mxu3  ;;  %v3478_v20 = vpop.f32.mrf.mxu0  ;;  %4397 = vmatpush.bf16.msrb.mxu1 %v14107_v43  ;;  %v3839_v43 = vor.u32 %v3838_v40, %v3835_v54  ;;  %v4155_v54 = vrot.slane %v4153_v47, 4  ;;  %v14103_v40 = vld [vmem:[%s18292_s1 + $0x540] sm:$0xff] }
 0x21e   : > { %v3136_v1 = vadd.f32 %v3117_v57, %v2974_v63  ;;  %v3844_v63 = vrot.slane %v3842_v21, 5 }
 0x220   : > { %v3271_v5 = vadd.f32 %v3252_v55, %v3136_v1  ;;  %v14105_v55 = vld [vmem:[%s18292_s1 + $0x550] sm:$0xff] }
 0x221   : > { %4398 = vmatpush.bf16.msrb.mxu1 %v14106_v62 }
 0x222   : > { %v3122_v52 = vpop.f32.mrf.mxu2  ;;  %v3497_v1 = vadd.f32 %v3478_v20, %v3271_v5 }
 0x223   : > { %v15680_v16 = vpop.f32.mrf.mxu1 }
 0x224   : > { %v2975_v0 = vadd.f32 %v15680_v16, %v2749_v14  ;;  %v2616_v16 = vadd.f32 %v15662_v60, %v2451_v15  ;;  %v3852_v60 = vshll.u32 %v15811_v56, 16  ;;  %v3849_v14 = vor.u32 %v3848_v31, %v3844_v63 }
 0x225   : > { %v3255_v13 = vpop.f32.mrf.mxu3  ;;  %v3481_v37 = vpop.f32.mrf.mxu0  ;;  %4399 = vmatpush.bf16.msrb.mxu1 %v14105_v55 }
 0x226   : > { %v3137_v51 = vadd.f32 %v3120_v7, %v2975_v0  ;;  %v2750_v53 = vadd.f32 %v15668_v23, %v2616_v16  ;;  %v3854_v15 = vrot.slane %v3852_v60, 5  ;;  %v3850_v62 = vrot.slane %v3849_v14, 4  ;;  %v4139_v16 = vld [vmem:[#allocation2] sm:$0xe] }
 0x227   : > { %v11999_v20 = vrot.slane %v4139_v16, 9 }
 0x229   : > { %v4154_v60 = vsel %vm14646_vm5, %v11999_v20, %v4153_v47 }
 0x22b   : > { %v15697_v41 = vpop.f32.mrf.mxu1 }
 0x22c   : > { %v2976_v58 = vadd.f32 %v15697_v41, %v2750_v53  ;;  %v3855_v41 = vsel %vm14634_vm4, %v3850_v62, %v3854_v15 }
 0x22d   : > { %v3257_v8 = vpop.f32.mrf.mxu3  ;;  %v3483_v31 = vpop.f32.mrf.mxu0 }
 0x22e   : > { %v3138_v14 = vadd.f32 %v3122_v52, %v2976_v58 }
 0x230   : > { %v3273_v52 = vadd.f32 %v3257_v8, %v3138_v14 }
 0x232   : > { %v3499_v20 = vadd.f32 %v3483_v31, %v3273_v52 }
 0x233   : > { %v15723_v26 = vpop.f32.mrf.mxu1 }
 0x23b   : > { %v15727_v28 = vpop.f32.mrf.mxu1 }
 0x243   : > { %v15731_v3 = vpop.f32.mrf.mxu1 }
 0x24b   : > { %v15763_v39 = vpop.f32.mrf.mxu1 }
 0x253   : > { %v3638_v59 = vpop.f32.mrf.mxu1 }
 0x254   : > { %v3658_v57 = vadd.f32 %v3638_v59, %v3496_v35  ;;  %v2454_v35 = vadd.f32 %v15666_v42, %v15642_v10  ;;  %v3272_v59 = vadd.f32 %v3255_v13, %v3137_v51  ;;  %v14104_v10 = vld [vmem:[%s18292_s1 + $0x548] sm:$0xff]  ;;  %v4156_v13 = vrot.slane %v15811_v56, 5 }
 0x255   : > { %v3946_v51 = vunpack.c.l.b16 %v3855_v41  ;;  %4400 = vmatpush.bf16.msrb.mxu1 %v14104_v10  ;;  %v2459_v41 = vadd.f32 %v15682_v38, %v15656_v19 }
 0x256   : > { %v3671_v50 = vadd.f32 %v15799_v2, %v3658_v57  ;;  %v3840_v57 = vrot.slane %v3839_v43, 4  ;;  %v2617_v32 = vadd.f32 %v15670_v22, %v2454_v35  ;;  %v3498_v53 = vadd.f32 %v3481_v37, %v3272_v59  ;;  %v3260_v59 = vpop.f32.mrf.mxu3 }
 0x257   : > { %v4157_v22 = vsel %vm14646_vm5, %v4155_v54, %v4156_v13  ;;  %v4196_v43 = vunpack.c.l.b16 %v4154_v60  ;;  %v3486_v13 = vpop.f32.mrf.mxu0  ;;  %v2619_v19 = vadd.f32 %v15689_v9, %v2459_v41 }
 0x258   : > { %v3679_v7 = vmax.f32 %v3671_v50, 0.0  ;;  %v3845_v42 = vsel %vm14634_vm4, %v3840_v57, %v3844_v63  ;;  %v3775_v50 = vld [vmem:[#allocation2 + $0xc] sm:$0xf]  ;;  %v3125_v63 = vpop.f32.mrf.mxu2 }
 0x259   : > { %v3945_v5 = vunpack.c.l.b16 %v3845_v42  ;;  %4401 = vmatpush.bf16.msrb.mxu1 %v14103_v40  ;;  %v2753_v9 = vadd.f32 %v15710_v12, %v2619_v19 }
 0x25a   : > { %v3687_v0 = vpack.c.bf16 %v3679_v7, %v3679_v7  ;;  %v2456_v7 = vadd.f32 %v15672_v6, %v15648_v36 }
 0x25b   : > { %v3640_v46 = vpop.f32.mrf.mxu1  ;;  %v3953_v55 = vpack.c.b16 %v3946_v51, %v3945_v5 }
 0x25c   : > { %v3696_v11 = vshrl.u32 %v3687_v0, 16  ;;  %v3699_v33 = vshll.u32 %v3687_v0, 16  ;;  %v3659_v23 = vadd.f32 %v3640_v46, %v3497_v1  ;;  %v4197_v1 = vunpack.c.l.b16 %v4157_v22 }
 0x25d   : > { %4017 = vmatmul.bf16.vlgmr.msra.gmra.mxu2 %v3953_v55  ;;  %v2751_v0 = vadd.f32 %v15674_v17, %v2617_v32  ;;  %v2618_v6 = vadd.f32 %v15678_v61, %v2456_v7  ;;  %v3782_v55 = vld [vmem:[#allocation2 + $0x18] sm:$0xf] }
 0x25e   : > { %v3698_v21 = vrot.slane %v3696_v11, 7  ;;  %v3672_v48 = vadd.f32 %v15799_v2, %v3659_v23  ;;  %v4204_v36 = vpack.c.b16 %v4197_v1, %v4196_v43  ;;  %v3779_v23 = vld [vmem:[#allocation2 + $0x14] sm:$0x1] }
 0x25f   : > { %v2977_v37 = vadd.f32 %v15723_v26, %v2751_v0  ;;  %v2752_v42 = vadd.f32 %v15684_v18, %v2618_v6  ;;  %v3488_v52 = vpop.f32.mrf.mxu0 }
 0x260   : > { %v3701_v56 = vor.u32 %v3699_v33, %v3698_v21  ;;  %v3680_v29 = vmax.f32 %v3672_v48, 0.0  ;;  %4268 = vmatmul.bf16.vlgmr.msrb.gmra.mxu0 %v4204_v36  ;;  %v3702_v16 = vrot.slane %v3698_v21, 4  ;;  %v3127_v26 = vpop.f32.mrf.mxu2 }
 0x261   : > { %v3139_v61 = vadd.f32 %v3125_v63, %v2977_v37  ;;  %v2978_v21 = vadd.f32 %v15727_v28, %v2752_v42 }
 0x262   : > { %v3776_v15 = vsel %vm14717_vm11, %v3701_v56, %v3775_v50  ;;  %v3688_v35 = vpack.c.bf16 %v3680_v29, %v3680_v29  ;;  %v2461_v56 = vadd.f32 %v15708_v44, %v15664_v4  ;;  %v3262_v29 = vpop.f32.mrf.mxu3 }
 0x263   : > { %3777 = vst [vmem:[#allocation2 + $0xc] sm:$0xf] %v3776_v15  ;;  %v3643_v46 = vpop.f32.mrf.mxu1  ;;  %v3274_v38 = vadd.f32 %v3260_v59, %v3139_v61  ;;  %v3140_v28 = vadd.f32 %v3127_v26, %v2978_v21 }
 0x264   : > { %v3704_v57 = vshrl.u32 %v3688_v35, 16  ;;  %v3660_v62 = vadd.f32 %v3643_v46, %v3498_v53  ;;  %v3707_v11 = vshll.u32 %v3688_v35, 16  ;;  %v2620_v44 = vadd.f32 %v15721_v24, %v2461_v56  ;;  %v14126_v24 = vld [vmem:[%s18292_s1 + $0x5f8] sm:$0xff] }
 0x265   : > { %v3500_v15 = vadd.f32 %v3486_v13, %v3274_v38  ;;  %4782 = vmatpush.bf16.msrb.mxu3 %v14126_v24  ;;  %v3786_v13 = vld [vmem:[#allocation2 + $0x20] sm:$0x1] }
 0x266   : > { %v3706_v58 = vrot.slane %v3704_v57, 7  ;;  %v3673_v33 = vadd.f32 %v15799_v2, %v3660_v62  ;;  %v3275_v62 = vadd.f32 %v3262_v29, %v3140_v28  ;;  %v2754_v38 = vadd.f32 %v15725_v25, %v2620_v44 }
 0x268   : > { %v3709_v17 = vor.u32 %v3707_v11, %v3706_v58  ;;  %v3711_v47 = vrot.slane %v3706_v58, 4  ;;  %v3681_v10 = vmax.f32 %v3673_v33, 0.0  ;;  %v3130_v12 = vpop.f32.mrf.mxu2  ;;  %v2979_v58 = vadd.f32 %v15731_v3, %v2753_v9 }
 0x269   : > { %v2980_v28 = vadd.f32 %v15763_v39, %v2754_v38  ;;  %v14138_v39 = vld [vmem:[%s18292_s1 + $0x638] sm:$0xff] }
 0x26a   : > { %v3710_v8 = vsel %vm14724_vm12, %v3702_v16, %v3709_v17  ;;  %v3780_v48 = vsel %vm14731_vm13, %v3711_v47, %v3779_v23  ;;  %v3689_v5 = vpack.c.bf16 %v3681_v10, %v3681_v10  ;;  %v3805_v60 = vld [vmem:[#allocation2 + $0xc] sm:$0xf]  ;;  %v3265_v26 = vpop.f32.mrf.mxu3  ;;  %4916 = vmatpush.bf16.msra.mxu0 %v14138_v39  ;;  %v14135_v39 = vld [vmem:[%s18292_s1 + $0x620] sm:$0xff] }
 0x26b   : > { %3778 = vst [vmem:[#allocation2 + $0x10] sm:$0xf] %v3710_v8  ;;  %v3645_v51 = vpop.f32.mrf.mxu1  ;;  %v3857_v63 = vshrl.u32 %v3805_v60, 16  ;;  %v3860_v31 = vshll.u32 %v3805_v60, 16  ;;  %v4140_v7 = vld [vmem:[#allocation2 + $0xc] sm:$0xe]  ;;  %v3141_v60 = vadd.f32 %v3130_v12, %v2979_v58 }
 0x26c   : > { %3781 = vst [vmem:[#allocation2 + $0x14] sm:$0x1] %v3780_v48  ;;  %v3713_v18 = vshrl.u32 %v3689_v5, 16  ;;  %v3661_v32 = vadd.f32 %v3645_v51, %v3499_v20  ;;  %v3716_v50 = vshll.u32 %v3689_v5, 16  ;;  %v12000_v4 = vrot.slane %v4140_v7, 9  ;;  %v14125_v20 = vld [vmem:[%s18292_s1 + $0x5f0] sm:$0xff] }
 0x26d   : > { %v3859_v43 = vrot.slane %v3857_v63, 4  ;;  %v3862_v14 = vrot.slane %v3860_v31, 5  ;;  %4783 = vmatpush.bf16.msrb.mxu3 %v14125_v20  ;;  %v14123_v58 = vld [vmem:[%s18292_s1 + $0x5e0] sm:$0xff]  ;;  %v14145_v20 = vld [vmem:[%s18292_s1 + $0x670] sm:$0xff] }
 0x26e   : > { %v15859_v54 = vrot.slane %v3713_v18, 7  ;;  %v3674_v40 = vadd.f32 %v15799_v2, %v3661_v32 }
 0x26f   : > { %v3863_v10 = vor.u32 %v3862_v14, %v3859_v43  ;;  %v3276_v43 = vadd.f32 %v3265_v26, %v3141_v60 }
 0x270   : > { %v3718_v53 = vor.u32 %v3716_v50, %v15859_v54  ;;  %v3682_v22 = vmax.f32 %v3674_v40, 0.0  ;;  %v3719_v11 = vrot.slane %v15859_v54, 4  ;;  %v3501_v50 = vadd.f32 %v3488_v52, %v3275_v62  ;;  %v14137_v52 = vld [vmem:[%s18292_s1 + $0x630] sm:$0xff] }
 0x271   : > { %4917 = vmatpush.bf16.msra.mxu0 %v14137_v52 }
 0x272   : > { %v3783_v35 = vsel %vm14717_vm11, %v3718_v53, %v3782_v55  ;;  %v3690_v1 = vpack.c.bf16 %v3682_v22, %v3682_v22  ;;  %v14072_v0 = vld [vmem:[#allocation2 + $0xc] sm:$0xff]  ;;  %v3864_v55 = vrot.slane %v3863_v10, 4  ;;  %v3491_v53 = vpop.f32.mrf.mxu0  ;;  %v3267_v10 = vpop.f32.mrf.mxu3 }
 0x273   : > { %v14099_v46 = vld [vmem:[#allocation2 + $0xc] sm:$0xff]  ;;  %3784 = vst [vmem:[#allocation2 + $0x18] sm:$0xf] %v3783_v35  ;;  %v3648_v36 = vpop.f32.mrf.mxu1  ;;  %v3829_v6 = vld [vmem:[#allocation2 + $0x14] sm:$0x1]  ;;  %4123 = vmatmul.bf16.gmra.mxu3 %v14072_v0 }
 0x274   : > { %v3806_v57 = vld [vmem:[#allocation2 + $0x10] sm:$0xf]  ;;  %v3721_v33 = vshrl.u32 %v3690_v1, 16  ;;  %v3662_v23 = vadd.f32 %v3648_v36, %v3500_v15  ;;  %4402 = vmatmul.bf16.vlgmr.msrb.gmra.mxu1 %v14099_v46  ;;  %v4163_v47 = vrot.slane %v3829_v6, 5  ;;  %v3724_v41 = vshll.u32 %v3690_v1, 16  ;;  %v14124_v1 = vld [vmem:[%s18292_s1 + $0x5e8] sm:$0xff]  ;;  %v3132_v46 = vpop.f32.mrf.mxu2 }
 0x275   : > { %v4160_v37 = vrot.slane %v3806_v57, 5  ;;  %v3866_v59 = vshll.u32 %v3806_v57, 16  ;;  %v3870_v61 = vshrl.u32 %v3806_v57, 16  ;;  %v3876_v21 = vshll.u32 %v3829_v6, 16  ;;  %v14118_v6 = vld [vmem:[%s18292_s1 + $0x5b8] sm:$0xff]  ;;  %4784 = vmatpush.bf16.msrb.mxu3 %v14124_v1  ;;  %v14121_v1 = vld [vmem:[%s18292_s1 + $0x5d0] sm:$0xff] }
 0x276   : > { %v3723_v42 = vrot.slane %v3721_v33, 7  ;;  %v3675_v3 = vadd.f32 %v15799_v2, %v3662_v23  ;;  %4620 = vmatpush.bf16.msrb.mxu2 %v14118_v6 }
 0x277   : > { %v4161_v16 = vsel %vm14646_vm5, %v12000_v4, %v4160_v37  ;;  %v4162_v17 = vrot.slane %v4160_v37, 4  ;;  %v3868_v5 = vrot.slane %v3866_v59, 5  ;;  %v3872_v54 = vrot.slane %v3870_v61, 4  ;;  %v3789_v4 = vld [vmem:[#allocation2 + $0x24] sm:$0xf]  ;;  %v14122_v61 = vld [vmem:[%s18292_s1 + $0x5d8] sm:$0xff] }
 0x278   : > { %v4198_v48 = vunpack.c.l.b16 %v4161_v16  ;;  %v3726_v51 = vor.u32 %v3724_v41, %v3723_v42  ;;  %v3728_v18 = vrot.slane %v3723_v42, 4  ;;  %v3683_v32 = vmax.f32 %v3675_v3, 0.0  ;;  %v14117_v16 = vld [vmem:[%s18292_s1 + $0x5b0] sm:$0xff]  ;;  %v14136_v3 = vld [vmem:[%s18292_s1 + $0x628] sm:$0xff] }
 0x279   : > { %v4164_v8 = vsel %vm14646_vm5, %v4162_v17, %v4163_v47  ;;  %v3873_v7 = vor.u32 %v3872_v54, %v3868_v5  ;;  %v3878_v9 = vrot.slane %v3876_v21, 5  ;;  %v3869_v15 = vsel %vm14634_vm4, %v3864_v55, %v3868_v5  ;;  %v14146_v17 = vld [vmem:[%s18292_s1 + $0x678] sm:$0xff]  ;;  %4785 = vmatpush.bf16.msrb.mxu3 %v14123_v58  ;;  %4918 = vmatpush.bf16.msra.mxu0 %v14136_v3 }
 0x27a   : > { %v4199_v19 = vunpack.c.l.b16 %v4164_v8  ;;  %v3727_v40 = vsel %vm14724_vm12, %v3719_v11, %v3726_v51  ;;  %v3787_v63 = vsel %vm14731_vm13, %v3728_v18, %v3786_v13  ;;  %v3691_v31 = vpack.c.bf16 %v3683_v32, %v3683_v32  ;;  %v3807_v0 = vld [vmem:[#allocation2 + $0x18] sm:$0xf]  ;;  %5142 = vmatpush.bf16.msra.mxu1 %v14146_v17  ;;  %4621 = vmatpush.bf16.msrb.mxu2 %v14117_v16  ;;  %v14120_v17 = vld [vmem:[%s18292_s1 + $0x5c8] sm:$0xff] }
 0x27b   : > { %3785 = vst [vmem:[#allocation2 + $0x1c] sm:$0xf] %v3727_v40  ;;  %v3650_v29 = vpop.f32.mrf.mxu1  ;;  %v3874_v35 = vrot.slane %v3873_v7, 4  ;;  %v3881_v62 = vshrl.u32 %v3807_v0, 16  ;;  %v3884_v36 = vshll.u32 %v3807_v0, 16  ;;  %v3142_v37 = vadd.f32 %v3132_v46, %v2980_v28  ;;  %v14116_v28 = vld [vmem:[%s18292_s1 + $0x5a8] sm:$0xff] }
 0x27c   : > { %v4205_v56 = vpack.c.b16 %v4199_v19, %v4198_v48  ;;  %3788 = vst [vmem:[#allocation2 + $0x20] sm:$0x1] %v3787_v63  ;;  %v3730_v25 = vshrl.u32 %v3691_v31, 16  ;;  %v3663_v22 = vadd.f32 %v3650_v29, %v3501_v50  ;;  %v3733_v14 = vshll.u32 %v3691_v31, 16  ;;  %v4141_v12 = vld [vmem:[#allocation2 + $0x18] sm:$0xe]  ;;  %v3493_v29 = vpop.f32.mrf.mxu0 }
 0x27d   : > { %v3879_v59 = vsel %vm14634_vm4, %v3874_v35, %v3878_v9  ;;  %v3947_v23 = vunpack.c.l.b16 %v3869_v15  ;;  %v3502_v47 = vadd.f32 %v3491_v53, %v3276_v43  ;;  %v3883_v42 = vrot.slane %v3881_v62, 4  ;;  %v3793_v43 = vld [vmem:[#allocation2 + $0x2c] sm:$0x1]  ;;  %4786 = vmatpush.bf16.msrb.mxu3 %v14122_v61  ;;  %4919 = vmatpush.bf16.msra.mxu0 %v14135_v39  ;;  %v14134_v16 = vld [vmem:[%s18292_s1 + $0x618] sm:$0xff]  ;;  %v15968_v61 = vld [vmem:[#allocation2 + $0x10] sm:$0xf] }
 0x27e   : > { %4273 = vmatmul.bf16.gmra.mxu0 %v4205_v56  ;;  %v15896_v57 = vrot.slane %v3730_v25, 7  ;;  %v3676_v44 = vadd.f32 %v15799_v2, %v3663_v22  ;;  %v3948_v24 = vunpack.c.l.b16 %v3879_v59  ;;  %v3886_v41 = vrot.slane %v3884_v36, 5  ;;  %5143 = vmatpush.bf16.msra.mxu1 %v14145_v20  ;;  %v14144_v22 = vld [vmem:[%s18292_s1 + $0x668] sm:$0xff]  ;;  %v3796_v20 = vld [vmem:[#allocation2 + $0x30] sm:$0xf] }
 0x27f   : > { %v12001_v51 = vrot.slane %v4141_v12, 9  ;;  %v3277_v50 = vadd.f32 %v3267_v10, %v3142_v37  ;;  %4622 = vmatpush.bf16.msrb.mxu2 %v14116_v28  ;;  %v14115_v37 = vld [vmem:[%s18292_s1 + $0x5a0] sm:$0xff]  ;;  %v14113_v28 = vld [vmem:[%s18292_s1 + $0x590] sm:$0xff] }
 0x280   : > { %v3735_v11 = vor.u32 %v3733_v14, %v15896_v57  ;;  %v3684_v33 = vmax.f32 %v3676_v44, 0.0  ;;  %v3954_v8 = vpack.c.b16 %v3948_v24, %v3947_v23  ;;  %v3887_v56 = vor.u32 %v3886_v41, %v3883_v42 }
 0x281   : > { %v3736_v9 = vrot.slane %v15896_v57, 4  ;;  %v3503_v44 = vadd.f32 %v3493_v29, %v3277_v50  ;;  %4787 = vmatpush.bf16.msrb.mxu3 %v14121_v1  ;;  %4920 = vmatpush.bf16.msra.mxu0 %v14134_v16 }
 0x282   : > { %v3790_v26 = vsel %vm14717_vm11, %v3735_v11, %v3789_v4  ;;  %v3692_v13 = vpack.c.bf16 %v3684_v33, %v3684_v33  ;;  %v14073_v48 = vld [vmem:[#allocation2 + $0x18] sm:$0xff]  ;;  %4022 = vmatmul.bf16.gmra.mxu2 %v3954_v8  ;;  %v3888_v62 = vrot.slane %v3887_v56, 4  ;;  %5144 = vmatpush.bf16.msra.mxu1 %v14144_v22  ;;  %v14143_v33 = vld [vmem:[%s18292_s1 + $0x660] sm:$0xff] }
 0x283   : > { %v14100_v5 = vld [vmem:[#allocation2 + $0x18] sm:$0xff]  ;;  %3791 = vst [vmem:[#allocation2 + $0x24] sm:$0xf] %v3790_v26  ;;  %v3653_v18 = vpop.f32.mrf.mxu1  ;;  %v15928_v32 = vld [vmem:[#allocation2 + $0x20] sm:$0x1]  ;;  %4128 = vmatmul.bf16.gmra.mxu3 %v14073_v48  ;;  %4623 = vmatpush.bf16.msrb.mxu2 %v14115_v37 }
 0x284   : > { %v3808_v21 = vld [vmem:[#allocation2 + $0x1c] sm:$0xf]  ;;  %v3738_v60 = vshrl.u32 %v3692_v13, 16  ;;  %v3664_v54 = vadd.f32 %v3653_v18, %v3502_v47  ;;  %4407 = vmatmul.bf16.gmra.mxu1 %v14100_v5  ;;  %v4170_v31 = vrot.slane %v15928_v32, 5  ;;  %v3741_v7 = vshll.u32 %v3692_v13, 16 }
 0x285   : > { %v4167_v19 = vrot.slane %v3808_v21, 5  ;;  %v3890_v38 = vshll.u32 %v3808_v21, 16  ;;  %v3894_v25 = vshrl.u32 %v3808_v21, 16  ;;  %v3900_v6 = vshll.u32 %v15928_v32, 16  ;;  %v14114_v8 = vld [vmem:[%s18292_s1 + $0x598] sm:$0xff]  ;;  %4788 = vmatpush.bf16.msrb.mxu3 %v14120_v17 }
 0x286   : > { %v3740_v55 = vrot.slane %v3738_v60, 7  ;;  %v3677_v53 = vadd.f32 %v15799_v2, %v3664_v54  ;;  %5145 = vmatpush.bf16.msra.mxu1 %v14143_v33  ;;  %v14142_v18 = vld [vmem:[%s18292_s1 + $0x658] sm:$0xff]  ;;  %v14133_v60 = vld [vmem:[%s18292_s1 + $0x610] sm:$0xff]  ;;  %v4675_v54 = vrot.slane %v15968_v61, 5 }
 0x287   : > { %v4168_v40 = vsel %vm14646_vm5, %v12001_v51, %v4167_v19  ;;  %v4169_v63 = vrot.slane %v4167_v19, 4  ;;  %v3892_v35 = vrot.slane %v3890_v38, 5  ;;  %v3896_v36 = vrot.slane %v3894_v25, 4  ;;  %v4657_v51 = vld [vmem:[#allocation2 + $0xc] sm:$0xe]  ;;  %4624 = vmatpush.bf16.msrb.mxu2 %v14114_v8  ;;  %4921 = vmatpush.bf16.msra.mxu0 %v14133_v60 }
 0x288   : > { %v4200_v15 = vunpack.c.l.b16 %v4168_v40  ;;  %v3743_v0 = vor.u32 %v3741_v7, %v3740_v55  ;;  %v3745_v46 = vrot.slane %v3740_v55, 4  ;;  %v3685_v4 = vmax.f32 %v3677_v53, 0.0  ;;  %v14132_v55 = vld [vmem:[%s18292_s1 + $0x608] sm:$0xff]  ;;  %v14141_v7 = vld [vmem:[%s18292_s1 + $0x650] sm:$0xff]  ;;  %v3800_v17 = vld [vmem:[#allocation2 + $0x38] sm:$0x1] }
 0x289   : > { %v4171_v14 = vsel %vm14646_vm5, %v4169_v63, %v4170_v31  ;;  %v3897_v24 = vor.u32 %v3896_v36, %v3892_v35  ;;  %v3893_v41 = vsel %vm14634_vm4, %v3888_v62, %v3892_v35  ;;  %v3902_v13 = vrot.slane %v3900_v6, 5  ;;  %v16004_v62 = vld [vmem:[#allocation2 + $0x14] sm:$0x1] }
 0x28a   : > { %v4201_v57 = vunpack.c.l.b16 %v4171_v14  ;;  %v3744_v59 = vsel %vm14724_vm12, %v3736_v9, %v3743_v0  ;;  %v3794_v12 = vsel %vm14731_vm13, %v3745_v46, %v3793_v43  ;;  %v3693_v52 = vpack.c.bf16 %v3685_v4, %v3685_v4  ;;  %v3809_v11 = vld [vmem:[#allocation2 + $0x24] sm:$0xf]  ;;  %5146 = vmatpush.bf16.msra.mxu1 %v14142_v18 }
 0x28b   : > { %3792 = vst [vmem:[#allocation2 + $0x28] sm:$0xf] %v3744_v59  ;;  %v3655_v23 = vpop.f32.mrf.mxu1  ;;  %v3905_v47 = vshrl.u32 %v3809_v11, 16  ;;  %v3908_v3 = vshll.u32 %v3809_v11, 16  ;;  %v3898_v26 = vrot.slane %v3897_v24, 4  ;;  %v3949_v19 = vunpack.c.l.b16 %v3893_v41  ;;  %4625 = vmatpush.bf16.msrb.mxu2 %v14113_v28  ;;  %v14140_v24 = vld [vmem:[%s18292_s1 + $0x648] sm:$0xff]  ;;  %4922 = vmatpush.bf16.msra.mxu0 %v14132_v55 }
 0x28c   : > { %v4206_v58 = vpack.c.b16 %v4201_v57, %v4200_v15  ;;  %3795 = vst [vmem:[#allocation2 + $0x2c] sm:$0x1] %v3794_v12  ;;  %v3747_v10 = vshrl.u32 %v3693_v52, 16  ;;  %v3665_v42 = vadd.f32 %v3655_v23, %v3503_v44  ;;  %v3750_v5 = vshll.u32 %v3693_v52, 16  ;;  %v4142_v38 = vld [vmem:[#allocation2 + $0x24] sm:$0xe] }
 0x28d   : > { %v3903_v32 = vsel %vm14634_vm4, %v3898_v26, %v3902_v13  ;;  %v3907_v50 = vrot.slane %v3905_v47, 4  ;;  %v3910_v56 = vrot.slane %v3908_v3, 5  ;;  %v12163_v29 = vrot.slane %v4657_v51, 9  ;;  %v14112_v12 = vld [vmem:[%s18292_s1 + $0x588] sm:$0xff]  ;;  %v14131_v41 = vld [vmem:[%s18292_s1 + $0x600] sm:$0xff] }
 0x28e   : > { %4278 = vmatmul.bf16.gmra.mxu0 %v4206_v58  ;;  %v15973_v48 = vrot.slane %v3747_v10, 7  ;;  %v3678_v21 = vadd.f32 %v15799_v2, %v3665_v42  ;;  %v14119_v2 = vld [vmem:[%s18292_s1 + $0x5c0] sm:$0xff]  ;;  %v3950_v31 = vunpack.c.l.b16 %v3903_v32  ;;  %v12002_v15 = vrot.slane %v4142_v38, 9  ;;  %v4431_v52 = vld [vmem:[#allocation2 + $0xc] sm:$0xf]  ;;  %5147 = vmatpush.bf16.msra.mxu1 %v14141_v7 }
 0x28f   : > { %4789 = vmatpush.bf16.msrb.mxu3 %v14119_v2  ;;  %v16002_v0 = vsel %vm14646_vm5, %v12163_v29, %v4675_v54  ;;  %v3911_v57 = vor.u32 %v3910_v56, %v3907_v50  ;;  %v4677_v23 = vrot.slane %v4675_v54, 4  ;;  %v4678_v42 = vrot.slane %v16004_v62, 5  ;;  %4626 = vmatpush.bf16.msrb.mxu2 %v14112_v12  ;;  %v14139_v50 = vld [vmem:[%s18292_s1 + $0x640] sm:$0xff]  ;;  %v16039_v28 = vld [vmem:[#allocation2 + $0x1c] sm:$0xf] }
 0x290   : > { %v3752_v40 = vor.u32 %v3750_v5, %v15973_v48  ;;  %v3686_v63 = vmax.f32 %v3678_v21, 0.0  ;;  %v3955_v22 = vpack.c.b16 %v3950_v31, %v3949_v19  ;;  %v3753_v16 = vrot.slane %v15973_v48, 4  ;;  %v14111_v48 = vld [vmem:[%s18292_s1 + $0x580] sm:$0xff]  ;;  %4923 = vmatpush.bf16.msra.mxu0 %v14131_v41  ;;  %v4953_v31 = vld [vmem:[#allocation2 + $0x18] sm:$0xf] }
 0x291   : > { %v3912_v8 = vrot.slane %v3911_v57, 4  ;;  %v4444_v21 = vshrl.u32 %v4431_v52, 16  ;;  %v4447_v51 = vshll.u32 %v4431_v52, 16  ;;  %v4679_v2 = vsel %vm14646_vm5, %v4677_v23, %v4678_v42 }
 0x292   : > { %v3797_v53 = vsel %vm14717_vm11, %v3752_v40, %v3796_v20  ;;  %v3694_v25 = vpack.c.bf16 %v3686_v63, %v3686_v63  ;;  %v14074_v9 = vld [vmem:[#allocation2 + $0x24] sm:$0xff]  ;;  %4027 = vmatmul.bf16.gmra.mxu2 %v3955_v22  ;;  %5148 = vmatpush.bf16.msra.mxu1 %v14140_v24  ;;  %v4453_v54 = vshll.u32 %v15968_v61, 16  ;;  %v4457_v40 = vshrl.u32 %v15968_v61, 16 }
 0x293   : > { %v14101_v43 = vld [vmem:[#allocation2 + $0x24] sm:$0xff]  ;;  %3798 = vst [vmem:[#allocation2 + $0x30] sm:$0xf] %v3797_v53  ;;  %v3831_v35 = vld [vmem:[#allocation2 + $0x2c] sm:$0x1]  ;;  %4133 = vmatmul.bf16.gmra.mxu3 %v14074_v9  ;;  %4627 = vmatpush.bf16.msrb.mxu2 %v14111_v48  ;;  %v4718_v55 = vunpack.c.l.b16 %v16002_v0  ;;  %v4719_v7 = vunpack.c.l.b16 %v4679_v2  ;;  %v4446_v53 = vrot.slane %v4444_v21, 4 }
 0x294   : > { %v3810_v14 = vld [vmem:[#allocation2 + $0x28] sm:$0xf]  ;;  %v3755_v46 = vshrl.u32 %v3694_v25, 16  ;;  %v4177_v4 = vrot.slane %v3831_v35, 5  ;;  %4412 = vmatmul.bf16.gmra.mxu1 %v14101_v43  ;;  %v3924_v59 = vshll.u32 %v3831_v35, 16  ;;  %v3758_v11 = vshll.u32 %v3694_v25, 16 }
 0x295   : > { %v4174_v39 = vrot.slane %v3810_v14, 5  ;;  %v3914_v1 = vshll.u32 %v3810_v14, 16  ;;  %v3918_v44 = vshrl.u32 %v3810_v14, 16  ;;  %v4449_v25 = vrot.slane %v4447_v51, 5  ;;  %v4435_v14 = vld [vmem:[#allocation2 + $0x1c] sm:$0xf] }
 0x296   : > { %v3757_v58 = vrot.slane %v3755_v46, 7  ;;  %v3926_v5 = vrot.slane %v3924_v59, 5  ;;  %5149 = vmatpush.bf16.msra.mxu1 %v14139_v50  ;;  %v4455_v22 = vrot.slane %v4453_v54, 5  ;;  %v4459_v9 = vrot.slane %v4457_v40, 4  ;;  %v4434_v48 = vld [vmem:[#allocation2 + $0x18] sm:$0xf] }
 0x297   : > { %v4175_v36 = vsel %vm14646_vm5, %v12002_v15, %v4174_v39  ;;  %v4176_v6 = vrot.slane %v4174_v39, 4  ;;  %v3916_v37 = vrot.slane %v3914_v1, 5  ;;  %v3920_v33 = vrot.slane %v3918_v44, 4  ;;  %v4956_v2 = vld [vmem:[#allocation2 + $0x24] sm:$0xf] }
 0x298   : > { %v4202_v10 = vunpack.c.l.b16 %v4175_v36  ;;  %v3760_v3 = vor.u32 %v3758_v11, %v3757_v58  ;;  %v3762_v20 = vrot.slane %v3757_v58, 4  ;;  %v4966_v61 = vshrl.u32 %v4953_v31, 16  ;;  %v16044_v36 = vld [vmem:[#allocation2 + $0x20] sm:$0x1]  ;;  %v4658_v58 = vld [vmem:[#allocation2 + $0x18] sm:$0xe] }
 0x299   : > { %v4178_v47 = vsel %vm14646_vm5, %v4176_v6, %v4177_v4  ;;  %v3921_v13 = vor.u32 %v3920_v33, %v3916_v37  ;;  %v3917_v60 = vsel %vm14634_vm4, %v3912_v8, %v3916_v37  ;;  %v4969_v15 = vshll.u32 %v4953_v31, 16  ;;  %v16047_v11 = vld [vmem:[#allocation2 + $0x20] sm:$0x1] }
 0x29a   : > { %v4203_v26 = vunpack.c.l.b16 %v4178_v47  ;;  %v3761_v18 = vsel %vm14724_vm12, %v3753_v16, %v3760_v3  ;;  %v3801_v32 = vsel %vm14731_vm13, %v3762_v20, %v3800_v17  ;;  %v3951_v29 = vunpack.c.l.b16 %v3917_v60  ;;  %v16051_v3 = vld [vmem:[#allocation2 + $0x28] sm:$0xf]  ;;  %v14127_v20 = vld [vmem:[#allocation2 + $0x18] sm:$0xff] }
 0x29b   : > { %v3922_v38 = vrot.slane %v3921_v13, 4  ;;  %3799 = vst [vmem:[#allocation2 + $0x34] sm:$0xf] %v3761_v18  ;;  %v4975_v35 = vshll.u32 %v16039_v28, 16  ;;  %v4979_v39 = vshrl.u32 %v16039_v28, 16  ;;  %v4726_v46 = vpack.c.b16 %v4719_v7, %v4718_v55 }
 0x29c   : > { %v4207_v19 = vpack.c.b16 %v4203_v26, %v4202_v10  ;;  %3802 = vst [vmem:[#allocation2 + $0x38] sm:$0x1] %v3801_v32  ;;  %v4460_v44 = vor.u32 %v4459_v9, %v4455_v22  ;;  %v4682_v0 = vrot.slane %v4435_v14, 5  ;;  %v4450_v6 = vor.u32 %v4449_v25, %v4446_v53  ;;  %v4438_v53 = vld [vmem:[#allocation2 + $0x28] sm:$0xf] }
 0x29d   : > { %v3927_v63 = vsel %vm14634_vm4, %v3922_v38, %v3926_v5  ;;  %v4977_v4 = vrot.slane %v4975_v35, 5  ;;  %v4981_v57 = vrot.slane %v4979_v39, 4  ;;  %v4968_v37 = vrot.slane %v4966_v61, 4 }
 0x29e   : > { %4283 = vmatmul.bf16.gmra.mxu0 %v4207_v19  ;;  %v3952_v56 = vunpack.c.l.b16 %v3927_v63  ;;  %v4971_v59 = vrot.slane %v4969_v15, 5  ;;  %v4463_v52 = vshll.u32 %v16004_v62, 16  ;;  %v4985_v33 = vshll.u32 %v16044_v36, 16 }
 0x29f   : > { %v4982_v12 = vor.u32 %v4981_v57, %v4977_v4  ;;  %v4461_v23 = vrot.slane %v4460_v44, 4  ;;  %v4684_v24 = vrot.slane %v4682_v0, 4  ;;  %v4451_v16 = vrot.slane %v4450_v6, 4  ;;  %v16072_v57 = vld [vmem:[#allocation2 + $0x2c] sm:$0x1] }
 0x2a0   : > { %v3956_v43 = vpack.c.b16 %v3952_v56, %v3951_v29  ;;  %v12164_v17 = vrot.slane %v4658_v58, 9  ;;  %v4972_v47 = vor.u32 %v4971_v59, %v4968_v37  ;;  %v4465_v42 = vrot.slane %v4463_v52, 5  ;;  %v14154_v37 = vld [vmem:[%s18292_s1 + $0x6b8] sm:$0xff]  ;;  %v4659_v52 = vld [vmem:[#allocation2 + $0x24] sm:$0xe] }
 0x2a1   : > { %v4983_v10 = vrot.slane %v4982_v12, 4  ;;  %v4685_v41 = vrot.slane %v16047_v11, 5  ;;  %v4456_v62 = vsel %vm14634_vm4, %v4451_v16, %v4455_v22  ;;  %v4987_v13 = vrot.slane %v4985_v33, 5  ;;  %v16079_v12 = vld [vmem:[#allocation2 + $0x2c] sm:$0x1]  ;;  %5304 = vmatpush.bf16.msra.mxu2 %v14154_v37 }
 0x2a2   : > { %v14102_v1 = vld [vmem:[#allocation2 + $0x30] sm:$0xff]  ;;  %4032 = vmatmul.bf16.gmra.mxu2 %v3956_v43  ;;  %v4683_v26 = vsel %vm14646_vm5, %v12164_v17, %v4682_v0  ;;  %v4466_v8 = vsel %vm14634_vm4, %v4461_v23, %v4465_v42  ;;  %v4477_v21 = vshll.u32 %v4435_v14, 16  ;;  %v4481_v51 = vshrl.u32 %v4435_v14, 16  ;;  %v4437_v16 = vld [vmem:[#allocation2 + $0x24] sm:$0xf] }
 0x2a3   : > { %4790 = vmatmul.bf16.vlgmr.msrb.gmra.mxu3 %v4726_v46  ;;  %v4686_v5 = vsel %vm14646_vm5, %v4684_v24, %v4685_v41  ;;  %v4973_v18 = vrot.slane %v4972_v47, 4  ;;  %v4988_v32 = vsel %vm14634_vm4, %v4983_v10, %v4987_v13  ;;  %v4999_v19 = vshll.u32 %v16051_v3, 16  ;;  %v14153_v17 = vld [vmem:[%s18292_s1 + $0x6b0] sm:$0xff]  ;;  %v14128_v13 = vld [vmem:[#allocation2 + $0x24] sm:$0xff]  ;;  %v16118_v37 = vld [vmem:[#allocation2 + $0x38] sm:$0x1] }
 0x2a4   : > { %4417 = vmatmul.bf16.gmra.mxu1 %v14102_v1  ;;  %v5003_v38 = vshrl.u32 %v16051_v3, 16  ;;  %v4556_v50 = vunpack.c.l.b16 %v4456_v62  ;;  %v4720_v60 = vunpack.c.l.b16 %v4683_v26  ;;  %v4557_v54 = vunpack.c.l.b16 %v4466_v8  ;;  %v16086_v26 = vld [vmem:[#allocation2 + $0x34] sm:$0xf] }
 0x2a5   : > { %v4721_v40 = vunpack.c.l.b16 %v4686_v5  ;;  %v4978_v63 = vsel %vm14634_vm4, %v4973_v18, %v4977_v4  ;;  %v4468_v31 = vshrl.u32 %v4434_v48, 16  ;;  %v5079_v56 = vunpack.c.l.b16 %v4988_v32  ;;  %5305 = vmatpush.bf16.msra.mxu2 %v14153_v17 }
 0x2a6   : > { %v4471_v29 = vshll.u32 %v4434_v48, 16  ;;  %v16067_v55 = vrot.slane %v4477_v21, 5  ;;  %v4483_v7 = vrot.slane %v4481_v51, 4  ;;  %v4990_v25 = vshrl.u32 %v4956_v2, 16  ;;  %v14152_v51 = vld [vmem:[%s18292_s1 + $0x6a8] sm:$0xff] }
 0x2a7   : > { %v4993_v22 = vshll.u32 %v4956_v2, 16  ;;  %v16069_v9 = vrot.slane %v4999_v19, 5  ;;  %v5005_v61 = vrot.slane %v5003_v38, 4  ;;  %v5078_v43 = vunpack.c.l.b16 %v4978_v63 }
 0x2a8   : > { %v4564_v14 = vpack.c.b16 %v4557_v54, %v4556_v50  ;;  %v4727_v15 = vpack.c.b16 %v4721_v40, %v4720_v60  ;;  %v4689_v35 = vrot.slane %v4438_v53, 5  ;;  %v4470_v1 = vrot.slane %v4468_v31, 4  ;;  %v4959_v60 = vld [vmem:[#allocation2 + $0x30] sm:$0xf] }
 0x2a9   : > { %v5086_v39 = vpack.c.b16 %v5079_v56, %v5078_v43  ;;  %v4473_v46 = vrot.slane %v4471_v29, 5  ;;  %v4484_v4 = vor.u32 %v4483_v7, %v16067_v55  ;;  %v4992_v44 = vrot.slane %v4990_v25, 4  ;;  %5306 = vmatpush.bf16.msra.mxu2 %v14152_v51 }
 0x2aa   : > { %v4995_v0 = vrot.slane %v4993_v22, 5  ;;  %v5006_v6 = vor.u32 %v5005_v61, %v16069_v9  ;;  %v4487_v59 = vshll.u32 %v16047_v11, 16  ;;  %v4691_v58 = vrot.slane %v4689_v35, 4  ;;  %v16109_v22 = vld [vmem:[#allocation2 + $0x34] sm:$0xf]  ;;  %v14151_v61 = vld [vmem:[%s18292_s1 + $0x6a0] sm:$0xff] }
 0x2ab   : > { %v5009_v33 = vshll.u32 %v16072_v57, 16  ;;  %v4474_v23 = vor.u32 %v4473_v46, %v4470_v1  ;;  %v4485_v24 = vrot.slane %v4484_v4, 4  ;;  %v4692_v47 = vrot.slane %v16079_v12, 5 }
 0x2ac   : > { %v4996_v10 = vor.u32 %v4995_v0, %v4992_v44  ;;  %v5007_v42 = vrot.slane %v5006_v6, 4  ;;  %v4489_v41 = vrot.slane %v4487_v59, 5  ;;  %v12165_v11 = vrot.slane %v4659_v52, 9 }
 0x2ad   : > { %v4505_v62 = vshrl.u32 %v4438_v53, 16  ;;  %v4693_v8 = vsel %vm14646_vm5, %v4691_v58, %v4692_v47  ;;  %v5011_v5 = vrot.slane %v5009_v33, 5  ;;  %v4492_v48 = vshrl.u32 %v4437_v16, 16  ;;  %5307 = vmatpush.bf16.msra.mxu2 %v14151_v61 }
 0x2ae   : > { %4924 = vmatmul.bf16.vlgmr.msra.gmra.mxu0 %v14127_v20  ;;  %v4501_v20 = vshll.u32 %v4438_v53, 16  ;;  %v4495_v21 = vshll.u32 %v4437_v16, 16  ;;  %v4475_v18 = vrot.slane %v4474_v23, 4  ;;  %v4490_v32 = vsel %vm14634_vm4, %v4485_v24, %v4489_v41  ;;  %v16121_v23 = vld [vmem:[#allocation2 + $0x38] sm:$0x1] }
 0x2af   : > { %v4690_v19 = vsel %vm14646_vm5, %v12165_v11, %v4689_v35  ;;  %v4997_v38 = vrot.slane %v4996_v10, 4  ;;  %v5012_v50 = vsel %vm14634_vm4, %v5007_v42, %v5011_v5  ;;  %v5023_v2 = vshll.u32 %v16086_v26, 16  ;;  %v14150_v16 = vld [vmem:[%s18292_s1 + $0x698] sm:$0xff]  ;;  %v4660_v41 = vld [vmem:[#allocation2 + $0x30] sm:$0xe] }
 0x2b0   : > { %v5027_v54 = vshrl.u32 %v16086_v26, 16  ;;  %v4480_v40 = vsel %vm14634_vm4, %v4475_v18, %v16067_v55  ;;  %v4723_v63 = vunpack.c.l.b16 %v4693_v8  ;;  %v16104_v31 = vrot.slane %v4501_v20, 5  ;;  %v16132_v8 = vld [vmem:[#allocation2 + $0x40] sm:$0xf] }
 0x2b1   : > { %v4507_v56 = vrot.slane %v4505_v62, 4  ;;  %v4559_v29 = vunpack.c.l.b16 %v4490_v32  ;;  %v5002_v7 = vsel %vm14634_vm4, %v4997_v38, %v16069_v9  ;;  %v4494_v53 = vrot.slane %v4492_v48, 4  ;;  %5308 = vmatpush.bf16.msra.mxu2 %v14150_v16  ;;  %v14129_v38 = vld [vmem:[#allocation2 + $0x30] sm:$0xff] }
 0x2b2   : > { %4628 = vmatmul.bf16.vlgmr.msrb.gmra.mxu2 %v4564_v14  ;;  %v4497_v25 = vrot.slane %v4495_v21, 5  ;;  %v5081_v43 = vunpack.c.l.b16 %v5012_v50  ;;  %v5014_v55 = vshrl.u32 %v4959_v60, 16  ;;  %v5017_v14 = vshll.u32 %v4959_v60, 16  ;;  %v14148_v50 = vld [vmem:[%s18292_s1 + $0x688] sm:$0xff] }
 0x2b3   : > { %4795 = vmatmul.bf16.gmra.mxu3 %v4727_v15  ;;  %v4558_v15 = vunpack.c.l.b16 %v4480_v40  ;;  %v4722_v35 = vunpack.c.l.b16 %v4690_v19  ;;  %v5029_v1 = vrot.slane %v5027_v54, 4  ;;  %v5080_v46 = vunpack.c.l.b16 %v5002_v7  ;;  %v4440_v19 = vld [vmem:[#allocation2 + $0x30] sm:$0xf] }
 0x2b4   : > { %5150 = vmatmul.bf16.vlgmr.msra.gmra.mxu1 %v5086_v39  ;;  %v16114_v39 = vrot.slane %v5023_v2, 5  ;;  %v4508_v9 = vor.u32 %v4507_v56, %v16104_v31  ;;  %v4696_v4 = vrot.slane %v16109_v22, 5  ;;  %v4498_v6 = vor.u32 %v4497_v25, %v4494_v53 }
 0x2b5   : > { %v4565_v44 = vpack.c.b16 %v4559_v29, %v4558_v15  ;;  %v4728_v0 = vpack.c.b16 %v4723_v63, %v4722_v35  ;;  %v5087_v59 = vpack.c.b16 %v5081_v43, %v5080_v46  ;;  %v4511_v52 = vshll.u32 %v16079_v12, 16  ;;  %v14149_v12 = vld [vmem:[%s18292_s1 + $0x690] sm:$0xff] }
 0x2b6   : > { %v5016_v58 = vrot.slane %v5014_v55, 4  ;;  %v5019_v33 = vrot.slane %v5017_v14, 5  ;;  %v5030_v24 = vor.u32 %v5029_v1, %v16114_v39  ;;  %v4509_v17 = vrot.slane %v4508_v9, 4  ;;  %5309 = vmatpush.bf16.msra.mxu2 %v14149_v12  ;;  %v14147_v1 = vld [vmem:[%s18292_s1 + $0x680] sm:$0xff] }
 0x2b7   : > { %v4698_v47 = vrot.slane %v4696_v4, 4  ;;  %v5033_v10 = vshll.u32 %v16118_v37, 16  ;;  %v4499_v42 = vrot.slane %v4498_v6, 4  ;;  %v4513_v11 = vrot.slane %v4511_v52, 5 }
 0x2b8   : > { %v4699_v20 = vrot.slane %v16121_v23, 5  ;;  %v5020_v62 = vor.u32 %v5019_v33, %v5016_v58  ;;  %v5031_v48 = vrot.slane %v5030_v24, 4  ;;  %v12166_v51 = vrot.slane %v4660_v41, 9 }
 0x2b9   : > { %v4504_v5 = vsel %vm14634_vm4, %v4499_v42, %v16104_v31  ;;  %v4514_v21 = vsel %vm14634_vm4, %v4509_v17, %v4513_v11  ;;  %v5035_v32 = vrot.slane %v5033_v10, 5  ;;  %v5047_v54 = vshll.u32 %v16132_v8, 16 }
 0x2ba   : > { %v4700_v18 = vsel %vm14646_vm5, %v4698_v47, %v4699_v20  ;;  %v5051_v40 = vshrl.u32 %v16132_v8, 16  ;;  %v5021_v63 = vrot.slane %v5020_v62, 4  ;;  %v4525_v31 = vshll.u32 %v16109_v22, 16  ;;  %5310 = vmatpush.bf16.msra.mxu2 %v14148_v50 }
 0x2bb   : > { %v4529_v56 = vshrl.u32 %v16109_v22, 16  ;;  %v4560_v29 = vunpack.c.l.b16 %v4504_v5  ;;  %v4697_v7 = vsel %vm14646_vm5, %v12166_v51, %v4696_v4  ;;  %v5036_v53 = vsel %vm14634_vm4, %v5031_v48, %v5035_v32 }
 0x2bc   : > { %v4561_v25 = vunpack.c.l.b16 %v4514_v21  ;;  %v4725_v61 = vunpack.c.l.b16 %v4700_v18  ;;  %v5026_v43 = vsel %vm14634_vm4, %v5021_v63, %v16114_v39  ;;  %v4516_v55 = vshrl.u32 %v4440_v19, 16  ;;  %v5179_v63 = vld [vmem:[#allocation2 + $0x18] sm:$0xe] }
 0x2bd   : > { %v5049_v35 = vrot.slane %v5047_v54, 5  ;;  %v5053_v22 = vrot.slane %v5051_v40, 4  ;;  %v5083_v46 = vunpack.c.l.b16 %v5036_v53  ;;  %v4519_v9 = vshll.u32 %v4440_v19, 16 }
 0x2be   : > { %4929 = vmatmul.bf16.gmra.mxu0 %v14128_v13  ;;  %v4962_v13 = vld [vmem:[#allocation2 + $0x3c] sm:$0xf]  ;;  %v4527_v4 = vrot.slane %v4525_v31, 5  ;;  %v4724_v6 = vunpack.c.l.b16 %v4697_v7  ;;  %v5082_v52 = vunpack.c.l.b16 %v5026_v43  ;;  %5311 = vmatpush.bf16.msra.mxu2 %v14147_v1  ;;  %v4518_v17 = vrot.slane %v4516_v55, 4 }
 0x2bf   : > { %v5038_v60 = vshrl.u32 %v4962_v13, 16  ;;  %v5041_v2 = vshll.u32 %v4962_v13, 16  ;;  %v5054_v33 = vor.u32 %v5053_v22, %v5049_v35  ;;  %v4521_v47 = vrot.slane %v4519_v9, 5  ;;  %v14130_v13 = vld [vmem:[#allocation2 + $0x3c] sm:$0xff] }
 0x2c0   : > { %v4729_v39 = vpack.c.b16 %v4725_v61, %v4724_v6  ;;  %v5088_v16 = vpack.c.b16 %v5083_v46, %v5082_v52  ;;  %v4535_v42 = vshll.u32 %v16121_v23, 16  ;;  %v5197_v54 = vrot.slane %v16039_v28, 5 }
 0x2c1   : > { %v5040_v14 = vrot.slane %v5038_v60, 4  ;;  %v5043_v15 = vrot.slane %v5041_v2, 5  ;;  %v5055_v12 = vrot.slane %v5054_v33, 4  ;;  %v4522_v20 = vor.u32 %v4521_v47, %v4518_v17  ;;  %v5181_v47 = vld [vmem:[#allocation2 + $0x30] sm:$0xe] }
 0x2c2   : > { %4633 = vmatmul.bf16.gmra.mxu2 %v4565_v44  ;;  %v4531_v44 = vrot.slane %v4529_v56, 4  ;;  %v4537_v5 = vrot.slane %v4535_v42, 5  ;;  %v5199_v40 = vrot.slane %v5197_v54, 4  ;;  %v5200_v31 = vrot.slane %v16044_v36, 5  ;;  %v4119_v42 = vpop.f32.mrf.mxu3 }
 0x2c3   : > { %4800 = vmatmul.bf16.gmra.mxu3 %v4728_v0  ;;  %v16158_v0 = vld [vmem:[#allocation2 + $0x44] sm:$0x1]  ;;  %v5044_v58 = vor.u32 %v5043_v15, %v5040_v14  ;;  %v4523_v51 = vrot.slane %v4522_v20, 4  ;;  %v12327_v56 = vrot.slane %v5179_v63, 9  ;;  %v5204_v43 = vrot.slane %v16051_v3, 5 }
 0x2c4   : > { %5155 = vmatmul.bf16.gmra.mxu1 %v5087_v59  ;;  %v4566_v59 = vpack.c.b16 %v4561_v25, %v4560_v29  ;;  %v5057_v24 = vshll.u32 %v16158_v0, 16  ;;  %v4532_v10 = vor.u32 %v4531_v44, %v4527_v4  ;;  %v5201_v29 = vsel %vm14646_vm5, %v5199_v40, %v5200_v31  ;;  %v5180_v14 = vld [vmem:[#allocation2 + $0x24] sm:$0xe]  ;;  %v5182_v3 = vld [vmem:[#allocation2 + $0x3c] sm:$0xe] }
 0x2c5   : > { %v5045_v41 = vrot.slane %v5044_v58, 4  ;;  %v4528_v23 = vsel %vm14634_vm4, %v4523_v51, %v4527_v4  ;;  %v5198_v7 = vsel %vm14646_vm5, %v12327_v56, %v5197_v54  ;;  %v5241_v53 = vunpack.c.l.b16 %v5201_v29 }
 0x2c6   : > { %v5059_v11 = vrot.slane %v5057_v24, 5  ;;  %v4533_v62 = vrot.slane %v4532_v10, 4  ;;  %v4562_v50 = vunpack.c.l.b16 %v4528_v23  ;;  %v5240_v25 = vunpack.c.l.b16 %v5198_v7 }
 0x2c7   : > { %v5050_v48 = vsel %vm14634_vm4, %v5045_v41, %v5049_v35  ;;  %v5206_v55 = vrot.slane %v5204_v43, 4  ;;  %v5207_v15 = vrot.slane %v16072_v57, 5  ;;  %v12328_v36 = vrot.slane %v5180_v14, 9 }
 0x2c8   : > { %v5060_v21 = vsel %vm14634_vm4, %v5055_v12, %v5059_v11  ;;  %v4538_v18 = vsel %vm14634_vm4, %v4533_v62, %v4537_v5  ;;  %v5084_v32 = vunpack.c.l.b16 %v5050_v48  ;;  %v5248_v61 = vpack.c.b16 %v5241_v53, %v5240_v25 }
 0x2c9   : > { %v5085_v19 = vunpack.c.l.b16 %v5060_v21  ;;  %v5208_v35 = vsel %vm14646_vm5, %v5206_v55, %v5207_v15  ;;  %v5205_v22 = vsel %vm14646_vm5, %v12328_v36, %v5204_v43  ;;  %v5218_v44 = vrot.slane %v16132_v8, 5  ;;  %v14166_v55 = vld [vmem:[%s18292_s1 + $0x6f8] sm:$0xff]  ;;  %v14165_v36 = vld [vmem:[%s18292_s1 + $0x6f0] sm:$0xff] }
 0x2ca   : > { %v5243_v1 = vunpack.c.l.b16 %v5208_v35  ;;  %v5242_v9 = vunpack.c.l.b16 %v5205_v22  ;;  %v5221_v6 = vrot.slane %v16158_v0, 5  ;;  %v12330_v57 = vrot.slane %v5182_v3, 9  ;;  %v16202_v5 = vpop.f32.mrf.mxu3  ;;  %5908 = vmatpush.bf16.msrb.mxu0 %v14166_v55  ;;  %v14174_v15 = vld [vmem:[%s18292_s1 + $0x738] sm:$0xff]  ;;  %v14173_v22 = vld [vmem:[%s18292_s1 + $0x730] sm:$0xff] }
 0x2cb   : > { %v5089_v60 = vpack.c.b16 %v5085_v19, %v5084_v32  ;;  %v5220_v52 = vrot.slane %v5218_v44, 4  ;;  %v5214_v8 = vrot.slane %v16118_v37, 5  ;;  %v12329_v10 = vrot.slane %v5181_v47, 9  ;;  %5807 = vmatpush.bf16.msra.mxu3 %v14174_v15 }
 0x2cc   : > { %v5249_v4 = vpack.c.b16 %v5243_v1, %v5242_v9  ;;  %v14182_v1 = vld [vmem:[%s18292_s1 + $0x778] sm:$0xff]  ;;  %v14164_v9 = vld [vmem:[%s18292_s1 + $0x6e8] sm:$0xff] }
 0x2cd   : > { %v5222_v58 = vsel %vm14646_vm5, %v5220_v52, %v5221_v6  ;;  %6058 = vmatpush.bf16.msrb.mxu1 %v14182_v1  ;;  %v14181_v6 = vld [vmem:[%s18292_s1 + $0x770] sm:$0xff] }
 0x2ce   : > { %4934 = vmatmul.bf16.gmra.mxu0 %v14129_v38  ;;  %v4563_v38 = vunpack.c.l.b16 %v4538_v18  ;;  %v5247_v17 = vunpack.c.l.b16 %v5222_v58 }
 0x2cf   : > { %5909 = vmatpush.bf16.msrb.mxu0 %v14165_v36  ;;  %5808 = vmatpush.bf16.msra.mxu3 %v14173_v22  ;;  %v14180_v36 = vld [vmem:[%s18292_s1 + $0x768] sm:$0xff] }
 0x2d0   : > { %v4567_v2 = vpack.c.b16 %v4563_v38, %v4562_v50 }
 0x2d1   : > { %6059 = vmatpush.bf16.msrb.mxu1 %v14181_v6  ;;  %v5357_v6 = vld [vmem:[#allocation3 + $0x18] sm:$0xf] }
 0x2d2   : > { %4638 = vmatmul.bf16.gmra.mxu2 %v4566_v59  ;;  %v5211_v59 = vrot.slane %v16086_v26, 5 }
 0x2d3   : > { %4805 = vmatmul.bf16.gmra.mxu3 %v4729_v39  ;;  %v5219_v39 = vsel %vm14646_vm5, %v12330_v57, %v5218_v44  ;;  %5910 = vmatpush.bf16.msrb.mxu0 %v14164_v9  ;;  %v14172_v44 = vld [vmem:[%s18292_s1 + $0x728] sm:$0xff]  ;;  %v14194_v9 = vld [vmem:[%s18292_s1 + $0x7b8] sm:$0xff] }
 0x2d4   : > { %5160 = vmatmul.bf16.gmra.mxu1 %v5088_v16  ;;  %v5246_v33 = vunpack.c.l.b16 %v5219_v39  ;;  %v5213_v16 = vrot.slane %v5211_v59, 4  ;;  %v5212_v41 = vsel %vm14646_vm5, %v12329_v10, %v5211_v59  ;;  %v14163_v59 = vld [vmem:[%s18292_s1 + $0x6e0] sm:$0xff]  ;;  %5809 = vmatpush.bf16.msra.mxu3 %v14172_v44 }
 0x2d5   : > { %v5244_v20 = vunpack.c.l.b16 %v5212_v41  ;;  %6060 = vmatpush.bf16.msrb.mxu1 %v14180_v36  ;;  %6192 = vmatpush.bf16.msrb.mxu2 %v14194_v9  ;;  %v5394_v36 = vshll.u32 %v5357_v6, 16 }
 0x2d6   : > { %v5251_v0 = vpack.c.b16 %v5247_v17, %v5246_v33  ;;  %v5215_v26 = vsel %vm14646_vm5, %v5213_v16, %v5214_v8  ;;  %v16294_v17 = vld [vmem:[#allocation3 + $0xc] sm:$0xf]  ;;  %v5355_v8 = vld [vmem:[#allocation3 + $0x10] sm:$0xf] }
 0x2d7   : > { %v5245_v12 = vunpack.c.l.b16 %v5215_v26  ;;  %5911 = vmatpush.bf16.msrb.mxu0 %v14163_v59  ;;  %v5370_v10 = vshll.u32 %v16294_v17, 16  ;;  %v5376_v41 = vshll.u32 %v5355_v8, 16  ;;  %v14170_v59 = vld [vmem:[%s18292_s1 + $0x718] sm:$0xff] }
 0x2d9   : > { %v16316_v1 = vrot.slane %v5376_v41, 5 }
 0x2dd   : > { %v4269_v62 = vpop.f32.mrf.mxu0 }
 0x2de   : > { %4939 = vmatmul.bf16.gmra.mxu0 %v14130_v13  ;;  %v5250_v13 = vpack.c.b16 %v5245_v12, %v5244_v20  ;;  %v5380_v12 = vshrl.u32 %v5355_v8, 16 }
 0x2e0   : > { %v16177_v28 = vpop.f32.mrf.mxu2  ;;  %v5382_v44 = vrot.slane %v5380_v12, 4 }
 0x2e1   : > { %v4120_v16 = vadd.f32 %v4119_v42, %v16177_v28  ;;  %v5372_v28 = vrot.slane %v5370_v10, 5  ;;  %v14171_v42 = vld [vmem:[%s18292_s1 + $0x720] sm:$0xff]  ;;  %v14193_v10 = vld [vmem:[%s18292_s1 + $0x7b0] sm:$0xff] }
 0x2e2   : > { %4643 = vmatmul.bf16.gmra.mxu2 %v4567_v2  ;;  %5810 = vmatpush.bf16.msra.mxu3 %v14171_v42  ;;  %v5391_v42 = vshrl.u32 %v5357_v6, 16  ;;  %v5396_v6 = vrot.slane %v5394_v36, 5  ;;  %v14177_v36 = vld [vmem:[%s18292_s1 + $0x750] sm:$0xff] }
 0x2e3   : > { %v4289_v26 = vadd.f32 %v4269_v62, %v4120_v16  ;;  %v14162_v62 = vld [vmem:[%s18292_s1 + $0x6d8] sm:$0xff]  ;;  %v14179_v16 = vld [vmem:[%s18292_s1 + $0x760] sm:$0xff]  ;;  %6193 = vmatpush.bf16.msrb.mxu2 %v14193_v10 }
 0x2e4   : > { %5165 = vmatmul.bf16.gmra.mxu1 %v5089_v60  ;;  %5912 = vmatpush.bf16.msrb.mxu0 %v14162_v62 }
 0x2e5   : > { %v16208_v21 = vpop.f32.mrf.mxu0  ;;  %6061 = vmatpush.bf16.msrb.mxu1 %v14179_v16  ;;  %v14178_v16 = vld [vmem:[%s18292_s1 + $0x758] sm:$0xff] }
 0x2e6   : > { %5811 = vmatpush.bf16.msra.mxu3 %v14170_v59 }
 0x2e8   : > { %v16184_v46 = vpop.f32.mrf.mxu2 }
 0x2e9   : > { %6062 = vmatpush.bf16.msrb.mxu1 %v14178_v16 }
 0x2ed   : > { %6063 = vmatpush.bf16.msrb.mxu1 %v14177_v36  ;;  %v16423_v36 = vld [vmem:[#allocation3 + $0x8] sm:$0x1] }
 0x2f1   : > { %v16204_v48 = vpop.f32.mrf.mxu1 }
 0x2f2   : > { %5312 = vmatmul.bf16.vlgmr.msra.gmra.mxu2 %v5248_v61  ;;  %v4423_v22 = vadd.f32 %v16204_v48, %v4289_v26  ;;  %v4122_v48 = vadd.f32 %v16202_v5, %v16184_v46  ;;  %v5356_v26 = vld [vmem:[#allocation3 + $0x14] sm:$0x1]  ;;  %v5383_v5 = vor.u32 %v5382_v44, %v16316_v1 }
 0x2f3   : > { %v5386_v62 = vshll.u32 %v5356_v26, 16 }
 0x2f6   : > { %v16212_v18 = vpop.f32.mrf.mxu3 }
 0x2f9   : > { %v16214_v23 = vpop.f32.mrf.mxu1 }
 0x2fb   : > { %v16216_v32 = vpop.f32.mrf.mxu0 }
 0x2fe   : > { %v16220_v38 = vpop.f32.mrf.mxu3 }
 0x301   : > { %v16222_v50 = vpop.f32.mrf.mxu1 }
 0x302   : > { %5317 = vmatmul.bf16.gmra.mxu2 %v5249_v4 }
 0x303   : > { %v16224_v60 = vpop.f32.mrf.mxu0 }
 0x305   : > { %v16193_v24 = vpop.f32.mrf.mxu2 }
 0x306   : > { %v16228_v54 = vpop.f32.mrf.mxu3  ;;  %v4125_v46 = vadd.f32 %v16212_v18, %v16193_v24 }
 0x308   : > { %v4291_v18 = vadd.f32 %v16216_v32, %v4125_v46  ;;  %v14192_v32 = vld [vmem:[%s18292_s1 + $0x7a8] sm:$0xff] }
 0x309   : > { %v16230_v40 = vpop.f32.mrf.mxu1  ;;  %6194 = vmatpush.bf16.msrb.mxu2 %v14192_v32 }
 0x30b   : > { %v16234_v31 = vpop.f32.mrf.mxu0 }
 0x30d   : > { %v16200_v11 = vpop.f32.mrf.mxu2 }
 0x30e   : > { %v16236_v56 = vpop.f32.mrf.mxu3 }
 0x311   : > { %v16238_v29 = vpop.f32.mrf.mxu1 }
 0x312   : > { %5322 = vmatmul.bf16.gmra.mxu2 %v5250_v13 }
 0x313   : > { %v16242_v53 = vpop.f32.mrf.mxu0 }
 0x315   : > { %v16206_v37 = vpop.f32.mrf.mxu2 }
 0x316   : > { %v16246_v61 = vpop.f32.mrf.mxu3 }
 0x319   : > { %v16248_v43 = vpop.f32.mrf.mxu1 }
 0x31b   : > { %v16253_v14 = vpop.f32.mrf.mxu0 }
 0x31d   : > { %v16210_v51 = vpop.f32.mrf.mxu2 }
 0x31e   : > { %v16272_v4 = vpop.f32.mrf.mxu3 }
 0x321   : > { %v16274_v3 = vpop.f32.mrf.mxu1 }
 0x322   : > { %5327 = vmatmul.bf16.gmra.mxu2 %v5251_v0  ;;  %18318 = vst [vmem:[#allocation11_spill] sm:$0xff] %v16274_v3  ;;  %v5367_v0 = vshrl.u32 %v16294_v17, 16  ;;  %v5360_v3 = vld [vmem:[#allocation3 + $0x24] sm:$0xf] }
 0x323   : > { %v16285_v57 = vpop.f32.mrf.mxu0  ;;  %v5415_v46 = vshrl.u32 %v5360_v3, 16 }
 0x324   : > { %18319 = vst [vmem:[#allocation7_spill] sm:$0xff] %v16285_v57  ;;  %v5369_v15 = vrot.slane %v5367_v0, 4  ;;  %v14161_v0 = vld [vmem:[%s18292_s1 + $0x6d0] sm:$0xff] }
 0x325   : > { %v16218_v19 = vpop.f32.mrf.mxu2  ;;  %5913 = vmatpush.bf16.msrb.mxu0 %v14161_v0 }
 0x326   : > { %v4791_v39 = vpop.f32.mrf.mxu3  ;;  %v5373_v12 = vor.u32 %v5372_v28, %v5369_v15  ;;  %v5393_v28 = vrot.slane %v5391_v42, 4  ;;  %v14168_v42 = vld [vmem:[%s18292_s1 + $0x708] sm:$0xff] }
 0x328   : > { %v5374_v15 = vrot.slane %v5373_v12, 4 }
 0x329   : > { %v16289_v58 = vpop.f32.mrf.mxu1 }
 0x32a   : > { %18320 = vst [vmem:[#allocation9_spill] sm:$0xff] %v16289_v58  ;;  %v5359_v58 = vld [vmem:[#allocation3 + $0x20] sm:$0x1]  ;;  %v5379_v12 = vsel %vm14634_vm4, %v5374_v15, %v16316_v1  ;;  %v16386_v15 = vld [vmem:[#allocation3 + $0x28] sm:$0xf] }
 0x32b   : > { %v16296_v47 = vpop.f32.mrf.mxu0  ;;  %v5410_v0 = vshll.u32 %v5359_v58, 16  ;;  %v14191_v58 = vld [vmem:[%s18292_s1 + $0x7a0] sm:$0xff] }
 0x32c   : > { %6195 = vmatpush.bf16.msrb.mxu2 %v14191_v58 }
 0x32d   : > { %v16226_v2 = vpop.f32.mrf.mxu2  ;;  %v16390_v16 = vrot.slane %v5410_v0, 5  ;;  %v14190_v0 = vld [vmem:[%s18292_s1 + $0x798] sm:$0xff] }
 0x32e   : > { %v16300_v20 = vpop.f32.mrf.mxu3 }
 0x330   : > { %6196 = vmatpush.bf16.msrb.mxu2 %v14190_v0 }
 0x331   : > { %v16302_v13 = vpop.f32.mrf.mxu1 }
 0x333   : > { %v16336_v41 = vpop.f32.mrf.mxu0 }
 0x335   : > { %v16232_v63 = vpop.f32.mrf.mxu2 }
 0x336   : > { %v4649_v8 = vadd.f32 %v16232_v63, %v4423_v22  ;;  %v5358_v63 = vld [vmem:[#allocation3 + $0x1c] sm:$0xf]  ;;  %v4290_v22 = vadd.f32 %v16208_v21, %v4122_v48  ;;  %v16346_v44 = vpop.f32.mrf.mxu3  ;;  %v5384_v21 = vrot.slane %v5383_v5, 4  ;;  %v14160_v48 = vld [vmem:[%s18292_s1 + $0x6c8] sm:$0xff]  ;;  %v5418_v5 = vshll.u32 %v5360_v3, 16 }
 0x337   : > { %v5400_v57 = vshll.u32 %v5358_v63, 16  ;;  %5914 = vmatpush.bf16.msrb.mxu0 %v14160_v48  ;;  %v5424_v48 = vshll.u32 %v16386_v15, 16 }
 0x338   : > { %v4811_v9 = vadd.f32 %v4791_v39, %v4649_v8  ;;  %v4424_v24 = vadd.f32 %v16214_v23, %v4290_v22  ;;  %v14169_v39 = vld [vmem:[%s18292_s1 + $0x710] sm:$0xff]  ;;  %v5404_v23 = vshrl.u32 %v5358_v63, 16  ;;  %v5388_v8 = vrot.slane %v5386_v62, 5 }
 0x339   : > { %v16348_v59 = vpop.f32.mrf.mxu1  ;;  %5812 = vmatpush.bf16.msra.mxu3 %v14169_v39  ;;  %v16379_v1 = vrot.slane %v5400_v57, 5  ;;  %v4127_v63 = vadd.f32 %v16220_v38, %v16200_v11  ;;  %v4425_v62 = vadd.f32 %v16222_v50, %v4291_v18  ;;  %v5470_v39 = vunpack.c.l.bf16 %v5379_v12  ;;  %v16398_v11 = vld [vmem:[%s18293_s2 + $0x2] ss:$0 sm:$0xff] }
 0x33a   : > { %v4945_v26 = vadd.f32 %v16296_v47, %v4811_v9  ;;  %v5397_v47 = vor.u32 %v5396_v6, %v5393_v28  ;;  %v5389_v22 = vsel %vm14634_vm4, %v5384_v21, %v5388_v8  ;;  %v5406_v9 = vrot.slane %v5404_v23, 4  ;;  %v16415_v23 = vld [vmem:[#allocation3 + $0x2c] sm:$0x1] }
 0x33b   : > { %v16400_v38 = vrot.slane %v5415_v46, 4  ;;  %v16402_v6 = vunpack.c.l.bf16 %v5389_v22  ;;  %v16412_v21 = vrot.slane %v5418_v5, 5  ;;  %v4292_v8 = vadd.f32 %v16224_v60, %v4127_v63 }
 0x33c   : > { %v5171_v28 = vadd.f32 %v16302_v13, %v4945_v26  ;;  %v16404_v18 = vrot.slane %v5397_v47, 4  ;;  %v14176_v13 = vld [vmem:[%s18292_s1 + $0x748] sm:$0xff]  ;;  %v5407_v12 = vor.u32 %v5406_v9, %v16379_v1  ;;  %v5650_v9 = vshll.u32 %v16423_v36, 16 }
 0x33d   : > { %v16240_v7 = vpop.f32.mrf.mxu2  ;;  %5813 = vmatpush.bf16.msra.mxu3 %v14168_v42  ;;  %v5602_v26 = vld [vmem:[#allocation3 + $0x4] sm:$0xf]  ;;  %v5428_v42 = vshrl.u32 %v16386_v15, 16  ;;  %6064 = vmatpush.bf16.msrb.mxu1 %v14176_v13 }
 0x33e   : > { %v4650_v10 = vadd.f32 %v16240_v7, %v4424_v24  ;;  %v14159_v7 = vld [vmem:[%s18292_s1 + $0x6c0] sm:$0xff]  ;;  %v16388_v24 = vpop.f32.mrf.mxu0  ;;  %v5640_v58 = vshll.u32 %v5602_v26, 16  ;;  %v5644_v47 = vshrl.u32 %v5602_v26, 16  ;;  %v16425_v5 = vpop.f32.mrf.mxu3  ;;  %v5652_v0 = vrot.slane %v5650_v9, 5 }
 0x33f   : > { %5915 = vmatpush.bf16.msrb.mxu0 %v14159_v7 }
 0x340   : > { %v4812_v57 = vadd.f32 %v16300_v20, %v4650_v10  ;;  %v14155_v20 = vld [vmem:[#allocation3] sm:$0xff] }
 0x341   : > { %v5601_v10 = vld [vmem:[#allocation3] sm:$0xf]  ;;  %v16427_v60 = vpop.f32.mrf.mxu1 }
 0x342   : > { %v5631_v46 = vshrl.u32 %v5601_v10, 16  ;;  %v5634_v7 = vshll.u32 %v5601_v10, 16  ;;  %v4946_v22 = vadd.f32 %v16336_v41, %v4812_v57  ;;  %5916 = vmatmul.bf16.vlgmr.msrb.gmra.mxu0 %v14155_v20  ;;  %v5646_v10 = vrot.slane %v5644_v47, 4 }
 0x343   : > { %v16443_v57 = vrot.slane %v5424_v48, 5  ;;  %v4426_v20 = vadd.f32 %v16230_v40, %v4292_v8 }
 0x344   : > { %v5633_v15 = vrot.slane %v5631_v46, 4  ;;  %v4130_v46 = vadd.f32 %v16228_v54, %v16206_v37  ;;  %v5937_v37 = vld [vmem:[#allocation3] sm:$0xe]  ;;  %v5951_v54 = vrot.slane %v5602_v26, 5 }
 0x345   : > { %v16244_v25 = vpop.f32.mrf.mxu2 }
 0x346   : > { %v4651_v3 = vadd.f32 %v16244_v25, %v4425_v62  ;;  %v14167_v25 = vld [vmem:[%s18292_s1 + $0x700] sm:$0xff]  ;;  %v16452_v47 = vpop.f32.mrf.mxu0  ;;  %v4293_v26 = vadd.f32 %v16234_v31, %v4130_v46  ;;  %v5421_v31 = vor.u32 %v16412_v21, %v16400_v38  ;;  %v5363_v46 = vld [vmem:[#allocation3 + $0x30] sm:$0xf] }
 0x347   : > { %5814 = vmatpush.bf16.msra.mxu3 %v14167_v25 }
 0x348   : > { %v4813_v63 = vadd.f32 %v16346_v44, %v4651_v3  ;;  %v14189_v44 = vld [vmem:[%s18292_s1 + $0x790] sm:$0xff]  ;;  %v4427_v38 = vadd.f32 %v16238_v29, %v4293_v26 }
 0x349   : > { %6197 = vmatpush.bf16.msrb.mxu2 %v14189_v44 }
 0x34a   : > { %v4947_v25 = vadd.f32 %v16388_v24, %v4813_v63  ;;  %v12492_v24 = vrot.slane %v5937_v37, 9  ;;  %v5954_v63 = vrot.slane %v16423_v36, 5  ;;  %v5158_v36 = vpop.f32.mrf.mxu1 }
 0x34c   : > { %v5952_v44 = vsel %vm14646_vm5, %v12492_v24, %v5951_v54 }
 0x34d   : > { %v16261_v35 = vpop.f32.mrf.mxu2 }
 0x34e   : > { %v4652_v48 = vadd.f32 %v16261_v35, %v4426_v20  ;;  %v4801_v20 = vpop.f32.mrf.mxu3 }
 0x355   : > { %v16287_v52 = vpop.f32.mrf.mxu2 }
 0x356   : > { %v4653_v29 = vadd.f32 %v16287_v52, %v4427_v38 }
 0x35d   : > { %v16291_v33 = vpop.f32.mrf.mxu2 }
 0x365   : > { %v16304_v55 = vpop.f32.mrf.mxu2 }
 0x366   : > { %18321 = vst [vmem:[#allocation8_spill] sm:$0xff] %v16304_v55 }
 0x36d   : > { %v16342_v55 = vpop.f32.mrf.mxu2 }
 0x36e   : > { %18322 = vst [vmem:[#allocation10_spill] sm:$0xff] %v16342_v55  ;;  %v14175_v55 = vld [vmem:[%s18292_s1 + $0x740] sm:$0xff] }
 0x36f   : > { %6065 = vmatpush.bf16.msrb.mxu1 %v14175_v55 }
 0x375   : > { %v5313_v50 = vpop.f32.mrf.mxu2 }
 0x376   : > { %v5333_v32 = vadd.f32 %v5313_v50, %v5171_v28  ;;  %v5636_v28 = vrot.slane %v5634_v7, 5  ;;  %v5642_v50 = vrot.slane %v5640_v58, 5  ;;  %v16450_v58 = vrot.slane %v5407_v12, 4 }
 0x378   : > { %v5346_v62 = vadd.f32 %v16398_v11, %v5333_v32  ;;  %v5637_v13 = vor.u32 %v5636_v28, %v5633_v15  ;;  %v5647_v32 = vor.u32 %v5646_v10, %v5642_v50 }
 0x37a   : > { %v5478_v3 = vadd.f32 %v5470_v39, %v5346_v62  ;;  %v5172_v39 = vadd.f32 %v16348_v59, %v4946_v22  ;;  %v5638_v41 = vrot.slane %v5637_v13, 4  ;;  %v5648_v40 = vrot.slane %v5647_v32, 4  ;;  %v14188_v59 = vld [vmem:[%s18292_s1 + $0x788] sm:$0xff] }
 0x37b   : > { %6198 = vmatpush.bf16.msrb.mxu2 %v14188_v59  ;;  %v5413_v59 = vsel %vm14634_vm4, %v16450_v58, %v16390_v16  ;;  %v4135_v58 = vadd.f32 %v16246_v61, %v16218_v19 }
 0x37c   : > { %v5486_v7 = vpack.c.bf16 %v5478_v3, %v5478_v3  ;;  %v5643_v12 = vsel %vm14634_vm4, %v5638_v41, %v5642_v50  ;;  %v5653_v35 = vsel %vm14634_vm4, %v5648_v40, %v5652_v0  ;;  %v5953_v3 = vrot.slane %v5951_v54, 4  ;;  %v14187_v50 = vld [vmem:[%s18292_s1 + $0x780] sm:$0xff]  ;;  %v4935_v54 = vpop.f32.mrf.mxu0 }
 0x37d   : > { %v5315_v62 = vpop.f32.mrf.mxu2  ;;  %v5743_v28 = vunpack.c.l.b16 %v5643_v12  ;;  %v5744_v10 = vunpack.c.l.b16 %v5653_v35  ;;  %v5430_v41 = vrot.slane %v5428_v42, 4  ;;  %v5994_v42 = vunpack.c.l.b16 %v5952_v44 }
 0x37e   : > { %v5495_v8 = vshrl.u32 %v5486_v7, 16  ;;  %v5498_v9 = vshll.u32 %v5486_v7, 16  ;;  %v5334_v15 = vadd.f32 %v5315_v62, %v5172_v39  ;;  %v4132_v7 = vadd.f32 %v16236_v56, %v16210_v51 }
 0x37f   : > { %v5751_v0 = vpack.c.b16 %v5744_v10, %v5743_v28  ;;  %v4814_v39 = vadd.f32 %v16425_v5, %v4652_v48  ;;  %v5955_v62 = vsel %vm14646_vm5, %v5953_v3, %v5954_v63  ;;  %6199 = vmatpush.bf16.msrb.mxu2 %v14187_v50  ;;  %v5431_v51 = vor.u32 %v5430_v41, %v16443_v57 }
 0x380   : > { %v16464_v55 = vrot.slane %v5495_v8, 7  ;;  %v5347_v22 = vadd.f32 %v16398_v11, %v5334_v15  ;;  %v5439_v56 = vshrl.u32 %v5363_v46, 16  ;;  %v5442_v5 = vshll.u32 %v5363_v46, 16  ;;  %v16514_v46 = vld [vmem:[#allocation3 + $0x34] sm:$0xf] }
 0x381   : > { %5815 = vmatmul.bf16.vlgmr.msra.gmra.mxu3 %v5751_v0  ;;  %v5422_v12 = vrot.slane %v5421_v31, 4  ;;  %v4815_v44 = vadd.f32 %v4801_v20, %v4653_v29  ;;  %v18324_v50 = vshll.u32 %v16415_v23, 16  ;;  %v5473_v61 = vunpack.c.l.bf16 %v5413_v59  ;;  %v18325_v29 = vld [vmem:[#allocation11_spill] sm:$0xff] }
 0x382   : > { %v5500_v13 = vor.u32 %v5498_v9, %v16464_v55  ;;  %v5479_v32 = vadd.f32 %v16402_v6, %v5347_v22  ;;  %v5173_v6 = vadd.f32 %v16427_v60, %v4947_v25  ;;  %v5995_v9 = vunpack.c.l.b16 %v5955_v62 }
 0x383   : > { %v4294_v25 = vadd.f32 %v16242_v53, %v4132_v7  ;;  %v4948_v22 = vadd.f32 %v16452_v47, %v4814_v39  ;;  %v5427_v53 = vsel %vm14634_vm4, %v5422_v12, %v16443_v57  ;;  %v5444_v52 = vrot.slane %v5442_v5, 5  ;;  %v5577_v47 = vld [vmem:[#allocation3 + $0x14] sm:$0x1]  ;;  %v5161_v57 = vpop.f32.mrf.mxu1  ;;  %v5580_v12 = vld [vmem:[#allocation3 + $0x18] sm:$0xf] }
 0x384   : > { %v5574_v40 = vsel %vm14717_vm11, %v5500_v13, %v16294_v17  ;;  %v5487_v8 = vpack.c.bf16 %v5479_v32, %v5479_v32  ;;  %v18323_v17 = vsel %vm14634_vm4, %v16404_v18, %v16379_v1  ;;  %v6002_v60 = vpack.c.b16 %v5995_v9, %v5994_v42  ;;  %v4803_v13 = vpop.f32.mrf.mxu3  ;;  %v16523_v9 = vld [vmem:[#allocation3 + $0x38] sm:$0x1]  ;;  %v4937_v5 = vpop.f32.mrf.mxu0 }
 0x385   : > { %5575 = vst [vmem:[#allocation3 + $0xc] sm:$0xf] %v5574_v40  ;;  %v5318_v21 = vpop.f32.mrf.mxu2  ;;  %v5472_v37 = vunpack.c.l.bf16 %v18323_v17  ;;  %v5432_v1 = vrot.slane %v5431_v51, 4  ;;  %v5441_v18 = vrot.slane %v5439_v56, 4  ;;  %v5501_v28 = vrot.slane %v16464_v55, 4 }
 0x386   : > { %v5503_v48 = vshrl.u32 %v5487_v8, 16  ;;  %v5335_v15 = vadd.f32 %v5318_v21, %v5173_v6  ;;  %v5506_v24 = vshll.u32 %v5487_v8, 16  ;;  %6066 = vmatmul.bf16.vlgmr.msrb.gmra.mxu1 %v6002_v60  ;;  %v4428_v3 = vadd.f32 %v16248_v43, %v4294_v25 }
 0x387   : > { %v5436_v41 = vrot.slane %v18324_v50, 5  ;;  %v5174_v31 = vadd.f32 %v5158_v36, %v4948_v22  ;;  %v16516_v43 = vunpack.c.l.bf16 %v5427_v53  ;;  %v5445_v20 = vor.u32 %v5444_v52, %v5441_v18 }
 0x388   : > { %v5505_v35 = vrot.slane %v5503_v48, 7  ;;  %v5348_v63 = vadd.f32 %v16398_v11, %v5335_v15  ;;  %v4654_v23 = vadd.f32 %v16291_v33, %v4428_v3  ;;  %v4295_v42 = vadd.f32 %v16253_v14, %v4135_v58 }
 0x389   : > { %v5437_v62 = vsel %vm14634_vm4, %v5432_v1, %v5436_v41  ;;  %v4949_v36 = vadd.f32 %v4935_v54, %v4815_v44  ;;  %v5448_v6 = vshll.u32 %v16514_v46, 16  ;;  %v4137_v56 = vadd.f32 %v16272_v4, %v16226_v2 }
 0x38a   : > { %v5508_v10 = vor.u32 %v5506_v24, %v5505_v35  ;;  %v5510_v26 = vrot.slane %v5505_v35, 4  ;;  %v5480_v16 = vadd.f32 %v5472_v37, %v5348_v63  ;;  %v16530_v48 = vunpack.c.l.bf16 %v5437_v62 }
 0x38b   : > { %v16532_v15 = vrot.slane %v5445_v20, 4  ;;  %v5452_v17 = vshrl.u32 %v16514_v46, 16  ;;  %v4816_v37 = vadd.f32 %v4803_v13, %v4654_v23  ;;  %v5458_v54 = vshll.u32 %v16523_v9, 16  ;;  %v5163_v41 = vpop.f32.mrf.mxu1  ;;  %v14222_v46 = vld [vmem:[%s18292_s1 + $0x878] sm:$0xff] }
 0x38c   : > { %v5509_v32 = vsel %vm14724_vm12, %v5501_v28, %v5508_v10  ;;  %v5578_v55 = vsel %vm14731_vm13, %v5510_v26, %v5577_v47  ;;  %v5488_v0 = vpack.c.bf16 %v5480_v16, %v5480_v16  ;;  %v5603_v8 = vld [vmem:[#allocation3 + $0xc] sm:$0xf]  ;;  %v4429_v59 = vadd.f32 %v18325_v29, %v4295_v42  ;;  %v18327_v26 = vld [vmem:[#allocation8_spill] sm:$0xff]  ;;  %v4806_v50 = vpop.f32.mrf.mxu3  ;;  %6714 = vmatpush.bf16.msra.mxu1 %v14222_v46 }
 0x38d   : > { %5576 = vst [vmem:[#allocation3 + $0x10] sm:$0xf] %v5509_v32  ;;  %v5320_v19 = vpop.f32.mrf.mxu2  ;;  %v5655_v33 = vshrl.u32 %v5603_v8, 16  ;;  %v5658_v51 = vshll.u32 %v5603_v8, 16  ;;  %v5938_v14 = vld [vmem:[#allocation3 + $0xc] sm:$0xe]  ;;  %v5175_v22 = vadd.f32 %v5161_v57, %v4949_v36  ;;  %v4950_v57 = vadd.f32 %v4937_v5, %v4816_v37 }
 0x38e   : > { %5579 = vst [vmem:[#allocation3 + $0x14] sm:$0x1] %v5578_v55  ;;  %v5512_v7 = vshrl.u32 %v5488_v0, 16  ;;  %v5336_v39 = vadd.f32 %v5320_v19, %v5174_v31  ;;  %v5515_v40 = vshll.u32 %v5488_v0, 16  ;;  %v16538_v2 = vrot.slane %v5448_v6, 5  ;;  %v18326_v28 = vld [vmem:[#allocation7_spill] sm:$0xff] }
 0x38f   : > { %v5657_v35 = vrot.slane %v5655_v33, 4  ;;  %v5660_v24 = vrot.slane %v5658_v51, 5  ;;  %v12493_v52 = vrot.slane %v5938_v14, 9  ;;  %v4296_v10 = vadd.f32 %v18326_v28, %v4137_v56  ;;  %v14210_v0 = vld [vmem:[%s18292_s1 + $0x838] sm:$0xff]  ;;  %v14209_v42 = vld [vmem:[%s18292_s1 + $0x830] sm:$0xff]  ;;  %v18328_v14 = vld [vmem:[#allocation9_spill] sm:$0xff] }
 0x390   : > { %v16525_v38 = vrot.slane %v5512_v7, 7  ;;  %v5349_v21 = vadd.f32 %v16398_v11, %v5336_v39  ;;  %v4655_v16 = vadd.f32 %v18327_v26, %v4429_v59  ;;  %6580 = vmatpush.bf16.msra.mxu0 %v14210_v0  ;;  %v5451_v26 = vsel %vm14634_vm4, %v16532_v15, %v16538_v2 }
 0x391   : > { %v5661_v20 = vor.u32 %v5660_v24, %v5657_v35  ;;  %v4430_v37 = vadd.f32 %v18328_v14, %v4296_v10 }
 0x392   : > { %v5517_v60 = vor.u32 %v5515_v40, %v16525_v38  ;;  %v5481_v25 = vadd.f32 %v5473_v61, %v5349_v21  ;;  %v5518_v13 = vrot.slane %v16525_v38, 4  ;;  %v4940_v40 = vpop.f32.mrf.mxu0  ;;  %v4817_v5 = vadd.f32 %v4806_v50, %v4655_v16 }
 0x394   : > { %v5581_v4 = vsel %vm14717_vm11, %v5517_v60, %v5580_v12  ;;  %v5489_v63 = vpack.c.bf16 %v5481_v25, %v5481_v25  ;;  %v14156_v53 = vld [vmem:[#allocation3 + $0xc] sm:$0xff]  ;;  %v5584_v60 = vld [vmem:[#allocation3 + $0x20] sm:$0x1]  ;;  %v5176_v25 = vadd.f32 %v5163_v41, %v4950_v57  ;;  %6581 = vmatpush.bf16.msra.mxu0 %v14209_v42  ;;  %v4951_v16 = vadd.f32 %v4940_v40, %v4817_v5  ;;  %v4808_v50 = vpop.f32.mrf.mxu3 }
 0x395   : > { %v14183_v1 = vld [vmem:[#allocation3 + $0xc] sm:$0xff]  ;;  %5582 = vst [vmem:[#allocation3 + $0x18] sm:$0xf] %v5581_v4  ;;  %v5323_v58 = vpop.f32.mrf.mxu2  ;;  %v5627_v44 = vld [vmem:[#allocation3 + $0x14] sm:$0x1]  ;;  %5921 = vmatmul.bf16.gmra.mxu0 %v14156_v53  ;;  %v18329_v4 = vld [vmem:[#allocation10_spill] sm:$0xff] }
 0x396   : > { %v5604_v18 = vld [vmem:[#allocation3 + $0x10] sm:$0xf]  ;;  %v5520_v32 = vshrl.u32 %v5489_v63, 16  ;;  %v5337_v55 = vadd.f32 %v5323_v58, %v5175_v22  ;;  %6200 = vmatmul.bf16.vlgmr.msrb.gmra.mxu2 %v14183_v1  ;;  %v5961_v61 = vrot.slane %v5627_v44, 5  ;;  %v5523_v7 = vshll.u32 %v5489_v63, 16 }
 0x397   : > { %v5958_v3 = vrot.slane %v5604_v18, 5  ;;  %v5664_v47 = vshll.u32 %v5604_v18, 16  ;;  %v5668_v62 = vshrl.u32 %v5604_v18, 16  ;;  %v5674_v38 = vshll.u32 %v5627_v44, 16  ;;  %v5166_v18 = vpop.f32.mrf.mxu1  ;;  %v14230_v40 = vld [vmem:[%s18292_s1 + $0x8b8] sm:$0xff] }
 0x398   : > { %v5522_v23 = vrot.slane %v5520_v32, 7  ;;  %v5350_v39 = vadd.f32 %v16398_v11, %v5337_v55  ;;  %v4656_v63 = vadd.f32 %v18329_v4, %v4430_v37  ;;  %v5662_v22 = vrot.slane %v5661_v20, 4  ;;  %v14202_v55 = vld [vmem:[%s18292_s1 + $0x7f8] sm:$0xff]  ;;  %v14207_v20 = vld [vmem:[%s18292_s1 + $0x820] sm:$0xff]  ;;  %6940 = vmatpush.bf16.msra.mxu2 %v14230_v40 }
 0x399   : > { %v5959_v31 = vsel %vm14646_vm5, %v12493_v52, %v5958_v3  ;;  %v5960_v19 = vrot.slane %v5958_v3, 4  ;;  %v5666_v6 = vrot.slane %v5664_v47, 5  ;;  %v5670_v29 = vrot.slane %v5668_v62, 4  ;;  %6418 = vmatpush.bf16.msrb.mxu3 %v14202_v55 }
 0x39a   : > { %v5996_v8 = vunpack.c.l.b16 %v5959_v31  ;;  %v5525_v21 = vor.u32 %v5523_v7, %v5522_v23  ;;  %v5527_v33 = vrot.slane %v5522_v23, 4  ;;  %v5482_v51 = vadd.f32 %v16516_v43, %v5350_v39  ;;  %v5587_v7 = vld [vmem:[#allocation3 + $0x24] sm:$0xf] }
 0x39b   : > { %v5962_v36 = vsel %vm14646_vm5, %v5960_v19, %v5961_v61  ;;  %v5671_v53 = vor.u32 %v5670_v29, %v5666_v6  ;;  %v16565_v1 = vrot.slane %v5452_v17, 4  ;;  %v5676_v10 = vrot.slane %v5674_v38, 5  ;;  %v14208_v17 = vld [vmem:[%s18292_s1 + $0x828] sm:$0xff]  ;;  %v14221_v61 = vld [vmem:[%s18292_s1 + $0x870] sm:$0xff] }
 0x39c   : > { %v5997_v56 = vunpack.c.l.b16 %v5962_v36  ;;  %v5526_v59 = vsel %vm14724_vm12, %v5518_v13, %v5525_v21  ;;  %v5585_v12 = vsel %vm14731_vm13, %v5527_v33, %v5584_v60  ;;  %v5490_v35 = vpack.c.bf16 %v5482_v51, %v5482_v51  ;;  %v5605_v47 = vld [vmem:[#allocation3 + $0x18] sm:$0xf]  ;;  %6582 = vmatpush.bf16.msra.mxu0 %v14208_v17  ;;  %v14206_v33 = vld [vmem:[%s18292_s1 + $0x818] sm:$0xff]  ;;  %v14229_v51 = vld [vmem:[%s18292_s1 + $0x8b0] sm:$0xff]  ;;  %6715 = vmatpush.bf16.msra.mxu1 %v14221_v61 }
 0x39d   : > { %5583 = vst [vmem:[#allocation3 + $0x1c] sm:$0xf] %v5526_v59  ;;  %v5325_v43 = vpop.f32.mrf.mxu2  ;;  %v5667_v44 = vsel %vm14634_vm4, %v5662_v22, %v5666_v6  ;;  %v5672_v3 = vrot.slane %v5671_v53, 4  ;;  %v5679_v13 = vshrl.u32 %v5605_v47, 16  ;;  %v5682_v32 = vshll.u32 %v5605_v47, 16  ;;  %6941 = vmatpush.bf16.msra.mxu2 %v14229_v51 }
 0x39e   : > { %v6003_v24 = vpack.c.b16 %v5997_v56, %v5996_v8  ;;  %5586 = vst [vmem:[#allocation3 + $0x20] sm:$0x1] %v5585_v12  ;;  %v5529_v52 = vshrl.u32 %v5490_v35, 16  ;;  %v5338_v28 = vadd.f32 %v5325_v43, %v5176_v25  ;;  %v5532_v58 = vshll.u32 %v5490_v35, 16  ;;  %v5939_v19 = vld [vmem:[#allocation3 + $0x18] sm:$0xe]  ;;  %v4942_v8 = vpop.f32.mrf.mxu0 }
 0x39f   : > { %v4818_v57 = vadd.f32 %v4808_v50, %v4656_v63  ;;  %v5677_v0 = vsel %vm14634_vm4, %v5672_v3, %v5676_v10  ;;  %v5455_v31 = vor.u32 %v16565_v1, %v16538_v2  ;;  %v5745_v62 = vunpack.c.l.b16 %v5667_v44  ;;  %v14201_v2 = vld [vmem:[%s18292_s1 + $0x7f0] sm:$0xff]  ;;  %v14228_v44 = vld [vmem:[%s18292_s1 + $0x8a8] sm:$0xff]  ;;  %v14219_v50 = vld [vmem:[%s18292_s1 + $0x860] sm:$0xff] }
 0x3a0   : > { %6071 = vmatmul.bf16.gmra.mxu1 %v6003_v24  ;;  %v16579_v41 = vrot.slane %v5529_v52, 7  ;;  %v5351_v15 = vadd.f32 %v16398_v11, %v5338_v28  ;;  %v5746_v42 = vunpack.c.l.b16 %v5677_v0  ;;  %v5177_v36 = vadd.f32 %v5166_v18, %v4951_v16  ;;  %6583 = vmatpush.bf16.msra.mxu0 %v14207_v20  ;;  %v14200_v52 = vld [vmem:[%s18292_s1 + $0x7e8] sm:$0xff]  ;;  %v5168_v28 = vpop.f32.mrf.mxu1  ;;  %v5591_v0 = vld [vmem:[#allocation3 + $0x2c] sm:$0x1]  ;;  %v14199_v20 = vld [vmem:[%s18292_s1 + $0x7e0] sm:$0xff] }
 0x3a1   : > { %v16605_v6 = vrot.slane %v5458_v54, 5  ;;  %v5681_v38 = vrot.slane %v5679_v13, 4  ;;  %v5684_v21 = vrot.slane %v5682_v32, 5  ;;  %v12494_v60 = vrot.slane %v5939_v19, 9  ;;  %6419 = vmatpush.bf16.msrb.mxu3 %v14201_v2  ;;  %6942 = vmatpush.bf16.msra.mxu2 %v14228_v44  ;;  %v14227_v2 = vld [vmem:[%s18292_s1 + $0x8a0] sm:$0xff] }
 0x3a2   : > { %v5534_v23 = vor.u32 %v5532_v58, %v16579_v41  ;;  %v5483_v39 = vadd.f32 %v16530_v48, %v5351_v15  ;;  %v14220_v48 = vld [vmem:[%s18292_s1 + $0x868] sm:$0xff]  ;;  %v5752_v54 = vpack.c.b16 %v5746_v42, %v5745_v62  ;;  %v5476_v29 = vunpack.c.l.bf16 %v5451_v26  ;;  %v14205_v15 = vld [vmem:[%s18292_s1 + $0x810] sm:$0xff] }
 0x3a3   : > { %v4952_v24 = vadd.f32 %v4942_v8, %v4818_v57  ;;  %v16620_v43 = vrot.slane %v5455_v31, 4  ;;  %v5685_v18 = vor.u32 %v5684_v21, %v5681_v38  ;;  %v5535_v3 = vrot.slane %v16579_v41, 4  ;;  %6716 = vmatpush.bf16.msra.mxu1 %v14220_v48  ;;  %v14218_v38 = vld [vmem:[%s18292_s1 + $0x858] sm:$0xff]  ;;  %v14204_v21 = vld [vmem:[%s18292_s1 + $0x808] sm:$0xff] }
 0x3a4   : > { %v5588_v56 = vsel %vm14717_vm11, %v5534_v23, %v5587_v7  ;;  %v5491_v9 = vpack.c.bf16 %v5483_v39, %v5483_v39  ;;  %v14157_v5 = vld [vmem:[#allocation3 + $0x18] sm:$0xff]  ;;  %5820 = vmatmul.bf16.gmra.mxu3 %v5752_v54  ;;  %6584 = vmatpush.bf16.msra.mxu0 %v14206_v33 }
 0x3a5   : > { %v14184_v14 = vld [vmem:[#allocation3 + $0x18] sm:$0xff]  ;;  %5589 = vst [vmem:[#allocation3 + $0x24] sm:$0xf] %v5588_v56  ;;  %v5328_v25 = vpop.f32.mrf.mxu2  ;;  %v16618_v59 = vld [vmem:[#allocation3 + $0x20] sm:$0x1]  ;;  %5926 = vmatmul.bf16.gmra.mxu0 %v14157_v5  ;;  %v5178_v41 = vadd.f32 %v5168_v28, %v4952_v24  ;;  %v5686_v31 = vrot.slane %v5685_v18, 4  ;;  %6420 = vmatpush.bf16.msrb.mxu3 %v14200_v52 }
 0x3a6   : > { %v5606_v37 = vld [vmem:[#allocation3 + $0x1c] sm:$0xf]  ;;  %v5537_v4 = vshrl.u32 %v5491_v9, 16  ;;  %v5339_v63 = vadd.f32 %v5328_v25, %v5177_v36  ;;  %6205 = vmatmul.bf16.gmra.mxu2 %v14184_v14  ;;  %v5968_v1 = vrot.slane %v16618_v59, 5  ;;  %v5540_v26 = vshll.u32 %v5491_v9, 16  ;;  %v14198_v14 = vld [vmem:[%s18292_s1 + $0x7d8] sm:$0xff] }
 0x3a7   : > { %v5965_v12 = vrot.slane %v5606_v37, 5  ;;  %v5688_v35 = vshll.u32 %v5606_v37, 16  ;;  %v5692_v58 = vshrl.u32 %v5606_v37, 16  ;;  %v5698_v61 = vshll.u32 %v16618_v59, 16  ;;  %6717 = vmatpush.bf16.msra.mxu1 %v14219_v50  ;;  %v16664_v9 = vld [vmem:[#allocation3 + $0x10] sm:$0xf]  ;;  %6943 = vmatpush.bf16.msra.mxu2 %v14227_v2 }
 0x3a8   : > { %v5539_v10 = vrot.slane %v5537_v4, 7  ;;  %v5352_v16 = vadd.f32 %v16398_v11, %v5339_v63  ;;  %v5461_v36 = vsel %vm14634_vm4, %v16620_v43, %v16605_v6  ;;  %6585 = vmatpush.bf16.msra.mxu0 %v14205_v15  ;;  %v6455_v59 = vld [vmem:[#allocation3 + $0xc] sm:$0xe] }
 0x3a9   : > { %v5966_v22 = vsel %vm14646_vm5, %v12494_v60, %v5965_v12  ;;  %v5967_v53 = vrot.slane %v5965_v12, 4  ;;  %v5690_v47 = vrot.slane %v5688_v35, 5  ;;  %v5694_v19 = vrot.slane %v5692_v58, 4  ;;  %6421 = vmatpush.bf16.msrb.mxu3 %v14199_v20  ;;  %v14226_v12 = vld [vmem:[%s18292_s1 + $0x898] sm:$0xff]  ;;  %v14217_v43 = vld [vmem:[%s18292_s1 + $0x850] sm:$0xff] }
 0x3aa   : > { %v5998_v17 = vunpack.c.l.b16 %v5966_v22  ;;  %v5542_v13 = vor.u32 %v5540_v26, %v5539_v10  ;;  %v5544_v32 = vrot.slane %v5539_v10, 4  ;;  %v5484_v55 = vadd.f32 %v5476_v29, %v5352_v16  ;;  %v14197_v10 = vld [vmem:[%s18292_s1 + $0x7d0] sm:$0xff]  ;;  %v14216_v16 = vld [vmem:[%s18292_s1 + $0x848] sm:$0xff] }
 0x3ab   : > { %v5969_v46 = vsel %vm14646_vm5, %v5967_v53, %v5968_v1  ;;  %v5695_v8 = vor.u32 %v5694_v19, %v5690_v47  ;;  %v5691_v56 = vsel %vm14634_vm4, %v5686_v31, %v5690_v47  ;;  %v5700_v5 = vrot.slane %v5698_v61, 5  ;;  %6718 = vmatpush.bf16.msra.mxu1 %v14218_v38  ;;  %v5594_v1 = vld [vmem:[#allocation3 + $0x30] sm:$0xf]  ;;  %v14225_v58 = vld [vmem:[%s18292_s1 + $0x890] sm:$0xff]  ;;  %6944 = vmatpush.bf16.msra.mxu2 %v14226_v12  ;;  %v16700_v61 = vld [vmem:[#allocation3 + $0x14] sm:$0x1] }
 0x3ac   : > { %v5999_v57 = vunpack.c.l.b16 %v5969_v46  ;;  %v5543_v23 = vsel %vm14724_vm12, %v5535_v3, %v5542_v13  ;;  %v5592_v7 = vsel %vm14731_vm13, %v5544_v32, %v5591_v0  ;;  %v5492_v39 = vpack.c.bf16 %v5484_v55, %v5484_v55  ;;  %v5607_v42 = vld [vmem:[#allocation3 + $0x24] sm:$0xf]  ;;  %6586 = vmatpush.bf16.msra.mxu0 %v14204_v21  ;;  %v6229_v38 = vld [vmem:[#allocation3 + $0xc] sm:$0xf] }
 0x3ad   : > { %5590 = vst [vmem:[#allocation3 + $0x28] sm:$0xf] %v5543_v23  ;;  %v5330_v40 = vpop.f32.mrf.mxu2  ;;  %v5703_v48 = vshrl.u32 %v5607_v42, 16  ;;  %v5706_v6 = vshll.u32 %v5607_v42, 16  ;;  %v5696_v54 = vrot.slane %v5695_v8, 4  ;;  %v5477_v29 = vunpack.c.l.bf16 %v5461_v36  ;;  %6422 = vmatpush.bf16.msrb.mxu3 %v14198_v14  ;;  %v14224_v42 = vld [vmem:[%s18292_s1 + $0x888] sm:$0xff] }
 0x3ae   : > { %v6004_v62 = vpack.c.b16 %v5999_v57, %v5998_v17  ;;  %5593 = vst [vmem:[#allocation3 + $0x2c] sm:$0x1] %v5592_v7  ;;  %v5546_v33 = vshrl.u32 %v5492_v39, 16  ;;  %v5340_v51 = vadd.f32 %v5330_v40, %v5178_v41  ;;  %v5549_v60 = vshll.u32 %v5492_v39, 16  ;;  %v5940_v4 = vld [vmem:[#allocation3 + $0x24] sm:$0xe] }
 0x3af   : > { %v5701_v35 = vsel %vm14634_vm4, %v5696_v54, %v5700_v5  ;;  %v5747_v24 = vunpack.c.l.b16 %v5691_v56  ;;  %v5705_v63 = vrot.slane %v5703_v48, 4  ;;  %v6473_v22 = vrot.slane %v16664_v9, 5  ;;  %6719 = vmatpush.bf16.msra.mxu1 %v14217_v43  ;;  %6945 = vmatpush.bf16.msra.mxu2 %v14225_v58  ;;  %v14215_v56 = vld [vmem:[%s18292_s1 + $0x840] sm:$0xff] }
 0x3b0   : > { %6076 = vmatmul.bf16.gmra.mxu1 %v6004_v62  ;;  %v16669_v37 = vrot.slane %v5546_v33, 7  ;;  %v5353_v25 = vadd.f32 %v16398_v11, %v5340_v51  ;;  %v14203_v11 = vld [vmem:[%s18292_s1 + $0x800] sm:$0xff]  ;;  %v5748_v52 = vunpack.c.l.b16 %v5701_v35  ;;  %v5708_v28 = vrot.slane %v5706_v6, 5  ;;  %v14196_v62 = vld [vmem:[%s18292_s1 + $0x7c8] sm:$0xff] }
 0x3b1   : > { %v12656_v26 = vrot.slane %v6455_v59, 9  ;;  %v12495_v15 = vrot.slane %v5940_v4, 9  ;;  %6587 = vmatpush.bf16.msra.mxu0 %v14203_v11  ;;  %6423 = vmatpush.bf16.msrb.mxu3 %v14197_v10  ;;  %v6475_v8 = vrot.slane %v6473_v22, 4  ;;  %v6476_v51 = vrot.slane %v16700_v61, 5  ;;  %v5598_v5 = vld [vmem:[#allocation3 + $0x38] sm:$0x1] }
 0x3b2   : > { %v5551_v53 = vor.u32 %v5549_v60, %v16669_v37  ;;  %v5485_v18 = vadd.f32 %v5477_v29, %v5353_v25  ;;  %v5753_v46 = vpack.c.b16 %v5748_v52, %v5747_v24  ;;  %v5709_v31 = vor.u32 %v5708_v28, %v5705_v63  ;;  %v14223_v43 = vld [vmem:[%s18292_s1 + $0x880] sm:$0xff] }
 0x3b3   : > { %v16698_v57 = vsel %vm14646_vm5, %v12656_v26, %v6473_v22  ;;  %v5552_v21 = vrot.slane %v16669_v37, 4  ;;  %6720 = vmatpush.bf16.msra.mxu1 %v14216_v16  ;;  %v14195_v37 = vld [vmem:[%s18292_s1 + $0x7c0] sm:$0xff]  ;;  %v6242_v59 = vshrl.u32 %v6229_v38, 16  ;;  %v6245_v12 = vshll.u32 %v6229_v38, 16  ;;  %6946 = vmatpush.bf16.msra.mxu2 %v14224_v42 }
 0x3b4   : > { %v5595_v44 = vsel %vm14717_vm11, %v5551_v53, %v5594_v1  ;;  %v5493_v3 = vpack.c.bf16 %v5485_v18, %v5485_v18  ;;  %v14158_v17 = vld [vmem:[#allocation3 + $0x24] sm:$0xff]  ;;  %5825 = vmatmul.bf16.gmra.mxu3 %v5753_v46  ;;  %v5710_v25 = vrot.slane %v5709_v31, 4  ;;  %v6477_v22 = vsel %vm14646_vm5, %v6475_v8, %v6476_v51  ;;  %v6751_v52 = vld [vmem:[#allocation3 + $0x18] sm:$0xf]  ;;  %v16735_v10 = vld [vmem:[#allocation3 + $0x1c] sm:$0xf] }
 0x3b5   : > { %v14185_v47 = vld [vmem:[#allocation3 + $0x24] sm:$0xff]  ;;  %5596 = vst [vmem:[#allocation3 + $0x30] sm:$0xf] %v5595_v44  ;;  %v5629_v13 = vld [vmem:[#allocation3 + $0x2c] sm:$0x1]  ;;  %5931 = vmatmul.bf16.gmra.mxu0 %v14158_v17  ;;  %6424 = vmatpush.bf16.msrb.mxu3 %v14196_v62  ;;  %v6251_v53 = vshll.u32 %v16664_v9, 16  ;;  %v6516_v16 = vunpack.c.l.b16 %v16698_v57  ;;  %v6517_v58 = vunpack.c.l.b16 %v6477_v22 }
 0x3b6   : > { %v5608_v50 = vld [vmem:[#allocation3 + $0x28] sm:$0xf]  ;;  %v5554_v41 = vshrl.u32 %v5493_v3, 16  ;;  %v5975_v0 = vrot.slane %v5629_v13, 5  ;;  %6210 = vmatmul.bf16.gmra.mxu2 %v14185_v47  ;;  %v5722_v39 = vshll.u32 %v5629_v13, 16  ;;  %v5557_v40 = vshll.u32 %v5493_v3, 16 }
 0x3b7   : > { %v5972_v32 = vrot.slane %v5608_v50, 5  ;;  %v5712_v55 = vshll.u32 %v5608_v50, 16  ;;  %v5716_v19 = vshrl.u32 %v5608_v50, 16  ;;  %6721 = vmatpush.bf16.msra.mxu1 %v14215_v56  ;;  %v6255_v1 = vshrl.u32 %v16664_v9, 16  ;;  %6947 = vmatpush.bf16.msra.mxu2 %v14223_v43  ;;  %v6233_v50 = vld [vmem:[#allocation3 + $0x1c] sm:$0xf] }
 0x3b8   : > { %v5556_v2 = vrot.slane %v5554_v41, 7  ;;  %v5724_v29 = vrot.slane %v5722_v39, 5  ;;  %v6244_v44 = vrot.slane %v6242_v59, 4  ;;  %v6247_v3 = vrot.slane %v6245_v12, 5  ;;  %v6754_v22 = vld [vmem:[#allocation3 + $0x24] sm:$0xf] }
 0x3b9   : > { %v5973_v20 = vsel %vm14646_vm5, %v12495_v15, %v5972_v32  ;;  %v5974_v23 = vrot.slane %v5972_v32, 4  ;;  %v5714_v7 = vrot.slane %v5712_v55, 5  ;;  %v5718_v36 = vrot.slane %v5716_v19, 4  ;;  %6425 = vmatpush.bf16.msrb.mxu3 %v14195_v37  ;;  %v6232_v37 = vld [vmem:[#allocation3 + $0x18] sm:$0xf] }
 0x3ba   : > { %v6000_v33 = vunpack.c.l.b16 %v5973_v20  ;;  %v5559_v6 = vor.u32 %v5557_v40, %v5556_v2  ;;  %v5561_v54 = vrot.slane %v5556_v2, 4  ;;  %v6253_v46 = vrot.slane %v6251_v53, 5  ;;  %v16740_v20 = vld [vmem:[#allocation3 + $0x20] sm:$0x1]  ;;  %v6456_v2 = vld [vmem:[#allocation3 + $0x18] sm:$0xe] }
 0x3bb   : > { %v5976_v48 = vsel %vm14646_vm5, %v5974_v23, %v5975_v0  ;;  %v5719_v60 = vor.u32 %v5718_v36, %v5714_v7  ;;  %v5715_v11 = vsel %vm14634_vm4, %v5710_v25, %v5714_v7  ;;  %v6257_v17 = vrot.slane %v6255_v1, 4  ;;  %v16743_v40 = vld [vmem:[#allocation3 + $0x20] sm:$0x1] }
 0x3bc   : > { %v6001_v14 = vunpack.c.l.b16 %v5976_v48  ;;  %v5560_v35 = vsel %vm14724_vm12, %v5552_v21, %v5559_v6  ;;  %v5599_v24 = vsel %vm14731_vm13, %v5561_v54, %v5598_v5  ;;  %v5749_v26 = vunpack.c.l.b16 %v5715_v11  ;;  %v16747_v54 = vld [vmem:[#allocation3 + $0x28] sm:$0xf]  ;;  %v14211_v5 = vld [vmem:[#allocation3 + $0x18] sm:$0xff] }
 0x3bd   : > { %v5720_v63 = vrot.slane %v5719_v60, 4  ;;  %5597 = vst [vmem:[#allocation3 + $0x34] sm:$0xf] %v5560_v35  ;;  %v6764_v9 = vshrl.u32 %v6751_v52, 16  ;;  %v6767_v15 = vshll.u32 %v6751_v52, 16  ;;  %v6773_v13 = vshll.u32 %v16735_v10, 16 }
 0x3be   : > { %v6005_v4 = vpack.c.b16 %v6001_v14, %v6000_v33  ;;  %5600 = vst [vmem:[#allocation3 + $0x38] sm:$0x1] %v5599_v24  ;;  %v6777_v32 = vshrl.u32 %v16735_v10, 16  ;;  %v6524_v41 = vpack.c.b16 %v6517_v58, %v6516_v16  ;;  %v6258_v19 = vor.u32 %v6257_v17, %v6253_v46 }
 0x3bf   : > { %v5725_v18 = vsel %vm14634_vm4, %v5720_v63, %v5724_v29  ;;  %v6775_v0 = vrot.slane %v6773_v13, 5  ;;  %v6480_v57 = vrot.slane %v6233_v50, 5  ;;  %v6248_v23 = vor.u32 %v6247_v3, %v6244_v44  ;;  %v6236_v44 = vld [vmem:[#allocation3 + $0x28] sm:$0xf] }
 0x3c0   : > { %6081 = vmatmul.bf16.gmra.mxu1 %v6005_v4  ;;  %v5750_v28 = vunpack.c.l.b16 %v5725_v18  ;;  %v6779_v31 = vrot.slane %v6777_v32, 4  ;;  %v6766_v7 = vrot.slane %v6764_v9, 4  ;;  %v6769_v39 = vrot.slane %v6767_v15, 5 }
 0x3c1   : > { %v6261_v42 = vshll.u32 %v16700_v61, 16  ;;  %v6783_v36 = vshll.u32 %v16740_v20, 16  ;;  %v6259_v8 = vrot.slane %v6258_v19, 4  ;;  %v6482_v38 = vrot.slane %v6480_v57, 4 }
 0x3c2   : > { %v5754_v47 = vpack.c.b16 %v5750_v28, %v5749_v26  ;;  %v6780_v62 = vor.u32 %v6779_v31, %v6775_v0  ;;  %v6249_v21 = vrot.slane %v6248_v23, 4  ;;  %v12657_v48 = vrot.slane %v6456_v2, 9  ;;  %v16768_v31 = vld [vmem:[#allocation3 + $0x2c] sm:$0x1] }
 0x3c3   : > { %v6770_v33 = vor.u32 %v6769_v39, %v6766_v7  ;;  %v6263_v56 = vrot.slane %v6261_v42, 5  ;;  %v6483_v6 = vrot.slane %v16743_v40, 5  ;;  %v6785_v60 = vrot.slane %v6783_v36, 5  ;;  %v14238_v7 = vld [vmem:[%s18292_s1 + $0x8f8] sm:$0xff]  ;;  %v6457_v42 = vld [vmem:[#allocation3 + $0x24] sm:$0xe] }
 0x3c4   : > { %v14186_v55 = vld [vmem:[#allocation3 + $0x30] sm:$0xff]  ;;  %5830 = vmatmul.bf16.gmra.mxu3 %v5754_v47  ;;  %v6781_v51 = vrot.slane %v6780_v62, 4  ;;  %v6254_v61 = vsel %vm14634_vm4, %v6249_v21, %v6253_v46  ;;  %v6481_v14 = vsel %vm14646_vm5, %v12657_v48, %v6480_v57  ;;  %v6275_v59 = vshll.u32 %v6233_v50, 16  ;;  %v16775_v62 = vld [vmem:[#allocation3 + $0x2c] sm:$0x1] }
 0x3c5   : > { %6588 = vmatmul.bf16.vlgmr.msra.gmra.mxu0 %v6524_v41  ;;  %v6264_v25 = vsel %vm14634_vm4, %v6259_v8, %v6263_v56  ;;  %v6484_v29 = vsel %vm14646_vm5, %v6482_v38, %v6483_v6  ;;  %v6279_v12 = vshrl.u32 %v6233_v50, 16  ;;  %v6771_v35 = vrot.slane %v6770_v33, 4  ;;  %7102 = vmatpush.bf16.msra.mxu3 %v14238_v7  ;;  %v6235_v21 = vld [vmem:[#allocation3 + $0x24] sm:$0xf]  ;;  %v14237_v48 = vld [vmem:[%s18292_s1 + $0x8f0] sm:$0xff] }
 0x3c6   : > { %6215 = vmatmul.bf16.gmra.mxu2 %v14186_v55  ;;  %v6786_v24 = vsel %vm14634_vm4, %v6781_v51, %v6785_v60  ;;  %v6797_v4 = vshll.u32 %v16747_v54, 16  ;;  %v6801_v63 = vshrl.u32 %v16747_v54, 16  ;;  %v6354_v43 = vunpack.c.l.b16 %v6254_v61  ;;  %v14212_v60 = vld [vmem:[#allocation3 + $0x24] sm:$0xff]  ;;  %v16814_v7 = vld [vmem:[#allocation3 + $0x38] sm:$0x1] }
 0x3c7   : > { %v6518_v11 = vunpack.c.l.b16 %v6481_v14  ;;  %v6355_v53 = vunpack.c.l.b16 %v6264_v25  ;;  %v6519_v1 = vunpack.c.l.b16 %v6484_v29  ;;  %v6776_v18 = vsel %vm14634_vm4, %v6771_v35, %v6775_v0  ;;  %v16782_v14 = vld [vmem:[#allocation3 + $0x34] sm:$0xf] }
 0x3c8   : > { %v6266_v52 = vshrl.u32 %v6232_v37, 16  ;;  %v6877_v28 = vunpack.c.l.b16 %v6786_v24  ;;  %v6269_v26 = vshll.u32 %v6232_v37, 16  ;;  %v16763_v16 = vrot.slane %v6275_v59, 5 }
 0x3c9   : > { %v6281_v58 = vrot.slane %v6279_v12, 4  ;;  %v6788_v3 = vshrl.u32 %v6754_v22, 16  ;;  %v6791_v46 = vshll.u32 %v6754_v22, 16  ;;  %v16765_v17 = vrot.slane %v6797_v4, 5  ;;  %7103 = vmatpush.bf16.msra.mxu3 %v14237_v48  ;;  %v14236_v12 = vld [vmem:[%s18292_s1 + $0x8e8] sm:$0xff] }
 0x3ca   : > { %v6803_v9 = vrot.slane %v6801_v63, 4  ;;  %v6876_v47 = vunpack.c.l.b16 %v6776_v18  ;;  %v6362_v50 = vpack.c.b16 %v6355_v53, %v6354_v43  ;;  %v6525_v15 = vpack.c.b16 %v6519_v1, %v6518_v11  ;;  %v6757_v11 = vld [vmem:[#allocation3 + $0x30] sm:$0xf] }
 0x3cb   : > { %v6487_v13 = vrot.slane %v6236_v44, 5  ;;  %v6268_v55 = vrot.slane %v6266_v52, 4  ;;  %v6271_v41 = vrot.slane %v6269_v26, 5  ;;  %v6282_v0 = vor.u32 %v6281_v58, %v16763_v16 }
 0x3cc   : > { %v6884_v32 = vpack.c.b16 %v6877_v28, %v6876_v47  ;;  %v6790_v19 = vrot.slane %v6788_v3, 4  ;;  %v6793_v57 = vrot.slane %v6791_v46, 5  ;;  %v6804_v23 = vor.u32 %v6803_v9, %v16765_v17  ;;  %v16805_v46 = vld [vmem:[#allocation3 + $0x34] sm:$0xf]  ;;  %v14235_v9 = vld [vmem:[%s18292_s1 + $0x8e0] sm:$0xff] }
 0x3cd   : > { %v6285_v39 = vshll.u32 %v16743_v40, 16  ;;  %v6489_v2 = vrot.slane %v6487_v13, 4  ;;  %v6807_v36 = vshll.u32 %v16768_v31, 16  ;;  %v6272_v8 = vor.u32 %v6271_v41, %v6268_v55  ;;  %7104 = vmatpush.bf16.msra.mxu3 %v14236_v12 }
 0x3ce   : > { %v6283_v38 = vrot.slane %v6282_v0, 4  ;;  %v6490_v33 = vrot.slane %v16775_v62, 5  ;;  %v6794_v51 = vor.u32 %v6793_v57, %v6790_v19  ;;  %v6805_v56 = vrot.slane %v6804_v23, 4 }
 0x3cf   : > { %v6287_v6 = vrot.slane %v6285_v39, 5  ;;  %v12658_v40 = vrot.slane %v6457_v42, 9  ;;  %v6303_v61 = vshrl.u32 %v6236_v44, 16  ;;  %v6809_v29 = vrot.slane %v6807_v36, 5 }
 0x3d0   : > { %6722 = vmatmul.bf16.vlgmr.msra.gmra.mxu1 %v14211_v5  ;;  %v6299_v5 = vshll.u32 %v6236_v44, 16  ;;  %v6491_v25 = vsel %vm14646_vm5, %v6489_v2, %v6490_v33  ;;  %v6290_v37 = vshrl.u32 %v6235_v21, 16  ;;  %v6293_v59 = vshll.u32 %v6235_v21, 16  ;;  %v14234_v21 = vld [vmem:[%s18292_s1 + $0x8d8] sm:$0xff] }
 0x3d1   : > { %v6273_v35 = vrot.slane %v6272_v8, 4  ;;  %v6288_v24 = vsel %vm14634_vm4, %v6283_v38, %v6287_v6  ;;  %v6488_v4 = vsel %vm14646_vm5, %v12658_v40, %v6487_v13  ;;  %v6795_v63 = vrot.slane %v6794_v51, 4  ;;  %7105 = vmatpush.bf16.msra.mxu3 %v14235_v9  ;;  %v16817_v8 = vld [vmem:[#allocation3 + $0x38] sm:$0x1]  ;;  %v6458_v6 = vld [vmem:[#allocation3 + $0x30] sm:$0xe] }
 0x3d2   : > { %v6810_v43 = vsel %vm14634_vm4, %v6805_v56, %v6809_v29  ;;  %v6821_v22 = vshll.u32 %v16782_v14, 16  ;;  %v6825_v53 = vshrl.u32 %v16782_v14, 16  ;;  %v6521_v18 = vunpack.c.l.b16 %v6491_v25  ;;  %v16828_v25 = vld [vmem:[#allocation3 + $0x40] sm:$0xf] }
 0x3d3   : > { %v6278_v1 = vsel %vm14634_vm4, %v6273_v35, %v16763_v16  ;;  %v16800_v52 = vrot.slane %v6299_v5, 5  ;;  %v6305_v28 = vrot.slane %v6303_v61, 4  ;;  %v6357_v26 = vunpack.c.l.b16 %v6288_v24 }
 0x3d4   : > { %6426 = vmatmul.bf16.vlgmr.msrb.gmra.mxu3 %v6362_v50  ;;  %v6800_v58 = vsel %vm14634_vm4, %v6795_v63, %v16765_v17  ;;  %v6292_v44 = vrot.slane %v6290_v37, 4  ;;  %v6295_v3 = vrot.slane %v6293_v59, 5  ;;  %v6879_v47 = vunpack.c.l.b16 %v6810_v43  ;;  %v14213_v63 = vld [vmem:[#allocation3 + $0x30] sm:$0xff] }
 0x3d5   : > { %6593 = vmatmul.bf16.gmra.mxu0 %v6525_v15  ;;  %v6812_v16 = vshrl.u32 %v6757_v11, 16  ;;  %v6815_v50 = vshll.u32 %v6757_v11, 16  ;;  %v6356_v15 = vunpack.c.l.b16 %v6278_v1  ;;  %v6520_v13 = vunpack.c.l.b16 %v6488_v4  ;;  %7106 = vmatpush.bf16.msra.mxu3 %v14234_v21  ;;  %v6238_v4 = vld [vmem:[#allocation3 + $0x30] sm:$0xf]  ;;  %v14232_v1 = vld [vmem:[%s18292_s1 + $0x8c8] sm:$0xff] }
 0x3d6   : > { %6948 = vmatmul.bf16.vlgmr.msra.gmra.mxu2 %v6884_v32  ;;  %v16810_v32 = vrot.slane %v6821_v22, 5  ;;  %v6827_v55 = vrot.slane %v6825_v53, 4  ;;  %v6878_v41 = vunpack.c.l.b16 %v6800_v58  ;;  %v6306_v17 = vor.u32 %v6305_v28, %v16800_v52 }
 0x3d7   : > { %v6494_v0 = vrot.slane %v16805_v46, 5  ;;  %v6363_v19 = vpack.c.b16 %v6357_v26, %v6356_v15  ;;  %v6526_v57 = vpack.c.b16 %v6521_v18, %v6520_v13  ;;  %v6296_v23 = vor.u32 %v6295_v3, %v6292_v44 }
 0x3d8   : > { %v6885_v39 = vpack.c.b16 %v6879_v47, %v6878_v41  ;;  %v6309_v42 = vshll.u32 %v16775_v62, 16  ;;  %v6814_v2 = vrot.slane %v6812_v16, 4  ;;  %v6817_v36 = vrot.slane %v6815_v50, 5  ;;  %v14233_v62 = vld [vmem:[%s18292_s1 + $0x8d0] sm:$0xff] }
 0x3d9   : > { %v6828_v38 = vor.u32 %v6827_v55, %v16810_v32  ;;  %v6307_v48 = vrot.slane %v6306_v17, 4  ;;  %v6496_v33 = vrot.slane %v6494_v0, 4  ;;  %v6831_v51 = vshll.u32 %v16814_v7, 16  ;;  %7107 = vmatpush.bf16.msra.mxu3 %v14233_v62 }
 0x3da   : > { %v6297_v56 = vrot.slane %v6296_v23, 4  ;;  %v6311_v40 = vrot.slane %v6309_v42, 5  ;;  %v6497_v5 = vrot.slane %v16817_v8, 5  ;;  %v6818_v61 = vor.u32 %v6817_v36, %v6814_v2 }
 0x3db   : > { %v6829_v37 = vrot.slane %v6828_v38, 4  ;;  %v12659_v12 = vrot.slane %v6458_v6, 9  ;;  %v6833_v24 = vrot.slane %v6831_v51, 5  ;;  %v6845_v22 = vshll.u32 %v16828_v25, 16 }
 0x3dc   : > { %v6302_v29 = vsel %vm14634_vm4, %v6297_v56, %v16800_v52  ;;  %v6312_v59 = vsel %vm14634_vm4, %v6307_v48, %v6311_v40  ;;  %v6498_v35 = vsel %vm14646_vm5, %v6496_v33, %v6497_v5  ;;  %v6849_v53 = vshrl.u32 %v16828_v25, 16 }
 0x3dd   : > { %v6819_v18 = vrot.slane %v6818_v61, 4  ;;  %v6323_v52 = vshll.u32 %v16805_v46, 16  ;;  %v6327_v28 = vshrl.u32 %v16805_v46, 16  ;;  %v6358_v26 = vunpack.c.l.b16 %v6302_v29  ;;  %7108 = vmatpush.bf16.msra.mxu3 %v14232_v1  ;;  %v14231_v46 = vld [vmem:[%s18292_s1 + $0x8c0] sm:$0xff] }
 0x3de   : > { %v6495_v58 = vsel %vm14646_vm5, %v12659_v12, %v6494_v0  ;;  %v6834_v44 = vsel %vm14634_vm4, %v6829_v37, %v6833_v24  ;;  %v6359_v3 = vunpack.c.l.b16 %v6312_v59  ;;  %v6523_v9 = vunpack.c.l.b16 %v6498_v35 }
 0x3df   : > { %v6824_v47 = vsel %vm14634_vm4, %v6819_v18, %v16810_v32  ;;  %v6314_v16 = vshrl.u32 %v6238_v4, 16  ;;  %v6847_v13 = vrot.slane %v6845_v22, 5  ;;  %v6851_v55 = vrot.slane %v6849_v53, 4  ;;  %v6977_v18 = vld [vmem:[#allocation3 + $0x18] sm:$0xe] }
 0x3e0   : > { %6727 = vmatmul.bf16.gmra.mxu1 %v14212_v60  ;;  %v6760_v60 = vld [vmem:[#allocation3 + $0x3c] sm:$0xf]  ;;  %v6881_v41 = vunpack.c.l.b16 %v6834_v44  ;;  %v6317_v17 = vshll.u32 %v6238_v4, 16  ;;  %v6325_v0 = vrot.slane %v6323_v52, 5  ;;  %v6522_v23 = vunpack.c.l.b16 %v6495_v58 }
 0x3e1   : > { %v6836_v43 = vshrl.u32 %v6760_v60, 16  ;;  %v6839_v11 = vshll.u32 %v6760_v60, 16  ;;  %v6880_v42 = vunpack.c.l.b16 %v6824_v47  ;;  %v6852_v36 = vor.u32 %v6851_v55, %v6847_v13  ;;  %7109 = vmatpush.bf16.msra.mxu3 %v14231_v46  ;;  %v14214_v60 = vld [vmem:[#allocation3 + $0x3c] sm:$0xff] }
 0x3e2   : > { %v6527_v32 = vpack.c.b16 %v6523_v9, %v6522_v23  ;;  %v6316_v48 = vrot.slane %v6314_v16, 4  ;;  %v6319_v33 = vrot.slane %v6317_v17, 5  ;;  %v6333_v56 = vshll.u32 %v16817_v8, 16 }
 0x3e3   : > { %v6838_v50 = vrot.slane %v6836_v43, 4  ;;  %v6841_v15 = vrot.slane %v6839_v11, 5  ;;  %v6886_v21 = vpack.c.b16 %v6881_v41, %v6880_v42  ;;  %v6853_v62 = vrot.slane %v6852_v36, 4 }
 0x3e4   : > { %6431 = vmatmul.bf16.gmra.mxu3 %v6363_v19  ;;  %v6329_v19 = vrot.slane %v6327_v28, 4  ;;  %v6320_v5 = vor.u32 %v6319_v33, %v6316_v48  ;;  %v6335_v29 = vrot.slane %v6333_v56, 5  ;;  %v6995_v53 = vrot.slane %v16735_v10, 5  ;;  %v16894_v56 = vpop.f32.mrf.mxu0 }
 0x3e5   : > { %6598 = vmatmul.bf16.gmra.mxu0 %v6526_v57  ;;  %v16854_v57 = vld [vmem:[#allocation3 + $0x44] sm:$0x1]  ;;  %v6842_v2 = vor.u32 %v6841_v15, %v6838_v50  ;;  %v6998_v52 = vrot.slane %v16740_v20, 5  ;;  %v12820_v28 = vrot.slane %v6977_v18, 9  ;;  %v7002_v47 = vrot.slane %v16747_v54, 5 }
 0x3e6   : > { %6953 = vmatmul.bf16.gmra.mxu2 %v6885_v39  ;;  %v6364_v39 = vpack.c.b16 %v6359_v3, %v6358_v26  ;;  %v6855_v38 = vshll.u32 %v16854_v57, 16  ;;  %v6330_v51 = vor.u32 %v6329_v19, %v6325_v0  ;;  %v6321_v12 = vrot.slane %v6320_v5, 4  ;;  %v6978_v50 = vld [vmem:[#allocation3 + $0x24] sm:$0xe]  ;;  %v6980_v19 = vld [vmem:[#allocation3 + $0x3c] sm:$0xe] }
 0x3e7   : > { %v6843_v6 = vrot.slane %v6842_v2, 4  ;;  %v6997_v1 = vrot.slane %v6995_v53, 4  ;;  %v6996_v58 = vsel %vm14646_vm5, %v12820_v28, %v6995_v53  ;;  %v7004_v16 = vrot.slane %v7002_v47, 4 }
 0x3e8   : > { %v6857_v40 = vrot.slane %v6855_v38, 5  ;;  %v6331_v61 = vrot.slane %v6330_v51, 4  ;;  %v6326_v8 = vsel %vm14634_vm4, %v6321_v12, %v6325_v0  ;;  %v7038_v3 = vunpack.c.l.b16 %v6996_v58  ;;  %v6979_v38 = vld [vmem:[#allocation3 + $0x30] sm:$0xe] }
 0x3e9   : > { %v6848_v37 = vsel %vm14634_vm4, %v6843_v6, %v6847_v13  ;;  %v6360_v43 = vunpack.c.l.b16 %v6326_v8  ;;  %v6999_v26 = vsel %vm14646_vm5, %v6997_v1, %v6998_v52  ;;  %v7005_v15 = vrot.slane %v16768_v31, 5 }
 0x3ea   : > { %v6858_v59 = vsel %vm14634_vm4, %v6853_v62, %v6857_v40  ;;  %v6336_v35 = vsel %vm14634_vm4, %v6331_v61, %v6335_v29  ;;  %v6882_v24 = vunpack.c.l.b16 %v6848_v37  ;;  %v7039_v44 = vunpack.c.l.b16 %v6999_v26 }
 0x3eb   : > { %v6883_v4 = vunpack.c.l.b16 %v6858_v59  ;;  %v12821_v20 = vrot.slane %v6978_v50, 9  ;;  %v7006_v13 = vsel %vm14646_vm5, %v7004_v16, %v7005_v15  ;;  %v7009_v54 = vrot.slane %v16782_v14, 5  ;;  %v14266_v16 = vld [vmem:[%s18292_s1 + $0x9b8] sm:$0xff] }
 0x3ec   : > { %v7046_v9 = vpack.c.b16 %v7039_v44, %v7038_v3  ;;  %v7041_v46 = vunpack.c.l.b16 %v7006_v13  ;;  %v7016_v23 = vrot.slane %v16828_v25, 5  ;;  %v7019_v31 = vrot.slane %v16854_v57, 5  ;;  %v14250_v50 = vld [vmem:[%s18292_s1 + $0x938] sm:$0xff]  ;;  %7733 = vmatpush.bf16.msrb.mxu2 %v14266_v16  ;;  %v14265_v13 = vld [vmem:[%s18292_s1 + $0x9b0] sm:$0xff] }
 0x3ed   : > { %v6887_v11 = vpack.c.b16 %v6883_v4, %v6882_v24  ;;  %v7003_v55 = vsel %vm14646_vm5, %v12821_v20, %v7002_v47  ;;  %v7011_v2 = vrot.slane %v7009_v54, 4  ;;  %v7012_v14 = vrot.slane %v16814_v7, 5  ;;  %v16902_v7 = vpop.f32.mrf.mxu0  ;;  %7583 = vmatpush.bf16.msrb.mxu1 %v14250_v50  ;;  %v14258_v20 = vld [vmem:[%s18292_s1 + $0x978] sm:$0xff]  ;;  %v14261_v50 = vld [vmem:[%s18292_s1 + $0x990] sm:$0xff] }
 0x3ee   : > { %v7040_v17 = vunpack.c.l.b16 %v7003_v55  ;;  %v7018_v42 = vrot.slane %v7016_v23, 4  ;;  %v12822_v51 = vrot.slane %v6979_v38, 9  ;;  %v14249_v55 = vld [vmem:[%s18292_s1 + $0x930] sm:$0xff]  ;;  %7482 = vmatpush.bf16.msrb.mxu0 %v14258_v20  ;;  %v14254_v16 = vld [vmem:[%s18292_s1 + $0x958] sm:$0xff] }
 0x3ef   : > { %v7013_v25 = vsel %vm14646_vm5, %v7011_v2, %v7012_v14  ;;  %v14247_v2 = vld [vmem:[%s18292_s1 + $0x920] sm:$0xff] }
 0x3f0   : > { %6732 = vmatmul.bf16.gmra.mxu1 %v14213_v63  ;;  %v6361_v63 = vunpack.c.l.b16 %v6336_v35  ;;  %v7047_v0 = vpack.c.b16 %v7041_v46, %v7040_v17  ;;  %v7010_v6 = vsel %vm14646_vm5, %v12822_v51, %v7009_v54  ;;  %v7043_v62 = vunpack.c.l.b16 %v7013_v25  ;;  %7734 = vmatpush.bf16.msrb.mxu2 %v14265_v13  ;;  %v14264_v54 = vld [vmem:[%s18292_s1 + $0x9a8] sm:$0xff] }
 0x3f1   : > { %v7042_v61 = vunpack.c.l.b16 %v7010_v6  ;;  %7584 = vmatpush.bf16.msrb.mxu1 %v14249_v55 }
 0x3f2   : > { %v6365_v22 = vpack.c.b16 %v6361_v63, %v6360_v43 }
 0x3f4   : > { %6436 = vmatmul.bf16.gmra.mxu3 %v6364_v39  ;;  %v12823_v39 = vrot.slane %v6980_v19, 9  ;;  %v14248_v19 = vld [vmem:[%s18292_s1 + $0x928] sm:$0xff]  ;;  %7735 = vmatpush.bf16.msrb.mxu2 %v14264_v54 }
 0x3f5   : > { %6603 = vmatmul.bf16.gmra.mxu0 %v6527_v32  ;;  %7585 = vmatpush.bf16.msrb.mxu1 %v14248_v19 }
 0x3f6   : > { %6958 = vmatmul.bf16.gmra.mxu2 %v6886_v21  ;;  %v7017_v36 = vsel %vm14646_vm5, %v12823_v39, %v7016_v23  ;;  %v7020_v21 = vsel %vm14646_vm5, %v7018_v42, %v7019_v31  ;;  %v14256_v39 = vld [vmem:[%s18292_s1 + $0x968] sm:$0xff]  ;;  %v14263_v42 = vld [vmem:[%s18292_s1 + $0x9a0] sm:$0xff] }
 0x3f7   : > { %v7044_v48 = vunpack.c.l.b16 %v7017_v36  ;;  %v7045_v33 = vunpack.c.l.b16 %v7020_v21 }
 0x3f8   : > { %7736 = vmatpush.bf16.msrb.mxu2 %v14263_v42  ;;  %v14253_v42 = vld [vmem:[%s18292_s1 + $0x950] sm:$0xff] }
 0x3f9   : > { %v7049_v57 = vpack.c.b16 %v7045_v33, %v7044_v48  ;;  %7586 = vmatpush.bf16.msrb.mxu1 %v14247_v2 }
 0x400   : > { %6737 = vmatmul.bf16.gmra.mxu1 %v14214_v60  ;;  %v7048_v60 = vpack.c.b16 %v7043_v62, %v7042_v61  ;;  %v14255_v62 = vld [vmem:[%s18292_s1 + $0x960] sm:$0xff]  ;;  %v14262_v61 = vld [vmem:[%s18292_s1 + $0x998] sm:$0xff] }
 0x401   : > { %7737 = vmatpush.bf16.msrb.mxu2 %v14262_v61 }
 0x403   : > { %v6067_v5 = vpop.f32.mrf.mxu1 }
 0x404   : > { %6441 = vmatmul.bf16.gmra.mxu3 %v6365_v22  ;;  %v16873_v10 = vpop.f32.mrf.mxu3 }
 0x405   : > { %v5918_v14 = vadd.f32 %v16894_v56, %v16873_v10  ;;  %v14278_v56 = vld [vmem:[%s18292_s1 + $0x9f8] sm:$0xff]  ;;  %7738 = vmatpush.bf16.msrb.mxu2 %v14261_v50  ;;  %v7301_v50 = vld [vmem:[#allocation2 + $0x8] sm:$0x1] }
 0x406   : > { %6963 = vmatmul.bf16.gmra.mxu2 %v6887_v11  ;;  %7867 = vmatpush.bf16.msrb.mxu3 %v14278_v56 }
 0x407   : > { %v6087_v51 = vadd.f32 %v6067_v5, %v5918_v14  ;;  %v14252_v14 = vld [vmem:[%s18292_s1 + $0x948] sm:$0xff] }
 0x40b   : > { %v16906_v59 = vpop.f32.mrf.mxu1 }
 0x40c   : > { %v16880_v41 = vpop.f32.mrf.mxu3 }
 0x40d   : > { %v5920_v5 = vadd.f32 %v16902_v7, %v16880_v41  ;;  %v14277_v41 = vld [vmem:[%s18292_s1 + $0x9f0] sm:$0xff] }
 0x40e   : > { %7868 = vmatpush.bf16.msrb.mxu3 %v14277_v41  ;;  %v7629_v41 = vrot.slane %v7301_v50, 5 }
 0x40f   : > { %v6088_v7 = vadd.f32 %v16906_v59, %v5920_v5  ;;  %v14244_v59 = vld [vmem:[%s18292_s1 + $0x908] sm:$0xff] }
 0x412   : > { %v16912_v8 = vpop.f32.mrf.mxu0 }
 0x414   : > { %7110 = vmatmul.bf16.vlgmr.msra.gmra.mxu3 %v7046_v9 }
 0x419   : > { %v16900_v29 = vpop.f32.mrf.mxu2 }
 0x41a   : > { %v16920_v43 = vpop.f32.mrf.mxu0  ;;  %v6221_v10 = vadd.f32 %v16900_v29, %v6087_v51  ;;  %v14245_v29 = vld [vmem:[%s18292_s1 + $0x910] sm:$0xff]  ;;  %v14259_v51 = vld [vmem:[%s18292_s1 + $0x980] sm:$0xff] }
 0x41d   : > { %v16914_v24 = vpop.f32.mrf.mxu1 }
 0x421   : > { %v16908_v12 = vpop.f32.mrf.mxu2 }
 0x422   : > { %v16928_v1 = vpop.f32.mrf.mxu0 }
 0x424   : > { %7115 = vmatmul.bf16.gmra.mxu3 %v7047_v0  ;;  %v14257_v0 = vld [vmem:[%s18292_s1 + $0x970] sm:$0xff] }
 0x425   : > { %v16922_v11 = vpop.f32.mrf.mxu1  ;;  %7483 = vmatpush.bf16.msrb.mxu0 %v14257_v0 }
 0x427   : > { %v16885_v32 = vpop.f32.mrf.mxu3 }
 0x428   : > { %v5923_v55 = vadd.f32 %v16912_v8, %v16885_v32  ;;  %v14260_v32 = vld [vmem:[%s18292_s1 + $0x988] sm:$0xff] }
 0x429   : > { %v16918_v63 = vpop.f32.mrf.mxu2  ;;  %7484 = vmatpush.bf16.msrb.mxu0 %v14256_v39  ;;  %7739 = vmatpush.bf16.msrb.mxu2 %v14260_v32  ;;  %v7325_v32 = vshll.u32 %v7301_v50, 16 }
 0x42a   : > { %v16934_v26 = vpop.f32.mrf.mxu0  ;;  %v6089_v8 = vadd.f32 %v16914_v24, %v5923_v55  ;;  %v14239_v55 = vld [vmem:[#allocation2] sm:$0xff] }
 0x42c   : > { %v6223_v61 = vadd.f32 %v16918_v63, %v6089_v8 }
 0x42d   : > { %v16930_v52 = vpop.f32.mrf.mxu1  ;;  %7485 = vmatpush.bf16.msrb.mxu0 %v14255_v62  ;;  %7740 = vmatpush.bf16.msrb.mxu2 %v14259_v51 }
 0x42f   : > { %v16898_v40 = vpop.f32.mrf.mxu3 }
 0x430   : > { %v5925_v24 = vadd.f32 %v16920_v43, %v16898_v40  ;;  %v17068_v40 = vld [vmem:[%s18293_s2 + $0x3] ss:$0 sm:$0xff] }
 0x431   : > { %v16926_v53 = vpop.f32.mrf.mxu2  ;;  %7486 = vmatpush.bf16.msrb.mxu0 %v14254_v16  ;;  %v7277_v16 = vld [vmem:[#allocation2 + $0x4] sm:$0xf] }
 0x432   : > { %v16944_v47 = vpop.f32.mrf.mxu0  ;;  %v6090_v43 = vadd.f32 %v16922_v11, %v5925_v24  ;;  %v14274_v11 = vld [vmem:[%s18292_s1 + $0x9d8] sm:$0xff] }
 0x434   : > { %7120 = vmatmul.bf16.gmra.mxu3 %v7048_v60  ;;  %v14246_v60 = vld [vmem:[%s18292_s1 + $0x918] sm:$0xff] }
 0x435   : > { %v16938_v44 = vpop.f32.mrf.mxu1  ;;  %7587 = vmatpush.bf16.msrb.mxu1 %v14246_v60  ;;  %7487 = vmatpush.bf16.msrb.mxu0 %v14253_v42  ;;  %v7319_v42 = vshrl.u32 %v7277_v16, 16 }
 0x437   : > { %v16904_v37 = vpop.f32.mrf.mxu3 }
 0x439   : > { %v16932_v28 = vpop.f32.mrf.mxu2  ;;  %7588 = vmatpush.bf16.msrb.mxu1 %v14245_v29  ;;  %7488 = vmatpush.bf16.msrb.mxu0 %v14252_v14  ;;  %v7626_v29 = vrot.slane %v7277_v16, 5 }
 0x43a   : > { %v16976_v23 = vpop.f32.mrf.mxu0 }
 0x43d   : > { %v16952_v15 = vpop.f32.mrf.mxu1  ;;  %7589 = vmatpush.bf16.msrb.mxu1 %v14244_v59 }
 0x43f   : > { %v16910_v35 = vpop.f32.mrf.mxu3 }
 0x441   : > { %v16940_v3 = vpop.f32.mrf.mxu2 }
 0x442   : > { %v6589_v21 = vpop.f32.mrf.mxu0 }
 0x444   : > { %7125 = vmatmul.bf16.gmra.mxu3 %v7049_v57 }
 0x445   : > { %v16978_v31 = vpop.f32.mrf.mxu1 }
 0x447   : > { %v16916_v4 = vpop.f32.mrf.mxu3 }
 0x449   : > { %v16965_v17 = vpop.f32.mrf.mxu2 }
 0x44a   : > { %v6591_v57 = vpop.f32.mrf.mxu0 }
 0x44d   : > { %v6723_v33 = vpop.f32.mrf.mxu1 }
 0x44f   : > { %v16924_v22 = vpop.f32.mrf.mxu3 }
 0x451   : > { %v16991_v38 = vpop.f32.mrf.mxu2 }
 0x452   : > { %v6594_v39 = vpop.f32.mrf.mxu0 }
 0x455   : > { %v6725_v20 = vpop.f32.mrf.mxu1 }
 0x457   : > { %v6427_v18 = vpop.f32.mrf.mxu3 }
 0x458   : > { %v6447_v13 = vadd.f32 %v6427_v18, %v6221_v10  ;;  %v6222_v18 = vadd.f32 %v16908_v12, %v6088_v7  ;;  %v14276_v12 = vld [vmem:[%s18292_s1 + $0x9e8] sm:$0xff]  ;;  %v14251_v7 = vld [vmem:[%s18292_s1 + $0x940] sm:$0xff] }
 0x459   : > { %v6949_v25 = vpop.f32.mrf.mxu2  ;;  %7869 = vmatpush.bf16.msrb.mxu3 %v14276_v12  ;;  %v7628_v12 = vrot.slane %v7626_v29, 4  ;;  %7489 = vmatpush.bf16.msrb.mxu0 %v14251_v7 }
 0x45a   : > { %v6609_v0 = vadd.f32 %v6589_v21, %v6447_v13  ;;  %v7612_v13 = vld [vmem:[#allocation2] sm:$0xe]  ;;  %v6596_v59 = vpop.f32.mrf.mxu0 }
 0x45c   : > { %v6743_v21 = vadd.f32 %v6723_v33, %v6609_v0  ;;  %v14275_v33 = vld [vmem:[%s18292_s1 + $0x9e0] sm:$0xff] }
 0x45d   : > { %v17062_v62 = vpop.f32.mrf.mxu1  ;;  %7870 = vmatpush.bf16.msrb.mxu3 %v14275_v33  ;;  %v7276_v0 = vld [vmem:[#allocation2] sm:$0xf] }
 0x45e   : > { %v6969_v10 = vadd.f32 %v6949_v25, %v6743_v21  ;;  %v7306_v21 = vshrl.u32 %v7276_v0, 16  ;;  %v7309_v51 = vshll.u32 %v7276_v0, 16 }
 0x45f   : > { %v16936_v58 = vpop.f32.mrf.mxu3 }
 0x460   : > { %v6448_v2 = vadd.f32 %v16936_v58, %v6222_v18  ;;  %v14243_v58 = vld [vmem:[%s18292_s1 + $0x900] sm:$0xff]  ;;  %v7315_v18 = vshll.u32 %v7277_v16, 16  ;;  %v7311_v16 = vrot.slane %v7309_v51, 5 }
 0x461   : > { %v17029_v54 = vpop.f32.mrf.mxu2  ;;  %7590 = vmatpush.bf16.msrb.mxu1 %v14243_v58  ;;  %7871 = vmatpush.bf16.msrb.mxu3 %v14274_v11  ;;  %v7321_v58 = vrot.slane %v7319_v42, 4 }
 0x462   : > { %v6610_v60 = vadd.f32 %v6591_v57, %v6448_v2  ;;  %v12985_v57 = vrot.slane %v7612_v13, 9  ;;  %v7317_v24 = vrot.slane %v7315_v18, 5  ;;  %v7327_v13 = vrot.slane %v7325_v32, 5 }
 0x464   : > { %v7627_v2 = vsel %vm14646_vm5, %v12985_v57, %v7626_v29  ;;  %7591 = vmatmul.bf16.vlgmr.msrb.gmra.mxu1 %v14239_v55  ;;  %v7322_v50 = vor.u32 %v7321_v58, %v7317_v24  ;;  %v5928_v55 = vadd.f32 %v16928_v1, %v16904_v37 }
 0x465   : > { %v7669_v14 = vunpack.c.l.b16 %v7627_v2  ;;  %v6730_v29 = vpop.f32.mrf.mxu1 }
 0x466   : > { %v7323_v0 = vrot.slane %v7322_v50, 4  ;;  %v6091_v2 = vadd.f32 %v16930_v52, %v5928_v55 }
 0x467   : > { %v16942_v9 = vpop.f32.mrf.mxu3 }
 0x468   : > { %v6449_v56 = vadd.f32 %v16942_v9, %v6223_v61  ;;  %v6744_v9 = vadd.f32 %v6725_v20, %v6610_v60  ;;  %v14273_v20 = vld [vmem:[%s18292_s1 + $0x9d0] sm:$0xff]  ;;  %v7630_v60 = vsel %vm14646_vm5, %v7628_v12, %v7629_v41  ;;  %v5930_v41 = vadd.f32 %v16934_v26, %v16910_v35 }
 0x469   : > { %v17072_v63 = vpop.f32.mrf.mxu2  ;;  %7872 = vmatpush.bf16.msrb.mxu3 %v14273_v20  ;;  %v7328_v1 = vsel %vm14634_vm4, %v7323_v0, %v7327_v13 }
 0x46a   : > { %v6611_v33 = vadd.f32 %v6594_v39, %v6449_v56  ;;  %v6970_v57 = vadd.f32 %v17029_v54, %v6744_v9  ;;  %v7419_v26 = vunpack.c.l.b16 %v7328_v1  ;;  %v6092_v58 = vadd.f32 %v16938_v44, %v5930_v41 }
 0x46b   : > { %v5933_v41 = vadd.f32 %v16944_v47, %v16916_v4 }
 0x46c   : > { %v6745_v54 = vadd.f32 %v17062_v62, %v6611_v33  ;;  %v6599_v62 = vpop.f32.mrf.mxu0  ;;  %v7248_v33 = vld [vmem:[#allocation2 + $0xc] sm:$0xf]  ;;  %v6226_v44 = vadd.f32 %v16940_v3, %v6092_v58 }
 0x46d   : > { %v6093_v47 = vadd.f32 %v16952_v15, %v5933_v41 }
 0x46e   : > { %v6971_v20 = vadd.f32 %v17072_v63, %v6745_v54 }
 0x46f   : > { %v16963_v46 = vpop.f32.mrf.mxu3  ;;  %v6227_v58 = vadd.f32 %v16965_v17, %v6093_v47  ;;  %v7259_v47 = vld [vmem:[#allocation2 + $0x20] sm:$0x1] }
 0x471   : > { %v6956_v9 = vpop.f32.mrf.mxu2 }
 0x474   : > { %v6601_v3 = vpop.f32.mrf.mxu0 }
 0x477   : > { %v16989_v36 = vpop.f32.mrf.mxu3 }
 0x47f   : > { %v16993_v48 = vpop.f32.mrf.mxu3 }
 0x480   : > { %v6452_v55 = vadd.f32 %v16993_v48, %v6226_v44  ;;  %v5935_v48 = vadd.f32 %v16976_v23, %v16924_v22 }
 0x487   : > { %v16997_v6 = vpop.f32.mrf.mxu3 }
 0x48f   : > { %v17032_v19 = vpop.f32.mrf.mxu3 }
 0x497   : > { %v7111_v5 = vpop.f32.mrf.mxu3 }
 0x498   : > { %v7131_v25 = vadd.f32 %v7111_v5, %v6969_v10  ;;  %v7308_v10 = vrot.slane %v7306_v21, 4  ;;  %v7670_v5 = vunpack.c.l.b16 %v7630_v60 }
 0x49a   : > { %v7144_v8 = vadd.f32 %v17068_v40, %v7131_v25  ;;  %v6224_v25 = vadd.f32 %v16926_v53, %v6090_v43  ;;  %v7677_v39 = vpack.c.b16 %v7670_v5, %v7669_v14  ;;  %v7312_v56 = vor.u32 %v7311_v16, %v7308_v10  ;;  %v14272_v53 = vld [vmem:[%s18292_s1 + $0x9c8] sm:$0xff]  ;;  %v6733_v16 = vpop.f32.mrf.mxu1 }
 0x49b   : > { %7873 = vmatpush.bf16.msrb.mxu3 %v14272_v53  ;;  %v6225_v10 = vadd.f32 %v16932_v28, %v6091_v2 }
 0x49c   : > { %v7152_v61 = vmax.f32 %v7144_v8, 0.0  ;;  %v6450_v43 = vadd.f32 %v16963_v46, %v6224_v25  ;;  %7741 = vmatmul.bf16.vlgmr.msrb.gmra.mxu2 %v7677_v39  ;;  %v7313_v37 = vrot.slane %v7312_v56, 4  ;;  %v14271_v46 = vld [vmem:[%s18292_s1 + $0x9c0] sm:$0xff] }
 0x49d   : > { %v6451_v63 = vadd.f32 %v16989_v36, %v6225_v10 }
 0x49e   : > { %v7160_v7 = vpack.c.bf16 %v7152_v61, %v7152_v61  ;;  %v7318_v12 = vsel %vm14634_vm4, %v7313_v37, %v7317_v24  ;;  %v6612_v61 = vadd.f32 %v6596_v59, %v6450_v43  ;;  %v6614_v43 = vadd.f32 %v6601_v3, %v6452_v55  ;;  %v14294_v55 = vld [vmem:[%s18292_s1 + $0xa78] sm:$0xff] }
 0x49f   : > { %v7113_v11 = vpop.f32.mrf.mxu3  ;;  %v7418_v51 = vunpack.c.l.b16 %v7318_v12  ;;  %7874 = vmatpush.bf16.msrb.mxu3 %v14271_v46  ;;  %8255 = vmatpush.bf16.msra.mxu1 %v14294_v55 }
 0x4a0   : > { %v7169_v18 = vshrl.u32 %v7160_v7, 16  ;;  %v7132_v42 = vadd.f32 %v7113_v11, %v6970_v57  ;;  %v7172_v8 = vshll.u32 %v7160_v7, 16  ;;  %v6746_v25 = vadd.f32 %v6730_v29, %v6612_v61  ;;  %v6959_v11 = vpop.f32.mrf.mxu2 }
 0x4a1   : > { %v7426_v24 = vpack.c.b16 %v7419_v26, %v7418_v51 }
 0x4a2   : > { %v7171_v32 = vrot.slane %v7169_v18, 7  ;;  %v7145_v35 = vadd.f32 %v17068_v40, %v7132_v42  ;;  %v6613_v18 = vadd.f32 %v6599_v62, %v6451_v63  ;;  %v7252_v42 = vld [vmem:[#allocation2 + $0x14] sm:$0x1]  ;;  %v6972_v53 = vadd.f32 %v6956_v9, %v6746_v25 }
 0x4a3   : > { %7490 = vmatmul.bf16.vlgmr.msrb.gmra.mxu0 %v7426_v24  ;;  %v6094_v62 = vadd.f32 %v16978_v31, %v5935_v48 }
 0x4a4   : > { %v7174_v21 = vor.u32 %v7172_v8, %v7171_v32  ;;  %v7153_v14 = vmax.f32 %v7145_v35, 0.0  ;;  %v7175_v28 = vrot.slane %v7171_v32, 4  ;;  %v6747_v32 = vadd.f32 %v6733_v16, %v6613_v18  ;;  %v6735_v35 = vpop.f32.mrf.mxu1 }
 0x4a5   : > { %v6748_v22 = vadd.f32 %v6735_v35, %v6614_v43  ;;  %v6453_v16 = vadd.f32 %v16997_v6, %v6227_v58 }
 0x4a6   : > { %v7249_v52 = vsel %vm14717_vm11, %v7174_v21, %v7248_v33  ;;  %v7161_v60 = vpack.c.bf16 %v7153_v14, %v7153_v14  ;;  %v6973_v33 = vadd.f32 %v6959_v11, %v6747_v32  ;;  %v6604_v11 = vpop.f32.mrf.mxu0 }
 0x4a7   : > { %7250 = vst [vmem:[#allocation2 + $0xc] sm:$0xf] %v7249_v52  ;;  %v7116_v5 = vpop.f32.mrf.mxu3 }
 0x4a8   : > { %v7177_v50 = vshrl.u32 %v7161_v60, 16  ;;  %v7133_v13 = vadd.f32 %v7116_v5, %v6971_v20  ;;  %v7180_v57 = vshll.u32 %v7161_v60, 16  ;;  %v7255_v20 = vld [vmem:[#allocation2 + $0x18] sm:$0xf]  ;;  %v6961_v61 = vpop.f32.mrf.mxu2  ;;  %v6228_v5 = vadd.f32 %v16991_v38, %v6094_v62 }
 0x4a9   : > { %v6974_v31 = vadd.f32 %v6961_v61, %v6748_v22 }
 0x4aa   : > { %v7179_v59 = vrot.slane %v7177_v50, 7  ;;  %v7146_v7 = vadd.f32 %v17068_v40, %v7133_v13 }
 0x4ac   : > { %v7182_v39 = vor.u32 %v7180_v57, %v7179_v59  ;;  %v7184_v56 = vrot.slane %v7179_v59, 4  ;;  %v7154_v0 = vmax.f32 %v7146_v7, 0.0  ;;  %v6738_v3 = vpop.f32.mrf.mxu1 }
 0x4ae   : > { %v7183_v36 = vsel %vm14724_vm12, %v7175_v28, %v7182_v39  ;;  %v7253_v29 = vsel %vm14731_vm13, %v7184_v56, %v7252_v42  ;;  %v7162_v54 = vpack.c.bf16 %v7154_v0, %v7154_v0  ;;  %v7278_v8 = vld [vmem:[#allocation2 + $0xc] sm:$0xf]  ;;  %v14293_v42 = vld [vmem:[%s18292_s1 + $0xa70] sm:$0xff] }
 0x4af   : > { %7254 = vst [vmem:[#allocation2 + $0x14] sm:$0x1] %v7253_v29  ;;  %v7118_v37 = vpop.f32.mrf.mxu3  ;;  %v7330_v12 = vshrl.u32 %v7278_v8, 16  ;;  %v7333_v46 = vshll.u32 %v7278_v8, 16  ;;  %v7613_v23 = vld [vmem:[#allocation2 + $0xc] sm:$0xe]  ;;  %8256 = vmatpush.bf16.msra.mxu1 %v14293_v42 }
 0x4b0   : > { %7251 = vst [vmem:[#allocation2 + $0x10] sm:$0xf] %v7183_v36  ;;  %v7186_v1 = vshrl.u32 %v7162_v54, 16  ;;  %v7134_v4 = vadd.f32 %v7118_v37, %v6972_v53  ;;  %v7189_v9 = vshll.u32 %v7162_v54, 16  ;;  %v12986_v10 = vrot.slane %v7613_v23, 9 }
 0x4b1   : > { %v7332_v51 = vrot.slane %v7330_v12, 4  ;;  %v7335_v15 = vrot.slane %v7333_v46, 5 }
 0x4b2   : > { %v7188_v26 = vrot.slane %v7186_v1, 7  ;;  %v7147_v2 = vadd.f32 %v17068_v40, %v7134_v4  ;;  %v6615_v4 = vadd.f32 %v6604_v11, %v6453_v16  ;;  %v14286_v16 = vld [vmem:[%s18292_s1 + $0xa38] sm:$0xff]  ;;  %v14285_v11 = vld [vmem:[%s18292_s1 + $0xa30] sm:$0xff] }
 0x4b3   : > { %v7336_v63 = vor.u32 %v7335_v15, %v7332_v51  ;;  %8093 = vmatpush.bf16.msra.mxu0 %v14286_v16 }
 0x4b4   : > { %v7191_v21 = vor.u32 %v7189_v9, %v7188_v26  ;;  %v7155_v14 = vmax.f32 %v7147_v2, 0.0  ;;  %v7192_v25 = vrot.slane %v7188_v26, 4 }
 0x4b5   : > { %v7337_v53 = vrot.slane %v7336_v63, 4  ;;  %v14291_v63 = vld [vmem:[%s18292_s1 + $0xa60] sm:$0xff] }
 0x4b6   : > { %v7256_v52 = vsel %vm14717_vm11, %v7191_v21, %v7255_v20  ;;  %v7163_v60 = vpack.c.bf16 %v7155_v14, %v7155_v14  ;;  %v7302_v24 = vld [vmem:[#allocation2 + $0x14] sm:$0x1]  ;;  %v6964_v21 = vpop.f32.mrf.mxu2  ;;  %v6454_v14 = vadd.f32 %v17032_v19, %v6228_v5  ;;  %v6749_v20 = vadd.f32 %v6738_v3, %v6615_v4 }
 0x4b7   : > { %7257 = vst [vmem:[#allocation2 + $0x18] sm:$0xf] %v7256_v52  ;;  %v7121_v50 = vpop.f32.mrf.mxu3  ;;  %v14240_v13 = vld [vmem:[#allocation2 + $0xc] sm:$0xff]  ;;  %v7636_v38 = vrot.slane %v7302_v24, 5  ;;  %v7349_v54 = vshll.u32 %v7302_v24, 16  ;;  %v14306_v52 = vld [vmem:[%s18292_s1 + $0xab8] sm:$0xff]  ;;  %8094 = vmatpush.bf16.msra.mxu0 %v14285_v11 }
 0x4b8   : > { %v14267_v44 = vld [vmem:[#allocation2 + $0xc] sm:$0xff]  ;;  %v7194_v59 = vshrl.u32 %v7163_v60, 16  ;;  %v7135_v57 = vadd.f32 %v7121_v50, %v6973_v33  ;;  %v7197_v28 = vshll.u32 %v7163_v60, 16  ;;  %7596 = vmatmul.bf16.gmra.mxu1 %v14240_v13  ;;  %v6606_v50 = vpop.f32.mrf.mxu0  ;;  %8389 = vmatpush.bf16.msra.mxu2 %v14306_v52 }
 0x4b9   : > { %v7279_v17 = vld [vmem:[#allocation2 + $0x10] sm:$0xf]  ;;  %7875 = vmatmul.bf16.vlgmr.msrb.gmra.mxu3 %v14267_v44  ;;  %v7351_v23 = vrot.slane %v7349_v54, 5  ;;  %v14292_v60 = vld [vmem:[%s18292_s1 + $0xa68] sm:$0xff] }
 0x4ba   : > { %v7633_v7 = vrot.slane %v7279_v17, 5  ;;  %v7339_v6 = vshll.u32 %v7279_v17, 16  ;;  %v7343_v39 = vshrl.u32 %v7279_v17, 16  ;;  %v7196_v56 = vrot.slane %v7194_v59, 7  ;;  %8257 = vmatpush.bf16.msra.mxu1 %v14292_v60  ;;  %v14305_v17 = vld [vmem:[%s18292_s1 + $0xab0] sm:$0xff]  ;;  %v14288_v11 = vld [vmem:[%s18292_s1 + $0xa48] sm:$0xff] }
 0x4bb   : > { %v7148_v0 = vadd.f32 %v17068_v40, %v7135_v57  ;;  %v7262_v57 = vld [vmem:[#allocation2 + $0x24] sm:$0xf] }
 0x4bc   : > { %v7634_v41 = vsel %vm14646_vm5, %v12986_v10, %v7633_v7  ;;  %v7635_v18 = vrot.slane %v7633_v7, 4  ;;  %v7341_v36 = vrot.slane %v7339_v6, 5  ;;  %v7345_v29 = vrot.slane %v7343_v39, 4  ;;  %8390 = vmatpush.bf16.msra.mxu2 %v14305_v17 }
 0x4bd   : > { %v7199_v48 = vor.u32 %v7197_v28, %v7196_v56  ;;  %v7201_v43 = vrot.slane %v7196_v56, 4  ;;  %v7156_v37 = vmax.f32 %v7148_v0, 0.0  ;;  %v7671_v32 = vunpack.c.l.b16 %v7634_v41  ;;  %v14314_v28 = vld [vmem:[%s18292_s1 + $0xaf8] sm:$0xff]  ;;  %v14304_v56 = vld [vmem:[%s18292_s1 + $0xaa8] sm:$0xff]  ;;  %v14313_v41 = vld [vmem:[%s18292_s1 + $0xaf0] sm:$0xff] }
 0x4be   : > { %v7637_v1 = vsel %vm14646_vm5, %v7635_v18, %v7636_v38  ;;  %v7346_v8 = vor.u32 %v7345_v29, %v7341_v36  ;;  %v7342_v12 = vsel %vm14634_vm4, %v7337_v53, %v7341_v36  ;;  %v7280_v24 = vld [vmem:[#allocation2 + $0x18] sm:$0xf]  ;;  %v6740_v38 = vpop.f32.mrf.mxu1  ;;  %v6975_v18 = vadd.f32 %v6964_v21, %v6749_v20  ;;  %8615 = vmatpush.bf16.msra.mxu3 %v14314_v28  ;;  %v14312_v21 = vld [vmem:[%s18292_s1 + $0xae8] sm:$0xff] }
 0x4bf   : > { %v7672_v9 = vunpack.c.l.b16 %v7637_v1  ;;  %v7200_v35 = vsel %vm14724_vm12, %v7192_v25, %v7199_v48  ;;  %v7260_v26 = vsel %vm14731_vm13, %v7201_v43, %v7259_v47  ;;  %v7164_v2 = vpack.c.bf16 %v7156_v37, %v7156_v37  ;;  %v7123_v46 = vpop.f32.mrf.mxu3  ;;  %v7614_v13 = vld [vmem:[#allocation2 + $0x18] sm:$0xe]  ;;  %8258 = vmatpush.bf16.msra.mxu1 %v14291_v63 }
 0x4c0   : > { %7258 = vst [vmem:[#allocation2 + $0x1c] sm:$0xf] %v7200_v35  ;;  %v7347_v22 = vrot.slane %v7346_v8, 4  ;;  %v7136_v58 = vadd.f32 %v7123_v46, %v6974_v31  ;;  %v7420_v61 = vunpack.c.l.b16 %v7342_v12  ;;  %v7354_v31 = vshrl.u32 %v7280_v24, 16  ;;  %v14290_v0 = vld [vmem:[%s18292_s1 + $0xa58] sm:$0xff]  ;;  %v6966_v12 = vpop.f32.mrf.mxu2  ;;  %8391 = vmatpush.bf16.msra.mxu2 %v14304_v56 }
 0x4c1   : > { %v7678_v62 = vpack.c.b16 %v7672_v9, %v7671_v32  ;;  %7261 = vst [vmem:[#allocation2 + $0x20] sm:$0x1] %v7260_v26  ;;  %v7203_v51 = vshrl.u32 %v7164_v2, 16  ;;  %v7206_v15 = vshll.u32 %v7164_v2, 16  ;;  %v7357_v44 = vshll.u32 %v7280_v24, 16  ;;  %v14284_v9 = vld [vmem:[%s18292_s1 + $0xa28] sm:$0xff] }
 0x4c2   : > { %v7352_v33 = vsel %vm14634_vm4, %v7347_v22, %v7351_v23  ;;  %v7149_v10 = vadd.f32 %v17068_v40, %v7136_v58  ;;  %v6616_v25 = vadd.f32 %v6606_v50, %v6454_v14  ;;  %v7356_v6 = vrot.slane %v7354_v31, 4  ;;  %8616 = vmatpush.bf16.msra.mxu3 %v14313_v41  ;;  %8095 = vmatpush.bf16.msra.mxu0 %v14284_v9 }
 0x4c3   : > { %7746 = vmatmul.bf16.gmra.mxu2 %v7678_v62  ;;  %v17159_v19 = vrot.slane %v7203_v51, 7  ;;  %v7421_v5 = vunpack.c.l.b16 %v7352_v33  ;;  %v7359_v39 = vrot.slane %v7357_v44, 5  ;;  %v12987_v54 = vrot.slane %v7614_v13, 9  ;;  %8259 = vmatpush.bf16.msra.mxu1 %v14290_v0  ;;  %v14289_v33 = vld [vmem:[%s18292_s1 + $0xa50] sm:$0xff]  ;;  %v14282_v0 = vld [vmem:[%s18292_s1 + $0xa18] sm:$0xff] }
 0x4c4   : > { %v7157_v7 = vmax.f32 %v7149_v10, 0.0  ;;  %v6750_v4 = vadd.f32 %v6740_v38, %v6616_v25 }
 0x4c5   : > { %v7208_v59 = vor.u32 %v7206_v15, %v17159_v19  ;;  %v7427_v55 = vpack.c.b16 %v7421_v5, %v7420_v61  ;;  %v7360_v2 = vor.u32 %v7359_v39, %v7356_v6  ;;  %v7209_v14 = vrot.slane %v17159_v19, 4  ;;  %v14303_v15 = vld [vmem:[%s18292_s1 + $0xaa0] sm:$0xff]  ;;  %v7266_v5 = vld [vmem:[#allocation2 + $0x2c] sm:$0x1] }
 0x4c6   : > { %v7165_v3 = vpack.c.bf16 %v7157_v7, %v7157_v7  ;;  %v14283_v19 = vld [vmem:[%s18292_s1 + $0xa20] sm:$0xff]  ;;  %v6976_v10 = vadd.f32 %v6966_v12, %v6750_v4  ;;  %8617 = vmatpush.bf16.msra.mxu3 %v14312_v21  ;;  %8392 = vmatpush.bf16.msra.mxu2 %v14303_v15  ;;  %v14301_v4 = vld [vmem:[%s18292_s1 + $0xa90] sm:$0xff] }
 0x4c7   : > { %v7263_v42 = vsel %vm14717_vm11, %v7208_v59, %v7262_v57  ;;  %7495 = vmatmul.bf16.gmra.mxu0 %v7427_v55  ;;  %v14241_v53 = vld [vmem:[#allocation2 + $0x18] sm:$0xff]  ;;  %v7126_v48 = vpop.f32.mrf.mxu3  ;;  %v7361_v31 = vrot.slane %v7360_v2, 4  ;;  %v14311_v59 = vld [vmem:[%s18292_s1 + $0xae0] sm:$0xff]  ;;  %8260 = vmatpush.bf16.msra.mxu1 %v14289_v33 }
 0x4c8   : > { %v14268_v36 = vld [vmem:[#allocation2 + $0x18] sm:$0xff]  ;;  %7264 = vst [vmem:[#allocation2 + $0x24] sm:$0xf] %v7263_v42  ;;  %v17189_v43 = vld [vmem:[#allocation2 + $0x20] sm:$0x1]  ;;  %v7211_v47 = vshrl.u32 %v7165_v3, 16  ;;  %v7137_v32 = vadd.f32 %v7126_v48, %v6975_v18  ;;  %7601 = vmatmul.bf16.gmra.mxu1 %v14241_v53  ;;  %8096 = vmatpush.bf16.msra.mxu0 %v14283_v19 }
 0x4c9   : > { %v7281_v29 = vld [vmem:[#allocation2 + $0x1c] sm:$0xf]  ;;  %7880 = vmatmul.bf16.gmra.mxu3 %v14268_v36  ;;  %v7643_v26 = vrot.slane %v17189_v43, 5  ;;  %v7214_v62 = vshll.u32 %v7165_v3, 16  ;;  %v7373_v50 = vshll.u32 %v17189_v43, 16 }
 0x4ca   : > { %v7640_v37 = vrot.slane %v7281_v29, 5  ;;  %v7363_v1 = vshll.u32 %v7281_v29, 16  ;;  %v7213_v46 = vrot.slane %v7211_v47, 7  ;;  %v7150_v22 = vadd.f32 %v17068_v40, %v7137_v32  ;;  %v14302_v55 = vld [vmem:[%s18292_s1 + $0xa98] sm:$0xff]  ;;  %v17232_v42 = vld [vmem:[#allocation2 + $0x10] sm:$0xf]  ;;  %8618 = vmatpush.bf16.msra.mxu3 %v14311_v59 }
 0x4cb   : > { %v7367_v23 = vshrl.u32 %v7281_v29, 16  ;;  %v7375_v18 = vrot.slane %v7373_v50, 5  ;;  %v8130_v29 = vld [vmem:[#allocation2 + $0xc] sm:$0xe]  ;;  %8393 = vmatpush.bf16.msra.mxu2 %v14302_v55  ;;  %8261 = vmatpush.bf16.msra.mxu1 %v14288_v11  ;;  %v7269_v32 = vld [vmem:[#allocation2 + $0x30] sm:$0xf] }
 0x4cc   : > { %v7641_v8 = vsel %vm14646_vm5, %v12987_v54, %v7640_v37  ;;  %v7642_v35 = vrot.slane %v7640_v37, 4  ;;  %v7365_v20 = vrot.slane %v7363_v1, 5  ;;  %v7216_v61 = vor.u32 %v7214_v62, %v7213_v46  ;;  %v14310_v54 = vld [vmem:[%s18292_s1 + $0xad8] sm:$0xff]  ;;  %8097 = vmatpush.bf16.msra.mxu0 %v14282_v0  ;;  %v14309_v62 = vld [vmem:[%s18292_s1 + $0xad0] sm:$0xff]  ;;  %v14308_v59 = vld [vmem:[%s18292_s1 + $0xac8] sm:$0xff] }
 0x4cd   : > { %v7673_v58 = vunpack.c.l.b16 %v7641_v8  ;;  %v7218_v52 = vrot.slane %v7213_v46, 4  ;;  %v7158_v60 = vmax.f32 %v7150_v22, 0.0  ;;  %v7369_v16 = vrot.slane %v7367_v23, 4  ;;  %v14300_v46 = vld [vmem:[%s18292_s1 + $0xa88] sm:$0xff]  ;;  %v17263_v50 = vld [vmem:[#allocation2 + $0x14] sm:$0x1] }
 0x4ce   : > { %v7644_v51 = vsel %vm14646_vm5, %v7642_v35, %v7643_v26  ;;  %v7217_v13 = vsel %vm14724_vm12, %v7209_v14, %v7216_v61  ;;  %v7366_v39 = vsel %vm14634_vm4, %v7361_v31, %v7365_v20  ;;  %v14281_v26 = vld [vmem:[%s18292_s1 + $0xa10] sm:$0xff]  ;;  %v13149_v2 = vrot.slane %v8130_v29, 9  ;;  %8619 = vmatpush.bf16.msra.mxu3 %v14310_v54 }
 0x4cf   : > { %v7674_v24 = vunpack.c.l.b16 %v7644_v51  ;;  %v7267_v44 = vsel %vm14731_vm13, %v7218_v52, %v7266_v5  ;;  %v7166_v17 = vpack.c.bf16 %v7158_v60, %v7158_v60  ;;  %v7282_v25 = vld [vmem:[#allocation2 + $0x24] sm:$0xf]  ;;  %7265 = vst [vmem:[#allocation2 + $0x28] sm:$0xf] %v7217_v13  ;;  %v7128_v57 = vpop.f32.mrf.mxu3  ;;  %v7370_v7 = vor.u32 %v7369_v16, %v7365_v20  ;;  %8394 = vmatpush.bf16.msra.mxu2 %v14301_v4  ;;  %v14280_v13 = vld [vmem:[%s18292_s1 + $0xa08] sm:$0xff] }
 0x4d0   : > { %v7378_v28 = vshrl.u32 %v7282_v25, 16  ;;  %7268 = vst [vmem:[#allocation2 + $0x2c] sm:$0x1] %v7267_v44  ;;  %v7138_v6 = vadd.f32 %v7128_v57, %v6976_v10  ;;  %v7381_v56 = vshll.u32 %v7282_v25, 16  ;;  %v7422_v43 = vunpack.c.l.b16 %v7366_v39  ;;  %v7615_v37 = vld [vmem:[#allocation2 + $0x24] sm:$0xe]  ;;  %8098 = vmatpush.bf16.msra.mxu0 %v14281_v26 }
 0x4d1   : > { %v7679_v63 = vpack.c.b16 %v7674_v24, %v7673_v58  ;;  %v7220_v38 = vshrl.u32 %v7166_v17, 16  ;;  %v7371_v41 = vrot.slane %v7370_v7, 4  ;;  %v7223_v53 = vshll.u32 %v7166_v17, 16  ;;  %v7904_v57 = vld [vmem:[#allocation2 + $0xc] sm:$0xf] }
 0x4d2   : > { %v7151_v36 = vadd.f32 %v17068_v40, %v7138_v6  ;;  %v7380_v1 = vrot.slane %v7378_v28, 4  ;;  %v14287_v40 = vld [vmem:[%s18292_s1 + $0xa40] sm:$0xff]  ;;  %v7383_v35 = vrot.slane %v7381_v56, 5  ;;  %v8148_v12 = vrot.slane %v17232_v42, 5  ;;  %8620 = vmatpush.bf16.msra.mxu3 %v14309_v62 }
 0x4d3   : > { %7751 = vmatmul.bf16.gmra.mxu2 %v7679_v63  ;;  %v17234_v3 = vrot.slane %v7220_v38, 7  ;;  %v7376_v48 = vsel %vm14634_vm4, %v7371_v41, %v7375_v18  ;;  %v12988_v20 = vrot.slane %v7615_v37, 9  ;;  %8262 = vmatpush.bf16.msra.mxu1 %v14287_v40  ;;  %v14299_v38 = vld [vmem:[%s18292_s1 + $0xa80] sm:$0xff]  ;;  %v7273_v41 = vld [vmem:[#allocation2 + $0x38] sm:$0x1] }
 0x4d4   : > { %v7159_v9 = vmax.f32 %v7151_v36, 0.0  ;;  %v7423_v8 = vunpack.c.l.b16 %v7376_v48  ;;  %v7384_v24 = vor.u32 %v7383_v35, %v7380_v1  ;;  %v8149_v25 = vsel %vm14646_vm5, %v13149_v2, %v8148_v12  ;;  %8395 = vmatpush.bf16.msra.mxu2 %v14300_v46  ;;  %8099 = vmatpush.bf16.msra.mxu0 %v14280_v13  ;;  %v14279_v37 = vld [vmem:[%s18292_s1 + $0xa00] sm:$0xff]  ;;  %v8426_v35 = vld [vmem:[#allocation2 + $0x18] sm:$0xf]  ;;  %v17298_v2 = vld [vmem:[#allocation2 + $0x1c] sm:$0xf] }
 0x4d5   : > { %v7225_v47 = vor.u32 %v7223_v53, %v17234_v3  ;;  %v7226_v7 = vrot.slane %v17234_v3, 4  ;;  %v8150_v28 = vrot.slane %v8148_v12, 4  ;;  %v8151_v36 = vrot.slane %v17263_v50, 5  ;;  %v14307_v1 = vld [vmem:[%s18292_s1 + $0xac0] sm:$0xff] }
 0x4d6   : > { %v7167_v23 = vpack.c.bf16 %v7159_v9, %v7159_v9  ;;  %v7428_v21 = vpack.c.b16 %v7423_v8, %v7422_v43  ;;  %v14242_v14 = vld [vmem:[#allocation2 + $0x24] sm:$0xff]  ;;  %v7385_v18 = vrot.slane %v7384_v24, 4  ;;  %v7917_v3 = vshrl.u32 %v7904_v57, 16  ;;  %8621 = vmatpush.bf16.msra.mxu3 %v14308_v59 }
 0x4d7   : > { %v7270_v22 = vsel %vm14717_vm11, %v7225_v47, %v7269_v32  ;;  %v14269_v51 = vld [vmem:[#allocation2 + $0x24] sm:$0xff]  ;;  %v7304_v15 = vld [vmem:[#allocation2 + $0x2c] sm:$0x1]  ;;  %v8152_v40 = vsel %vm14646_vm5, %v8150_v28, %v8151_v36  ;;  %v7926_v47 = vshll.u32 %v17232_v42, 16  ;;  %v7930_v32 = vshrl.u32 %v17232_v42, 16 }
 0x4d8   : > { %v7283_v58 = vld [vmem:[#allocation2 + $0x28] sm:$0xf]  ;;  %7271 = vst [vmem:[#allocation2 + $0x30] sm:$0xf] %v7270_v22  ;;  %v7228_v52 = vshrl.u32 %v7167_v23, 16  ;;  %7500 = vmatmul.bf16.gmra.mxu0 %v7428_v21  ;;  %v7650_v60 = vrot.slane %v7304_v15, 5  ;;  %7606 = vmatmul.bf16.gmra.mxu1 %v14242_v14  ;;  %v8191_v46 = vunpack.c.l.b16 %v8149_v25  ;;  %v8192_v62 = vunpack.c.l.b16 %v8152_v40 }
 0x4d9   : > { %v7647_v33 = vrot.slane %v7283_v58, 5  ;;  %v7387_v61 = vshll.u32 %v7283_v58, 16  ;;  %v7391_v19 = vshrl.u32 %v7283_v58, 16  ;;  %7885 = vmatmul.bf16.gmra.mxu3 %v14269_v51  ;;  %v7397_v16 = vshll.u32 %v7304_v15, 16  ;;  %8396 = vmatpush.bf16.msra.mxu2 %v14299_v38  ;;  %v17305_v25 = vld [vmem:[#allocation2 + $0x20] sm:$0x1] }
 0x4da   : > { %v7230_v44 = vrot.slane %v7228_v52, 7  ;;  %v7231_v17 = vshll.u32 %v7167_v23, 16  ;;  %v7920_v8 = vshll.u32 %v7904_v57, 16  ;;  %8100 = vmatpush.bf16.msra.mxu0 %v14279_v37  ;;  %v7919_v22 = vrot.slane %v7917_v3, 4  ;;  %8622 = vmatpush.bf16.msra.mxu3 %v14307_v1  ;;  %v14295_v3 = vld [vmem:[#allocation2 + $0x18] sm:$0xff] }
 0x4db   : > { %v7648_v10 = vsel %vm14646_vm5, %v12988_v20, %v7647_v33  ;;  %v7649_v5 = vrot.slane %v7647_v33, 4  ;;  %v7389_v31 = vrot.slane %v7387_v61, 5  ;;  %v7393_v63 = vrot.slane %v7391_v19, 4  ;;  %v7908_v20 = vld [vmem:[#allocation2 + $0x1c] sm:$0xf] }
 0x4dc   : > { %v7675_v11 = vunpack.c.l.b16 %v7648_v10  ;;  %v7233_v6 = vor.u32 %v7231_v17, %v7230_v44  ;;  %v7235_v39 = vrot.slane %v7230_v44, 4  ;;  %v7399_v53 = vrot.slane %v7397_v16, 5 }
 0x4dd   : > { %v7651_v55 = vsel %vm14646_vm5, %v7649_v5, %v7650_v60  ;;  %v7394_v0 = vor.u32 %v7393_v63, %v7389_v31  ;;  %v7390_v4 = vsel %vm14634_vm4, %v7385_v18, %v7389_v31  ;;  %v7928_v23 = vrot.slane %v7926_v47, 5  ;;  %v17302_v5 = vld [vmem:[#allocation2 + $0x20] sm:$0x1]  ;;  %v8131_v63 = vld [vmem:[#allocation2 + $0x18] sm:$0xe] }
 0x4de   : > { %v7676_v56 = vunpack.c.l.b16 %v7651_v55  ;;  %v7234_v29 = vsel %vm14724_vm12, %v7226_v7, %v7233_v6  ;;  %v7274_v54 = vsel %vm14731_vm13, %v7235_v39, %v7273_v41  ;;  %v7424_v12 = vunpack.c.l.b16 %v7390_v4  ;;  %v7907_v6 = vld [vmem:[#allocation2 + $0x18] sm:$0xf]  ;;  %v17309_v18 = vld [vmem:[#allocation2 + $0x28] sm:$0xf]  ;;  %v8429_v4 = vld [vmem:[#allocation2 + $0x24] sm:$0xf] }
 0x4df   : > { %v7395_v43 = vrot.slane %v7394_v0, 4  ;;  %7275 = vst [vmem:[#allocation2 + $0x38] sm:$0x1] %v7274_v54  ;;  %v7932_v21 = vrot.slane %v7930_v32, 4  ;;  %v8439_v14 = vshrl.u32 %v8426_v35, 16  ;;  %v8442_v42 = vshll.u32 %v8426_v35, 16 }
 0x4e0   : > { %v7680_v48 = vpack.c.b16 %v7676_v56, %v7675_v11  ;;  %7272 = vst [vmem:[#allocation2 + $0x34] sm:$0xf] %v7234_v29  ;;  %v7922_v58 = vrot.slane %v7920_v8, 5  ;;  %v8448_v15 = vshll.u32 %v17298_v2, 16  ;;  %v8452_v33 = vshrl.u32 %v17298_v2, 16 }
 0x4e1   : > { %v7400_v9 = vsel %vm14634_vm4, %v7395_v43, %v7399_v53  ;;  %v8199_v61 = vpack.c.b16 %v8192_v62, %v8191_v46  ;;  %v7933_v19 = vor.u32 %v7932_v21, %v7928_v23  ;;  %v8155_v10 = vrot.slane %v7908_v20, 5  ;;  %v7911_v46 = vld [vmem:[#allocation2 + $0x28] sm:$0xf] }
 0x4e2   : > { %v7425_v26 = vunpack.c.l.b16 %v7400_v9  ;;  %v8450_v52 = vrot.slane %v8448_v15, 5  ;;  %v8454_v60 = vrot.slane %v8452_v33, 4  ;;  %v8441_v31 = vrot.slane %v8439_v14, 4 }
 0x4e3   : > { %7756 = vmatmul.bf16.gmra.mxu2 %v7680_v48  ;;  %v8444_v16 = vrot.slane %v8442_v42, 5  ;;  %v7923_v13 = vor.u32 %v7922_v58, %v7919_v22  ;;  %v7936_v17 = vshll.u32 %v17263_v50, 16  ;;  %v8458_v59 = vshll.u32 %v17302_v5, 16 }
 0x4e4   : > { %v7429_v51 = vpack.c.b16 %v7425_v26, %v7424_v12  ;;  %v8455_v44 = vor.u32 %v8454_v60, %v8450_v52  ;;  %v7934_v57 = vrot.slane %v7933_v19, 4  ;;  %v8157_v7 = vrot.slane %v8155_v10, 4  ;;  %v17330_v19 = vld [vmem:[#allocation2 + $0x2c] sm:$0x1] }
 0x4e5   : > { %v8445_v55 = vor.u32 %v8444_v16, %v8441_v31  ;;  %v7924_v11 = vrot.slane %v7923_v13, 4  ;;  %v13150_v28 = vrot.slane %v8131_v63, 9  ;;  %v7938_v39 = vrot.slane %v7936_v17, 5  ;;  %v7910_v13 = vld [vmem:[#allocation2 + $0x24] sm:$0xf] }
 0x4e6   : > { %v8456_v38 = vrot.slane %v8455_v44, 4  ;;  %v8158_v56 = vrot.slane %v17305_v25, 5  ;;  %v7950_v0 = vshll.u32 %v7908_v20, 16  ;;  %v7954_v41 = vshrl.u32 %v7908_v20, 16  ;;  %v17333_v17 = vld [vmem:[#allocation2 + $0x2c] sm:$0x1] }
 0x4e7   : > { %v14270_v24 = vld [vmem:[#allocation2 + $0x30] sm:$0xff]  ;;  %v7929_v50 = vsel %vm14634_vm4, %v7924_v11, %v7928_v23  ;;  %v8156_v53 = vsel %vm14646_vm5, %v13150_v28, %v8155_v10  ;;  %v8460_v36 = vrot.slane %v8458_v59, 5  ;;  %v7939_v29 = vsel %vm14634_vm4, %v7934_v57, %v7938_v39  ;;  %v14322_v59 = vld [vmem:[%s18292_s1 + $0xb38] sm:$0xff] }
 0x4e8   : > { %7505 = vmatmul.bf16.gmra.mxu0 %v7429_v51  ;;  %8263 = vmatmul.bf16.vlgmr.msra.gmra.mxu1 %v8199_v61  ;;  %v8159_v54 = vsel %vm14646_vm5, %v8157_v7, %v8158_v56  ;;  %v8446_v48 = vrot.slane %v8445_v55, 4  ;;  %v7941_v43 = vshrl.u32 %v7907_v6, 16  ;;  %v7944_v1 = vshll.u32 %v7907_v6, 16 }
 0x4e9   : > { %7890 = vmatmul.bf16.gmra.mxu3 %v14270_v24  ;;  %v8461_v37 = vsel %vm14634_vm4, %v8456_v38, %v8460_v36  ;;  %v8472_v40 = vshll.u32 %v17309_v18, 16  ;;  %v8476_v47 = vshrl.u32 %v17309_v18, 16  ;;  %v17323_v32 = vrot.slane %v7950_v0, 5  ;;  %v8132_v24 = vld [vmem:[#allocation2 + $0x24] sm:$0xe]  ;;  %8777 = vmatpush.bf16.msrb.mxu0 %v14322_v59 }
 0x4ea   : > { %v7956_v9 = vrot.slane %v7954_v41, 4  ;;  %v8029_v8 = vunpack.c.l.b16 %v7929_v50  ;;  %v8030_v35 = vunpack.c.l.b16 %v7939_v29  ;;  %v8194_v26 = vunpack.c.l.b16 %v8159_v54  ;;  %v14321_v41 = vld [vmem:[%s18292_s1 + $0xb30] sm:$0xff] }
 0x4eb   : > { %v8451_v12 = vsel %vm14634_vm4, %v8446_v48, %v8450_v52  ;;  %v8193_v62 = vunpack.c.l.b16 %v8156_v53  ;;  %v8552_v22 = vunpack.c.l.b16 %v8461_v37  ;;  %v8463_v23 = vshrl.u32 %v8429_v4, 16  ;;  %v17351_v48 = vld [vmem:[#allocation2 + $0x34] sm:$0xf] }
 0x4ec   : > { %v8466_v21 = vshll.u32 %v8429_v4, 16  ;;  %v7943_v14 = vrot.slane %v7941_v43, 4  ;;  %v7946_v42 = vrot.slane %v7944_v1, 5  ;;  %v17327_v51 = vrot.slane %v8472_v40, 5  ;;  %v8652_v43 = vld [vmem:[#allocation2 + $0x18] sm:$0xe] }
 0x4ed   : > { %v8478_v58 = vrot.slane %v8476_v47, 4  ;;  %v8551_v20 = vunpack.c.l.b16 %v8451_v12  ;;  %v7957_v15 = vor.u32 %v7956_v9, %v17323_v32  ;;  %v8162_v33 = vrot.slane %v7911_v46, 5  ;;  %8778 = vmatpush.bf16.msrb.mxu0 %v14321_v41  ;;  %v14296_v47 = vld [vmem:[#allocation2 + $0x24] sm:$0xff] }
 0x4ee   : > { %v8037_v61 = vpack.c.b16 %v8030_v35, %v8029_v8  ;;  %v8200_v60 = vpack.c.b16 %v8194_v26, %v8193_v62  ;;  %v7960_v10 = vshll.u32 %v17305_v25, 16  ;;  %v8465_v31 = vrot.slane %v8463_v23, 4 }
 0x4ef   : > { %v8559_v52 = vpack.c.b16 %v8552_v22, %v8551_v20  ;;  %v8468_v16 = vrot.slane %v8466_v21, 5  ;;  %v7947_v44 = vor.u32 %v7946_v42, %v7943_v14  ;;  %v8479_v63 = vor.u32 %v8478_v58, %v17327_v51  ;;  %v17365_v58 = vld [vmem:[#allocation2 + $0x34] sm:$0xf] }
 0x4f0   : > { %v7958_v57 = vrot.slane %v7957_v15, 4  ;;  %v13151_v7 = vrot.slane %v8132_v24, 9  ;;  %v8164_v55 = vrot.slane %v8162_v33, 4  ;;  %v8482_v25 = vshll.u32 %v17330_v19, 16 }
 0x4f1   : > { %v7965_v11 = vshrl.u32 %v7910_v13, 16  ;;  %v7968_v28 = vshll.u32 %v7910_v13, 16  ;;  %v7974_v38 = vshll.u32 %v7911_v46, 16  ;;  %v7978_v6 = vshrl.u32 %v7911_v46, 16  ;;  %v8432_v46 = vld [vmem:[#allocation2 + $0x30] sm:$0xf] }
 0x4f2   : > { %v7962_v39 = vrot.slane %v7960_v10, 5  ;;  %v8165_v56 = vrot.slane %v17333_v17, 5  ;;  %v8469_v0 = vor.u32 %v8468_v16, %v8465_v31  ;;  %v8670_v50 = vrot.slane %v17298_v2, 5  ;;  %v14320_v2 = vld [vmem:[%s18292_s1 + $0xb28] sm:$0xff] }
 0x4f3   : > { %8397 = vmatmul.bf16.vlgmr.msra.gmra.mxu2 %v14295_v3  ;;  %v8163_v53 = vsel %vm14646_vm5, %v13151_v7, %v8162_v33  ;;  %v8480_v36 = vrot.slane %v8479_v63, 4  ;;  %v8484_v54 = vrot.slane %v8482_v25, 5  ;;  %v7967_v37 = vrot.slane %v7965_v11, 4  ;;  %8779 = vmatpush.bf16.msrb.mxu0 %v14320_v2 }
 0x4f4   : > { %v7963_v3 = vsel %vm14634_vm4, %v7958_v57, %v7962_v39  ;;  %v8166_v29 = vsel %vm14646_vm5, %v8164_v55, %v8165_v56  ;;  %v7970_v1 = vrot.slane %v7968_v28, 5  ;;  %v17353_v4 = vrot.slane %v7974_v38, 5  ;;  %v17383_v28 = vld [vmem:[#allocation2 + $0x38] sm:$0x1]  ;;  %v8133_v39 = vld [vmem:[#allocation2 + $0x30] sm:$0xe] }
 0x4f5   : > { %v7980_v40 = vrot.slane %v7978_v6, 4  ;;  %v7948_v9 = vrot.slane %v7947_v44, 4  ;;  %v8195_v8 = vunpack.c.l.b16 %v8163_v53  ;;  %v8470_v35 = vrot.slane %v8469_v0, 4  ;;  %v17385_v6 = vld [vmem:[#allocation2 + $0x38] sm:$0x1] }
 0x4f6   : > { %v8672_v26 = vrot.slane %v8670_v50, 4  ;;  %v8485_v12 = vsel %vm14634_vm4, %v8480_v36, %v8484_v54  ;;  %v8496_v62 = vshll.u32 %v17351_v48, 16  ;;  %v8500_v22 = vshrl.u32 %v17351_v48, 16  ;;  %v14318_v36 = vld [vmem:[%s18292_s1 + $0xb18] sm:$0xff] }
 0x4f7   : > { %v13313_v23 = vrot.slane %v8652_v43, 9  ;;  %v7953_v21 = vsel %vm14634_vm4, %v7948_v9, %v17323_v32  ;;  %v8032_v14 = vunpack.c.l.b16 %v7963_v3  ;;  %v8196_v42 = vunpack.c.l.b16 %v8166_v29  ;;  %v8653_v3 = vld [vmem:[#allocation2 + $0x24] sm:$0xe] }
 0x4f8   : > { %8101 = vmatmul.bf16.vlgmr.msra.gmra.mxu0 %v8037_v61  ;;  %8268 = vmatmul.bf16.gmra.mxu1 %v8200_v60  ;;  %v8673_v20 = vrot.slane %v17302_v5, 5  ;;  %v8475_v15 = vsel %vm14634_vm4, %v8470_v35, %v17327_v51  ;;  %v7971_v33 = vor.u32 %v7970_v1, %v7967_v37  ;;  %v7981_v61 = vor.u32 %v7980_v40, %v17353_v4  ;;  %v14319_v60 = vld [vmem:[%s18292_s1 + $0xb20] sm:$0xff]  ;;  %v14317_v40 = vld [vmem:[%s18292_s1 + $0xb10] sm:$0xff] }
 0x4f9   : > { %8623 = vmatmul.bf16.vlgmr.msra.gmra.mxu3 %v8559_v52  ;;  %v8671_v32 = vsel %vm14646_vm5, %v13313_v23, %v8670_v50  ;;  %v8554_v24 = vunpack.c.l.b16 %v8485_v12  ;;  %v8487_v52 = vshrl.u32 %v8432_v46, 16  ;;  %v8490_v10 = vshll.u32 %v8432_v46, 16  ;;  %8780 = vmatpush.bf16.msrb.mxu0 %v14319_v60  ;;  %v14297_v60 = vld [vmem:[#allocation2 + $0x30] sm:$0xff] }
 0x4fa   : > { %v8674_v5 = vsel %vm14646_vm5, %v8672_v26, %v8673_v20  ;;  %v8031_v31 = vunpack.c.l.b16 %v7953_v21  ;;  %v8169_v51 = vrot.slane %v17365_v58, 5  ;;  %v17380_v16 = vrot.slane %v8496_v62, 5 }
 0x4fb   : > { %v8502_v13 = vrot.slane %v8500_v22, 4  ;;  %v8553_v44 = vunpack.c.l.b16 %v8475_v15  ;;  %v7984_v63 = vshll.u32 %v17333_v17, 16  ;;  %v8713_v59 = vunpack.c.l.b16 %v8671_v32 }
 0x4fc   : > { %v8714_v57 = vunpack.c.l.b16 %v8674_v5  ;;  %v8038_v7 = vpack.c.b16 %v8032_v14, %v8031_v31  ;;  %v8201_v55 = vpack.c.b16 %v8196_v42, %v8195_v8  ;;  %v7972_v25 = vrot.slane %v7971_v33, 4  ;;  %v7913_v42 = vld [vmem:[#allocation2 + $0x30] sm:$0xf] }
 0x4fd   : > { %v7982_v11 = vrot.slane %v7981_v61, 4  ;;  %v8560_v38 = vpack.c.b16 %v8554_v24, %v8553_v44  ;;  %v8489_v56 = vrot.slane %v8487_v52, 4  ;;  %v8492_v0 = vrot.slane %v8490_v10, 5  ;;  %8781 = vmatpush.bf16.msrb.mxu0 %v14318_v36  ;;  %v14316_v61 = vld [vmem:[%s18292_s1 + $0xb08] sm:$0xff] }
 0x4fe   : > { %v17387_v41 = vpack.c.b16 %v8714_v57, %v8713_v59  ;;  %v7977_v17 = vsel %vm14634_vm4, %v7972_v25, %v17353_v4  ;;  %v8171_v50 = vrot.slane %v8169_v51, 4  ;;  %v8503_v53 = vor.u32 %v8502_v13, %v17380_v16  ;;  %v8435_v4 = vld [vmem:[#allocation2 + $0x3c] sm:$0xf] }
 0x4ff   : > { %v8677_v29 = vrot.slane %v17309_v18, 5  ;;  %v7986_v54 = vrot.slane %v7984_v63, 5  ;;  %v8506_v43 = vshll.u32 %v17383_v28, 16  ;;  %v13152_v37 = vrot.slane %v8133_v39, 9  ;;  %v17404_v18 = vld [vmem:[#allocation2 + $0x40] sm:$0xf] }
 0x500   : > { %v8172_v1 = vrot.slane %v17385_v6, 5  ;;  %v8493_v9 = vor.u32 %v8492_v0, %v8489_v56  ;;  %v13314_v8 = vrot.slane %v8653_v3, 9  ;;  %v8504_v12 = vrot.slane %v8503_v53, 4  ;;  %v8437_v0 = vld [vmem:[#allocation2 + $0x44] sm:$0x1] }
 0x501   : > { %v7987_v2 = vsel %vm14634_vm4, %v7982_v11, %v7986_v54  ;;  %v8170_v35 = vsel %vm14646_vm5, %v13152_v37, %v8169_v51  ;;  %v8679_v46 = vrot.slane %v8677_v29, 4  ;;  %v8508_v62 = vrot.slane %v8506_v43, 5  ;;  %8782 = vmatpush.bf16.msrb.mxu0 %v14317_v40 }
 0x502   : > { %v8173_v26 = vsel %vm14646_vm5, %v8171_v50, %v8172_v1  ;;  %v8511_v22 = vshrl.u32 %v8435_v4, 16  ;;  %v8678_v23 = vsel %vm14646_vm5, %v13314_v8, %v8677_v29  ;;  %v8680_v21 = vrot.slane %v17330_v19, 5 }
 0x503   : > { %8402 = vmatmul.bf16.gmra.mxu2 %v14296_v47  ;;  %v8033_v47 = vunpack.c.l.b16 %v7977_v17  ;;  %v8034_v14 = vunpack.c.l.b16 %v7987_v2  ;;  %v8514_v20 = vshll.u32 %v8435_v4, 16  ;;  %v8520_v15 = vshll.u32 %v17404_v18, 16  ;;  %v8654_v17 = vld [vmem:[#allocation2 + $0x30] sm:$0xe] }
 0x504   : > { %v8524_v33 = vshrl.u32 %v17404_v18, 16  ;;  %v8494_v32 = vrot.slane %v8493_v9, 4  ;;  %v7998_v24 = vshll.u32 %v17365_v58, 16  ;;  %v8002_v52 = vshrl.u32 %v17365_v58, 16 }
 0x505   : > { %v8681_v19 = vsel %vm14646_vm5, %v8679_v46, %v8680_v21  ;;  %v8198_v10 = vunpack.c.l.b16 %v8173_v26  ;;  %v8509_v5 = vsel %vm14634_vm4, %v8504_v12, %v8508_v62  ;;  %v8715_v31 = vunpack.c.l.b16 %v8678_v23  ;;  %8783 = vmatpush.bf16.msrb.mxu0 %v14316_v61  ;;  %v14298_v21 = vld [vmem:[#allocation2 + $0x3c] sm:$0xff] }
 0x506   : > { %v8716_v51 = vunpack.c.l.b16 %v8681_v19  ;;  %v8499_v13 = vsel %vm14634_vm4, %v8494_v32, %v17380_v16  ;;  %v7989_v44 = vshrl.u32 %v7913_v42, 16  ;;  %v7992_v63 = vshll.u32 %v7913_v42, 16 }
 0x507   : > { %v8513_v59 = vrot.slane %v8511_v22, 4  ;;  %v8516_v57 = vrot.slane %v8514_v20, 5  ;;  %v8526_v58 = vrot.slane %v8524_v33, 4  ;;  %v8197_v11 = vunpack.c.l.b16 %v8170_v35 }
 0x508   : > { %8106 = vmatmul.bf16.gmra.mxu0 %v8038_v7  ;;  %8273 = vmatmul.bf16.gmra.mxu1 %v8201_v55  ;;  %v8522_v7 = vrot.slane %v8520_v15, 5  ;;  %v14315_v55 = vld [vmem:[%s18292_s1 + $0xb00] sm:$0xff]  ;;  %v8722_v25 = vpack.c.b16 %v8716_v51, %v8715_v31  ;;  %v8000_v39 = vrot.slane %v7998_v24, 5  ;;  %v8004_v56 = vrot.slane %v8002_v52, 4  ;;  %v8655_v51 = vld [vmem:[#allocation2 + $0x3c] sm:$0xe] }
 0x509   : > { %8628 = vmatmul.bf16.gmra.mxu3 %v8560_v38  ;;  %v8556_v38 = vunpack.c.l.b16 %v8509_v5  ;;  %v8039_v50 = vpack.c.b16 %v8034_v14, %v8033_v47  ;;  %v8202_v16 = vpack.c.b16 %v8198_v10, %v8197_v11  ;;  %v8555_v53 = vunpack.c.l.b16 %v8499_v13  ;;  %8784 = vmatpush.bf16.msrb.mxu0 %v14315_v55 }
 0x50a   : > { %v7991_v36 = vrot.slane %v7989_v44, 4  ;;  %v7994_v3 = vrot.slane %v7992_v63, 5  ;;  %v8517_v29 = vor.u32 %v8516_v57, %v8513_v59  ;;  %v8527_v54 = vor.u32 %v8526_v58, %v8522_v7  ;;  %v17453_v59 = vpop.f32.mrf.mxu1 }
 0x50b   : > { %v8530_v43 = vshll.u32 %v8437_v0, 16  ;;  %v8561_v37 = vpack.c.b16 %v8556_v38, %v8555_v53  ;;  %v8005_v1 = vor.u32 %v8004_v56, %v8000_v39  ;;  %v13315_v4 = vrot.slane %v8654_v17, 9 }
 0x50c   : > { %v8684_v40 = vrot.slane %v17351_v48, 5  ;;  %v8008_v2 = vshll.u32 %v17385_v6, 16  ;;  %v8687_v8 = vrot.slane %v17383_v28, 5  ;;  %v8518_v35 = vrot.slane %v8517_v29, 4 }
 0x50d   : > { %v8528_v26 = vrot.slane %v8527_v54, 4  ;;  %v8532_v12 = vrot.slane %v8530_v43, 5  ;;  %v7995_v46 = vor.u32 %v7994_v3, %v7991_v36  ;;  %v8006_v62 = vrot.slane %v8005_v1, 4 }
 0x50e   : > { %v8685_v47 = vsel %vm14646_vm5, %v13315_v4, %v8684_v40  ;;  %v8686_v9 = vrot.slane %v8684_v40, 4  ;;  %v8010_v14 = vrot.slane %v8008_v2, 5  ;;  %v8523_v6 = vsel %vm14634_vm4, %v8518_v35, %v8522_v7 }
 0x50f   : > { %v8717_v48 = vunpack.c.l.b16 %v8685_v47  ;;  %v8533_v42 = vsel %vm14634_vm4, %v8528_v26, %v8532_v12  ;;  %v7996_v28 = vrot.slane %v7995_v46, 4  ;;  %v8557_v61 = vunpack.c.l.b16 %v8523_v6  ;;  %v14334_v46 = vld [vmem:[%s18292_s1 + $0xb78] sm:$0xff] }
 0x510   : > { %v8688_v22 = vsel %vm14646_vm5, %v8686_v9, %v8687_v8  ;;  %v8011_v15 = vsel %vm14634_vm4, %v8006_v62, %v8010_v14  ;;  %v8691_v13 = vrot.slane %v17404_v18, 5  ;;  %v8694_v44 = vrot.slane %v8437_v0, 5  ;;  %v14350_v62 = vld [vmem:[%s18292_s1 + $0xbf8] sm:$0xff]  ;;  %9381 = vmatpush.bf16.msrb.mxu2 %v14334_v46 }
 0x511   : > { %v8718_v23 = vunpack.c.l.b16 %v8688_v22  ;;  %v8001_v33 = vsel %vm14634_vm4, %v7996_v28, %v8000_v39  ;;  %v8036_v32 = vunpack.c.l.b16 %v8011_v15  ;;  %v13316_v63 = vrot.slane %v8655_v51, 9  ;;  %9531 = vmatpush.bf16.msrb.mxu3 %v14350_v62  ;;  %v14333_v22 = vld [vmem:[%s18292_s1 + $0xb70] sm:$0xff]  ;;  %v14348_v28 = vld [vmem:[%s18292_s1 + $0xbe8] sm:$0xff] }
 0x512   : > { %v8035_v24 = vunpack.c.l.b16 %v8001_v33  ;;  %v8693_v57 = vrot.slane %v8691_v13, 4  ;;  %v17465_v18 = vpop.f32.mrf.mxu1  ;;  %v14331_v33 = vld [vmem:[%s18292_s1 + $0xb60] sm:$0xff] }
 0x513   : > { %8407 = vmatmul.bf16.gmra.mxu2 %v14297_v60  ;;  %v8723_v20 = vpack.c.b16 %v8718_v23, %v8717_v48  ;;  %v8558_v60 = vunpack.c.l.b16 %v8533_v42  ;;  %v8692_v58 = vsel %vm14646_vm5, %v13316_v63, %v8691_v13  ;;  %v14342_v48 = vld [vmem:[%s18292_s1 + $0xbb8] sm:$0xff]  ;;  %v14349_v23 = vld [vmem:[%s18292_s1 + $0xbf0] sm:$0xff]  ;;  %v14332_v42 = vld [vmem:[%s18292_s1 + $0xb68] sm:$0xff] }
 0x514   : > { %v8040_v19 = vpack.c.b16 %v8036_v32, %v8035_v24  ;;  %v8719_v55 = vunpack.c.l.b16 %v8692_v58  ;;  %9382 = vmatpush.bf16.msrb.mxu2 %v14333_v22  ;;  %9280 = vmatpush.bf16.msrb.mxu1 %v14342_v48  ;;  %v17560_v13 = vld [vmem:[#allocation3 + $0xc] sm:$0xf]  ;;  %v8828_v63 = vld [vmem:[#allocation3 + $0x10] sm:$0xf]  ;;  %v8830_v48 = vld [vmem:[#allocation3 + $0x18] sm:$0xf] }
 0x515   : > { %v8562_v52 = vpack.c.b16 %v8558_v60, %v8557_v61  ;;  %9532 = vmatpush.bf16.msrb.mxu3 %v14349_v23  ;;  %v14340_v61 = vld [vmem:[%s18292_s1 + $0xba8] sm:$0xff]  ;;  %v14347_v60 = vld [vmem:[%s18292_s1 + $0xbe0] sm:$0xff]  ;;  %v8843_v58 = vshll.u32 %v17560_v13, 16 }
 0x517   : > { %v8845_v22 = vrot.slane %v8843_v58, 5 }
 0x518   : > { %8111 = vmatmul.bf16.gmra.mxu0 %v8039_v50  ;;  %8278 = vmatmul.bf16.gmra.mxu1 %v8202_v16 }
 0x519   : > { %8633 = vmatmul.bf16.gmra.mxu3 %v8561_v37  ;;  %9383 = vmatpush.bf16.msrb.mxu2 %v14332_v42  ;;  %v14330_v42 = vld [vmem:[%s18292_s1 + $0xb58] sm:$0xff] }
 0x51a   : > { %9533 = vmatpush.bf16.msrb.mxu3 %v14348_v28 }
 0x51d   : > { %9384 = vmatpush.bf16.msrb.mxu2 %v14331_v33  ;;  %v14362_v33 = vld [vmem:[%s18292_s1 + $0xc38] sm:$0xff] }
 0x51e   : > { %9534 = vmatpush.bf16.msrb.mxu3 %v14347_v60  ;;  %9665 = vmatpush.bf16.msra.mxu0 %v14362_v33 }
 0x520   : > { %v17445_v10 = vpop.f32.mrf.mxu0 }
 0x521   : > { %9385 = vmatpush.bf16.msrb.mxu2 %v14330_v42  ;;  %v8829_v42 = vld [vmem:[#allocation3 + $0x14] sm:$0x1] }
 0x522   : > { %v8859_v33 = vshll.u32 %v8829_v42, 16  ;;  %v14327_v42 = vld [vmem:[%s18292_s1 + $0xb40] sm:$0xff] }
 0x523   : > { %8412 = vmatmul.bf16.gmra.mxu2 %v14298_v21 }
 0x528   : > { %8116 = vmatmul.bf16.gmra.mxu0 %v8040_v19  ;;  %v17448_v5 = vpop.f32.mrf.mxu0 }
 0x529   : > { %8638 = vmatmul.bf16.gmra.mxu3 %v8562_v52  ;;  %v7595_v60 = vadd.f32 %v17465_v18, %v17448_v5  ;;  %v14361_v5 = vld [vmem:[%s18292_s1 + $0xc30] sm:$0xff]  ;;  %v8864_v18 = vshrl.u32 %v8830_v48, 16 }
 0x52a   : > { %9666 = vmatpush.bf16.msra.mxu0 %v14361_v5 }
 0x535   : > { %v17475_v16 = vpop.f32.mrf.mxu1 }
 0x538   : > { %8785 = vmatmul.bf16.vlgmr.msrb.gmra.mxu0 %v17387_v41  ;;  %v8695_v41 = vsel %vm14646_vm5, %v8693_v57, %v8694_v44  ;;  %v8840_v57 = vshrl.u32 %v17560_v13, 16 }
 0x539   : > { %v8720_v11 = vunpack.c.l.b16 %v8695_v41  ;;  %v7593_v41 = vadd.f32 %v17453_v59, %v17445_v10  ;;  %v14346_v10 = vld [vmem:[%s18292_s1 + $0xbd8] sm:$0xff] }
 0x53a   : > { %v8842_v62 = vrot.slane %v8840_v57, 4  ;;  %9535 = vmatpush.bf16.msrb.mxu3 %v14346_v10 }
 0x53b   : > { %v8724_v38 = vpack.c.b16 %v8720_v11, %v8719_v55  ;;  %v8849_v11 = vshll.u32 %v8828_v63, 16 }
 0x53c   : > { %v17463_v39 = vpop.f32.mrf.mxu3  ;;  %v8846_v58 = vor.u32 %v8845_v22, %v8842_v62  ;;  %v8831_v62 = vld [vmem:[#allocation3 + $0x1c] sm:$0xf] }
 0x53d   : > { %v17483_v29 = vpop.f32.mrf.mxu1  ;;  %v17584_v28 = vrot.slane %v8849_v11, 5  ;;  %v8867_v11 = vshll.u32 %v8830_v48, 16 }
 0x53f   : > { %v8869_v48 = vrot.slane %v8867_v11, 5  ;;  %v8861_v11 = vrot.slane %v8859_v33, 5 }
 0x544   : > { %v17450_v31 = vpop.f32.mrf.mxu0  ;;  %v17471_v17 = vpop.f32.mrf.mxu3 }
 0x545   : > { %v17491_v1 = vpop.f32.mrf.mxu1 }
 0x548   : > { %8790 = vmatmul.bf16.gmra.mxu0 %v8722_v25  ;;  %v17461_v25 = vpop.f32.mrf.mxu2 }
 0x549   : > { %v7762_v59 = vadd.f32 %v17461_v25, %v7593_v41  ;;  %v14338_v25 = vld [vmem:[%s18292_s1 + $0xb98] sm:$0xff]  ;;  %v14345_v41 = vld [vmem:[%s18292_s1 + $0xbd0] sm:$0xff] }
 0x54a   : > { %9536 = vmatpush.bf16.msrb.mxu3 %v14345_v41  ;;  %v17634_v41 = vld [vmem:[#allocation3 + $0x20] sm:$0x1] }
 0x54b   : > { %v7896_v57 = vadd.f32 %v17463_v39, %v7762_v59  ;;  %v8847_v59 = vrot.slane %v8846_v58, 4 }
 0x54c   : > { %v17455_v7 = vpop.f32.mrf.mxu0  ;;  %v17481_v3 = vpop.f32.mrf.mxu3 }
 0x54d   : > { %v17499_v47 = vpop.f32.mrf.mxu1 }
 0x550   : > { %v17469_v0 = vpop.f32.mrf.mxu2 }
 0x551   : > { %v7763_v22 = vadd.f32 %v17469_v0, %v7595_v60  ;;  %v8852_v0 = vsel %vm14634_vm4, %v8847_v59, %v17584_v28 }
 0x554   : > { %v17489_v37 = vpop.f32.mrf.mxu3 }
 0x555   : > { %v17467_v56 = vpop.f32.mrf.mxu0  ;;  %v17509_v12 = vpop.f32.mrf.mxu1 }
 0x558   : > { %8795 = vmatmul.bf16.gmra.mxu0 %v8723_v20  ;;  %v17477_v53 = vpop.f32.mrf.mxu2  ;;  %v14341_v20 = vld [vmem:[%s18292_s1 + $0xbb0] sm:$0xff] }
 0x559   : > { %9281 = vmatpush.bf16.msrb.mxu1 %v14341_v20  ;;  %v14339_v20 = vld [vmem:[%s18292_s1 + $0xba0] sm:$0xff] }
 0x55c   : > { %v17497_v2 = vpop.f32.mrf.mxu3 }
 0x55d   : > { %v17473_v50 = vpop.f32.mrf.mxu0  ;;  %v17541_v15 = vpop.f32.mrf.mxu1  ;;  %9282 = vmatpush.bf16.msrb.mxu1 %v14340_v61 }
 0x55e   : > { %18333 = vst [vmem:[#allocation9_spill] sm:$0xff] %v17541_v15 }
 0x560   : > { %v17485_v54 = vpop.f32.mrf.mxu2 }
 0x561   : > { %9283 = vmatpush.bf16.msrb.mxu1 %v14339_v20 }
 0x564   : > { %v17505_v35 = vpop.f32.mrf.mxu3 }
 0x565   : > { %v17479_v36 = vpop.f32.mrf.mxu0  ;;  %v8264_v19 = vpop.f32.mrf.mxu1  ;;  %9284 = vmatpush.bf16.msrb.mxu1 %v14338_v25  ;;  %v14344_v25 = vld [vmem:[%s18292_s1 + $0xbc8] sm:$0xff] }
 0x566   : > { %9537 = vmatpush.bf16.msrb.mxu3 %v14344_v25 }
 0x568   : > { %8800 = vmatmul.bf16.gmra.mxu0 %v8724_v38  ;;  %v17495_v40 = vpop.f32.mrf.mxu2  ;;  %v8853_v38 = vshrl.u32 %v8828_v63, 16  ;;  %v14329_v63 = vld [vmem:[%s18292_s1 + $0xb50] sm:$0xff] }
 0x569   : > { %9386 = vmatpush.bf16.msrb.mxu2 %v14329_v63  ;;  %v14328_v63 = vld [vmem:[%s18292_s1 + $0xb48] sm:$0xff] }
 0x56a   : > { %v8855_v61 = vrot.slane %v8853_v38, 4 }
 0x56c   : > { %v17530_v6 = vpop.f32.mrf.mxu3  ;;  %v8856_v39 = vor.u32 %v8855_v61, %v17584_v28  ;;  %v8877_v61 = vshrl.u32 %v8831_v62, 16  ;;  %v14360_v28 = vld [vmem:[%s18292_s1 + $0xc28] sm:$0xff] }
 0x56d   : > { %v17487_v43 = vpop.f32.mrf.mxu0  ;;  %18332 = vst [vmem:[#allocation8_spill] sm:$0xff] %v17530_v6  ;;  %v17570_v46 = vpop.f32.mrf.mxu1  ;;  %9387 = vmatpush.bf16.msrb.mxu2 %v14328_v63  ;;  %9667 = vmatpush.bf16.msra.mxu0 %v14360_v28  ;;  %v9099_v28 = vld [vmem:[#allocation3 + $0x8] sm:$0x1] }
 0x56e   : > { %18330 = vst [vmem:[#allocation11_spill] sm:$0xff] %v17487_v43  ;;  %v8857_v60 = vrot.slane %v8856_v39, 4  ;;  %v17652_v39 = vld [vmem:[#allocation3 + $0x28] sm:$0xf] }
 0x570   : > { %v17503_v8 = vpop.f32.mrf.mxu2 }
 0x571   : > { %9388 = vmatpush.bf16.msrb.mxu2 %v14327_v42 }
 0x574   : > { %v17556_v52 = vpop.f32.mrf.mxu3 }
 0x575   : > { %v17493_v4 = vpop.f32.mrf.mxu0  ;;  %18335 = vst [vmem:[#allocation12_spill] sm:$0xff] %v17556_v52  ;;  %v8866_v52 = vrot.slane %v8864_v18, 4  ;;  %v17614_v15 = vpop.f32.mrf.mxu1 }
 0x576   : > { %v8122_v20 = vadd.f32 %v17493_v4, %v7896_v57  ;;  %v8873_v4 = vshll.u32 %v8831_v62, 16 }
 0x578   : > { %v17526_v21 = vpop.f32.mrf.mxu2  ;;  %v8284_v57 = vadd.f32 %v8264_v19, %v8122_v20  ;;  %v7598_v19 = vadd.f32 %v17475_v16, %v17450_v31  ;;  %v14336_v31 = vld [vmem:[%s18292_s1 + $0xb88] sm:$0xff]  ;;  %v8870_v16 = vor.u32 %v8869_v48, %v8866_v52  ;;  %v17650_v20 = vrot.slane %v8877_v61, 4 }
 0x579   : > { %18331 = vst [vmem:[#allocation7_spill] sm:$0xff] %v17526_v21  ;;  %v8862_v52 = vsel %vm14634_vm4, %v8857_v60, %v8861_v11 }
 0x57a   : > { %v7764_v33 = vadd.f32 %v17477_v53, %v7598_v19  ;;  %v8897_v53 = vshll.u32 %v17652_v39, 16 }
 0x57c   : > { %v17568_v55 = vpop.f32.mrf.mxu3  ;;  %v7898_v60 = vadd.f32 %v17481_v3, %v7764_v33  ;;  %v14358_v3 = vld [vmem:[%s18292_s1 + $0xc18] sm:$0xff]  ;;  %v9123_v33 = vshll.u32 %v9099_v28, 16 }
 0x57d   : > { %v17501_v9 = vpop.f32.mrf.mxu0  ;;  %v17692_v59 = vpop.f32.mrf.mxu1 }
 0x57e   : > { %v9125_v21 = vrot.slane %v9123_v33, 5 }
 0x580   : > { %v17552_v32 = vpop.f32.mrf.mxu2 }
 0x581   : > { %18334 = vst [vmem:[#allocation10_spill] sm:$0xff] %v17552_v32  ;;  %v7897_v32 = vadd.f32 %v17471_v17, %v7763_v22  ;;  %v14337_v17 = vld [vmem:[%s18292_s1 + $0xb90] sm:$0xff]  ;;  %v8943_v22 = vunpack.c.l.bf16 %v8852_v0  ;;  %v7600_v0 = vadd.f32 %v17483_v29, %v17455_v7  ;;  %v14335_v7 = vld [vmem:[%s18292_s1 + $0xb80] sm:$0xff] }
 0x582   : > { %9285 = vmatpush.bf16.msrb.mxu1 %v14337_v17 }
 0x583   : > { %v8123_v58 = vadd.f32 %v17501_v9, %v7897_v32  ;;  %v14343_v9 = vld [vmem:[%s18292_s1 + $0xbc0] sm:$0xff] }
 0x584   : > { %v17609_v10 = vpop.f32.mrf.mxu3  ;;  %v14359_v32 = vld [vmem:[%s18292_s1 + $0xc20] sm:$0xff]  ;;  %9538 = vmatpush.bf16.msrb.mxu3 %v14343_v9  ;;  %v9074_v9 = vld [vmem:[#allocation3] sm:$0xf] }
 0x585   : > { %v17507_v26 = vpop.f32.mrf.mxu0  ;;  %v8285_v48 = vadd.f32 %v17570_v46, %v8123_v58  ;;  %9668 = vmatpush.bf16.msra.mxu0 %v14359_v32  ;;  %v9075_v58 = vld [vmem:[#allocation3 + $0x4] sm:$0xf] }
 0x586   : > { %9286 = vmatpush.bf16.msrb.mxu1 %v14336_v31  ;;  %v9113_v32 = vshll.u32 %v9075_v58, 16 }
 0x588   : > { %v17562_v44 = vpop.f32.mrf.mxu2  ;;  %v9115_v43 = vrot.slane %v9113_v32, 5 }
 0x589   : > { %v8418_v62 = vadd.f32 %v17562_v44, %v8284_v57  ;;  %v17670_v44 = vld [vmem:[%s18293_s2 + $0x4] ss:$0 sm:$0xff]  ;;  %v17672_v57 = vrot.slane %v8870_v16, 4  ;;  %v9424_v16 = vrot.slane %v9075_v58, 5  ;;  %9669 = vmatpush.bf16.msra.mxu0 %v14358_v3 }
 0x58a   : > { %9287 = vmatpush.bf16.msrb.mxu1 %v14335_v7 }
 0x58b   : > { %v8644_v25 = vadd.f32 %v17568_v55, %v8418_v62  ;;  %v17679_v55 = vunpack.c.l.bf16 %v8862_v52  ;;  %v9427_v62 = vrot.slane %v9099_v28, 5  ;;  %v9117_v52 = vshrl.u32 %v9075_v58, 16 }
 0x58c   : > { %v17683_v11 = vpop.f32.mrf.mxu3 }
 0x58d   : > { %v17528_v14 = vpop.f32.mrf.mxu0 }
 0x590   : > { %v17604_v38 = vpop.f32.mrf.mxu2 }
 0x591   : > { %v8419_v29 = vadd.f32 %v17604_v38, %v8285_v48  ;;  %v9119_v38 = vrot.slane %v9117_v52, 4  ;;  %v14357_v48 = vld [vmem:[%s18292_s1 + $0xc10] sm:$0xff] }
 0x592   : > { %9670 = vmatpush.bf16.msra.mxu0 %v14357_v48 }
 0x593   : > { %v9120_v7 = vor.u32 %v9119_v38, %v9115_v43  ;;  %v8645_v3 = vadd.f32 %v17609_v10, %v8419_v29 }
 0x595   : > { %v17554_v24 = vpop.f32.mrf.mxu0  ;;  %v9121_v52 = vrot.slane %v9120_v7, 4 }
 0x598   : > { %v17660_v63 = vpop.f32.mrf.mxu2 }
 0x59d   : > { %v17558_v51 = vpop.f32.mrf.mxu0 }
 0x5a5   : > { %v17572_v23 = vpop.f32.mrf.mxu0 }
 0x5a6   : > { %18336 = vst [vmem:[#allocation13_spill] sm:$0xff] %v17572_v23  ;;  %v8833_v23 = vld [vmem:[#allocation3 + $0x24] sm:$0xf] }
 0x5a7   : > { %v8888_v5 = vshrl.u32 %v8833_v23, 16  ;;  %v8891_v18 = vshll.u32 %v8833_v23, 16  ;;  %v17648_v23 = vrot.slane %v8873_v4, 5  ;;  %v14323_v4 = vld [vmem:[#allocation3] sm:$0xff] }
 0x5a8   : > { %9389 = vmatmul.bf16.vlgmr.msrb.gmra.mxu2 %v14323_v4  ;;  %v8124_v4 = vadd.f32 %v17507_v26, %v7898_v60  ;;  %v17711_v60 = vpop.f32.mrf.mxu2 }
 0x5a9   : > { %v17662_v17 = vrot.slane %v8888_v5, 4  ;;  %v17664_v61 = vrot.slane %v8891_v18, 5  ;;  %v9410_v5 = vld [vmem:[#allocation3] sm:$0xe]  ;;  %v9104_v18 = vshrl.u32 %v9074_v9, 16  ;;  %v8876_v32 = vsel %vm14634_vm4, %v17672_v57, %v17648_v23 }
 0x5aa   : > { %v13478_v31 = vrot.slane %v9410_v5, 9  ;;  %v9426_v5 = vrot.slane %v9424_v16, 4  ;;  %v8286_v10 = vadd.f32 %v17614_v15, %v8124_v4  ;;  %v14356_v57 = vld [vmem:[%s18292_s1 + $0xc08] sm:$0xff]  ;;  %v8835_v4 = vld [vmem:[#allocation3 + $0x2c] sm:$0x1] }
 0x5ab   : > { %v8894_v26 = vor.u32 %v17664_v61, %v17662_v17  ;;  %v9126_v61 = vsel %vm14634_vm4, %v9121_v52, %v9125_v21  ;;  %v18339_v21 = vor.u32 %v17650_v20, %v17648_v23  ;;  %9671 = vmatpush.bf16.msra.mxu0 %v14356_v57  ;;  %v8907_v23 = vshll.u32 %v8835_v4, 16 }
 0x5ac   : > { %v9428_v28 = vsel %vm14646_vm5, %v9426_v5, %v9427_v62  ;;  %v9217_v48 = vunpack.c.l.b16 %v9126_v61 }
 0x5ad   : > { %v17612_v6 = vpop.f32.mrf.mxu0  ;;  %v8909_v57 = vrot.slane %v8907_v23, 5 }
 0x5ae   : > { %18337 = vst [vmem:[#allocation14_spill] sm:$0xff] %v17612_v6  ;;  %v9107_v6 = vshll.u32 %v9074_v9, 16 }
 0x5b5   : > { %v8786_v19 = vpop.f32.mrf.mxu0 }
 0x5b6   : > { %v8806_v42 = vadd.f32 %v8786_v19, %v8644_v25  ;;  %v9425_v19 = vsel %vm14646_vm5, %v13478_v31, %v9424_v16  ;;  %v9468_v31 = vunpack.c.l.b16 %v9428_v28  ;;  %v9109_v16 = vrot.slane %v9107_v6, 5  ;;  %v14355_v28 = vld [vmem:[%s18292_s1 + $0xc00] sm:$0xff] }
 0x5b7   : > { %v9467_v46 = vunpack.c.l.b16 %v9425_v19  ;;  %v8631_v19 = vpop.f32.mrf.mxu3  ;;  %9672 = vmatpush.bf16.msra.mxu0 %v14355_v28  ;;  %v17772_v28 = vld [vmem:[#allocation3 + $0x38] sm:$0x1] }
 0x5b8   : > { %v8819_v25 = vadd.f32 %v17670_v44, %v8806_v42  ;;  %v9106_v42 = vrot.slane %v9104_v18, 4 }
 0x5b9   : > { %v9475_v62 = vpack.c.b16 %v9468_v31, %v9467_v46  ;;  %v18338_v46 = vshrl.u32 %v17652_v39, 16  ;;  %v8881_v39 = vrot.slane %v18339_v21, 4  ;;  %v8274_v31 = vpop.f32.mrf.mxu1 }
 0x5ba   : > { %v8951_v58 = vadd.f32 %v8943_v22, %v8819_v25  ;;  %v7765_v22 = vadd.f32 %v17485_v54, %v7600_v0  ;;  %v9110_v6 = vor.u32 %v9109_v16, %v9106_v42  ;;  %v17717_v25 = vrot.slane %v8897_v53, 5 }
 0x5bb   : > { %9539 = vmatmul.bf16.vlgmr.msrb.gmra.mxu3 %v9475_v62  ;;  %v8903_v0 = vrot.slane %v18338_v46, 4  ;;  %v7603_v53 = vadd.f32 %v17491_v1, %v17467_v56  ;;  %v8420_v42 = vadd.f32 %v17660_v63, %v8286_v10  ;;  %v8895_v10 = vrot.slane %v8894_v26, 4 }
 0x5bc   : > { %v8959_v9 = vpack.c.bf16 %v8951_v58, %v8951_v58  ;;  %v7899_v17 = vadd.f32 %v17489_v37, %v7765_v22  ;;  %v9111_v54 = vrot.slane %v9110_v6, 4  ;;  %v8836_v22 = vld [vmem:[#allocation3 + $0x30] sm:$0xf]  ;;  %v8945_v6 = vunpack.c.l.bf16 %v8876_v32 }
 0x5bd   : > { %v8788_v18 = vpop.f32.mrf.mxu0  ;;  %v8904_v7 = vor.u32 %v8903_v0, %v17717_v25  ;;  %v8646_v20 = vadd.f32 %v17683_v11, %v8420_v42  ;;  %v8900_v32 = vsel %vm14634_vm4, %v8895_v10, %v17717_v25  ;;  %v8915_v46 = vshll.u32 %v8836_v22, 16  ;;  %v8837_v25 = vld [vmem:[#allocation3 + $0x34] sm:$0xf] }
 0x5be   : > { %v8968_v29 = vshrl.u32 %v8959_v9, 16  ;;  %v8807_v33 = vadd.f32 %v8788_v18, %v8645_v3  ;;  %v8971_v5 = vshll.u32 %v8959_v9, 16  ;;  %v8125_v37 = vadd.f32 %v17528_v14, %v7899_v17 }
 0x5bf   : > { %v9116_v58 = vsel %vm14634_vm4, %v9111_v54, %v9115_v43  ;;  %v18340_v14 = vshll.u32 %v17634_v41, 16  ;;  %v7766_v18 = vadd.f32 %v17495_v40, %v7603_v53  ;;  %v8905_v40 = vrot.slane %v8904_v7, 4  ;;  %v9050_v53 = vld [vmem:[#allocation3 + $0x14] sm:$0x1] }
 0x5c0   : > { %v17724_v15 = vrot.slane %v8968_v29, 7  ;;  %v8820_v38 = vadd.f32 %v17670_v44, %v8807_v33  ;;  %v9216_v1 = vunpack.c.l.b16 %v9116_v58  ;;  %v8287_v41 = vadd.f32 %v17692_v59, %v8125_v37  ;;  %v8408_v33 = vpop.f32.mrf.mxu2 }
 0x5c1   : > { %v8885_v43 = vrot.slane %v18340_v14, 5  ;;  %v7900_v29 = vadd.f32 %v17497_v2, %v7766_v18  ;;  %v8912_v17 = vshrl.u32 %v8836_v22, 16  ;;  %v8634_v2 = vpop.f32.mrf.mxu3  ;;  %v17764_v58 = vunpack.c.l.bf16 %v8900_v32  ;;  %v18341_v18 = vld [vmem:[#allocation7_spill] sm:$0xff] }
 0x5c2   : > { %v8973_v16 = vor.u32 %v8971_v5, %v17724_v15  ;;  %v8952_v56 = vadd.f32 %v17679_v55, %v8820_v38  ;;  %v9224_v63 = vpack.c.b16 %v9217_v48, %v9216_v1  ;;  %v7605_v55 = vadd.f32 %v17499_v47, %v17473_v50 }
 0x5c3   : > { %v8421_v61 = vadd.f32 %v17711_v60, %v8287_v41  ;;  %v8126_v26 = vadd.f32 %v17554_v24, %v7900_v29  ;;  %v8974_v0 = vrot.slane %v17724_v15, 4  ;;  %v8276_v60 = vpop.f32.mrf.mxu1  ;;  %v17779_v1 = vrot.slane %v8915_v46, 5  ;;  %v18343_v41 = vld [vmem:[#allocation9_spill] sm:$0xff] }
 0x5c4   : > { %v9047_v3 = vsel %vm14717_vm11, %v8973_v16, %v17560_v13  ;;  %v8960_v9 = vpack.c.bf16 %v8952_v56, %v8952_v56  ;;  %9288 = vmatmul.bf16.vlgmr.msrb.gmra.mxu1 %v9224_v63  ;;  %v8886_v13 = vsel %vm14634_vm4, %v8881_v39, %v8885_v43  ;;  %v7767_v54 = vadd.f32 %v17503_v8, %v7605_v55 }
 0x5c5   : > { %9048 = vst [vmem:[#allocation3 + $0xc] sm:$0xf] %v9047_v3  ;;  %v8791_v62 = vpop.f32.mrf.mxu0  ;;  %v8946_v37 = vunpack.c.l.bf16 %v8886_v13  ;;  %v8910_v8 = vsel %vm14634_vm4, %v8905_v40, %v8909_v57  ;;  %v8647_v21 = vadd.f32 %v8631_v19, %v8421_v61  ;;  %v17777_v56 = vrot.slane %v8912_v17, 4  ;;  %v18344_v17 = vld [vmem:[#allocation8_spill] sm:$0xff] }
 0x5c6   : > { %v8976_v52 = vshrl.u32 %v8960_v9, 16  ;;  %v8808_v11 = vadd.f32 %v8791_v62, %v8646_v20  ;;  %v8979_v47 = vshll.u32 %v8960_v9, 16  ;;  %v7901_v4 = vadd.f32 %v17505_v35, %v7767_v54 }
 0x5c7   : > { %v7608_v35 = vadd.f32 %v17509_v12, %v17479_v36  ;;  %v8288_v19 = vadd.f32 %v8274_v31, %v8126_v26  ;;  %v8921_v7 = vshll.u32 %v8837_v25, 16  ;;  %v17781_v20 = vunpack.c.l.bf16 %v8910_v8  ;;  %v18342_v31 = vld [vmem:[#allocation11_spill] sm:$0xff] }
 0x5c8   : > { %v8978_v50 = vrot.slane %v8976_v52, 7  ;;  %v8821_v59 = vadd.f32 %v17670_v44, %v8808_v11  ;;  %v8127_v42 = vadd.f32 %v17558_v51, %v7901_v4  ;;  %v8925_v9 = vshrl.u32 %v8837_v25, 16  ;;  %v8410_v52 = vpop.f32.mrf.mxu2  ;;  %v18345_v4 = vld [vmem:[#allocation10_spill] sm:$0xff] }
 0x5c9   : > { %v8931_v36 = vshll.u32 %v17772_v28, 16  ;;  %v7768_v55 = vadd.f32 %v18341_v18, %v7608_v35  ;;  %v7610_v62 = vadd.f32 %v18343_v41, %v18342_v31  ;;  %v8918_v13 = vor.u32 %v17779_v1, %v17777_v56  ;;  %v8636_v26 = vpop.f32.mrf.mxu3 }
 0x5ca   : > { %v8981_v5 = vor.u32 %v8979_v47, %v8978_v50  ;;  %v8983_v38 = vrot.slane %v8978_v50, 4  ;;  %v8953_v48 = vadd.f32 %v8945_v6, %v8821_v59  ;;  %v8289_v6 = vadd.f32 %v8276_v60, %v8127_v42  ;;  %v9053_v47 = vld [vmem:[#allocation3 + $0x18] sm:$0xf] }
 0x5cb   : > { %v8422_v10 = vadd.f32 %v8408_v33, %v8288_v19  ;;  %v17793_v57 = vrot.slane %v8921_v7, 5  ;;  %v7902_v50 = vadd.f32 %v18344_v17, %v7768_v55  ;;  %v17796_v54 = vrot.slane %v8925_v9, 4  ;;  %v14377_v9 = vld [vmem:[%s18292_s1 + $0xcb0] sm:$0xff] }
 0x5cc   : > { %v8982_v24 = vsel %vm14724_vm12, %v8974_v0, %v8981_v5  ;;  %v9051_v15 = vsel %vm14731_vm13, %v8983_v38, %v9050_v53  ;;  %v8961_v39 = vpack.c.bf16 %v8953_v48, %v8953_v48  ;;  %v9076_v3 = vld [vmem:[#allocation3 + $0xc] sm:$0xf]  ;;  %v7769_v53 = vadd.f32 %v18345_v4, %v7610_v62 }
 0x5cd   : > { %9049 = vst [vmem:[#allocation3 + $0x10] sm:$0xf] %v8982_v24  ;;  %v8793_v16 = vpop.f32.mrf.mxu0  ;;  %v9128_v63 = vshrl.u32 %v9076_v3, 16  ;;  %v9131_v22 = vshll.u32 %v9076_v3, 16  ;;  %v9411_v11 = vld [vmem:[#allocation3 + $0xc] sm:$0xe]  ;;  %v8648_v61 = vadd.f32 %v8634_v2, %v8422_v10  ;;  %v8279_v24 = vpop.f32.mrf.mxu1 }
 0x5ce   : > { %9052 = vst [vmem:[#allocation3 + $0x14] sm:$0x1] %v9051_v15  ;;  %v8985_v14 = vshrl.u32 %v8961_v39, 16  ;;  %v8809_v43 = vadd.f32 %v8793_v16, %v8647_v21  ;;  %v8988_v23 = vshll.u32 %v8961_v39, 16  ;;  %v13479_v48 = vrot.slane %v9411_v11, 9  ;;  %v18346_v15 = vld [vmem:[#allocation13_spill] sm:$0xff] }
 0x5cf   : > { %v9130_v59 = vrot.slane %v9128_v63, 4  ;;  %v9133_v32 = vrot.slane %v9131_v22, 5  ;;  %v8128_v2 = vadd.f32 %v18346_v15, %v7902_v50  ;;  %v14378_v16 = vld [vmem:[%s18292_s1 + $0xcb8] sm:$0xff]  ;;  %v9057_v10 = vld [vmem:[#allocation3 + $0x20] sm:$0x1] }
 0x5d0   : > { %v17784_v12 = vrot.slane %v8985_v14, 7  ;;  %v8822_v51 = vadd.f32 %v17670_v44, %v8809_v43  ;;  %10053 = vmatpush.bf16.msra.mxu2 %v14378_v16 }
 0x5d1   : > { %v9134_v14 = vor.u32 %v9133_v32, %v9130_v59  ;;  %v8290_v32 = vadd.f32 %v8279_v24, %v8128_v2 }
 0x5d2   : > { %v8990_v29 = vor.u32 %v8988_v23, %v17784_v12  ;;  %v8954_v40 = vadd.f32 %v8946_v37, %v8822_v51  ;;  %v8423_v37 = vadd.f32 %v8410_v52, %v8289_v6  ;;  %v8991_v39 = vrot.slane %v17784_v12, 4  ;;  %v8413_v12 = vpop.f32.mrf.mxu2  ;;  %v18347_v6 = vld [vmem:[#allocation12_spill] sm:$0xff] }
 0x5d3   : > { %v7903_v52 = vadd.f32 %v18347_v6, %v7769_v53 }
 0x5d4   : > { %v9054_v46 = vsel %vm14717_vm11, %v8990_v29, %v9053_v47  ;;  %v8962_v0 = vpack.c.bf16 %v8954_v40, %v8954_v40  ;;  %v14324_v5 = vld [vmem:[#allocation3 + $0xc] sm:$0xff]  ;;  %v8649_v11 = vadd.f32 %v8636_v26, %v8423_v37  ;;  %v17816_v40 = vrot.slane %v8918_v13, 4  ;;  %10054 = vmatpush.bf16.msra.mxu2 %v14377_v9 }
 0x5d5   : > { %v14351_v33 = vld [vmem:[#allocation3 + $0xc] sm:$0xff]  ;;  %9055 = vst [vmem:[#allocation3 + $0x18] sm:$0xf] %v9054_v46  ;;  %v8796_v8 = vpop.f32.mrf.mxu0  ;;  %v9100_v25 = vld [vmem:[#allocation3 + $0x14] sm:$0x1]  ;;  %9394 = vmatmul.bf16.gmra.mxu2 %v14324_v5  ;;  %v8639_v5 = vpop.f32.mrf.mxu3 }
 0x5d6   : > { %v9077_v38 = vld [vmem:[#allocation3 + $0x10] sm:$0xf]  ;;  %v8993_v35 = vshrl.u32 %v8962_v0, 16  ;;  %v8810_v42 = vadd.f32 %v8796_v8, %v8648_v61  ;;  %9673 = vmatmul.bf16.vlgmr.msra.gmra.mxu0 %v14351_v33  ;;  %v9434_v19 = vrot.slane %v9100_v25, 5  ;;  %v8996_v7 = vshll.u32 %v8962_v0, 16  ;;  %v18348_v61 = vld [vmem:[#allocation14_spill] sm:$0xff] }
 0x5d7   : > { %v9431_v60 = vrot.slane %v9077_v38, 5  ;;  %v9137_v21 = vshll.u32 %v9077_v38, 16  ;;  %v9141_v3 = vshrl.u32 %v9077_v38, 16  ;;  %v9147_v18 = vshll.u32 %v9100_v25, 16  ;;  %v14390_v25 = vld [vmem:[%s18292_s1 + $0xcf8] sm:$0xff]  ;;  %v14369_v9 = vld [vmem:[%s18292_s1 + $0xc70] sm:$0xff] }
 0x5d8   : > { %v8995_v43 = vrot.slane %v8993_v35, 7  ;;  %v8823_v23 = vadd.f32 %v17670_v44, %v8810_v42  ;;  %v9135_v0 = vrot.slane %v9134_v14, 4  ;;  %v8924_v8 = vsel %vm14634_vm4, %v17816_v40, %v17793_v57  ;;  %10187 = vmatpush.bf16.msra.mxu3 %v14390_v25 }
 0x5d9   : > { %v9432_v56 = vsel %vm14646_vm5, %v13479_v48, %v9431_v60  ;;  %v9433_v1 = vrot.slane %v9431_v60, 4  ;;  %v9139_v22 = vrot.slane %v9137_v21, 5  ;;  %v9143_v29 = vrot.slane %v9141_v3, 4  ;;  %v14376_v60 = vld [vmem:[%s18292_s1 + $0xca8] sm:$0xff] }
 0x5da   : > { %v9469_v63 = vunpack.c.l.b16 %v9432_v56  ;;  %v8998_v55 = vor.u32 %v8996_v7, %v8995_v43  ;;  %v9000_v31 = vrot.slane %v8995_v43, 4  ;;  %v8955_v41 = vadd.f32 %v17764_v58, %v8823_v23  ;;  %10055 = vmatpush.bf16.msra.mxu2 %v14376_v60  ;;  %v9060_v43 = vld [vmem:[#allocation3 + $0x24] sm:$0xf] }
 0x5db   : > { %v9435_v51 = vsel %vm14646_vm5, %v9433_v1, %v9434_v19  ;;  %v8129_v58 = vadd.f32 %v18348_v61, %v7903_v52  ;;  %v9144_v26 = vor.u32 %v9143_v29, %v9139_v22  ;;  %v9149_v38 = vrot.slane %v9147_v18, 5  ;;  %v14389_v1 = vld [vmem:[%s18292_s1 + $0xcf0] sm:$0xff]  ;;  %v14375_v19 = vld [vmem:[%s18292_s1 + $0xca0] sm:$0xff] }
 0x5dc   : > { %v9470_v62 = vunpack.c.l.b16 %v9435_v51  ;;  %v8999_v17 = vsel %vm14724_vm12, %v8991_v39, %v8998_v55  ;;  %v9058_v50 = vsel %vm14731_vm13, %v9000_v31, %v9057_v10  ;;  %v8963_v47 = vpack.c.bf16 %v8955_v41, %v8955_v41  ;;  %v9078_v21 = vld [vmem:[#allocation3 + $0x18] sm:$0xf]  ;;  %v14374_v31 = vld [vmem:[%s18292_s1 + $0xc98] sm:$0xff]  ;;  %v14397_v41 = vld [vmem:[%s18292_s1 + $0xd30] sm:$0xff]  ;;  %10188 = vmatpush.bf16.msra.mxu3 %v14389_v1 }
 0x5dd   : > { %9056 = vst [vmem:[#allocation3 + $0x1c] sm:$0xf] %v8999_v17  ;;  %v8798_v46 = vpop.f32.mrf.mxu0  ;;  %v8928_v48 = vor.u32 %v17796_v54, %v17793_v57  ;;  %v9140_v53 = vsel %vm14634_vm4, %v9135_v0, %v9139_v22  ;;  %v9145_v37 = vrot.slane %v9144_v26, 4  ;;  %v8281_v54 = vpop.f32.mrf.mxu1  ;;  %v9152_v2 = vshrl.u32 %v9078_v21, 16  ;;  %v14370_v57 = vld [vmem:[%s18292_s1 + $0xc78] sm:$0xff] }
 0x5de   : > { %v9476_v59 = vpack.c.b16 %v9470_v62, %v9469_v63  ;;  %9059 = vst [vmem:[#allocation3 + $0x20] sm:$0x1] %v9058_v50  ;;  %v9002_v13 = vshrl.u32 %v8963_v47, 16  ;;  %v8811_v33 = vadd.f32 %v8798_v46, %v8649_v11  ;;  %v9005_v4 = vshll.u32 %v8963_v47, 16  ;;  %v9412_v56 = vld [vmem:[#allocation3 + $0x18] sm:$0xe]  ;;  %9891 = vmatpush.bf16.msra.mxu1 %v14370_v57  ;;  %v8415_v63 = vpop.f32.mrf.mxu2  ;;  %10056 = vmatpush.bf16.msra.mxu2 %v14375_v19 }
 0x5df   : > { %v9155_v39 = vshll.u32 %v9078_v21, 16  ;;  %v8424_v35 = vadd.f32 %v8413_v12, %v8290_v32  ;;  %v8291_v42 = vadd.f32 %v8281_v54, %v8129_v58  ;;  %v9150_v16 = vsel %vm14634_vm4, %v9145_v37, %v9149_v38  ;;  %v14398_v12 = vld [vmem:[%s18292_s1 + $0xd38] sm:$0xff]  ;;  %v14396_v37 = vld [vmem:[%s18292_s1 + $0xd28] sm:$0xff]  ;;  %v14387_v54 = vld [vmem:[%s18292_s1 + $0xce0] sm:$0xff] }
 0x5e0   : > { %9544 = vmatmul.bf16.gmra.mxu3 %v9476_v59  ;;  %v17837_v24 = vrot.slane %v9002_v13, 7  ;;  %v8824_v15 = vadd.f32 %v17670_v44, %v8811_v33  ;;  %v9218_v23 = vunpack.c.l.b16 %v9140_v53  ;;  %v9219_v3 = vunpack.c.l.b16 %v9150_v16  ;;  %10413 = vmatpush.bf16.msrb.mxu0 %v14398_v12  ;;  %v14368_v13 = vld [vmem:[%s18292_s1 + $0xc68] sm:$0xff]  ;;  %v8641_v33 = vpop.f32.mrf.mxu3  ;;  %v14367_v19 = vld [vmem:[%s18292_s1 + $0xc60] sm:$0xff] }
 0x5e1   : > { %v8650_v51 = vadd.f32 %v8639_v5, %v8424_v35  ;;  %v17861_v22 = vrot.slane %v8931_v36, 5  ;;  %v9154_v18 = vrot.slane %v9152_v2, 4  ;;  %v9157_v55 = vrot.slane %v9155_v39, 5 }
 0x5e2   : > { %v9007_v14 = vor.u32 %v9005_v4, %v17837_v24  ;;  %v8956_v7 = vadd.f32 %v17781_v20, %v8824_v15  ;;  %v14388_v20 = vld [vmem:[%s18292_s1 + $0xce8] sm:$0xff]  ;;  %v9225_v36 = vpack.c.b16 %v9219_v3, %v9218_v23  ;;  %v13480_v10 = vrot.slane %v9412_v56, 9  ;;  %9892 = vmatpush.bf16.msra.mxu1 %v14369_v9  ;;  %10057 = vmatpush.bf16.msra.mxu2 %v14374_v31  ;;  %v14373_v15 = vld [vmem:[%s18292_s1 + $0xc90] sm:$0xff]  ;;  %v14395_v9 = vld [vmem:[%s18292_s1 + $0xd20] sm:$0xff] }
 0x5e3   : > { %v8949_v40 = vunpack.c.l.bf16 %v8924_v8  ;;  %v8425_v59 = vadd.f32 %v8415_v63, %v8291_v42  ;;  %v17876_v58 = vrot.slane %v8928_v48, 4  ;;  %v9158_v5 = vor.u32 %v9157_v55, %v9154_v18  ;;  %10189 = vmatpush.bf16.msra.mxu3 %v14388_v20  ;;  %v9064_v42 = vld [vmem:[#allocation3 + $0x2c] sm:$0x1]  ;;  %v14386_v18 = vld [vmem:[%s18292_s1 + $0xcd8] sm:$0xff]  ;;  %v14372_v55 = vld [vmem:[%s18292_s1 + $0xc88] sm:$0xff] }
 0x5e4   : > { %v9061_v62 = vsel %vm14717_vm11, %v9007_v14, %v9060_v43  ;;  %v8964_v28 = vpack.c.bf16 %v8956_v7, %v8956_v7  ;;  %v14325_v6 = vld [vmem:[#allocation3 + $0x18] sm:$0xff]  ;;  %9293 = vmatmul.bf16.gmra.mxu1 %v9225_v36  ;;  %10414 = vmatpush.bf16.msrb.mxu0 %v14397_v41  ;;  %v9008_v8 = vrot.slane %v17837_v24, 4 }
 0x5e5   : > { %v14352_v52 = vld [vmem:[#allocation3 + $0x18] sm:$0xff]  ;;  %9062 = vst [vmem:[#allocation3 + $0x24] sm:$0xf] %v9061_v62  ;;  %v8801_v29 = vpop.f32.mrf.mxu0  ;;  %v17874_v17 = vld [vmem:[#allocation3 + $0x20] sm:$0x1]  ;;  %9399 = vmatmul.bf16.gmra.mxu2 %v14325_v6  ;;  %v8651_v24 = vadd.f32 %v8641_v33, %v8425_v59  ;;  %v9159_v16 = vrot.slane %v9158_v5, 4 }
 0x5e6   : > { %v9079_v11 = vld [vmem:[#allocation3 + $0x1c] sm:$0xf]  ;;  %v9010_v32 = vshrl.u32 %v8964_v28, 16  ;;  %v8812_v61 = vadd.f32 %v8801_v29, %v8650_v51  ;;  %9678 = vmatmul.bf16.gmra.mxu0 %v14352_v52  ;;  %v9441_v26 = vrot.slane %v17874_v17, 5  ;;  %v9013_v4 = vshll.u32 %v8964_v28, 16  ;;  %9893 = vmatpush.bf16.msra.mxu1 %v14368_v13  ;;  %v14366_v6 = vld [vmem:[%s18292_s1 + $0xc58] sm:$0xff] }
 0x5e7   : > { %v9438_v50 = vrot.slane %v9079_v11, 5  ;;  %v9161_v47 = vshll.u32 %v9079_v11, 16  ;;  %v9165_v48 = vshrl.u32 %v9079_v11, 16  ;;  %v9171_v1 = vshll.u32 %v17874_v17, 16  ;;  %10190 = vmatpush.bf16.msra.mxu3 %v14387_v54  ;;  %10058 = vmatpush.bf16.msra.mxu2 %v14373_v15  ;;  %v14394_v17 = vld [vmem:[%s18292_s1 + $0xd18] sm:$0xff]  ;;  %v14365_v13 = vld [vmem:[%s18292_s1 + $0xc50] sm:$0xff] }
 0x5e8   : > { %v9012_v38 = vrot.slane %v9010_v32, 7  ;;  %v8825_v53 = vadd.f32 %v17670_v44, %v8812_v61  ;;  %10415 = vmatpush.bf16.msrb.mxu0 %v14396_v37  ;;  %v8934_v51 = vsel %vm14634_vm4, %v17876_v58, %v17861_v22  ;;  %v14371_v61 = vld [vmem:[%s18292_s1 + $0xc80] sm:$0xff] }
 0x5e9   : > { %v9439_v46 = vsel %vm14646_vm5, %v13480_v10, %v9438_v50  ;;  %v9440_v0 = vrot.slane %v9438_v50, 4  ;;  %v9163_v21 = vrot.slane %v9161_v47, 5  ;;  %v9167_v56 = vrot.slane %v9165_v48, 4 }
 0x5ea   : > { %v9471_v60 = vunpack.c.l.b16 %v9439_v46  ;;  %v9015_v2 = vor.u32 %v9013_v4, %v9012_v38  ;;  %v9017_v39 = vrot.slane %v9012_v38, 4  ;;  %v8957_v57 = vadd.f32 %v8949_v40, %v8825_v53  ;;  %9894 = vmatpush.bf16.msra.mxu1 %v14367_v19  ;;  %v17926_v40 = vld [vmem:[#allocation3 + $0x10] sm:$0xf]  ;;  %v14384_v38 = vld [vmem:[%s18292_s1 + $0xcc8] sm:$0xff]  ;;  %v14393_v4 = vld [vmem:[%s18292_s1 + $0xd10] sm:$0xff] }
 0x5eb   : > { %v9442_v25 = vsel %vm14646_vm5, %v9440_v0, %v9441_v26  ;;  %v9168_v63 = vor.u32 %v9167_v56, %v9163_v21  ;;  %v9164_v62 = vsel %vm14634_vm4, %v9159_v16, %v9163_v21  ;;  %v9173_v36 = vrot.slane %v9171_v1, 5  ;;  %10191 = vmatpush.bf16.msra.mxu3 %v14386_v18  ;;  %10059 = vmatpush.bf16.msra.mxu2 %v14372_v55  ;;  %v9067_v46 = vld [vmem:[#allocation3 + $0x30] sm:$0xf]  ;;  %v17954_v1 = vld [vmem:[#allocation3 + $0x14] sm:$0x1]  ;;  %v14364_v19 = vld [vmem:[%s18292_s1 + $0xc48] sm:$0xff] }
 0x5ec   : > { %v9472_v35 = vunpack.c.l.b16 %v9442_v25  ;;  %v9016_v14 = vsel %vm14724_vm12, %v9008_v8, %v9015_v2  ;;  %v9065_v43 = vsel %vm14731_vm13, %v9017_v39, %v9064_v42  ;;  %v8965_v7 = vpack.c.bf16 %v8957_v57, %v8957_v57  ;;  %v9080_v3 = vld [vmem:[#allocation3 + $0x24] sm:$0xf]  ;;  %10416 = vmatpush.bf16.msrb.mxu0 %v14395_v9  ;;  %v14383_v18 = vld [vmem:[%s18292_s1 + $0xcc0] sm:$0xff] }
 0x5ed   : > { %9063 = vst [vmem:[#allocation3 + $0x28] sm:$0xf] %v9016_v14  ;;  %v8803_v12 = vpop.f32.mrf.mxu0  ;;  %v9176_v20 = vshrl.u32 %v9080_v3, 16  ;;  %v9179_v22 = vshll.u32 %v9080_v3, 16  ;;  %v9169_v28 = vrot.slane %v9168_v63, 4  ;;  %v8950_v29 = vunpack.c.l.bf16 %v8934_v51  ;;  %v14392_v3 = vld [vmem:[%s18292_s1 + $0xd08] sm:$0xff] }
 0x5ee   : > { %v9477_v23 = vpack.c.b16 %v9472_v35, %v9471_v60  ;;  %9066 = vst [vmem:[#allocation3 + $0x2c] sm:$0x1] %v9065_v43  ;;  %v9019_v31 = vshrl.u32 %v8965_v7, 16  ;;  %v8813_v41 = vadd.f32 %v8803_v12, %v8651_v24  ;;  %v9022_v11 = vshll.u32 %v8965_v7, 16  ;;  %v9413_v59 = vld [vmem:[#allocation3 + $0x24] sm:$0xe]  ;;  %9895 = vmatpush.bf16.msra.mxu1 %v14366_v6 }
 0x5ef   : > { %v9174_v50 = vsel %vm14634_vm4, %v9169_v28, %v9173_v36  ;;  %v9220_v47 = vunpack.c.l.b16 %v9164_v62  ;;  %v9178_v32 = vrot.slane %v9176_v20, 4  ;;  %v9181_v5 = vrot.slane %v9179_v22, 5  ;;  %10060 = vmatpush.bf16.msra.mxu2 %v14371_v61 }
 0x5f0   : > { %9549 = vmatmul.bf16.gmra.mxu3 %v9477_v23  ;;  %v17923_v52 = vrot.slane %v9019_v31, 7  ;;  %v8826_v10 = vadd.f32 %v17670_v44, %v8813_v41  ;;  %v14385_v44 = vld [vmem:[%s18292_s1 + $0xcd0] sm:$0xff]  ;;  %v9221_v26 = vunpack.c.l.b16 %v9174_v50  ;;  %v9946_v33 = vrot.slane %v17926_v40, 5  ;;  %10417 = vmatpush.bf16.msrb.mxu0 %v14394_v17  ;;  %v9071_v31 = vld [vmem:[#allocation3 + $0x38] sm:$0x1] }
 0x5f1   : > { %v13481_v21 = vrot.slane %v9413_v59, 9  ;;  %10192 = vmatpush.bf16.msra.mxu3 %v14385_v44  ;;  %v9182_v35 = vor.u32 %v9181_v5, %v9178_v32  ;;  %v9928_v23 = vld [vmem:[#allocation3 + $0xc] sm:$0xe]  ;;  %v9949_v6 = vrot.slane %v17954_v1, 5  ;;  %v9724_v30 = vshll.u32 %v17926_v40, 16 }
 0x5f2   : > { %v9024_v58 = vor.u32 %v9022_v11, %v17923_v52  ;;  %v8958_v0 = vadd.f32 %v8950_v29, %v8826_v10  ;;  %v9226_v37 = vpack.c.b16 %v9221_v26, %v9220_v47  ;;  %9896 = vmatpush.bf16.msra.mxu1 %v14365_v13  ;;  %v9025_v9 = vrot.slane %v17923_v52, 4  ;;  %v14363_v52 = vld [vmem:[%s18292_s1 + $0xc40] sm:$0xff]  ;;  %v9702_v50 = vld [vmem:[#allocation3 + $0xc] sm:$0xf] }
 0x5f3   : > { %v9948_v63 = vrot.slane %v9946_v33, 4  ;;  %v9183_v22 = vrot.slane %v9182_v35, 4  ;;  %v13642_v36 = vrot.slane %v9928_v23, 9  ;;  %v14391_v47 = vld [vmem:[%s18292_s1 + $0xd00] sm:$0xff]  ;;  %v9728_v34 = vshrl.u32 %v17926_v40, 16 }
 0x5f4   : > { %v9068_v53 = vsel %vm14717_vm11, %v9024_v58, %v9067_v46  ;;  %v8966_v48 = vpack.c.bf16 %v8958_v0, %v8958_v0  ;;  %v14326_v8 = vld [vmem:[#allocation3 + $0x24] sm:$0xff]  ;;  %9298 = vmatmul.bf16.gmra.mxu1 %v9226_v37  ;;  %10418 = vmatpush.bf16.msrb.mxu0 %v14393_v4  ;;  %v10224_v58 = vld [vmem:[#allocation3 + $0x18] sm:$0xf]  ;;  %v9715_v0 = vshrl.u32 %v9702_v50, 16  ;;  %v17993_v26 = vld [vmem:[#allocation3 + $0x1c] sm:$0xf] }
 0x5f5   : > { %v14353_v25 = vld [vmem:[#allocation3 + $0x24] sm:$0xff]  ;;  %9069 = vst [vmem:[#allocation3 + $0x30] sm:$0xf] %v9068_v53  ;;  %v9102_v54 = vld [vmem:[#allocation3 + $0x2c] sm:$0x1]  ;;  %9404 = vmatmul.bf16.gmra.mxu2 %v14326_v8  ;;  %10193 = vmatpush.bf16.msra.mxu3 %v14384_v38  ;;  %v9950_v32 = vsel %vm14646_vm5, %v9948_v63, %v9949_v6  ;;  %v9947_v61 = vsel %vm14646_vm5, %v13642_v36, %v9946_v33  ;;  %v9718_v38 = vshll.u32 %v9702_v50, 16 }
 0x5f6   : > { %v9081_v60 = vld [vmem:[#allocation3 + $0x28] sm:$0xf]  ;;  %v9027_v39 = vshrl.u32 %v8966_v48, 16  ;;  %v9448_v57 = vrot.slane %v9102_v54, 5  ;;  %9683 = vmatmul.bf16.gmra.mxu0 %v14353_v25  ;;  %v9195_v56 = vshll.u32 %v9102_v54, 16  ;;  %v9030_v43 = vshll.u32 %v8966_v48, 16  ;;  %9897 = vmatpush.bf16.msra.mxu1 %v14364_v19 }
 0x5f7   : > { %v9445_v15 = vrot.slane %v9081_v60, 5  ;;  %v9185_v2 = vshll.u32 %v9081_v60, 16  ;;  %v9189_v27 = vshrl.u32 %v9081_v60, 16  ;;  %v9990_v13 = vunpack.c.l.b16 %v9950_v32  ;;  %v9706_v40 = vld [vmem:[#allocation3 + $0x1c] sm:$0xf] }
 0x5f8   : > { %v9029_v14 = vrot.slane %v9027_v39, 7  ;;  %v9197_v28 = vrot.slane %v9195_v56, 5  ;;  %10419 = vmatpush.bf16.msrb.mxu0 %v14392_v3  ;;  %v9989_v4 = vunpack.c.l.b16 %v9947_v61  ;;  %v17995_v53 = vrot.slane %v9724_v30, 5 }
 0x5f9   : > { %v9446_v24 = vsel %vm14646_vm5, %v13481_v21, %v9445_v15  ;;  %v9447_v42 = vrot.slane %v9445_v15, 4  ;;  %v9187_v16 = vrot.slane %v9185_v2, 5  ;;  %v9191_v7 = vrot.slane %v9189_v27, 4  ;;  %10194 = vmatpush.bf16.msra.mxu3 %v14383_v18 }
 0x5fa   : > { %v9473_v51 = vunpack.c.l.b16 %v9446_v24  ;;  %v9032_v55 = vor.u32 %v9030_v43, %v9029_v14  ;;  %v9034_v20 = vrot.slane %v9029_v14, 4  ;;  %9898 = vmatpush.bf16.msra.mxu1 %v14363_v52  ;;  %v9730_v48 = vrot.slane %v9728_v34, 4  ;;  %v18000_v24 = vld [vmem:[#allocation3 + $0x20] sm:$0x1] }
 0x5fb   : > { %v9449_v12 = vsel %vm14646_vm5, %v9447_v42, %v9448_v57  ;;  %v9192_v62 = vor.u32 %v9191_v7, %v9187_v16  ;;  %v9188_v59 = vsel %vm14634_vm4, %v9183_v22, %v9187_v16  ;;  %v10237_v37 = vshrl.u32 %v10224_v58, 16  ;;  %v18003_v43 = vld [vmem:[#allocation3 + $0x20] sm:$0x1] }
 0x5fc   : > { %v9474_v41 = vunpack.c.l.b16 %v9449_v12  ;;  %v9033_v11 = vsel %vm14724_vm12, %v9025_v9, %v9032_v55  ;;  %v9072_v10 = vsel %vm14731_vm13, %v9034_v20, %v9071_v31  ;;  %v9222_v5 = vunpack.c.l.b16 %v9188_v59  ;;  %10420 = vmatpush.bf16.msrb.mxu0 %v14391_v47  ;;  %v9705_v9 = vld [vmem:[#allocation3 + $0x18] sm:$0xf] }
 0x5fd   : > { %v9193_v17 = vrot.slane %v9192_v62, 4  ;;  %9073 = vst [vmem:[#allocation3 + $0x38] sm:$0x1] %v9072_v10  ;;  %v10240_v25 = vshll.u32 %v10224_v58, 16  ;;  %v10246_v33 = vshll.u32 %v17993_v26, 16  ;;  %v10250_v60 = vshrl.u32 %v17993_v26, 16 }
 0x5fe   : > { %v9478_v29 = vpack.c.b16 %v9474_v41, %v9473_v51  ;;  %9070 = vst [vmem:[#allocation3 + $0x34] sm:$0xf] %v9033_v11  ;;  %v9717_v21 = vrot.slane %v9715_v0, 4  ;;  %v9997_v54 = vpack.c.b16 %v9990_v13, %v9989_v4  ;;  %v9720_v15 = vrot.slane %v9718_v38, 5  ;;  %v9929_v12 = vld [vmem:[#allocation3 + $0x18] sm:$0xe] }
 0x5ff   : > { %v9198_v44 = vsel %vm14634_vm4, %v9193_v17, %v9197_v28  ;;  %v10248_v2 = vrot.slane %v10246_v33, 5  ;;  %v10252_v39 = vrot.slane %v10250_v60, 4  ;;  %v9731_v35 = vor.u32 %v9730_v48, %v17995_v53  ;;  %v18007_v41 = vld [vmem:[#allocation3 + $0x28] sm:$0xf]  ;;  %v14379_v62 = vld [vmem:[#allocation3 + $0x18] sm:$0xff] }
 0x600   : > { %9554 = vmatmul.bf16.gmra.mxu3 %v9478_v29  ;;  %v9223_v46 = vunpack.c.l.b16 %v9198_v44  ;;  %v9953_v27 = vrot.slane %v9706_v40, 5  ;;  %v10239_v42 = vrot.slane %v10237_v37, 4  ;;  %v10242_v16 = vrot.slane %v10240_v25, 5  ;;  %v10227_v17 = vld [vmem:[#allocation3 + $0x24] sm:$0xf] }
 0x601   : > { %v10253_v56 = vor.u32 %v10252_v39, %v10248_v2  ;;  %v9734_v19 = vshll.u32 %v17954_v1, 16  ;;  %v9721_v14 = vor.u32 %v9720_v15, %v9717_v21  ;;  %v10256_v7 = vshll.u32 %v18000_v24, 16  ;;  %v9709_v0 = vld [vmem:[#allocation3 + $0x28] sm:$0xf]  ;;  %v9930_v15 = vld [vmem:[#allocation3 + $0x24] sm:$0xe] }
 0x602   : > { %v9227_v8 = vpack.c.b16 %v9223_v46, %v9222_v5  ;;  %v9732_v23 = vrot.slane %v9731_v35, 4  ;;  %v9955_v3 = vrot.slane %v9953_v27, 4  ;;  %v10243_v51 = vor.u32 %v10242_v16, %v10239_v42  ;;  %v9708_v42 = vld [vmem:[#allocation3 + $0x24] sm:$0xf]  ;;  %v18032_v16 = vld [vmem:[#allocation3 + $0x2c] sm:$0x1] }
 0x603   : > { %v10254_v63 = vrot.slane %v10253_v56, 4  ;;  %v9736_v18 = vrot.slane %v9734_v19, 5  ;;  %v9956_v55 = vrot.slane %v18003_v43, 5  ;;  %v9748_v20 = vshll.u32 %v9706_v40, 16  ;;  %v14406_v19 = vld [vmem:[%s18292_s1 + $0xd78] sm:$0xff] }
 0x604   : > { %9303 = vmatmul.bf16.gmra.mxu1 %v9227_v8  ;;  %v9752_v31 = vshrl.u32 %v9706_v40, 16  ;;  %v9722_v1 = vrot.slane %v9721_v14, 4  ;;  %v10258_v22 = vrot.slane %v10256_v7, 5  ;;  %v9739_v28 = vshrl.u32 %v9705_v9, 16 }
 0x605   : > { %v14354_v57 = vld [vmem:[#allocation3 + $0x30] sm:$0xff]  ;;  %10061 = vmatmul.bf16.vlgmr.msra.gmra.mxu2 %v9997_v54  ;;  %v9737_v36 = vsel %vm14634_vm4, %v9732_v23, %v9736_v18  ;;  %v13643_v6 = vrot.slane %v9929_v12, 9  ;;  %v9957_v52 = vsel %vm14646_vm5, %v9955_v3, %v9956_v55  ;;  %v9742_v11 = vshll.u32 %v9705_v9, 16  ;;  %10575 = vmatpush.bf16.msrb.mxu1 %v14406_v19  ;;  %v18078_v19 = vld [vmem:[#allocation3 + $0x38] sm:$0x1] }
 0x606   : > { %9688 = vmatmul.bf16.gmra.mxu0 %v14354_v57  ;;  %v10244_v10 = vrot.slane %v10243_v51, 4  ;;  %v10259_v29 = vsel %vm14634_vm4, %v10254_v63, %v10258_v22  ;;  %v10270_v50 = vshll.u32 %v18007_v41, 16  ;;  %v10274_v47 = vshrl.u32 %v18007_v41, 16 }
 0x607   : > { %v9727_v59 = vsel %vm14634_vm4, %v9722_v1, %v17995_v53  ;;  %v9954_v32 = vsel %vm14646_vm5, %v13643_v6, %v9953_v27  ;;  %v18022_v30 = vrot.slane %v9748_v20, 5  ;;  %v9754_v34 = vrot.slane %v9752_v31, 4  ;;  %v14405_v31 = vld [vmem:[%s18292_s1 + $0xd70] sm:$0xff] }
 0x608   : > { %v9828_v44 = vunpack.c.l.b16 %v9737_v36  ;;  %v9992_v61 = vunpack.c.l.b16 %v9957_v52  ;;  %v10249_v58 = vsel %vm14634_vm4, %v10244_v10, %v10248_v2  ;;  %v9741_v46 = vrot.slane %v9739_v28, 4  ;;  %v18030_v2 = vld [vmem:[#allocation3 + $0x2c] sm:$0x1]  ;;  %v18052_v52 = vld [vmem:[#allocation3 + $0x34] sm:$0xf] }
 0x609   : > { %v10350_v5 = vunpack.c.l.b16 %v10259_v29  ;;  %v9744_v13 = vrot.slane %v9742_v11, 5  ;;  %v10261_v38 = vshrl.u32 %v10227_v17, 16  ;;  %v10264_v4 = vshll.u32 %v10227_v17, 16  ;;  %v14380_v11 = vld [vmem:[#allocation3 + $0x24] sm:$0xff]  ;;  %10576 = vmatpush.bf16.msrb.mxu1 %v14405_v31 }
 0x60a   : > { %v9827_v48 = vunpack.c.l.b16 %v9727_v59  ;;  %v9991_v37 = vunpack.c.l.b16 %v9954_v32  ;;  %v18026_v53 = vrot.slane %v10270_v50, 5  ;;  %v10276_v8 = vrot.slane %v10274_v47, 4  ;;  %v14404_v47 = vld [vmem:[%s18292_s1 + $0xd68] sm:$0xff]  ;;  %v18059_v32 = vld [vmem:[#allocation3 + $0x34] sm:$0xf] }
 0x60b   : > { %v10349_v40 = vunpack.c.l.b16 %v10249_v58  ;;  %v9755_v25 = vor.u32 %v9754_v34, %v18022_v30  ;;  %v9960_v33 = vrot.slane %v9709_v0, 5  ;;  %v9758_v54 = vshll.u32 %v18003_v43, 16 }
 0x60c   : > { %v9835_v60 = vpack.c.b16 %v9828_v44, %v9827_v48  ;;  %v9998_v21 = vpack.c.b16 %v9992_v61, %v9991_v37  ;;  %v9745_v57 = vor.u32 %v9744_v13, %v9741_v46  ;;  %v10263_v35 = vrot.slane %v10261_v38, 4  ;;  %v10230_v44 = vld [vmem:[#allocation3 + $0x30] sm:$0xf] }
 0x60d   : > { %v10357_v39 = vpack.c.b16 %v10350_v5, %v10349_v40  ;;  %v10266_v27 = vrot.slane %v10264_v4, 5  ;;  %v10277_v56 = vor.u32 %v10276_v8, %v18026_v53  ;;  %v9756_v14 = vrot.slane %v9755_v25, 4  ;;  %10577 = vmatpush.bf16.msrb.mxu1 %v14404_v47  ;;  %v14403_v8 = vld [vmem:[%s18292_s1 + $0xd60] sm:$0xff] }
 0x60e   : > { %v13644_v43 = vrot.slane %v9930_v15, 9  ;;  %v9962_v7 = vrot.slane %v9960_v33, 4  ;;  %v10280_v23 = vshll.u32 %v18030_v2, 16  ;;  %v9763_v3 = vshrl.u32 %v9708_v42, 16 }
 0x60f   : > { %v9766_v9 = vshll.u32 %v9708_v42, 16  ;;  %v9772_v12 = vshll.u32 %v9709_v0, 16  ;;  %v9776_v51 = vshrl.u32 %v9709_v0, 16  ;;  %v9746_v63 = vrot.slane %v9745_v57, 4 }
 0x610   : > { %10195 = vmatmul.bf16.vlgmr.msra.gmra.mxu3 %v14379_v62  ;;  %v9760_v18 = vrot.slane %v9758_v54, 5  ;;  %v9963_v55 = vrot.slane %v18032_v16, 5  ;;  %v10267_v20 = vor.u32 %v10266_v27, %v10263_v35  ;;  %v9961_v62 = vsel %vm14646_vm5, %v13644_v43, %v9960_v33 }
 0x611   : > { %v10278_v1 = vrot.slane %v10277_v56, 4  ;;  %v9751_v22 = vsel %vm14634_vm4, %v9746_v63, %v18022_v30  ;;  %v10282_v6 = vrot.slane %v10280_v23, 5  ;;  %v9765_v10 = vrot.slane %v9763_v3, 4  ;;  %v10450_v30 = vld [vmem:[#allocation3 + $0x18] sm:$0xe]  ;;  %10578 = vmatpush.bf16.msrb.mxu1 %v14403_v8  ;;  %v14402_v63 = vld [vmem:[%s18292_s1 + $0xd58] sm:$0xff] }
 0x612   : > { %v9761_v28 = vsel %vm14634_vm4, %v9756_v14, %v9760_v18  ;;  %v9964_v36 = vsel %vm14646_vm5, %v9962_v7, %v9963_v55  ;;  %v9768_v29 = vrot.slane %v9766_v9, 5  ;;  %v18054_v17 = vrot.slane %v9772_v12, 5  ;;  %v9931_v56 = vld [vmem:[#allocation3 + $0x30] sm:$0xe]  ;;  %v18084_v23 = vld [vmem:[#allocation3 + $0x38] sm:$0x1] }
 0x613   : > { %v9778_v50 = vrot.slane %v9776_v51, 4  ;;  %v10268_v59 = vrot.slane %v10267_v20, 4  ;;  %v10283_v34 = vsel %vm14634_vm4, %v10278_v1, %v10282_v6  ;;  %v10294_v61 = vshll.u32 %v18052_v52, 16  ;;  %v18098_v6 = vld [vmem:[#allocation3 + $0x40] sm:$0xf] }
 0x614   : > { %9899 = vmatmul.bf16.vlgmr.msra.gmra.mxu1 %v9835_v60  ;;  %v10298_v58 = vshrl.u32 %v18052_v52, 16  ;;  %v10468_v46 = vrot.slane %v17993_v26, 5  ;;  %v9829_v0 = vunpack.c.l.b16 %v9751_v22  ;;  %v9830_v5 = vunpack.c.l.b16 %v9761_v28  ;;  %v14401_v28 = vld [vmem:[%s18292_s1 + $0xd50] sm:$0xff] }
 0x615   : > { %10066 = vmatmul.bf16.gmra.mxu2 %v9998_v21  ;;  %v9993_v13 = vunpack.c.l.b16 %v9961_v62  ;;  %v9994_v38 = vunpack.c.l.b16 %v9964_v36  ;;  %v10273_v4 = vsel %vm14634_vm4, %v10268_v59, %v18026_v53  ;;  %v9769_v48 = vor.u32 %v9768_v29, %v9765_v10  ;;  %v10451_v62 = vld [vmem:[#allocation3 + $0x24] sm:$0xe]  ;;  %10579 = vmatpush.bf16.msrb.mxu1 %v14402_v63  ;;  %v10233_v36 = vld [vmem:[#allocation3 + $0x3c] sm:$0xf] }
 0x616   : > { %10421 = vmatmul.bf16.vlgmr.msrb.gmra.mxu0 %v10357_v39  ;;  %v9779_v37 = vor.u32 %v9778_v50, %v18054_v17  ;;  %v13806_v40 = vrot.slane %v10450_v30, 9  ;;  %v10352_v25 = vunpack.c.l.b16 %v10283_v34  ;;  %v9967_v26 = vrot.slane %v18059_v32, 5 }
 0x617   : > { %v10285_v33 = vshrl.u32 %v10230_v44, 16  ;;  %v10288_v60 = vshll.u32 %v10230_v44, 16  ;;  %v18074_v21 = vrot.slane %v10294_v61, 5  ;;  %v10300_v54 = vrot.slane %v10298_v58, 4  ;;  %v9711_v44 = vld [vmem:[#allocation3 + $0x30] sm:$0xf] }
 0x618   : > { %v10470_v15 = vrot.slane %v10468_v46, 4  ;;  %v10471_v53 = vrot.slane %v18000_v24, 5  ;;  %v9999_v39 = vpack.c.b16 %v9994_v38, %v9993_v13  ;;  %v10351_v57 = vunpack.c.l.b16 %v10273_v4  ;;  %v14400_v13 = vld [vmem:[%s18292_s1 + $0xd48] sm:$0xff] }
 0x619   : > { %v9782_v35 = vshll.u32 %v18032_v16, 16  ;;  %v9836_v27 = vpack.c.b16 %v9830_v5, %v9829_v0  ;;  %v9780_v42 = vrot.slane %v9779_v37, 4  ;;  %v10469_v14 = vsel %vm14646_vm5, %v13806_v40, %v10468_v46  ;;  %v14381_v0 = vld [vmem:[#allocation3 + $0x30] sm:$0xff]  ;;  %10580 = vmatpush.bf16.msrb.mxu1 %v14401_v28 }
 0x61a   : > { %v10472_v43 = vsel %vm14646_vm5, %v10470_v15, %v10471_v53  ;;  %v10358_v7 = vpack.c.b16 %v10352_v25, %v10351_v57  ;;  %v10287_v24 = vrot.slane %v10285_v33, 4  ;;  %v10290_v3 = vrot.slane %v10288_v60, 5  ;;  %v18126_v15 = vld [vmem:[#allocation3 + $0x44] sm:$0x1] }
 0x61b   : > { %v10512_v9 = vunpack.c.l.b16 %v10472_v43  ;;  %v9770_v16 = vrot.slane %v9769_v48, 4  ;;  %v9969_v12 = vrot.slane %v9967_v26, 4  ;;  %v10301_v51 = vor.u32 %v10300_v54, %v18074_v21 }
 0x61c   : > { %v9784_v18 = vrot.slane %v9782_v35, 5  ;;  %v13645_v55 = vrot.slane %v9931_v56, 9  ;;  %v10304_v20 = vshll.u32 %v18078_v19, 16  ;;  %v10511_v31 = vunpack.c.l.b16 %v10469_v14 }
 0x61d   : > { %v9775_v1 = vsel %vm14634_vm4, %v9770_v16, %v18054_v17  ;;  %v9970_v22 = vrot.slane %v18084_v23, 5  ;;  %v10291_v29 = vor.u32 %v10290_v3, %v10287_v24  ;;  %v10302_v47 = vrot.slane %v10301_v51, 4  ;;  %10581 = vmatpush.bf16.msrb.mxu1 %v14400_v13 }
 0x61e   : > { %v9968_v10 = vsel %vm14646_vm5, %v13645_v55, %v9967_v26  ;;  %v18104_v50 = vpack.c.b16 %v10512_v9, %v10511_v31  ;;  %v13807_v59 = vrot.slane %v10451_v62, 9  ;;  %v10475_v30 = vrot.slane %v18007_v41, 5  ;;  %v10452_v62 = vld [vmem:[#allocation3 + $0x30] sm:$0xe] }
 0x61f   : > { %v9971_v17 = vsel %vm14646_vm5, %v9969_v12, %v9970_v22  ;;  %v10306_v34 = vrot.slane %v10304_v20, 5  ;;  %v10309_v61 = vshrl.u32 %v10233_v36, 16  ;;  %v10312_v58 = vshll.u32 %v10233_v36, 16 }
 0x620   : > { %10200 = vmatmul.bf16.gmra.mxu3 %v14380_v11  ;;  %v9785_v11 = vsel %vm14634_vm4, %v9780_v42, %v9784_v18  ;;  %v10318_v46 = vshll.u32 %v18098_v6, 16  ;;  %v10322_v5 = vshrl.u32 %v18098_v6, 16  ;;  %v10476_v38 = vsel %vm14646_vm5, %v13807_v59, %v10475_v30  ;;  %v14399_v42 = vld [vmem:[%s18292_s1 + $0xd40] sm:$0xff] }
 0x621   : > { %v10477_v4 = vrot.slane %v10475_v30, 4  ;;  %v10478_v41 = vrot.slane %v18030_v2, 5  ;;  %v9832_v48 = vunpack.c.l.b16 %v9785_v11  ;;  %v10292_v37 = vrot.slane %v10291_v29, 4  ;;  %10582 = vmatpush.bf16.msrb.mxu1 %v14399_v42 }
 0x622   : > { %v9796_v8 = vshll.u32 %v18059_v32, 16  ;;  %v9800_v40 = vshrl.u32 %v18059_v32, 16  ;;  %v9996_v25 = vunpack.c.l.b16 %v9971_v17  ;;  %v10307_v26 = vsel %vm14634_vm4, %v10302_v47, %v10306_v34  ;;  %v14382_v47 = vld [vmem:[#allocation3 + $0x3c] sm:$0xff] }
 0x623   : > { %v9787_v33 = vshrl.u32 %v9711_v44, 16  ;;  %v10479_v60 = vsel %vm14646_vm5, %v10477_v4, %v10478_v41  ;;  %v10297_v54 = vsel %vm14634_vm4, %v10292_v37, %v18074_v21  ;;  %v9790_v2 = vshll.u32 %v9711_v44, 16 }
 0x624   : > { %9904 = vmatmul.bf16.gmra.mxu1 %v9836_v27  ;;  %v10513_v53 = vunpack.c.l.b16 %v10476_v38  ;;  %v10311_v57 = vrot.slane %v10309_v61, 4  ;;  %v10314_v32 = vrot.slane %v10312_v58, 5  ;;  %v10320_v35 = vrot.slane %v10318_v46, 5 }
 0x625   : > { %10071 = vmatmul.bf16.gmra.mxu2 %v9999_v39  ;;  %v10514_v39 = vunpack.c.l.b16 %v10479_v60  ;;  %v10324_v27 = vrot.slane %v10322_v5, 4  ;;  %v10354_v56 = vunpack.c.l.b16 %v10307_v26  ;;  %v9798_v14 = vrot.slane %v9796_v8, 5 }
 0x626   : > { %10426 = vmatmul.bf16.gmra.mxu0 %v10358_v7  ;;  %v9802_v43 = vrot.slane %v9800_v40, 4  ;;  %v9831_v21 = vunpack.c.l.b16 %v9775_v1  ;;  %v9995_v24 = vunpack.c.l.b16 %v9968_v10  ;;  %v10353_v3 = vunpack.c.l.b16 %v10297_v54 }
 0x627   : > { %v18131_v7 = vpack.c.b16 %v10514_v39, %v10513_v53  ;;  %v10328_v9 = vshll.u32 %v18126_v15, 16  ;;  %v10315_v51 = vor.u32 %v10314_v32, %v10311_v57  ;;  %v10325_v63 = vor.u32 %v10324_v27, %v10320_v35 }
 0x628   : > { %v9837_v16 = vpack.c.b16 %v9832_v48, %v9831_v21  ;;  %v10000_v12 = vpack.c.b16 %v9996_v25, %v9995_v24  ;;  %v10359_v18 = vpack.c.b16 %v10354_v56, %v10353_v3  ;;  %v9789_v55 = vrot.slane %v9787_v33, 4  ;;  %v10453_v21 = vld [vmem:[#allocation3 + $0x3c] sm:$0xe] }
 0x629   : > { %v9792_v20 = vrot.slane %v9790_v2, 5  ;;  %v9803_v31 = vor.u32 %v9802_v43, %v9798_v14  ;;  %v9806_v22 = vshll.u32 %v18084_v23, 16  ;;  %v10330_v1 = vrot.slane %v10328_v9, 5 }
 0x62a   : > { %v10316_v28 = vrot.slane %v10315_v51, 4  ;;  %v10326_v36 = vrot.slane %v10325_v63, 4  ;;  %v13808_v11 = vrot.slane %v10452_v62, 9  ;;  %v10482_v10 = vrot.slane %v18052_v52, 5 }
 0x62b   : > { %v9793_v29 = vor.u32 %v9792_v20, %v9789_v55  ;;  %v9804_v17 = vrot.slane %v9803_v31, 4  ;;  %v10485_v34 = vrot.slane %v18078_v19, 5  ;;  %v9808_v44 = vrot.slane %v9806_v22, 5  ;;  %v9390_v8 = vpop.f32.mrf.mxu2 }
 0x62c   : > { %v10483_v59 = vsel %vm14646_vm5, %v13808_v11, %v10482_v10  ;;  %v10484_v30 = vrot.slane %v10482_v10, 4  ;;  %v10321_v61 = vsel %vm14634_vm4, %v10316_v28, %v10320_v35  ;;  %v10331_v23 = vsel %vm14634_vm4, %v10326_v36, %v10330_v1 }
 0x62d   : > { %v9794_v52 = vrot.slane %v9793_v29, 4  ;;  %v9809_v46 = vsel %vm14634_vm4, %v9804_v17, %v9808_v44  ;;  %v10355_v13 = vunpack.c.l.b16 %v10321_v61  ;;  %v10356_v38 = vunpack.c.l.b16 %v10331_v23 }
 0x62e   : > { %v10486_v58 = vsel %vm14646_vm5, %v10484_v30, %v10485_v34  ;;  %v9834_v41 = vunpack.c.l.b16 %v9809_v46  ;;  %v10489_v24 = vrot.slane %v18098_v6, 5  ;;  %v13809_v3 = vrot.slane %v10453_v21, 9 }
 0x62f   : > { %v10516_v5 = vunpack.c.l.b16 %v10486_v58  ;;  %v9799_v19 = vsel %vm14634_vm4, %v9794_v52, %v9798_v14  ;;  %v10360_v40 = vpack.c.b16 %v10356_v38, %v10355_v13 }
 0x630   : > { %10205 = vmatmul.bf16.gmra.mxu3 %v14381_v0  ;;  %v10515_v0 = vunpack.c.l.b16 %v10483_v59  ;;  %v9833_v48 = vunpack.c.l.b16 %v9799_v19  ;;  %v10490_v51 = vsel %vm14646_vm5, %v13809_v3, %v10489_v24 }
 0x632   : > { %v10521_v4 = vpack.c.b16 %v10516_v5, %v10515_v0  ;;  %v9838_v25 = vpack.c.b16 %v9834_v41, %v9833_v48 }
 0x633   : > { %v18149_v54 = vpop.f32.mrf.mxu2 }
 0x634   : > { %9909 = vmatmul.bf16.gmra.mxu1 %v9837_v16  ;;  %v10491_v16 = vrot.slane %v10489_v24, 4 }
 0x635   : > { %10076 = vmatmul.bf16.gmra.mxu2 %v10000_v12 }
 0x636   : > { %10431 = vmatmul.bf16.gmra.mxu0 %v10359_v18  ;;  %v10517_v18 = vunpack.c.l.b16 %v10490_v51 }
 0x63e   : > { %v9540_v33 = vpop.f32.mrf.mxu3 }
 0x640   : > { %10210 = vmatmul.bf16.gmra.mxu3 %v14382_v47 }
 0x641   : > { %v9289_v37 = vpop.f32.mrf.mxu1 }
 0x642   : > { %v9391_v26 = vadd.f32 %v9390_v8, %v9289_v37 }
 0x644   : > { %9914 = vmatmul.bf16.gmra.mxu1 %v9838_v25  ;;  %v9560_v60 = vadd.f32 %v9540_v33, %v9391_v26 }
 0x646   : > { %10436 = vmatmul.bf16.gmra.mxu0 %v10360_v40  ;;  %v18152_v45 = vpop.f32.mrf.mxu3 }
 0x649   : > { %v9291_v57 = vpop.f32.mrf.mxu1 }
 0x653   : > { %v9674_v2 = vpop.f32.mrf.mxu0 }
 0x654   : > { %v9694_v53 = vadd.f32 %v9674_v2, %v9560_v60  ;;  %10583 = vmatmul.bf16.vlgmr.msrb.gmra.mxu1 %v18104_v50  ;;  %v10492_v50 = vrot.slane %v18126_v15, 5  ;;  %v9393_v2 = vadd.f32 %v18149_v54, %v9291_v57 }
 0x656   : > { %v10493_v63 = vsel %vm14646_vm5, %v10491_v16, %v10492_v50 }
 0x657   : > { %v10518_v20 = vunpack.c.l.b16 %v10493_v63 }
 0x658   : > { %v9395_v39 = vpop.f32.mrf.mxu2 }
 0x659   : > { %v10522_v31 = vpack.c.b16 %v10518_v20, %v10517_v18 }
 0x65b   : > { %v18154_v32 = vpop.f32.mrf.mxu0 }
 0x660   : > { %v18156_v56 = vpop.f32.mrf.mxu2 }
 0x661   : > { %v9294_v27 = vpop.f32.mrf.mxu1 }
 0x662   : > { %v9396_v42 = vadd.f32 %v9395_v39, %v9294_v27  ;;  %v9561_v39 = vadd.f32 %v18152_v45, %v9393_v2  ;;  %v18200_v45 = vld [vmem:[%s18293_s2 + $0x5] ss:$0 sm:$0xff] }
 0x663   : > { %v9545_v35 = vpop.f32.mrf.mxu3  ;;  %v9679_v14 = vpop.f32.mrf.mxu0 }
 0x664   : > { %v9562_v43 = vadd.f32 %v9545_v35, %v9396_v42  ;;  %10588 = vmatmul.bf16.gmra.mxu1 %v18131_v7  ;;  %v9695_v27 = vadd.f32 %v18154_v32, %v9561_v39 }
 0x666   : > { %v9696_v9 = vadd.f32 %v9679_v14, %v9562_v43 }
 0x668   : > { %v9400_v6 = vpop.f32.mrf.mxu2 }
 0x669   : > { %v9296_v55 = vpop.f32.mrf.mxu1 }
 0x66a   : > { %v9398_v16 = vadd.f32 %v18156_v56, %v9296_v55 }
 0x66b   : > { %v18161_v12 = vpop.f32.mrf.mxu3  ;;  %v18167_v7 = vpop.f32.mrf.mxu0 }
 0x66c   : > { %v9563_v63 = vadd.f32 %v18161_v12, %v9398_v16 }
 0x66e   : > { %v9697_v56 = vadd.f32 %v18167_v7, %v9563_v63 }
 0x670   : > { %v18169_v36 = vpop.f32.mrf.mxu2 }
 0x671   : > { %v9299_v15 = vpop.f32.mrf.mxu1 }
 0x672   : > { %v9401_v22 = vadd.f32 %v9400_v6, %v9299_v15  ;;  %v18204_v6 = vstv %s13859_s24 }
 0x673   : > { %v9550_v62 = vpop.f32.mrf.mxu3  ;;  %v9684_v1 = vpop.f32.mrf.mxu0 }
 0x674   : > { %v9564_v28 = vadd.f32 %v9550_v62, %v9401_v22  ;;  %10593 = vmatmul.bf16.gmra.mxu1 %v10521_v4 }
 0x676   : > { %v9698_v11 = vadd.f32 %v9684_v1, %v9564_v28 }
 0x678   : > { %v9405_v17 = vpop.f32.mrf.mxu2 }
 0x679   : > { %v18173_v49 = vpop.f32.mrf.mxu1 }
 0x67b   : > { %v18171_v10 = vpop.f32.mrf.mxu3  ;;  %v18175_v29 = vpop.f32.mrf.mxu0 }
 0x680   : > { %v18179_v13 = vpop.f32.mrf.mxu2 }
 0x681   : > { %v9304_v47 = vpop.f32.mrf.mxu1 }
 0x682   : > { %v9406_v30 = vadd.f32 %v9405_v17, %v9304_v47 }
 0x683   : > { %v9555_v59 = vpop.f32.mrf.mxu3  ;;  %v9689_v34 = vpop.f32.mrf.mxu0 }
 0x684   : > { %v9566_v44 = vadd.f32 %v9555_v59, %v9406_v30  ;;  %10598 = vmatmul.bf16.gmra.mxu1 %v10522_v31 }
 0x686   : > { %v9700_v61 = vadd.f32 %v9689_v34, %v9566_v44 }
 0x688   : > { %v10062_v37 = vpop.f32.mrf.mxu2 }
 0x689   : > { %v18177_v23 = vpop.f32.mrf.mxu1 }
 0x68b   : > { %v18183_v41 = vpop.f32.mrf.mxu3  ;;  %v18185_v48 = vpop.f32.mrf.mxu0 }
 0x690   : > { %v10064_v60 = vpop.f32.mrf.mxu2 }
 0x691   : > { %v9900_v58 = vpop.f32.mrf.mxu1 }
 0x692   : > { %v9920_v52 = vadd.f32 %v9900_v58, %v9694_v53  ;;  %v9403_v58 = vadd.f32 %v18169_v36, %v18173_v49 }
 0x693   : > { %v10196_v40 = vpop.f32.mrf.mxu3  ;;  %v10422_v25 = vpop.f32.mrf.mxu0 }
 0x694   : > { %v10082_v42 = vadd.f32 %v10062_v37, %v9920_v52 }
 0x696   : > { %v10216_v24 = vadd.f32 %v10196_v40, %v10082_v42  ;;  %v18217_v40 = vld [vmem:[%s18295_s4] sm:$0xf] }
 0x698   : > { %v10067_v21 = vpop.f32.mrf.mxu2  ;;  %v10442_v51 = vadd.f32 %v10422_v25, %v10216_v24 }
 0x699   : > { %v9902_v46 = vpop.f32.mrf.mxu1 }
 0x69a   : > { %v9921_v43 = vadd.f32 %v9902_v46, %v9695_v27 }
 0x69b   : > { %v10198_v53 = vpop.f32.mrf.mxu3  ;;  %v10424_v14 = vpop.f32.mrf.mxu0 }
 0x69c   : > { %v10083_v50 = vadd.f32 %v10064_v60, %v9921_v43 }
 0x69e   : > { %v10217_v54 = vadd.f32 %v10198_v53, %v10083_v50 }
 0x6a0   : > { %v10069_v18 = vpop.f32.mrf.mxu2  ;;  %v10443_v20 = vadd.f32 %v10424_v14, %v10217_v54 }
 0x6a1   : > { %v9905_v0 = vpop.f32.mrf.mxu1 }
 0x6a2   : > { %v9922_v5 = vadd.f32 %v9905_v0, %v9696_v9 }
 0x6a3   : > { %v10201_v3 = vpop.f32.mrf.mxu3  ;;  %v10427_v32 = vpop.f32.mrf.mxu0 }
 0x6a4   : > { %v10084_v55 = vadd.f32 %v10067_v21, %v9922_v5 }
 0x6a6   : > { %v10218_v17 = vadd.f32 %v10201_v3, %v10084_v55 }
 0x6a8   : > { %v10072_v44 = vpop.f32.mrf.mxu2  ;;  %v10444_v52 = vadd.f32 %v10427_v32, %v10218_v17 }
 0x6a9   : > { %v9907_v19 = vpop.f32.mrf.mxu1 }
 0x6aa   : > { %v9923_v1 = vadd.f32 %v9907_v19, %v9697_v56  ;;  %v9565_v19 = vadd.f32 %v18171_v10, %v9403_v58 }
 0x6ab   : > { %v10203_v22 = vpop.f32.mrf.mxu3  ;;  %v10429_v47 = vpop.f32.mrf.mxu0 }
 0x6ac   : > { %v10085_v59 = vadd.f32 %v10069_v18, %v9923_v1  ;;  %v9699_v36 = vadd.f32 %v18175_v29, %v9565_v19  ;;  %v14412_v1 = vld [vmem:[%s18296_s5 + $0x28] sm:$0xff] }
 0x6ae   : > { %v10219_v46 = vadd.f32 %v10203_v22, %v10085_v59 }
 0x6b0   : > { %v10074_v10 = vpop.f32.mrf.mxu2 }
 0x6b1   : > { %v9910_v38 = vpop.f32.mrf.mxu1 }
 0x6b2   : > { %v18181_v4 = vadd.f32 %v9910_v38, %v9698_v11  ;;  %v10445_v38 = vadd.f32 %v10429_v47, %v10219_v46 }
 0x6b3   : > { %v10206_v5 = vpop.f32.mrf.mxu3  ;;  %v10432_v25 = vpop.f32.mrf.mxu0 }
 0x6b4   : > { %v10086_v49 = vadd.f32 %v10072_v44, %v18181_v4  ;;  %v9408_v4 = vadd.f32 %v18179_v13, %v18177_v23  ;;  %v18236_v23 = vld [vmem:[%s18296_s5 + $0x38] sm:$0xff] }
 0x6b5   : > { %10735 = vmatpush.bf16.msrb.mxu3 %v18236_v23  ;;  %10795 = vmatpush.bf16.msra.mxu0 %v18236_v23 }
 0x6b6   : > { %v10220_v27 = vadd.f32 %v10206_v5, %v10086_v49  ;;  %v9567_v54 = vadd.f32 %v18183_v41, %v9408_v4  ;;  %v18244_v41 = vld [vmem:[%s18296_s5 + $0x30] sm:$0xff]  ;;  %10825 = vmatpush.bf16.msra.mxu1 %v18236_v23 }
 0x6b7   : > { %v14409_v5 = vld [vmem:[%s18296_s5 + $0x10] sm:$0xff] }
 0x6b8   : > { %v10446_v3 = vadd.f32 %v10432_v25, %v10220_v27  ;;  %v9701_v13 = vadd.f32 %v18185_v48, %v9567_v54  ;;  %v14408_v25 = vld [vmem:[%s18296_s5 + $0x8] sm:$0xff] }
 0x6b9   : > { %v18187_v8 = vpop.f32.mrf.mxu1  ;;  %10736 = vmatpush.bf16.msrb.mxu3 %v18244_v41  ;;  %10796 = vmatpush.bf16.msra.mxu0 %v18244_v41 }
 0x6ba   : > { %v9925_v2 = vadd.f32 %v18187_v8, %v9699_v36  ;;  %10826 = vmatpush.bf16.msra.mxu1 %v18244_v41 }
 0x6bb   : > { %v10208_v14 = vpop.f32.mrf.mxu3  ;;  %v10434_v8 = vpop.f32.mrf.mxu0 }
 0x6bc   : > { %v10087_v43 = vadd.f32 %v10074_v10, %v9925_v2 }
 0x6bd   : > { %10737 = vmatpush.bf16.msrb.mxu3 %v14412_v1  ;;  %10797 = vmatpush.bf16.msra.mxu0 %v14412_v1 }
 0x6be   : > { %10827 = vmatpush.bf16.msra.mxu1 %v14412_v1 }
 0x6c1   : > { %v9915_v26 = vpop.f32.mrf.mxu1 }
 0x6c2   : > { %v18189_v33 = vadd.f32 %v9915_v26, %v9700_v61 }
 0x6c9   : > { %v18193_v35 = vpop.f32.mrf.mxu1 }
 0x6ca   : > { %v9927_v56 = vadd.f32 %v18193_v35, %v9701_v13 }
 0x6d1   : > { %v10584_v9 = vpop.f32.mrf.mxu1 }
 0x6d2   : > { %v10604_v57 = vadd.f32 %v10584_v9, %v10442_v51  ;;  %v10221_v9 = vadd.f32 %v10208_v14, %v10087_v43  ;;  %v10077_v51 = vpop.f32.mrf.mxu2 }
 0x6d4   : > { %v10617_v31 = vadd.f32 %v18200_v45, %v10604_v57  ;;  %v10211_v57 = vpop.f32.mrf.mxu3  ;;  %v10447_v32 = vadd.f32 %v10434_v8, %v10221_v9 }
 0x6d6   : > { %v10635_v28 = vmul.f32 %v18204_v6, %v10617_v31  ;;  %vm10625_vm4 = vcmp.ge.f32.partialorder %v10617_v31, 0.0 }
 0x6d8   : > { %v10643_v30 = vsel %vm10625_vm4, %v10617_v31, %v10635_v28 }
 0x6d9   : > { %v10586_v62 = vpop.f32.mrf.mxu1 }
 0x6da   : > { %v10605_v15 = vadd.f32 %v10586_v62, %v10443_v20  ;;  %v10088_v20 = vadd.f32 %v10077_v51, %v18189_v33  ;;  %v10437_v62 = vpop.f32.mrf.mxu0  ;;  %v10079_v22 = vpop.f32.mrf.mxu2 }
 0x6db   : > { %v10089_v35 = vadd.f32 %v10079_v22, %v9927_v56 }
 0x6dc   : > { %v10618_v11 = vadd.f32 %v18200_v45, %v10605_v15  ;;  %v10222_v48 = vadd.f32 %v10211_v57, %v10088_v20  ;;  %v10213_v17 = vpop.f32.mrf.mxu3 }
 0x6de   : > { %vm10626_vm5 = vcmp.ge.f32.partialorder %v10618_v11, 0.0  ;;  %v10636_v12 = vmul.f32 %v18204_v6, %v10618_v11  ;;  %v10448_v59 = vadd.f32 %v10437_v62, %v10222_v48 }
 0x6e0   : > { %v10644_v34 = vsel %vm10626_vm5, %v10618_v11, %v10636_v12 }
 0x6e1   : > { %v10589_v61 = vpop.f32.mrf.mxu1  ;;  %v10668_v7 = vpack.c.bf16 %v10644_v34, %v10643_v30  ;;  %v14411_v30 = vld [vmem:[%s18296_s5 + $0x20] sm:$0xff]  ;;  %v10223_v34 = vadd.f32 %v10213_v17, %v10089_v35 }
 0x6e2   : > { %v10606_v0 = vadd.f32 %v10589_v61, %v10444_v52  ;;  %v10439_v61 = vpop.f32.mrf.mxu0  ;;  %10738 = vmatpush.bf16.msrb.mxu3 %v14411_v30  ;;  %10798 = vmatpush.bf16.msra.mxu0 %v14411_v30 }
 0x6e3   : > { %10680 = vmatpush.bf16.msrb.mxu2 %v10668_v7  ;;  %v14410_v7 = vld [vmem:[%s18296_s5 + $0x18] sm:$0xff]  ;;  %v10449_v58 = vadd.f32 %v10439_v61, %v10223_v34  ;;  %10828 = vmatpush.bf16.msra.mxu1 %v14411_v30 }
 0x6e4   : > { %v10619_v37 = vadd.f32 %v18200_v45, %v10606_v0 }
 0x6e6   : > { %13860 = vmatmul.msk.bf16.vlgmr.msrb.gmra.mxu2 %vm10669_vm8, %v18217_v40  ;;  %v10637_v53 = vmul.f32 %v18204_v6, %v10619_v37  ;;  %vm10627_vm9 = vcmp.ge.f32.partialorder %v10619_v37, 0.0  ;;  %10739 = vmatpush.bf16.msrb.mxu3 %v14410_v7 }
 0x6e7   : > { %10799 = vmatpush.bf16.msra.mxu0 %v14410_v7  ;;  %10829 = vmatpush.bf16.msra.mxu1 %v14410_v7 }
 0x6e8   : > { %v10645_v21 = vsel %vm10627_vm9, %v10619_v37, %v10637_v53 }
 0x6e9   : > { %v10591_v26 = vpop.f32.mrf.mxu1 }
 0x6ea   : > { %v10607_v60 = vadd.f32 %v10591_v26, %v10445_v38  ;;  %10740 = vmatpush.bf16.msrb.mxu3 %v14409_v5 }
 0x6eb   : > { %10800 = vmatpush.bf16.msra.mxu0 %v14409_v5  ;;  %10830 = vmatpush.bf16.msra.mxu1 %v14409_v5 }
 0x6ec   : > { %v10620_v39 = vadd.f32 %v18200_v45, %v10607_v60 }
 0x6ee   : > { %vm10628_vm10 = vcmp.ge.f32.partialorder %v10620_v39, 0.0  ;;  %v10638_v42 = vmul.f32 %v18204_v6, %v10620_v39  ;;  %10741 = vmatpush.bf16.msrb.mxu3 %v14408_v25 }
 0x6ef   : > { %10801 = vmatpush.bf16.msra.mxu0 %v14408_v25  ;;  %10831 = vmatpush.bf16.msra.mxu1 %v14408_v25 }
 0x6f0   : > { %v10646_v24 = vsel %vm10628_vm10, %v10620_v39, %v10638_v42 }
 0x6f1   : > { %v10594_v29 = vpop.f32.mrf.mxu1  ;;  %v10750_v50 = vpack.c.bf16 %v10646_v24, %v10645_v21 }
 0x6f2   : > { %v10608_v16 = vadd.f32 %v10594_v29, %v10446_v3 }
 0x6f3   : > { %10758 = vmatpush.bf16.msra.mxu2 %v10750_v50 }
 0x6f4   : > { %v10621_v63 = vadd.f32 %v18200_v45, %v10608_v16 }
 0x6f6   : > { %13893 = vmatmul.msk.bf16.vlgmr.msra.gmra.mxu2 %vm10669_vm8, %v18217_v40  ;;  %v10639_v55 = vmul.f32 %v18204_v6, %v10621_v63  ;;  %vm10629_vm11 = vcmp.ge.f32.partialorder %v10621_v63, 0.0 }
 0x6f8   : > { %v10647_v28 = vsel %vm10629_vm11, %v10621_v63, %v10639_v55 }
 0x6f9   : > { %v10596_v18 = vpop.f32.mrf.mxu1 }
 0x6fa   : > { %v10609_v31 = vadd.f32 %v10596_v18, %v10447_v32 }
 0x6fc   : > { %v10622_v15 = vadd.f32 %v18200_v45, %v10609_v31 }
 0x6fe   : > { %vm10630_vm12 = vcmp.ge.f32.partialorder %v10622_v15, 0.0  ;;  %v10640_v33 = vmul.f32 %v18204_v6, %v10622_v15 }
 0x700   : > { %v10648_v11 = vsel %vm10630_vm12, %v10622_v15, %v10640_v33 }
 0x701   : > { %v10599_v12 = vpop.f32.mrf.mxu1  ;;  %v10780_v47 = vpack.c.bf16 %v10648_v11, %v10647_v28 }
 0x702   : > { %v10610_v44 = vadd.f32 %v10599_v12, %v10448_v59 }
 0x703   : > { %10788 = vmatpush.bf16.msrb.mxu2 %v10780_v47 }
 0x704   : > { %v10623_v52 = vadd.f32 %v18200_v45, %v10610_v44 }
 0x706   : > { %13895 = vmatmul.msk.bf16.vlgmr.msrb.gmra.mxu2 %vm10669_vm8, %v18217_v40  ;;  %v10641_v19 = vmul.f32 %v18204_v6, %v10623_v52  ;;  %vm10631_vm13 = vcmp.ge.f32.partialorder %v10623_v52, 0.0 }
 0x708   : > { %v10649_v26 = vsel %vm10631_vm13, %v10623_v52, %v10641_v19 }
 0x709   : > { %v10601_v46 = vpop.f32.mrf.mxu1 }
 0x70a   : > { %v10611_v0 = vadd.f32 %v10601_v46, %v10449_v58 }
 0x70c   : > { %v10624_v38 = vadd.f32 %v18200_v45, %v10611_v0  ;;  %v14407_v45 = vld [vmem:[%s18296_s5] sm:$0xff] }
 0x70d   : > { %10742 = vmatpush.bf16.msrb.mxu3 %v14407_v45  ;;  %10802 = vmatpush.bf16.msra.mxu0 %v14407_v45 }
 0x70e   : > { %vm10632_vm14 = vcmp.ge.f32.partialorder %v10624_v38, 0.0  ;;  %v10642_v37 = vmul.f32 %v18204_v6, %v10624_v38  ;;  %10832 = vmatpush.bf16.msra.mxu1 %v14407_v45 }
 0x710   : > { %v10650_v36 = vsel %vm10632_vm14, %v10624_v38, %v10642_v37 }
 0x711   : > { %v10810_v49 = vpack.c.bf16 %v10650_v36, %v10649_v26  ;;  %10765 = vmatpush.bf16.msra.mxu3 %v18236_v23 }
 0x713   : > { %10818 = vmatpush.bf16.msra.mxu2 %v10810_v49 }
 0x715   : > { %10766 = vmatpush.bf16.msra.mxu3 %v18244_v41 }
 0x716   : > { %13897 = vmatmul.msk.bf16.vlgmr.msra.gmra.mxu2 %vm10669_vm8, %v18217_v40 }
 0x719   : > { %10767 = vmatpush.bf16.msra.mxu3 %v14412_v1 }
 0x71d   : > { %10768 = vmatpush.bf16.msra.mxu3 %v14411_v30 }
 0x721   : > { %10769 = vmatpush.bf16.msra.mxu3 %v14410_v7 }
 0x725   : > { %10770 = vmatpush.bf16.msra.mxu3 %v14409_v5 }
 0x729   : > { %10771 = vmatpush.bf16.msra.mxu3 %v14408_v25 }
 0x72d   : > { %10772 = vmatpush.bf16.msra.mxu3 %v14407_v45 }
 0x769   : > { %v10682_v6 = vpop.f32.mrf.mxu2 }
 0x76a   : > { %v10686_v60 = vpack.c.bf16 %v10682_v6, %v10682_v6 }
 0x76c   : > { %10743 = vmatmul.bf16.vlgmr.msrb.gmra.mxu3 %v10686_v60 }
 0x771   : > { %v10684_v10 = vpop.f32.mrf.mxu2 }
 0x779   : > { %v10760_v2 = vpop.f32.mrf.mxu2 }
 0x77a   : > { %v10764_v53 = vpack.c.bf16 %v10760_v2, %v10760_v2 }
 0x77c   : > { %10773 = vmatmul.bf16.vlgmr.msra.gmra.mxu3 %v10764_v53 }
 0x781   : > { %v10762_v39 = vpop.f32.mrf.mxu2 }
 0x789   : > { %v10790_v27 = vpop.f32.mrf.mxu2 }
 0x78a   : > { %v10794_v40 = vpack.c.bf16 %v10790_v27, %v10790_v27 }
 0x78c   : > { %10803 = vmatmul.bf16.vlgmr.msra.gmra.mxu0 %v10794_v40 }
 0x791   : > { %v10792_v42 = vpop.f32.mrf.mxu2 }
 0x799   : > { %v10820_v14 = vpop.f32.mrf.mxu2 }
 0x79a   : > { %v10824_v43 = vpack.c.bf16 %v10820_v14, %v10820_v14 }
 0x79c   : > { %10833 = vmatmul.bf16.vlgmr.msra.gmra.mxu1 %v10824_v43 }
 0x7a1   : > { %v10822_v21 = vpop.f32.mrf.mxu2 }
 0x7ef   : > { %v10744_v24 = vpop.f32.mrf.mxu3 }
 0x7f0   : > { %10749 = vst.msk [vmem:[%s265_s26] sm:$0xff] %vm10748_vm15, %v10744_v24 }
 0x7f7   : > { %v10746_v29 = vpop.f32.mrf.mxu3 }
 0x7ff   : > { %v10774_v50 = vpop.f32.mrf.mxu3 }
 0x800   : > { %13894 = vst.msk [vmem:[%s265_s26 + $0x8] sm:$0xff] %vm10748_vm15, %v10774_v50 }
 0x807   : > { %v10776_v4 = vpop.f32.mrf.mxu3 }
 0x809   : > { %v10804_v3 = vpop.f32.mrf.mxu0 }
 0x80a   : > { %13896 = vst.msk [vmem:[%s265_s26 + $0x10] sm:$0xff] %vm10748_vm15, %v10804_v3 }
 0x811   : > { %v10806_v8 = vpop.f32.mrf.mxu0 }
 0x819   : > { %v10834_v9 = vpop.f32.mrf.mxu1 }
 0x81a   : > { %13898 = vst.msk [vmem:[%s265_s26 + $0x18] sm:$0xff] %vm10748_vm15, %v10834_v9 }
 0x821   : > { %v10836_v16 = vpop.f32.mrf.mxu1 }
 0x822 PF: > { %s17_s21 = sadd.s32 1, %s14466_s21  }
 0x823   : > { %p14_p7 = scmp.ge.s32.totalorder %s17_s21, 4  }
 0x825   :  { %16 = sbr.rel (!%p14_p7) target bundleno = 1 (0x1), region = 144 }
 0x82a   :  { %10861 = vsyncpa [#allocation5], 1 }
 0x82b   :  { %10863 = vsyncpa [#allocation5 + $0x1], 1 }

</bundles_post_ra>
